<compile_context>
chip_gen: v6e
topology: v6e:2x2x1
jax: 0.10.0
libtpu: 0.0.40
codegen_flags: <defaults>
</compile_context>

<pallas_src>
import functools
import math

import jax
import jax.numpy as jnp
from jax.experimental import pallas as pl
from jax.experimental.pallas import tpu as pltpu

IN_CHANNELS = 8
HIDDEN = 32
SUB_LAYERS = 2
_NEG = 1e9     # finite "-inf" for masked attention logits
_EPS = 1e-5


def _pairs(seq):
    return list(zip(seq[0::2], seq[1::2]))


# ----------------------------- fused kernel -----------------------------

def _fused_kernel(*refs, np_, tp_, h, scale, sub_layers):
    f32 = jnp.float32
    (pad_ref, padt_ref, bias_sp_ref, bias_tp_ref,
     mrow_sp_ref, mrow_tp_ref, mcross_ref, mglob_ref) = refs[:8]
    i = 8
    dense_refs = refs[i:i + 18]; i += 18          # traj(3)+dense(3)+dense2(3): (w, [b,g,be]) pairs
    d2_ln_ref = refs[i]; i += 1                   # (2, 1, H)
    n_attn = 2 * sub_layers
    sp_refs = refs[i:i + n_attn]; i += n_attn
    tpr_refs = refs[i:i + n_attn]; i += n_attn
    cr_refs = refs[i:i + n_attn]; i += n_attn
    gl_refs = refs[i:i + n_attn]; i += n_attn
    out_ref = refs[i]
    pool_sp_ref, pool_tp_ref = refs[i + 1], refs[i + 2]

    te_layers = _pairs(dense_refs[0:6])
    dd_layers = _pairs(dense_refs[6:12])
    d2_layers = _pairs(dense_refs[12:18])

    def dense(x, wp):                              # Linear + LayerNorm + ReLU, 2-D rows
        w_ref, p_ref = wp
        y = jnp.dot(x, w_ref[...], preferred_element_type=f32) + p_ref[0]
        mu = jnp.mean(y, axis=-1, keepdims=True)
        var = jnp.mean((y - mu) ** 2, axis=-1, keepdims=True)
        y = (y - mu) * jax.lax.rsqrt(var + _EPS) * p_ref[1] + p_ref[2]
        return jnp.maximum(y, 0.0)

    def proj(x, w3_ref, b3_ref, idx):              # q/k/v projection (weights stacked on dim 0)
        return jnp.dot(x, w3_ref[idx], preferred_element_type=f32) + b3_ref[idx]

    def softmax_last(s):
        s = s - jnp.max(s, axis=-1, keepdims=True)
        p = jnp.exp(s)
        return p * pl.reciprocal(jnp.sum(p, axis=-1, keepdims=True), approx=True)

    def self_attn_batched(x2, bias3, wb, g, s_len):
        # x2: (g*s_len, H) group-major rows; bias3: (g, s_len, s_len) additive bias.
        w3_ref, b3_ref = wb
        q = proj(x2, w3_ref, b3_ref, 0).reshape(g, s_len, h)
        k = proj(x2, w3_ref, b3_ref, 1).reshape(g, s_len, h)
        v = proj(x2, w3_ref, b3_ref, 2).reshape(g, s_len, h)
        s = jnp.einsum('gqd,gkd->gqk', q, k, preferred_element_type=f32) * scale + bias3
        o = jnp.einsum('gqk,gkd->gqd', softmax_last(s), v, preferred_element_type=f32)
        return o.reshape(g * s_len, h)

    def attn_2d(xq, xkv, bias2, wb):
        w3_ref, b3_ref = wb
        q = proj(xq, w3_ref, b3_ref, 0)
        k = proj(xkv, w3_ref, b3_ref, 1)
        v = proj(xkv, w3_ref, b3_ref, 2)
        s = jax.lax.dot_general(q, k, (((1,), (1,)), ((), ())),
                                preferred_element_type=f32) * scale + bias2
        return jnp.dot(softmax_last(s), v, preferred_element_type=f32)

    # ---- trajectory embedding (row-wise) in both layouts (avoids in-kernel transpose) ----
    x_sp = pad_ref[0].astype(f32)                  # (NP*TP, Cin), agent-major rows
    x_tp = padt_ref[0].astype(f32)                 # (TP*NP, Cin), time-major rows
    for wp in te_layers:
        x_sp = dense(x_sp, wp)
        x_tp = dense(x_tp, wp)

    # ---- spatio / temporal trajectory encoders (stacked self-attention) ----
    bias_sp = bias_sp_ref[0]                       # (NP, TP, TP)
    bias_tp = bias_tp_ref[0]                       # (TP, NP, NP)
    for wb in _pairs(sp_refs):
        x_sp = self_attn_batched(x_sp, bias_sp, wb, np_, tp_)
    for wb in _pairs(tpr_refs):
        x_tp = self_attn_batched(x_tp, bias_tp, wb, tp_, np_)

    # ---- shared dense stack on both branches ----
    for wp in dd_layers:
        x_sp = dense(x_sp, wp)
        x_tp = dense(x_tp, wp)

    # ---- masked max pooling epilogue (masked_fill(·, 0) then max over sequence dim) ----
    x_sp = x_sp * mrow_sp_ref[0]                   # (NP*TP, 1) row mask, lane-broadcast
    x_tp = x_tp * mrow_tp_ref[0]
    for n in range(np_):
        pool_sp_ref[pl.ds(n, 1), :] = jnp.max(
            x_sp[n * tp_:(n + 1) * tp_, :], axis=0, keepdims=True)
    for t in range(tp_):
        pool_tp_ref[pl.ds(t, 1), :] = jnp.max(
            x_tp[t * np_:(t + 1) * np_, :], axis=0, keepdims=True)
    spatio_feat = pool_sp_ref[...]                 # (NP, H)
    temporal_feat = pool_tp_ref[...]               # (TP, H)

    # ---- spatio-temporal cross encoder (queries: agents, keys/values: timesteps) ----
    bias_cr = (mcross_ref[0] - 1.0) * _NEG         # (NP, TP): 0 valid / -1e9 masked
    feat = spatio_feat
    for wb in _pairs(cr_refs):
        feat = attn_2d(feat, temporal_feat, bias_cr, wb)

    # ---- dense2 stack + final LayerNorm ----
    for wp in d2_layers:
        feat = dense(feat, wp)
    mu = jnp.mean(feat, axis=-1, keepdims=True)
    var = jnp.mean((feat - mu) ** 2, axis=-1, keepdims=True)
    feat = (feat - mu) * jax.lax.rsqrt(var + _EPS) * d2_ln_ref[0] + d2_ln_ref[1]

    # ---- global graph (agent self-attention, keys masked by valid_mask) ----
    bias_gl = (mglob_ref[0] - 1.0) * _NEG          # (1, NP), broadcast over query rows
    for wb in _pairs(gl_refs):
        feat = attn_2d(feat, feat, bias_gl, wb)

    out_ref[...] = feat[None].astype(out_ref.dtype)


# ----------------------------- parameters -----------------------------

def _init_linear(key, cin, cout):
    kw, kb = jax.random.split(key)
    bound = 1.0 / math.sqrt(cin)
    w = jax.random.uniform(kw, (cin, cout), jnp.float32, -bound, bound)
    b = jax.random.uniform(kb, (cout,), jnp.float32, -bound, bound)
    return w, b


def _init_dense(key, cin, cout):
    w, b = _init_linear(key, cin, cout)
    return dict(w=w, b=b,
                gamma=jnp.ones((cout,), jnp.float32),
                beta=jnp.zeros((cout,), jnp.float32))


def _init_attn_layer(key, h):
    kq, kk, kv = jax.random.split(key, 3)
    wq, bq = _init_linear(kq, h, h)
    wk, bk = _init_linear(kk, h, h)
    wv, bv = _init_linear(kv, h, h)
    return dict(wq=wq, bq=bq, wk=wk, bk=bk, wv=wv, bv=bv)


def init_params(key):
    ki = iter(jax.random.split(key, 32))
    p = {}
    p["traj_embedding"] = [_init_dense(next(ki), IN_CHANNELS, HIDDEN),
                           _init_dense(next(ki), HIDDEN, HIDDEN),
                           _init_dense(next(ki), HIDDEN, HIDDEN)]
    p["dense"] = [_init_dense(next(ki), HIDDEN, HIDDEN) for _ in range(3)]
    p["dense2"] = [_init_dense(next(ki), HIDDEN, HIDDEN) for _ in range(3)]
    p["dense2_ln"] = dict(gamma=jnp.ones((HIDDEN,), jnp.float32),
                          beta=jnp.zeros((HIDDEN,), jnp.float32))
    p["spatio_enc"] = [_init_attn_layer(next(ki), HIDDEN) for _ in range(SUB_LAYERS)]
    p["temporal_enc"] = [_init_attn_layer(next(ki), HIDDEN) for _ in range(SUB_LAYERS)]
    p["cross"] = [_init_attn_layer(next(ki), HIDDEN) for _ in range(SUB_LAYERS)]
    p["global"] = [_init_attn_layer(next(ki), HIDDEN) for _ in range(SUB_LAYERS)]
    return p


# ----------------------------- wrapper -----------------------------

def _pack_dense(lp):
    return lp["w"], jnp.stack([lp["b"], lp["gamma"], lp["beta"]])[:, None, :]


def _pack_attn(lp):
    w = jnp.stack([lp["wq"], lp["wk"], lp["wv"]])                    # (3, H, H)
    b = jnp.stack([lp["bq"], lp["bk"], lp["bv"]])[:, None, :]        # (3, 1, H)
    return w, b


def _batched_spec(tail):
    n = len(tail)
    return pl.BlockSpec((1,) + tuple(tail), lambda b, _n=n: (b,) + (0,) * _n)


def _full_spec(shape):
    n = len(shape)
    return pl.BlockSpec(tuple(shape), lambda b, _n=n: (0,) * _n)


def _round_up(x, m):
    return -(-x // m) * m


def spatio_temporal_net(params, padding, mask, valid_mask):
    # TODO(synk): need_scale semantics of the original GlobalGraph unknown; using 1/sqrt(hidden).
    scale = 1.0 / math.sqrt(HIDDEN)
    B, N, T, cin = padding.shape
    NP, TP = _round_up(N, 8), _round_up(T, 8)

    # Pad agents / timesteps to multiples of 8 (sublane-friendly); padded entries are
    # masked out everywhere and sliced off at the end, so results are unchanged.
    padding = jnp.pad(padding.astype(jnp.float32),
                      ((0, 0), (0, NP - N), (0, TP - T), (0, 0)))
    mask = jnp.pad(mask, ((0, 0), (0, NP - N), (0, TP - T)))
    valid_mask = jnp.pad(valid_mask, ((0, 0), (0, NP - N)))
    mf = mask.astype(jnp.float32)

    pad_rows = padding.reshape(B, NP * TP, cin)                          # agent-major rows
    padt_rows = jnp.swapaxes(padding, 1, 2).reshape(B, TP * NP, cin)     # time-major rows
    bias_sp = jnp.broadcast_to(
        jnp.where(mask[:, :, None, :], 0.0, -_NEG), (B, NP, TP, TP)).astype(jnp.float32)
    bias_tp = jnp.broadcast_to(
        jnp.where(jnp.swapaxes(mask, 1, 2)[:, :, None, :], 0.0, -_NEG),
        (B, TP, NP, NP)).astype(jnp.float32)
    mrow_sp = mf.reshape(B, NP * TP, 1)
    mrow_tp = jnp.swapaxes(mf, 1, 2).reshape(B, TP * NP, 1)
    mcross = mf                                                          # (B, NP, TP)
    mglob = valid_mask.astype(jnp.float32).reshape(B, 1, NP)

    data = [pad_rows, padt_rows, bias_sp, bias_tp, mrow_sp, mrow_tp, mcross, mglob]

    weights = []
    for lp in params["traj_embedding"] + params["dense"] + params["dense2"]:
        weights += list(_pack_dense(lp))
    weights.append(jnp.stack([params["dense2_ln"]["gamma"],
                              params["dense2_ln"]["beta"]])[:, None, :])
    for enc in ("spatio_enc", "temporal_enc", "cross", "global"):
        for lp in params[enc]:
            weights += list(_pack_attn(lp))

    in_specs = ([_batched_spec(x.shape[1:]) for x in data]
                + [_full_spec(w.shape) for w in weights])

    out = pl.pallas_call(
        functools.partial(_fused_kernel, np_=NP, tp_=TP, h=HIDDEN, scale=scale,
                          sub_layers=SUB_LAYERS),
        out_shape=jax.ShapeDtypeStruct((B, NP, HIDDEN), jnp.float32),
        grid=(B,),
        in_specs=in_specs,
        out_specs=_batched_spec((NP, HIDDEN)),
        scratch_shapes=[pltpu.VMEM((NP, HIDDEN), jnp.float32),
                        pltpu.VMEM((TP, HIDDEN), jnp.float32)],
        compiler_params=pltpu.CompilerParams(
            dimension_semantics=("parallel",)),
    )(*data, *weights)
    return out[:, :N]


# ----------------------------- demo -----------------------------

if __name__ == "__main__":
    key = jax.random.PRNGKey(0)
    kp, kx, km, kv = jax.random.split(key, 4)

    B, N, T = 2, 6, 8
    params = init_params(kp)
    padding = jax.random.normal(kx, (B, N, T, IN_CHANNELS), jnp.float32)
    mask = jax.random.bernoulli(km, 0.8, (B, N, T))
    mask = mask.at[..., 0].set(True)          # avoid fully-masked trajectories
    valid_mask = jax.random.bernoulli(kv, 0.9, (B, N))
    valid_mask = valid_mask.at[..., 0].set(True)

    fwd = jax.jit(spatio_temporal_net)
    out = fwd(params, padding, mask, valid_mask)
    jax.block_until_ready(out)
    assert out.shape == (B, N, HIDDEN) and out.dtype == jnp.float32
    assert bool(jnp.all(jnp.isfinite(out)))
    print("KERNEL_OK")
</pallas_src>

<mosaic_0001>
module attributes {stable_mosaic.version = 11 : i64} {
  func.func @_fused_kernel(%arg0: i32, %arg1: memref<1x64x8xf32, #tpu.memory_space<vmem>>, %arg2: memref<1x64x8xf32, #tpu.memory_space<vmem>>, %arg3: memref<1x8x8x8xf32, #tpu.memory_space<vmem>>, %arg4: memref<1x8x8x8xf32, #tpu.memory_space<vmem>>, %arg5: memref<1x64x1xf32, #tpu.memory_space<vmem>>, %arg6: memref<1x64x1xf32, #tpu.memory_space<vmem>>, %arg7: memref<1x8x8xf32, #tpu.memory_space<vmem>>, %arg8: memref<1x1x8xf32, #tpu.memory_space<vmem>>, %arg9: memref<8x32xf32, #tpu.memory_space<vmem>>, %arg10: memref<3x1x32xf32, #tpu.memory_space<vmem>>, %arg11: memref<32x32xf32, #tpu.memory_space<vmem>>, %arg12: memref<3x1x32xf32, #tpu.memory_space<vmem>>, %arg13: memref<32x32xf32, #tpu.memory_space<vmem>>, %arg14: memref<3x1x32xf32, #tpu.memory_space<vmem>>, %arg15: memref<32x32xf32, #tpu.memory_space<vmem>>, %arg16: memref<3x1x32xf32, #tpu.memory_space<vmem>>, %arg17: memref<32x32xf32, #tpu.memory_space<vmem>>, %arg18: memref<3x1x32xf32, #tpu.memory_space<vmem>>, %arg19: memref<32x32xf32, #tpu.memory_space<vmem>>, %arg20: memref<3x1x32xf32, #tpu.memory_space<vmem>>, %arg21: memref<32x32xf32, #tpu.memory_space<vmem>>, %arg22: memref<3x1x32xf32, #tpu.memory_space<vmem>>, %arg23: memref<32x32xf32, #tpu.memory_space<vmem>>, %arg24: memref<3x1x32xf32, #tpu.memory_space<vmem>>, %arg25: memref<32x32xf32, #tpu.memory_space<vmem>>, %arg26: memref<3x1x32xf32, #tpu.memory_space<vmem>>, %arg27: memref<2x1x32xf32, #tpu.memory_space<vmem>>, %arg28: memref<3x32x32xf32, #tpu.memory_space<vmem>>, %arg29: memref<3x1x32xf32, #tpu.memory_space<vmem>>, %arg30: memref<3x32x32xf32, #tpu.memory_space<vmem>>, %arg31: memref<3x1x32xf32, #tpu.memory_space<vmem>>, %arg32: memref<3x32x32xf32, #tpu.memory_space<vmem>>, %arg33: memref<3x1x32xf32, #tpu.memory_space<vmem>>, %arg34: memref<3x32x32xf32, #tpu.memory_space<vmem>>, %arg35: memref<3x1x32xf32, #tpu.memory_space<vmem>>, %arg36: memref<3x32x32xf32, #tpu.memory_space<vmem>>, %arg37: memref<3x1x32xf32, #tpu.memory_space<vmem>>, %arg38: memref<3x32x32xf32, #tpu.memory_space<vmem>>, %arg39: memref<3x1x32xf32, #tpu.memory_space<vmem>>, %arg40: memref<3x32x32xf32, #tpu.memory_space<vmem>>, %arg41: memref<3x1x32xf32, #tpu.memory_space<vmem>>, %arg42: memref<3x32x32xf32, #tpu.memory_space<vmem>>, %arg43: memref<3x1x32xf32, #tpu.memory_space<vmem>>, %arg44: memref<1x8x32xf32, #tpu.memory_space<vmem>>, %arg45: memref<8x32xf32, #tpu.memory_space<vmem>>, %arg46: memref<8x32xf32, #tpu.memory_space<vmem>>) attributes {dimension_semantics = [#tpu.dimension_semantics<parallel>], iteration_bounds = array<i64: 2>, scalar_prefetch = 0 : i64, scratch_operands = 2 : i64, tpu.core_type = #tpu.core_type<tc>, window_params = [{transform_indices = @transform_0, window_bounds = array<i64: 1, 64, 8>}, {transform_indices = @transform_1, window_bounds = array<i64: 1, 64, 8>}, {transform_indices = @transform_2, window_bounds = array<i64: 1, 8, 8, 8>}, {transform_indices = @transform_3, window_bounds = array<i64: 1, 8, 8, 8>}, {transform_indices = @transform_4, window_bounds = array<i64: 1, 64, 1>}, {transform_indices = @transform_5, window_bounds = array<i64: 1, 64, 1>}, {transform_indices = @transform_6, window_bounds = array<i64: 1, 8, 8>}, {transform_indices = @transform_7, window_bounds = array<i64: 1, 1, 8>}, {pipeline_mode = #tpu.pipeline_mode<synchronous>, transform_indices = @transform_8, window_bounds = array<i64: 8, 32>}, {pipeline_mode = #tpu.pipeline_mode<synchronous>, transform_indices = @transform_9, window_bounds = array<i64: 3, 1, 32>}, {pipeline_mode = #tpu.pipeline_mode<synchronous>, transform_indices = @transform_10, window_bounds = array<i64: 32, 32>}, {pipeline_mode = #tpu.pipeline_mode<synchronous>, transform_indices = @transform_11, window_bounds = array<i64: 3, 1, 32>}, {pipeline_mode = #tpu.pipeline_mode<synchronous>, transform_indices = @transform_12, window_bounds = array<i64: 32, 32>}, {pipeline_mode = #tpu.pipeline_mode<synchronous>, transform_indices = @transform_13, window_bounds = array<i64: 3, 1, 32>}, {pipeline_mode = #tpu.pipeline_mode<synchronous>, transform_indices = @transform_14, window_bounds = array<i64: 32, 32>}, {pipeline_mode = #tpu.pipeline_mode<synchronous>, transform_indices = @transform_15, window_bounds = array<i64: 3, 1, 32>}, {pipeline_mode = #tpu.pipeline_mode<synchronous>, transform_indices = @transform_16, window_bounds = array<i64: 32, 32>}, {pipeline_mode = #tpu.pipeline_mode<synchronous>, transform_indices = @transform_17, window_bounds = array<i64: 3, 1, 32>}, {pipeline_mode = #tpu.pipeline_mode<synchronous>, transform_indices = @transform_18, window_bounds = array<i64: 32, 32>}, {pipeline_mode = #tpu.pipeline_mode<synchronous>, transform_indices = @transform_19, window_bounds = array<i64: 3, 1, 32>}, {pipeline_mode = #tpu.pipeline_mode<synchronous>, transform_indices = @transform_20, window_bounds = array<i64: 32, 32>}, {pipeline_mode = #tpu.pipeline_mode<synchronous>, transform_indices = @transform_21, window_bounds = array<i64: 3, 1, 32>}, {pipeline_mode = #tpu.pipeline_mode<synchronous>, transform_indices = @transform_22, window_bounds = array<i64: 32, 32>}, {pipeline_mode = #tpu.pipeline_mode<synchronous>, transform_indices = @transform_23, window_bounds = array<i64: 3, 1, 32>}, {pipeline_mode = #tpu.pipeline_mode<synchronous>, transform_indices = @transform_24, window_bounds = array<i64: 32, 32>}, {pipeline_mode = #tpu.pipeline_mode<synchronous>, transform_indices = @transform_25, window_bounds = array<i64: 3, 1, 32>}, {pipeline_mode = #tpu.pipeline_mode<synchronous>, transform_indices = @transform_26, window_bounds = array<i64: 2, 1, 32>}, {pipeline_mode = #tpu.pipeline_mode<synchronous>, transform_indices = @transform_27, window_bounds = array<i64: 3, 32, 32>}, {pipeline_mode = #tpu.pipeline_mode<synchronous>, transform_indices = @transform_28, window_bounds = array<i64: 3, 1, 32>}, {pipeline_mode = #tpu.pipeline_mode<synchronous>, transform_indices = @transform_29, window_bounds = array<i64: 3, 32, 32>}, {pipeline_mode = #tpu.pipeline_mode<synchronous>, transform_indices = @transform_30, window_bounds = array<i64: 3, 1, 32>}, {pipeline_mode = #tpu.pipeline_mode<synchronous>, transform_indices = @transform_31, window_bounds = array<i64: 3, 32, 32>}, {pipeline_mode = #tpu.pipeline_mode<synchronous>, transform_indices = @transform_32, window_bounds = array<i64: 3, 1, 32>}, {pipeline_mode = #tpu.pipeline_mode<synchronous>, transform_indices = @transform_33, window_bounds = array<i64: 3, 32, 32>}, {pipeline_mode = #tpu.pipeline_mode<synchronous>, transform_indices = @transform_34, window_bounds = array<i64: 3, 1, 32>}, {pipeline_mode = #tpu.pipeline_mode<synchronous>, transform_indices = @transform_35, window_bounds = array<i64: 3, 32, 32>}, {pipeline_mode = #tpu.pipeline_mode<synchronous>, transform_indices = @transform_36, window_bounds = array<i64: 3, 1, 32>}, {pipeline_mode = #tpu.pipeline_mode<synchronous>, transform_indices = @transform_37, window_bounds = array<i64: 3, 32, 32>}, {pipeline_mode = #tpu.pipeline_mode<synchronous>, transform_indices = @transform_38, window_bounds = array<i64: 3, 1, 32>}, {pipeline_mode = #tpu.pipeline_mode<synchronous>, transform_indices = @transform_39, window_bounds = array<i64: 3, 32, 32>}, {pipeline_mode = #tpu.pipeline_mode<synchronous>, transform_indices = @transform_40, window_bounds = array<i64: 3, 1, 32>}, {pipeline_mode = #tpu.pipeline_mode<synchronous>, transform_indices = @transform_41, window_bounds = array<i64: 3, 32, 32>}, {pipeline_mode = #tpu.pipeline_mode<synchronous>, transform_indices = @transform_42, window_bounds = array<i64: 3, 1, 32>}, {transform_indices = @transform_43, window_bounds = array<i64: 1, 8, 32>}]} {
    %c0 = arith.constant 0 : index
    %c0_0 = arith.constant 0 : index
    %c0_1 = arith.constant 0 : index
    %0 = vector.load %arg1[%c0, %c0_0, %c0_1] : memref<1x64x8xf32, #tpu.memory_space<vmem>>, vector<1x64x8xf32>
    %1 = vector.shape_cast %0 : vector<1x64x8xf32> to vector<64x8xf32>
    %c0_2 = arith.constant 0 : index
    %c0_3 = arith.constant 0 : index
    %c0_4 = arith.constant 0 : index
    %2 = vector.load %arg2[%c0_2, %c0_3, %c0_4] : memref<1x64x8xf32, #tpu.memory_space<vmem>>, vector<1x64x8xf32>
    %3 = vector.shape_cast %2 : vector<1x64x8xf32> to vector<64x8xf32>
    %c0_5 = arith.constant 0 : index
    %c0_6 = arith.constant 0 : index
    %4 = vector.load %arg9[%c0_5, %c0_6] : memref<8x32xf32, #tpu.memory_space<vmem>>, vector<8x32xf32>
    %cst = arith.constant dense<0.000000e+00> : vector<64x32xf32>
    %5 = tpu.matmul %1, %4, %cst {dimension_numbers = #tpu.dot_dimension_numbers<[1], [0], [0], [1], [0, 0, 1, 1], [], []>} : vector<64x8xf32>, vector<8x32xf32>, vector<64x32xf32> -> vector<64x32xf32>
    %c0_7 = arith.constant 0 : index
    %c0_8 = arith.constant 0 : index
    %c0_9 = arith.constant 0 : index
    %6 = vector.load %arg10[%c0_7, %c0_8, %c0_9] : memref<3x1x32xf32, #tpu.memory_space<vmem>>, vector<1x1x32xf32>
    %7 = vector.shape_cast %6 : vector<1x1x32xf32> to vector<1x32xf32>
    %8 = vector.broadcast %7 : vector<1x32xf32> to vector<64x32xf32>
    %9 = arith.addf %5, %8 : vector<64x32xf32>
    %cst_10 = arith.constant dense<0.000000e+00> : vector<64xf32>
    %10 = vector.multi_reduction <add>, %9, %cst_10 [1] : vector<64x32xf32> to vector<64xf32>
    %11 = vector.shape_cast %10 : vector<64xf32> to vector<64x1xf32>
    %cst_11 = arith.constant 3.200000e+01 : f32
    %12 = vector.broadcast %cst_11 : f32 to vector<64x1xf32>
    %13 = arith.divf %11, %12 : vector<64x1xf32>
    %14 = vector.broadcast %13 : vector<64x1xf32> to vector<64x32xf32>
    %15 = arith.subf %9, %14 : vector<64x32xf32>
    %16 = arith.mulf %15, %15 : vector<64x32xf32>
    %cst_12 = arith.constant dense<0.000000e+00> : vector<64xf32>
    %17 = vector.multi_reduction <add>, %16, %cst_12 [1] : vector<64x32xf32> to vector<64xf32>
    %18 = vector.shape_cast %17 : vector<64xf32> to vector<64x1xf32>
    %cst_13 = arith.constant 3.200000e+01 : f32
    %19 = vector.broadcast %cst_13 : f32 to vector<64x1xf32>
    %20 = arith.divf %18, %19 : vector<64x1xf32>
    %21 = vector.broadcast %13 : vector<64x1xf32> to vector<64x32xf32>
    %22 = arith.subf %9, %21 : vector<64x32xf32>
    %cst_14 = arith.constant 9.99999974E-6 : f32
    %23 = vector.broadcast %cst_14 : f32 to vector<64x1xf32>
    %24 = arith.addf %20, %23 : vector<64x1xf32>
    %25 = math.rsqrt %24 : vector<64x1xf32>
    %26 = vector.broadcast %25 : vector<64x1xf32> to vector<64x32xf32>
    %27 = arith.mulf %22, %26 : vector<64x32xf32>
    %c1 = arith.constant 1 : index
    %c0_15 = arith.constant 0 : index
    %c0_16 = arith.constant 0 : index
    %28 = vector.load %arg10[%c1, %c0_15, %c0_16] : memref<3x1x32xf32, #tpu.memory_space<vmem>>, vector<1x1x32xf32>
    %29 = vector.shape_cast %28 : vector<1x1x32xf32> to vector<1x32xf32>
    %30 = vector.broadcast %29 : vector<1x32xf32> to vector<64x32xf32>
    %31 = arith.mulf %27, %30 : vector<64x32xf32>
    %c2 = arith.constant 2 : index
    %c0_17 = arith.constant 0 : index
    %c0_18 = arith.constant 0 : index
    %32 = vector.load %arg10[%c2, %c0_17, %c0_18] : memref<3x1x32xf32, #tpu.memory_space<vmem>>, vector<1x1x32xf32>
    %33 = vector.shape_cast %32 : vector<1x1x32xf32> to vector<1x32xf32>
    %34 = vector.broadcast %33 : vector<1x32xf32> to vector<64x32xf32>
    %35 = arith.addf %31, %34 : vector<64x32xf32>
    %cst_19 = arith.constant 0.000000e+00 : f32
    %36 = vector.broadcast %cst_19 : f32 to vector<64x32xf32>
    %37 = arith.maximumf %35, %36 : vector<64x32xf32>
    %c0_20 = arith.constant 0 : index
    %c0_21 = arith.constant 0 : index
    %38 = vector.load %arg9[%c0_20, %c0_21] : memref<8x32xf32, #tpu.memory_space<vmem>>, vector<8x32xf32>
    %cst_22 = arith.constant dense<0.000000e+00> : vector<64x32xf32>
    %39 = tpu.matmul %3, %38, %cst_22 {dimension_numbers = #tpu.dot_dimension_numbers<[1], [0], [0], [1], [0, 0, 1, 1], [], []>} : vector<64x8xf32>, vector<8x32xf32>, vector<64x32xf32> -> vector<64x32xf32>
    %c0_23 = arith.constant 0 : index
    %c0_24 = arith.constant 0 : index
    %c0_25 = arith.constant 0 : index
    %40 = vector.load %arg10[%c0_23, %c0_24, %c0_25] : memref<3x1x32xf32, #tpu.memory_space<vmem>>, vector<1x1x32xf32>
    %41 = vector.shape_cast %40 : vector<1x1x32xf32> to vector<1x32xf32>
    %42 = vector.broadcast %41 : vector<1x32xf32> to vector<64x32xf32>
    %43 = arith.addf %39, %42 : vector<64x32xf32>
    %cst_26 = arith.constant dense<0.000000e+00> : vector<64xf32>
    %44 = vector.multi_reduction <add>, %43, %cst_26 [1] : vector<64x32xf32> to vector<64xf32>
    %45 = vector.shape_cast %44 : vector<64xf32> to vector<64x1xf32>
    %cst_27 = arith.constant 3.200000e+01 : f32
    %46 = vector.broadcast %cst_27 : f32 to vector<64x1xf32>
    %47 = arith.divf %45, %46 : vector<64x1xf32>
    %48 = vector.broadcast %47 : vector<64x1xf32> to vector<64x32xf32>
    %49 = arith.subf %43, %48 : vector<64x32xf32>
    %50 = arith.mulf %49, %49 : vector<64x32xf32>
    %cst_28 = arith.constant dense<0.000000e+00> : vector<64xf32>
    %51 = vector.multi_reduction <add>, %50, %cst_28 [1] : vector<64x32xf32> to vector<64xf32>
    %52 = vector.shape_cast %51 : vector<64xf32> to vector<64x1xf32>
    %cst_29 = arith.constant 3.200000e+01 : f32
    %53 = vector.broadcast %cst_29 : f32 to vector<64x1xf32>
    %54 = arith.divf %52, %53 : vector<64x1xf32>
    %55 = vector.broadcast %47 : vector<64x1xf32> to vector<64x32xf32>
    %56 = arith.subf %43, %55 : vector<64x32xf32>
    %cst_30 = arith.constant 9.99999974E-6 : f32
    %57 = vector.broadcast %cst_30 : f32 to vector<64x1xf32>
    %58 = arith.addf %54, %57 : vector<64x1xf32>
    %59 = math.rsqrt %58 : vector<64x1xf32>
    %60 = vector.broadcast %59 : vector<64x1xf32> to vector<64x32xf32>
    %61 = arith.mulf %56, %60 : vector<64x32xf32>
    %c1_31 = arith.constant 1 : index
    %c0_32 = arith.constant 0 : index
    %c0_33 = arith.constant 0 : index
    %62 = vector.load %arg10[%c1_31, %c0_32, %c0_33] : memref<3x1x32xf32, #tpu.memory_space<vmem>>, vector<1x1x32xf32>
    %63 = vector.shape_cast %62 : vector<1x1x32xf32> to vector<1x32xf32>
    %64 = vector.broadcast %63 : vector<1x32xf32> to vector<64x32xf32>
    %65 = arith.mulf %61, %64 : vector<64x32xf32>
    %c2_34 = arith.constant 2 : index
    %c0_35 = arith.constant 0 : index
    %c0_36 = arith.constant 0 : index
    %66 = vector.load %arg10[%c2_34, %c0_35, %c0_36] : memref<3x1x32xf32, #tpu.memory_space<vmem>>, vector<1x1x32xf32>
    %67 = vector.shape_cast %66 : vector<1x1x32xf32> to vector<1x32xf32>
    %68 = vector.broadcast %67 : vector<1x32xf32> to vector<64x32xf32>
    %69 = arith.addf %65, %68 : vector<64x32xf32>
    %cst_37 = arith.constant 0.000000e+00 : f32
    %70 = vector.broadcast %cst_37 : f32 to vector<64x32xf32>
    %71 = arith.maximumf %69, %70 : vector<64x32xf32>
    %c0_38 = arith.constant 0 : index
    %c0_39 = arith.constant 0 : index
    %72 = vector.load %arg11[%c0_38, %c0_39] : memref<32x32xf32, #tpu.memory_space<vmem>>, vector<32x32xf32>
    %cst_40 = arith.constant dense<0.000000e+00> : vector<64x32xf32>
    %73 = tpu.matmul %37, %72, %cst_40 {dimension_numbers = #tpu.dot_dimension_numbers<[1], [0], [0], [1], [0, 0, 1, 1], [], []>} : vector<64x32xf32>, vector<32x32xf32>, vector<64x32xf32> -> vector<64x32xf32>
    %c0_41 = arith.constant 0 : index
    %c0_42 = arith.constant 0 : index
    %c0_43 = arith.constant 0 : index
    %74 = vector.load %arg12[%c0_41, %c0_42, %c0_43] : memref<3x1x32xf32, #tpu.memory_space<vmem>>, vector<1x1x32xf32>
    %75 = vector.shape_cast %74 : vector<1x1x32xf32> to vector<1x32xf32>
    %76 = vector.broadcast %75 : vector<1x32xf32> to vector<64x32xf32>
    %77 = arith.addf %73, %76 : vector<64x32xf32>
    %cst_44 = arith.constant dense<0.000000e+00> : vector<64xf32>
    %78 = vector.multi_reduction <add>, %77, %cst_44 [1] : vector<64x32xf32> to vector<64xf32>
    %79 = vector.shape_cast %78 : vector<64xf32> to vector<64x1xf32>
    %cst_45 = arith.constant 3.200000e+01 : f32
    %80 = vector.broadcast %cst_45 : f32 to vector<64x1xf32>
    %81 = arith.divf %79, %80 : vector<64x1xf32>
    %82 = vector.broadcast %81 : vector<64x1xf32> to vector<64x32xf32>
    %83 = arith.subf %77, %82 : vector<64x32xf32>
    %84 = arith.mulf %83, %83 : vector<64x32xf32>
    %cst_46 = arith.constant dense<0.000000e+00> : vector<64xf32>
    %85 = vector.multi_reduction <add>, %84, %cst_46 [1] : vector<64x32xf32> to vector<64xf32>
    %86 = vector.shape_cast %85 : vector<64xf32> to vector<64x1xf32>
    %cst_47 = arith.constant 3.200000e+01 : f32
    %87 = vector.broadcast %cst_47 : f32 to vector<64x1xf32>
    %88 = arith.divf %86, %87 : vector<64x1xf32>
    %89 = vector.broadcast %81 : vector<64x1xf32> to vector<64x32xf32>
    %90 = arith.subf %77, %89 : vector<64x32xf32>
    %cst_48 = arith.constant 9.99999974E-6 : f32
    %91 = vector.broadcast %cst_48 : f32 to vector<64x1xf32>
    %92 = arith.addf %88, %91 : vector<64x1xf32>
    %93 = math.rsqrt %92 : vector<64x1xf32>
    %94 = vector.broadcast %93 : vector<64x1xf32> to vector<64x32xf32>
    %95 = arith.mulf %90, %94 : vector<64x32xf32>
    %c1_49 = arith.constant 1 : index
    %c0_50 = arith.constant 0 : index
    %c0_51 = arith.constant 0 : index
    %96 = vector.load %arg12[%c1_49, %c0_50, %c0_51] : memref<3x1x32xf32, #tpu.memory_space<vmem>>, vector<1x1x32xf32>
    %97 = vector.shape_cast %96 : vector<1x1x32xf32> to vector<1x32xf32>
    %98 = vector.broadcast %97 : vector<1x32xf32> to vector<64x32xf32>
    %99 = arith.mulf %95, %98 : vector<64x32xf32>
    %c2_52 = arith.constant 2 : index
    %c0_53 = arith.constant 0 : index
    %c0_54 = arith.constant 0 : index
    %100 = vector.load %arg12[%c2_52, %c0_53, %c0_54] : memref<3x1x32xf32, #tpu.memory_space<vmem>>, vector<1x1x32xf32>
    %101 = vector.shape_cast %100 : vector<1x1x32xf32> to vector<1x32xf32>
    %102 = vector.broadcast %101 : vector<1x32xf32> to vector<64x32xf32>
    %103 = arith.addf %99, %102 : vector<64x32xf32>
    %cst_55 = arith.constant 0.000000e+00 : f32
    %104 = vector.broadcast %cst_55 : f32 to vector<64x32xf32>
    %105 = arith.maximumf %103, %104 : vector<64x32xf32>
    %c0_56 = arith.constant 0 : index
    %c0_57 = arith.constant 0 : index
    %106 = vector.load %arg11[%c0_56, %c0_57] : memref<32x32xf32, #tpu.memory_space<vmem>>, vector<32x32xf32>
    %cst_58 = arith.constant dense<0.000000e+00> : vector<64x32xf32>
    %107 = tpu.matmul %71, %106, %cst_58 {dimension_numbers = #tpu.dot_dimension_numbers<[1], [0], [0], [1], [0, 0, 1, 1], [], []>} : vector<64x32xf32>, vector<32x32xf32>, vector<64x32xf32> -> vector<64x32xf32>
    %c0_59 = arith.constant 0 : index
    %c0_60 = arith.constant 0 : index
    %c0_61 = arith.constant 0 : index
    %108 = vector.load %arg12[%c0_59, %c0_60, %c0_61] : memref<3x1x32xf32, #tpu.memory_space<vmem>>, vector<1x1x32xf32>
    %109 = vector.shape_cast %108 : vector<1x1x32xf32> to vector<1x32xf32>
    %110 = vector.broadcast %109 : vector<1x32xf32> to vector<64x32xf32>
    %111 = arith.addf %107, %110 : vector<64x32xf32>
    %cst_62 = arith.constant dense<0.000000e+00> : vector<64xf32>
    %112 = vector.multi_reduction <add>, %111, %cst_62 [1] : vector<64x32xf32> to vector<64xf32>
    %113 = vector.shape_cast %112 : vector<64xf32> to vector<64x1xf32>
    %cst_63 = arith.constant 3.200000e+01 : f32
    %114 = vector.broadcast %cst_63 : f32 to vector<64x1xf32>
    %115 = arith.divf %113, %114 : vector<64x1xf32>
    %116 = vector.broadcast %115 : vector<64x1xf32> to vector<64x32xf32>
    %117 = arith.subf %111, %116 : vector<64x32xf32>
    %118 = arith.mulf %117, %117 : vector<64x32xf32>
    %cst_64 = arith.constant dense<0.000000e+00> : vector<64xf32>
    %119 = vector.multi_reduction <add>, %118, %cst_64 [1] : vector<64x32xf32> to vector<64xf32>
    %120 = vector.shape_cast %119 : vector<64xf32> to vector<64x1xf32>
    %cst_65 = arith.constant 3.200000e+01 : f32
    %121 = vector.broadcast %cst_65 : f32 to vector<64x1xf32>
    %122 = arith.divf %120, %121 : vector<64x1xf32>
    %123 = vector.broadcast %115 : vector<64x1xf32> to vector<64x32xf32>
    %124 = arith.subf %111, %123 : vector<64x32xf32>
    %cst_66 = arith.constant 9.99999974E-6 : f32
    %125 = vector.broadcast %cst_66 : f32 to vector<64x1xf32>
    %126 = arith.addf %122, %125 : vector<64x1xf32>
    %127 = math.rsqrt %126 : vector<64x1xf32>
    %128 = vector.broadcast %127 : vector<64x1xf32> to vector<64x32xf32>
    %129 = arith.mulf %124, %128 : vector<64x32xf32>
    %c1_67 = arith.constant 1 : index
    %c0_68 = arith.constant 0 : index
    %c0_69 = arith.constant 0 : index
    %130 = vector.load %arg12[%c1_67, %c0_68, %c0_69] : memref<3x1x32xf32, #tpu.memory_space<vmem>>, vector<1x1x32xf32>
    %131 = vector.shape_cast %130 : vector<1x1x32xf32> to vector<1x32xf32>
    %132 = vector.broadcast %131 : vector<1x32xf32> to vector<64x32xf32>
    %133 = arith.mulf %129, %132 : vector<64x32xf32>
    %c2_70 = arith.constant 2 : index
    %c0_71 = arith.constant 0 : index
    %c0_72 = arith.constant 0 : index
    %134 = vector.load %arg12[%c2_70, %c0_71, %c0_72] : memref<3x1x32xf32, #tpu.memory_space<vmem>>, vector<1x1x32xf32>
    %135 = vector.shape_cast %134 : vector<1x1x32xf32> to vector<1x32xf32>
    %136 = vector.broadcast %135 : vector<1x32xf32> to vector<64x32xf32>
    %137 = arith.addf %133, %136 : vector<64x32xf32>
    %cst_73 = arith.constant 0.000000e+00 : f32
    %138 = vector.broadcast %cst_73 : f32 to vector<64x32xf32>
    %139 = arith.maximumf %137, %138 : vector<64x32xf32>
    %c0_74 = arith.constant 0 : index
    %c0_75 = arith.constant 0 : index
    %140 = vector.load %arg13[%c0_74, %c0_75] : memref<32x32xf32, #tpu.memory_space<vmem>>, vector<32x32xf32>
    %cst_76 = arith.constant dense<0.000000e+00> : vector<64x32xf32>
    %141 = tpu.matmul %105, %140, %cst_76 {dimension_numbers = #tpu.dot_dimension_numbers<[1], [0], [0], [1], [0, 0, 1, 1], [], []>} : vector<64x32xf32>, vector<32x32xf32>, vector<64x32xf32> -> vector<64x32xf32>
    %c0_77 = arith.constant 0 : index
    %c0_78 = arith.constant 0 : index
    %c0_79 = arith.constant 0 : index
    %142 = vector.load %arg14[%c0_77, %c0_78, %c0_79] : memref<3x1x32xf32, #tpu.memory_space<vmem>>, vector<1x1x32xf32>
    %143 = vector.shape_cast %142 : vector<1x1x32xf32> to vector<1x32xf32>
    %144 = vector.broadcast %143 : vector<1x32xf32> to vector<64x32xf32>
    %145 = arith.addf %141, %144 : vector<64x32xf32>
    %cst_80 = arith.constant dense<0.000000e+00> : vector<64xf32>
    %146 = vector.multi_reduction <add>, %145, %cst_80 [1] : vector<64x32xf32> to vector<64xf32>
    %147 = vector.shape_cast %146 : vector<64xf32> to vector<64x1xf32>
    %cst_81 = arith.constant 3.200000e+01 : f32
    %148 = vector.broadcast %cst_81 : f32 to vector<64x1xf32>
    %149 = arith.divf %147, %148 : vector<64x1xf32>
    %150 = vector.broadcast %149 : vector<64x1xf32> to vector<64x32xf32>
    %151 = arith.subf %145, %150 : vector<64x32xf32>
    %152 = arith.mulf %151, %151 : vector<64x32xf32>
    %cst_82 = arith.constant dense<0.000000e+00> : vector<64xf32>
    %153 = vector.multi_reduction <add>, %152, %cst_82 [1] : vector<64x32xf32> to vector<64xf32>
    %154 = vector.shape_cast %153 : vector<64xf32> to vector<64x1xf32>
    %cst_83 = arith.constant 3.200000e+01 : f32
    %155 = vector.broadcast %cst_83 : f32 to vector<64x1xf32>
    %156 = arith.divf %154, %155 : vector<64x1xf32>
    %157 = vector.broadcast %149 : vector<64x1xf32> to vector<64x32xf32>
    %158 = arith.subf %145, %157 : vector<64x32xf32>
    %cst_84 = arith.constant 9.99999974E-6 : f32
    %159 = vector.broadcast %cst_84 : f32 to vector<64x1xf32>
    %160 = arith.addf %156, %159 : vector<64x1xf32>
    %161 = math.rsqrt %160 : vector<64x1xf32>
    %162 = vector.broadcast %161 : vector<64x1xf32> to vector<64x32xf32>
    %163 = arith.mulf %158, %162 : vector<64x32xf32>
    %c1_85 = arith.constant 1 : index
    %c0_86 = arith.constant 0 : index
    %c0_87 = arith.constant 0 : index
    %164 = vector.load %arg14[%c1_85, %c0_86, %c0_87] : memref<3x1x32xf32, #tpu.memory_space<vmem>>, vector<1x1x32xf32>
    %165 = vector.shape_cast %164 : vector<1x1x32xf32> to vector<1x32xf32>
    %166 = vector.broadcast %165 : vector<1x32xf32> to vector<64x32xf32>
    %167 = arith.mulf %163, %166 : vector<64x32xf32>
    %c2_88 = arith.constant 2 : index
    %c0_89 = arith.constant 0 : index
    %c0_90 = arith.constant 0 : index
    %168 = vector.load %arg14[%c2_88, %c0_89, %c0_90] : memref<3x1x32xf32, #tpu.memory_space<vmem>>, vector<1x1x32xf32>
    %169 = vector.shape_cast %168 : vector<1x1x32xf32> to vector<1x32xf32>
    %170 = vector.broadcast %169 : vector<1x32xf32> to vector<64x32xf32>
    %171 = arith.addf %167, %170 : vector<64x32xf32>
    %cst_91 = arith.constant 0.000000e+00 : f32
    %172 = vector.broadcast %cst_91 : f32 to vector<64x32xf32>
    %173 = arith.maximumf %171, %172 : vector<64x32xf32>
    %c0_92 = arith.constant 0 : index
    %c0_93 = arith.constant 0 : index
    %174 = vector.load %arg13[%c0_92, %c0_93] : memref<32x32xf32, #tpu.memory_space<vmem>>, vector<32x32xf32>
    %cst_94 = arith.constant dense<0.000000e+00> : vector<64x32xf32>
    %175 = tpu.matmul %139, %174, %cst_94 {dimension_numbers = #tpu.dot_dimension_numbers<[1], [0], [0], [1], [0, 0, 1, 1], [], []>} : vector<64x32xf32>, vector<32x32xf32>, vector<64x32xf32> -> vector<64x32xf32>
    %c0_95 = arith.constant 0 : index
    %c0_96 = arith.constant 0 : index
    %c0_97 = arith.constant 0 : index
    %176 = vector.load %arg14[%c0_95, %c0_96, %c0_97] : memref<3x1x32xf32, #tpu.memory_space<vmem>>, vector<1x1x32xf32>
    %177 = vector.shape_cast %176 : vector<1x1x32xf32> to vector<1x32xf32>
    %178 = vector.broadcast %177 : vector<1x32xf32> to vector<64x32xf32>
    %179 = arith.addf %175, %178 : vector<64x32xf32>
    %cst_98 = arith.constant dense<0.000000e+00> : vector<64xf32>
    %180 = vector.multi_reduction <add>, %179, %cst_98 [1] : vector<64x32xf32> to vector<64xf32>
    %181 = vector.shape_cast %180 : vector<64xf32> to vector<64x1xf32>
    %cst_99 = arith.constant 3.200000e+01 : f32
    %182 = vector.broadcast %cst_99 : f32 to vector<64x1xf32>
    %183 = arith.divf %181, %182 : vector<64x1xf32>
    %184 = vector.broadcast %183 : vector<64x1xf32> to vector<64x32xf32>
    %185 = arith.subf %179, %184 : vector<64x32xf32>
    %186 = arith.mulf %185, %185 : vector<64x32xf32>
    %cst_100 = arith.constant dense<0.000000e+00> : vector<64xf32>
    %187 = vector.multi_reduction <add>, %186, %cst_100 [1] : vector<64x32xf32> to vector<64xf32>
    %188 = vector.shape_cast %187 : vector<64xf32> to vector<64x1xf32>
    %cst_101 = arith.constant 3.200000e+01 : f32
    %189 = vector.broadcast %cst_101 : f32 to vector<64x1xf32>
    %190 = arith.divf %188, %189 : vector<64x1xf32>
    %191 = vector.broadcast %183 : vector<64x1xf32> to vector<64x32xf32>
    %192 = arith.subf %179, %191 : vector<64x32xf32>
    %cst_102 = arith.constant 9.99999974E-6 : f32
    %193 = vector.broadcast %cst_102 : f32 to vector<64x1xf32>
    %194 = arith.addf %190, %193 : vector<64x1xf32>
    %195 = math.rsqrt %194 : vector<64x1xf32>
    %196 = vector.broadcast %195 : vector<64x1xf32> to vector<64x32xf32>
    %197 = arith.mulf %192, %196 : vector<64x32xf32>
    %c1_103 = arith.constant 1 : index
    %c0_104 = arith.constant 0 : index
    %c0_105 = arith.constant 0 : index
    %198 = vector.load %arg14[%c1_103, %c0_104, %c0_105] : memref<3x1x32xf32, #tpu.memory_space<vmem>>, vector<1x1x32xf32>
    %199 = vector.shape_cast %198 : vector<1x1x32xf32> to vector<1x32xf32>
    %200 = vector.broadcast %199 : vector<1x32xf32> to vector<64x32xf32>
    %201 = arith.mulf %197, %200 : vector<64x32xf32>
    %c2_106 = arith.constant 2 : index
    %c0_107 = arith.constant 0 : index
    %c0_108 = arith.constant 0 : index
    %202 = vector.load %arg14[%c2_106, %c0_107, %c0_108] : memref<3x1x32xf32, #tpu.memory_space<vmem>>, vector<1x1x32xf32>
    %203 = vector.shape_cast %202 : vector<1x1x32xf32> to vector<1x32xf32>
    %204 = vector.broadcast %203 : vector<1x32xf32> to vector<64x32xf32>
    %205 = arith.addf %201, %204 : vector<64x32xf32>
    %cst_109 = arith.constant 0.000000e+00 : f32
    %206 = vector.broadcast %cst_109 : f32 to vector<64x32xf32>
    %207 = arith.maximumf %205, %206 : vector<64x32xf32>
    %c0_110 = arith.constant 0 : index
    %c0_111 = arith.constant 0 : index
    %c0_112 = arith.constant 0 : index
    %c0_113 = arith.constant 0 : index
    %208 = vector.load %arg3[%c0_110, %c0_111, %c0_112, %c0_113] : memref<1x8x8x8xf32, #tpu.memory_space<vmem>>, vector<1x8x8x8xf32>
    %209 = vector.shape_cast %208 : vector<1x8x8x8xf32> to vector<8x8x8xf32>
    %c0_114 = arith.constant 0 : index
    %c0_115 = arith.constant 0 : index
    %c0_116 = arith.constant 0 : index
    %c0_117 = arith.constant 0 : index
    %210 = vector.load %arg4[%c0_114, %c0_115, %c0_116, %c0_117] : memref<1x8x8x8xf32, #tpu.memory_space<vmem>>, vector<1x8x8x8xf32>
    %211 = vector.shape_cast %210 : vector<1x8x8x8xf32> to vector<8x8x8xf32>
    %c0_118 = arith.constant 0 : index
    %c0_119 = arith.constant 0 : index
    %c0_120 = arith.constant 0 : index
    %212 = vector.load %arg28[%c0_118, %c0_119, %c0_120] : memref<3x32x32xf32, #tpu.memory_space<vmem>>, vector<1x32x32xf32>
    %213 = vector.shape_cast %212 : vector<1x32x32xf32> to vector<32x32xf32>
    %cst_121 = arith.constant dense<0.000000e+00> : vector<64x32xf32>
    %214 = tpu.matmul %173, %213, %cst_121 {dimension_numbers = #tpu.dot_dimension_numbers<[1], [0], [0], [1], [0, 0, 1, 1], [], []>} : vector<64x32xf32>, vector<32x32xf32>, vector<64x32xf32> -> vector<64x32xf32>
    %c0_122 = arith.constant 0 : index
    %c0_123 = arith.constant 0 : index
    %c0_124 = arith.constant 0 : index
    %215 = vector.load %arg29[%c0_122, %c0_123, %c0_124] : memref<3x1x32xf32, #tpu.memory_space<vmem>>, vector<1x1x32xf32>
    %216 = vector.shape_cast %215 : vector<1x1x32xf32> to vector<1x32xf32>
    %217 = vector.broadcast %216 : vector<1x32xf32> to vector<64x32xf32>
    %218 = arith.addf %214, %217 : vector<64x32xf32>
    %219 = vector.shape_cast %218 : vector<64x32xf32> to vector<8x8x32xf32>
    %c1_125 = arith.constant 1 : index
    %c0_126 = arith.constant 0 : index
    %c0_127 = arith.constant 0 : index
    %220 = vector.load %arg28[%c1_125, %c0_126, %c0_127] : memref<3x32x32xf32, #tpu.memory_space<vmem>>, vector<1x32x32xf32>
    %221 = vector.shape_cast %220 : vector<1x32x32xf32> to vector<32x32xf32>
    %cst_128 = arith.constant dense<0.000000e+00> : vector<64x32xf32>
    %222 = tpu.matmul %173, %221, %cst_128 {dimension_numbers = #tpu.dot_dimension_numbers<[1], [0], [0], [1], [0, 0, 1, 1], [], []>} : vector<64x32xf32>, vector<32x32xf32>, vector<64x32xf32> -> vector<64x32xf32>
    %c1_129 = arith.constant 1 : index
    %c0_130 = arith.constant 0 : index
    %c0_131 = arith.constant 0 : index
    %223 = vector.load %arg29[%c1_129, %c0_130, %c0_131] : memref<3x1x32xf32, #tpu.memory_space<vmem>>, vector<1x1x32xf32>
    %224 = vector.shape_cast %223 : vector<1x1x32xf32> to vector<1x32xf32>
    %225 = vector.broadcast %224 : vector<1x32xf32> to vector<64x32xf32>
    %226 = arith.addf %222, %225 : vector<64x32xf32>
    %227 = vector.shape_cast %226 : vector<64x32xf32> to vector<8x8x32xf32>
    %c2_132 = arith.constant 2 : index
    %c0_133 = arith.constant 0 : index
    %c0_134 = arith.constant 0 : index
    %228 = vector.load %arg28[%c2_132, %c0_133, %c0_134] : memref<3x32x32xf32, #tpu.memory_space<vmem>>, vector<1x32x32xf32>
    %229 = vector.shape_cast %228 : vector<1x32x32xf32> to vector<32x32xf32>
    %cst_135 = arith.constant dense<0.000000e+00> : vector<64x32xf32>
    %230 = tpu.matmul %173, %229, %cst_135 {dimension_numbers = #tpu.dot_dimension_numbers<[1], [0], [0], [1], [0, 0, 1, 1], [], []>} : vector<64x32xf32>, vector<32x32xf32>, vector<64x32xf32> -> vector<64x32xf32>
    %c2_136 = arith.constant 2 : index
    %c0_137 = arith.constant 0 : index
    %c0_138 = arith.constant 0 : index
    %231 = vector.load %arg29[%c2_136, %c0_137, %c0_138] : memref<3x1x32xf32, #tpu.memory_space<vmem>>, vector<1x1x32xf32>
    %232 = vector.shape_cast %231 : vector<1x1x32xf32> to vector<1x32xf32>
    %233 = vector.broadcast %232 : vector<1x32xf32> to vector<64x32xf32>
    %234 = arith.addf %230, %233 : vector<64x32xf32>
    %235 = vector.shape_cast %234 : vector<64x32xf32> to vector<8x8x32xf32>
    "tpu.trace_start"() <{level = 10 : i32, message = "gqd,gkd->gqk"}> : () -> ()
    %cst_139 = arith.constant dense<0.000000e+00> : vector<8x8x8xf32>
    %236 = tpu.matmul %219, %227, %cst_139 {dimension_numbers = #tpu.dot_dimension_numbers<[2], [2], [1], [1], [0, 0, 0, 1, 1, 1], [0], [0]>} : vector<8x8x32xf32>, vector<8x8x32xf32>, vector<8x8x8xf32> -> vector<8x8x8xf32>
    "tpu.trace_stop"() : () -> ()
    %cst_140 = arith.constant 0.176776692 : f32
    %237 = vector.broadcast %cst_140 : f32 to vector<8x8x8xf32>
    %238 = arith.mulf %236, %237 : vector<8x8x8xf32>
    %239 = arith.addf %238, %209 : vector<8x8x8xf32>
    %cst_141 = arith.constant dense<0xFF800000> : vector<8x8xf32>
    %240 = vector.multi_reduction <maximumf>, %239, %cst_141 [2] : vector<8x8x8xf32> to vector<8x8xf32>
    %241 = vector.shape_cast %240 : vector<8x8xf32> to vector<8x8x1xf32>
    %242 = vector.broadcast %241 : vector<8x8x1xf32> to vector<8x8x8xf32>
    %243 = arith.subf %239, %242 : vector<8x8x8xf32>
    %244 = math.exp %243 : vector<8x8x8xf32>
    %cst_142 = arith.constant dense<0.000000e+00> : vector<8x8xf32>
    %245 = vector.multi_reduction <add>, %244, %cst_142 [2] : vector<8x8x8xf32> to vector<8x8xf32>
    %246 = vector.shape_cast %245 : vector<8x8xf32> to vector<8x8x1xf32>
    %247 = tpu.reciprocal %246 {approx = true} : vector<8x8x1xf32> -> vector<8x8x1xf32>
    %248 = vector.broadcast %247 : vector<8x8x1xf32> to vector<8x8x8xf32>
    %249 = arith.mulf %244, %248 : vector<8x8x8xf32>
    "tpu.trace_start"() <{level = 10 : i32, message = "gqk,gkd->gqd"}> : () -> ()
    %cst_143 = arith.constant dense<0.000000e+00> : vector<8x8x32xf32>
    %250 = tpu.matmul %249, %235, %cst_143 {dimension_numbers = #tpu.dot_dimension_numbers<[2], [1], [1], [2], [0, 0, 0, 1, 1, 2], [0], [0]>} : vector<8x8x8xf32>, vector<8x8x32xf32>, vector<8x8x32xf32> -> vector<8x8x32xf32>
    "tpu.trace_stop"() : () -> ()
    %251 = vector.shape_cast %250 : vector<8x8x32xf32> to vector<64x32xf32>
    %c0_144 = arith.constant 0 : index
    %c0_145 = arith.constant 0 : index
    %c0_146 = arith.constant 0 : index
    %252 = vector.load %arg30[%c0_144, %c0_145, %c0_146] : memref<3x32x32xf32, #tpu.memory_space<vmem>>, vector<1x32x32xf32>
    %253 = vector.shape_cast %252 : vector<1x32x32xf32> to vector<32x32xf32>
    %cst_147 = arith.constant dense<0.000000e+00> : vector<64x32xf32>
    %254 = tpu.matmul %251, %253, %cst_147 {dimension_numbers = #tpu.dot_dimension_numbers<[1], [0], [0], [1], [0, 0, 1, 1], [], []>} : vector<64x32xf32>, vector<32x32xf32>, vector<64x32xf32> -> vector<64x32xf32>
    %c0_148 = arith.constant 0 : index
    %c0_149 = arith.constant 0 : index
    %c0_150 = arith.constant 0 : index
    %255 = vector.load %arg31[%c0_148, %c0_149, %c0_150] : memref<3x1x32xf32, #tpu.memory_space<vmem>>, vector<1x1x32xf32>
    %256 = vector.shape_cast %255 : vector<1x1x32xf32> to vector<1x32xf32>
    %257 = vector.broadcast %256 : vector<1x32xf32> to vector<64x32xf32>
    %258 = arith.addf %254, %257 : vector<64x32xf32>
    %259 = vector.shape_cast %258 : vector<64x32xf32> to vector<8x8x32xf32>
    %c1_151 = arith.constant 1 : index
    %c0_152 = arith.constant 0 : index
    %c0_153 = arith.constant 0 : index
    %260 = vector.load %arg30[%c1_151, %c0_152, %c0_153] : memref<3x32x32xf32, #tpu.memory_space<vmem>>, vector<1x32x32xf32>
    %261 = vector.shape_cast %260 : vector<1x32x32xf32> to vector<32x32xf32>
    %cst_154 = arith.constant dense<0.000000e+00> : vector<64x32xf32>
    %262 = tpu.matmul %251, %261, %cst_154 {dimension_numbers = #tpu.dot_dimension_numbers<[1], [0], [0], [1], [0, 0, 1, 1], [], []>} : vector<64x32xf32>, vector<32x32xf32>, vector<64x32xf32> -> vector<64x32xf32>
    %c1_155 = arith.constant 1 : index
    %c0_156 = arith.constant 0 : index
    %c0_157 = arith.constant 0 : index
    %263 = vector.load %arg31[%c1_155, %c0_156, %c0_157] : memref<3x1x32xf32, #tpu.memory_space<vmem>>, vector<1x1x32xf32>
    %264 = vector.shape_cast %263 : vector<1x1x32xf32> to vector<1x32xf32>
    %265 = vector.broadcast %264 : vector<1x32xf32> to vector<64x32xf32>
    %266 = arith.addf %262, %265 : vector<64x32xf32>
    %267 = vector.shape_cast %266 : vector<64x32xf32> to vector<8x8x32xf32>
    %c2_158 = arith.constant 2 : index
    %c0_159 = arith.constant 0 : index
    %c0_160 = arith.constant 0 : index
    %268 = vector.load %arg30[%c2_158, %c0_159, %c0_160] : memref<3x32x32xf32, #tpu.memory_space<vmem>>, vector<1x32x32xf32>
    %269 = vector.shape_cast %268 : vector<1x32x32xf32> to vector<32x32xf32>
    %cst_161 = arith.constant dense<0.000000e+00> : vector<64x32xf32>
    %270 = tpu.matmul %251, %269, %cst_161 {dimension_numbers = #tpu.dot_dimension_numbers<[1], [0], [0], [1], [0, 0, 1, 1], [], []>} : vector<64x32xf32>, vector<32x32xf32>, vector<64x32xf32> -> vector<64x32xf32>
    %c2_162 = arith.constant 2 : index
    %c0_163 = arith.constant 0 : index
    %c0_164 = arith.constant 0 : index
    %271 = vector.load %arg31[%c2_162, %c0_163, %c0_164] : memref<3x1x32xf32, #tpu.memory_space<vmem>>, vector<1x1x32xf32>
    %272 = vector.shape_cast %271 : vector<1x1x32xf32> to vector<1x32xf32>
    %273 = vector.broadcast %272 : vector<1x32xf32> to vector<64x32xf32>
    %274 = arith.addf %270, %273 : vector<64x32xf32>
    %275 = vector.shape_cast %274 : vector<64x32xf32> to vector<8x8x32xf32>
    "tpu.trace_start"() <{level = 10 : i32, message = "gqd,gkd->gqk"}> : () -> ()
    %cst_165 = arith.constant dense<0.000000e+00> : vector<8x8x8xf32>
    %276 = tpu.matmul %259, %267, %cst_165 {dimension_numbers = #tpu.dot_dimension_numbers<[2], [2], [1], [1], [0, 0, 0, 1, 1, 1], [0], [0]>} : vector<8x8x32xf32>, vector<8x8x32xf32>, vector<8x8x8xf32> -> vector<8x8x8xf32>
    "tpu.trace_stop"() : () -> ()
    %cst_166 = arith.constant 0.176776692 : f32
    %277 = vector.broadcast %cst_166 : f32 to vector<8x8x8xf32>
    %278 = arith.mulf %276, %277 : vector<8x8x8xf32>
    %279 = arith.addf %278, %209 : vector<8x8x8xf32>
    %cst_167 = arith.constant dense<0xFF800000> : vector<8x8xf32>
    %280 = vector.multi_reduction <maximumf>, %279, %cst_167 [2] : vector<8x8x8xf32> to vector<8x8xf32>
    %281 = vector.shape_cast %280 : vector<8x8xf32> to vector<8x8x1xf32>
    %282 = vector.broadcast %281 : vector<8x8x1xf32> to vector<8x8x8xf32>
    %283 = arith.subf %279, %282 : vector<8x8x8xf32>
    %284 = math.exp %283 : vector<8x8x8xf32>
    %cst_168 = arith.constant dense<0.000000e+00> : vector<8x8xf32>
    %285 = vector.multi_reduction <add>, %284, %cst_168 [2] : vector<8x8x8xf32> to vector<8x8xf32>
    %286 = vector.shape_cast %285 : vector<8x8xf32> to vector<8x8x1xf32>
    %287 = tpu.reciprocal %286 {approx = true} : vector<8x8x1xf32> -> vector<8x8x1xf32>
    %288 = vector.broadcast %287 : vector<8x8x1xf32> to vector<8x8x8xf32>
    %289 = arith.mulf %284, %288 : vector<8x8x8xf32>
    "tpu.trace_start"() <{level = 10 : i32, message = "gqk,gkd->gqd"}> : () -> ()
    %cst_169 = arith.constant dense<0.000000e+00> : vector<8x8x32xf32>
    %290 = tpu.matmul %289, %275, %cst_169 {dimension_numbers = #tpu.dot_dimension_numbers<[2], [1], [1], [2], [0, 0, 0, 1, 1, 2], [0], [0]>} : vector<8x8x8xf32>, vector<8x8x32xf32>, vector<8x8x32xf32> -> vector<8x8x32xf32>
    "tpu.trace_stop"() : () -> ()
    %291 = vector.shape_cast %290 : vector<8x8x32xf32> to vector<64x32xf32>
    %c0_170 = arith.constant 0 : index
    %c0_171 = arith.constant 0 : index
    %c0_172 = arith.constant 0 : index
    %292 = vector.load %arg32[%c0_170, %c0_171, %c0_172] : memref<3x32x32xf32, #tpu.memory_space<vmem>>, vector<1x32x32xf32>
    %293 = vector.shape_cast %292 : vector<1x32x32xf32> to vector<32x32xf32>
    %cst_173 = arith.constant dense<0.000000e+00> : vector<64x32xf32>
    %294 = tpu.matmul %207, %293, %cst_173 {dimension_numbers = #tpu.dot_dimension_numbers<[1], [0], [0], [1], [0, 0, 1, 1], [], []>} : vector<64x32xf32>, vector<32x32xf32>, vector<64x32xf32> -> vector<64x32xf32>
    %c0_174 = arith.constant 0 : index
    %c0_175 = arith.constant 0 : index
    %c0_176 = arith.constant 0 : index
    %295 = vector.load %arg33[%c0_174, %c0_175, %c0_176] : memref<3x1x32xf32, #tpu.memory_space<vmem>>, vector<1x1x32xf32>
    %296 = vector.shape_cast %295 : vector<1x1x32xf32> to vector<1x32xf32>
    %297 = vector.broadcast %296 : vector<1x32xf32> to vector<64x32xf32>
    %298 = arith.addf %294, %297 : vector<64x32xf32>
    %299 = vector.shape_cast %298 : vector<64x32xf32> to vector<8x8x32xf32>
    %c1_177 = arith.constant 1 : index
    %c0_178 = arith.constant 0 : index
    %c0_179 = arith.constant 0 : index
    %300 = vector.load %arg32[%c1_177, %c0_178, %c0_179] : memref<3x32x32xf32, #tpu.memory_space<vmem>>, vector<1x32x32xf32>
    %301 = vector.shape_cast %300 : vector<1x32x32xf32> to vector<32x32xf32>
    %cst_180 = arith.constant dense<0.000000e+00> : vector<64x32xf32>
    %302 = tpu.matmul %207, %301, %cst_180 {dimension_numbers = #tpu.dot_dimension_numbers<[1], [0], [0], [1], [0, 0, 1, 1], [], []>} : vector<64x32xf32>, vector<32x32xf32>, vector<64x32xf32> -> vector<64x32xf32>
    %c1_181 = arith.constant 1 : index
    %c0_182 = arith.constant 0 : index
    %c0_183 = arith.constant 0 : index
    %303 = vector.load %arg33[%c1_181, %c0_182, %c0_183] : memref<3x1x32xf32, #tpu.memory_space<vmem>>, vector<1x1x32xf32>
    %304 = vector.shape_cast %303 : vector<1x1x32xf32> to vector<1x32xf32>
    %305 = vector.broadcast %304 : vector<1x32xf32> to vector<64x32xf32>
    %306 = arith.addf %302, %305 : vector<64x32xf32>
    %307 = vector.shape_cast %306 : vector<64x32xf32> to vector<8x8x32xf32>
    %c2_184 = arith.constant 2 : index
    %c0_185 = arith.constant 0 : index
    %c0_186 = arith.constant 0 : index
    %308 = vector.load %arg32[%c2_184, %c0_185, %c0_186] : memref<3x32x32xf32, #tpu.memory_space<vmem>>, vector<1x32x32xf32>
    %309 = vector.shape_cast %308 : vector<1x32x32xf32> to vector<32x32xf32>
    %cst_187 = arith.constant dense<0.000000e+00> : vector<64x32xf32>
    %310 = tpu.matmul %207, %309, %cst_187 {dimension_numbers = #tpu.dot_dimension_numbers<[1], [0], [0], [1], [0, 0, 1, 1], [], []>} : vector<64x32xf32>, vector<32x32xf32>, vector<64x32xf32> -> vector<64x32xf32>
    %c2_188 = arith.constant 2 : index
    %c0_189 = arith.constant 0 : index
    %c0_190 = arith.constant 0 : index
    %311 = vector.load %arg33[%c2_188, %c0_189, %c0_190] : memref<3x1x32xf32, #tpu.memory_space<vmem>>, vector<1x1x32xf32>
    %312 = vector.shape_cast %311 : vector<1x1x32xf32> to vector<1x32xf32>
    %313 = vector.broadcast %312 : vector<1x32xf32> to vector<64x32xf32>
    %314 = arith.addf %310, %313 : vector<64x32xf32>
    %315 = vector.shape_cast %314 : vector<64x32xf32> to vector<8x8x32xf32>
    "tpu.trace_start"() <{level = 10 : i32, message = "gqd,gkd->gqk"}> : () -> ()
    %cst_191 = arith.constant dense<0.000000e+00> : vector<8x8x8xf32>
    %316 = tpu.matmul %299, %307, %cst_191 {dimension_numbers = #tpu.dot_dimension_numbers<[2], [2], [1], [1], [0, 0, 0, 1, 1, 1], [0], [0]>} : vector<8x8x32xf32>, vector<8x8x32xf32>, vector<8x8x8xf32> -> vector<8x8x8xf32>
    "tpu.trace_stop"() : () -> ()
    %cst_192 = arith.constant 0.176776692 : f32
    %317 = vector.broadcast %cst_192 : f32 to vector<8x8x8xf32>
    %318 = arith.mulf %316, %317 : vector<8x8x8xf32>
    %319 = arith.addf %318, %211 : vector<8x8x8xf32>
    %cst_193 = arith.constant dense<0xFF800000> : vector<8x8xf32>
    %320 = vector.multi_reduction <maximumf>, %319, %cst_193 [2] : vector<8x8x8xf32> to vector<8x8xf32>
    %321 = vector.shape_cast %320 : vector<8x8xf32> to vector<8x8x1xf32>
    %322 = vector.broadcast %321 : vector<8x8x1xf32> to vector<8x8x8xf32>
    %323 = arith.subf %319, %322 : vector<8x8x8xf32>
    %324 = math.exp %323 : vector<8x8x8xf32>
    %cst_194 = arith.constant dense<0.000000e+00> : vector<8x8xf32>
    %325 = vector.multi_reduction <add>, %324, %cst_194 [2] : vector<8x8x8xf32> to vector<8x8xf32>
    %326 = vector.shape_cast %325 : vector<8x8xf32> to vector<8x8x1xf32>
    %327 = tpu.reciprocal %326 {approx = true} : vector<8x8x1xf32> -> vector<8x8x1xf32>
    %328 = vector.broadcast %327 : vector<8x8x1xf32> to vector<8x8x8xf32>
    %329 = arith.mulf %324, %328 : vector<8x8x8xf32>
    "tpu.trace_start"() <{level = 10 : i32, message = "gqk,gkd->gqd"}> : () -> ()
    %cst_195 = arith.constant dense<0.000000e+00> : vector<8x8x32xf32>
    %330 = tpu.matmul %329, %315, %cst_195 {dimension_numbers = #tpu.dot_dimension_numbers<[2], [1], [1], [2], [0, 0, 0, 1, 1, 2], [0], [0]>} : vector<8x8x8xf32>, vector<8x8x32xf32>, vector<8x8x32xf32> -> vector<8x8x32xf32>
    "tpu.trace_stop"() : () -> ()
    %331 = vector.shape_cast %330 : vector<8x8x32xf32> to vector<64x32xf32>
    %c0_196 = arith.constant 0 : index
    %c0_197 = arith.constant 0 : index
    %c0_198 = arith.constant 0 : index
    %332 = vector.load %arg34[%c0_196, %c0_197, %c0_198] : memref<3x32x32xf32, #tpu.memory_space<vmem>>, vector<1x32x32xf32>
    %333 = vector.shape_cast %332 : vector<1x32x32xf32> to vector<32x32xf32>
    %cst_199 = arith.constant dense<0.000000e+00> : vector<64x32xf32>
    %334 = tpu.matmul %331, %333, %cst_199 {dimension_numbers = #tpu.dot_dimension_numbers<[1], [0], [0], [1], [0, 0, 1, 1], [], []>} : vector<64x32xf32>, vector<32x32xf32>, vector<64x32xf32> -> vector<64x32xf32>
    %c0_200 = arith.constant 0 : index
    %c0_201 = arith.constant 0 : index
    %c0_202 = arith.constant 0 : index
    %335 = vector.load %arg35[%c0_200, %c0_201, %c0_202] : memref<3x1x32xf32, #tpu.memory_space<vmem>>, vector<1x1x32xf32>
    %336 = vector.shape_cast %335 : vector<1x1x32xf32> to vector<1x32xf32>
    %337 = vector.broadcast %336 : vector<1x32xf32> to vector<64x32xf32>
    %338 = arith.addf %334, %337 : vector<64x32xf32>
    %339 = vector.shape_cast %338 : vector<64x32xf32> to vector<8x8x32xf32>
    %c1_203 = arith.constant 1 : index
    %c0_204 = arith.constant 0 : index
    %c0_205 = arith.constant 0 : index
    %340 = vector.load %arg34[%c1_203, %c0_204, %c0_205] : memref<3x32x32xf32, #tpu.memory_space<vmem>>, vector<1x32x32xf32>
    %341 = vector.shape_cast %340 : vector<1x32x32xf32> to vector<32x32xf32>
    %cst_206 = arith.constant dense<0.000000e+00> : vector<64x32xf32>
    %342 = tpu.matmul %331, %341, %cst_206 {dimension_numbers = #tpu.dot_dimension_numbers<[1], [0], [0], [1], [0, 0, 1, 1], [], []>} : vector<64x32xf32>, vector<32x32xf32>, vector<64x32xf32> -> vector<64x32xf32>
    %c1_207 = arith.constant 1 : index
    %c0_208 = arith.constant 0 : index
    %c0_209 = arith.constant 0 : index
    %343 = vector.load %arg35[%c1_207, %c0_208, %c0_209] : memref<3x1x32xf32, #tpu.memory_space<vmem>>, vector<1x1x32xf32>
    %344 = vector.shape_cast %343 : vector<1x1x32xf32> to vector<1x32xf32>
    %345 = vector.broadcast %344 : vector<1x32xf32> to vector<64x32xf32>
    %346 = arith.addf %342, %345 : vector<64x32xf32>
    %347 = vector.shape_cast %346 : vector<64x32xf32> to vector<8x8x32xf32>
    %c2_210 = arith.constant 2 : index
    %c0_211 = arith.constant 0 : index
    %c0_212 = arith.constant 0 : index
    %348 = vector.load %arg34[%c2_210, %c0_211, %c0_212] : memref<3x32x32xf32, #tpu.memory_space<vmem>>, vector<1x32x32xf32>
    %349 = vector.shape_cast %348 : vector<1x32x32xf32> to vector<32x32xf32>
    %cst_213 = arith.constant dense<0.000000e+00> : vector<64x32xf32>
    %350 = tpu.matmul %331, %349, %cst_213 {dimension_numbers = #tpu.dot_dimension_numbers<[1], [0], [0], [1], [0, 0, 1, 1], [], []>} : vector<64x32xf32>, vector<32x32xf32>, vector<64x32xf32> -> vector<64x32xf32>
    %c2_214 = arith.constant 2 : index
    %c0_215 = arith.constant 0 : index
    %c0_216 = arith.constant 0 : index
    %351 = vector.load %arg35[%c2_214, %c0_215, %c0_216] : memref<3x1x32xf32, #tpu.memory_space<vmem>>, vector<1x1x32xf32>
    %352 = vector.shape_cast %351 : vector<1x1x32xf32> to vector<1x32xf32>
    %353 = vector.broadcast %352 : vector<1x32xf32> to vector<64x32xf32>
    %354 = arith.addf %350, %353 : vector<64x32xf32>
    %355 = vector.shape_cast %354 : vector<64x32xf32> to vector<8x8x32xf32>
    "tpu.trace_start"() <{level = 10 : i32, message = "gqd,gkd->gqk"}> : () -> ()
    %cst_217 = arith.constant dense<0.000000e+00> : vector<8x8x8xf32>
    %356 = tpu.matmul %339, %347, %cst_217 {dimension_numbers = #tpu.dot_dimension_numbers<[2], [2], [1], [1], [0, 0, 0, 1, 1, 1], [0], [0]>} : vector<8x8x32xf32>, vector<8x8x32xf32>, vector<8x8x8xf32> -> vector<8x8x8xf32>
    "tpu.trace_stop"() : () -> ()
    %cst_218 = arith.constant 0.176776692 : f32
    %357 = vector.broadcast %cst_218 : f32 to vector<8x8x8xf32>
    %358 = arith.mulf %356, %357 : vector<8x8x8xf32>
    %359 = arith.addf %358, %211 : vector<8x8x8xf32>
    %cst_219 = arith.constant dense<0xFF800000> : vector<8x8xf32>
    %360 = vector.multi_reduction <maximumf>, %359, %cst_219 [2] : vector<8x8x8xf32> to vector<8x8xf32>
    %361 = vector.shape_cast %360 : vector<8x8xf32> to vector<8x8x1xf32>
    %362 = vector.broadcast %361 : vector<8x8x1xf32> to vector<8x8x8xf32>
    %363 = arith.subf %359, %362 : vector<8x8x8xf32>
    %364 = math.exp %363 : vector<8x8x8xf32>
    %cst_220 = arith.constant dense<0.000000e+00> : vector<8x8xf32>
    %365 = vector.multi_reduction <add>, %364, %cst_220 [2] : vector<8x8x8xf32> to vector<8x8xf32>
    %366 = vector.shape_cast %365 : vector<8x8xf32> to vector<8x8x1xf32>
    %367 = tpu.reciprocal %366 {approx = true} : vector<8x8x1xf32> -> vector<8x8x1xf32>
    %368 = vector.broadcast %367 : vector<8x8x1xf32> to vector<8x8x8xf32>
    %369 = arith.mulf %364, %368 : vector<8x8x8xf32>
    "tpu.trace_start"() <{level = 10 : i32, message = "gqk,gkd->gqd"}> : () -> ()
    %cst_221 = arith.constant dense<0.000000e+00> : vector<8x8x32xf32>
    %370 = tpu.matmul %369, %355, %cst_221 {dimension_numbers = #tpu.dot_dimension_numbers<[2], [1], [1], [2], [0, 0, 0, 1, 1, 2], [0], [0]>} : vector<8x8x8xf32>, vector<8x8x32xf32>, vector<8x8x32xf32> -> vector<8x8x32xf32>
    "tpu.trace_stop"() : () -> ()
    %371 = vector.shape_cast %370 : vector<8x8x32xf32> to vector<64x32xf32>
    %c0_222 = arith.constant 0 : index
    %c0_223 = arith.constant 0 : index
    %372 = vector.load %arg15[%c0_222, %c0_223] : memref<32x32xf32, #tpu.memory_space<vmem>>, vector<32x32xf32>
    %cst_224 = arith.constant dense<0.000000e+00> : vector<64x32xf32>
    %373 = tpu.matmul %291, %372, %cst_224 {dimension_numbers = #tpu.dot_dimension_numbers<[1], [0], [0], [1], [0, 0, 1, 1], [], []>} : vector<64x32xf32>, vector<32x32xf32>, vector<64x32xf32> -> vector<64x32xf32>
    %c0_225 = arith.constant 0 : index
    %c0_226 = arith.constant 0 : index
    %c0_227 = arith.constant 0 : index
    %374 = vector.load %arg16[%c0_225, %c0_226, %c0_227] : memref<3x1x32xf32, #tpu.memory_space<vmem>>, vector<1x1x32xf32>
    %375 = vector.shape_cast %374 : vector<1x1x32xf32> to vector<1x32xf32>
    %376 = vector.broadcast %375 : vector<1x32xf32> to vector<64x32xf32>
    %377 = arith.addf %373, %376 : vector<64x32xf32>
    %cst_228 = arith.constant dense<0.000000e+00> : vector<64xf32>
    %378 = vector.multi_reduction <add>, %377, %cst_228 [1] : vector<64x32xf32> to vector<64xf32>
    %379 = vector.shape_cast %378 : vector<64xf32> to vector<64x1xf32>
    %cst_229 = arith.constant 3.200000e+01 : f32
    %380 = vector.broadcast %cst_229 : f32 to vector<64x1xf32>
    %381 = arith.divf %379, %380 : vector<64x1xf32>
    %382 = vector.broadcast %381 : vector<64x1xf32> to vector<64x32xf32>
    %383 = arith.subf %377, %382 : vector<64x32xf32>
    %384 = arith.mulf %383, %383 : vector<64x32xf32>
    %cst_230 = arith.constant dense<0.000000e+00> : vector<64xf32>
    %385 = vector.multi_reduction <add>, %384, %cst_230 [1] : vector<64x32xf32> to vector<64xf32>
    %386 = vector.shape_cast %385 : vector<64xf32> to vector<64x1xf32>
    %cst_231 = arith.constant 3.200000e+01 : f32
    %387 = vector.broadcast %cst_231 : f32 to vector<64x1xf32>
    %388 = arith.divf %386, %387 : vector<64x1xf32>
    %389 = vector.broadcast %381 : vector<64x1xf32> to vector<64x32xf32>
    %390 = arith.subf %377, %389 : vector<64x32xf32>
    %cst_232 = arith.constant 9.99999974E-6 : f32
    %391 = vector.broadcast %cst_232 : f32 to vector<64x1xf32>
    %392 = arith.addf %388, %391 : vector<64x1xf32>
    %393 = math.rsqrt %392 : vector<64x1xf32>
    %394 = vector.broadcast %393 : vector<64x1xf32> to vector<64x32xf32>
    %395 = arith.mulf %390, %394 : vector<64x32xf32>
    %c1_233 = arith.constant 1 : index
    %c0_234 = arith.constant 0 : index
    %c0_235 = arith.constant 0 : index
    %396 = vector.load %arg16[%c1_233, %c0_234, %c0_235] : memref<3x1x32xf32, #tpu.memory_space<vmem>>, vector<1x1x32xf32>
    %397 = vector.shape_cast %396 : vector<1x1x32xf32> to vector<1x32xf32>
    %398 = vector.broadcast %397 : vector<1x32xf32> to vector<64x32xf32>
    %399 = arith.mulf %395, %398 : vector<64x32xf32>
    %c2_236 = arith.constant 2 : index
    %c0_237 = arith.constant 0 : index
    %c0_238 = arith.constant 0 : index
    %400 = vector.load %arg16[%c2_236, %c0_237, %c0_238] : memref<3x1x32xf32, #tpu.memory_space<vmem>>, vector<1x1x32xf32>
    %401 = vector.shape_cast %400 : vector<1x1x32xf32> to vector<1x32xf32>
    %402 = vector.broadcast %401 : vector<1x32xf32> to vector<64x32xf32>
    %403 = arith.addf %399, %402 : vector<64x32xf32>
    %cst_239 = arith.constant 0.000000e+00 : f32
    %404 = vector.broadcast %cst_239 : f32 to vector<64x32xf32>
    %405 = arith.maximumf %403, %404 : vector<64x32xf32>
    %c0_240 = arith.constant 0 : index
    %c0_241 = arith.constant 0 : index
    %406 = vector.load %arg15[%c0_240, %c0_241] : memref<32x32xf32, #tpu.memory_space<vmem>>, vector<32x32xf32>
    %cst_242 = arith.constant dense<0.000000e+00> : vector<64x32xf32>
    %407 = tpu.matmul %371, %406, %cst_242 {dimension_numbers = #tpu.dot_dimension_numbers<[1], [0], [0], [1], [0, 0, 1, 1], [], []>} : vector<64x32xf32>, vector<32x32xf32>, vector<64x32xf32> -> vector<64x32xf32>
    %c0_243 = arith.constant 0 : index
    %c0_244 = arith.constant 0 : index
    %c0_245 = arith.constant 0 : index
    %408 = vector.load %arg16[%c0_243, %c0_244, %c0_245] : memref<3x1x32xf32, #tpu.memory_space<vmem>>, vector<1x1x32xf32>
    %409 = vector.shape_cast %408 : vector<1x1x32xf32> to vector<1x32xf32>
    %410 = vector.broadcast %409 : vector<1x32xf32> to vector<64x32xf32>
    %411 = arith.addf %407, %410 : vector<64x32xf32>
    %cst_246 = arith.constant dense<0.000000e+00> : vector<64xf32>
    %412 = vector.multi_reduction <add>, %411, %cst_246 [1] : vector<64x32xf32> to vector<64xf32>
    %413 = vector.shape_cast %412 : vector<64xf32> to vector<64x1xf32>
    %cst_247 = arith.constant 3.200000e+01 : f32
    %414 = vector.broadcast %cst_247 : f32 to vector<64x1xf32>
    %415 = arith.divf %413, %414 : vector<64x1xf32>
    %416 = vector.broadcast %415 : vector<64x1xf32> to vector<64x32xf32>
    %417 = arith.subf %411, %416 : vector<64x32xf32>
    %418 = arith.mulf %417, %417 : vector<64x32xf32>
    %cst_248 = arith.constant dense<0.000000e+00> : vector<64xf32>
    %419 = vector.multi_reduction <add>, %418, %cst_248 [1] : vector<64x32xf32> to vector<64xf32>
    %420 = vector.shape_cast %419 : vector<64xf32> to vector<64x1xf32>
    %cst_249 = arith.constant 3.200000e+01 : f32
    %421 = vector.broadcast %cst_249 : f32 to vector<64x1xf32>
    %422 = arith.divf %420, %421 : vector<64x1xf32>
    %423 = vector.broadcast %415 : vector<64x1xf32> to vector<64x32xf32>
    %424 = arith.subf %411, %423 : vector<64x32xf32>
    %cst_250 = arith.constant 9.99999974E-6 : f32
    %425 = vector.broadcast %cst_250 : f32 to vector<64x1xf32>
    %426 = arith.addf %422, %425 : vector<64x1xf32>
    %427 = math.rsqrt %426 : vector<64x1xf32>
    %428 = vector.broadcast %427 : vector<64x1xf32> to vector<64x32xf32>
    %429 = arith.mulf %424, %428 : vector<64x32xf32>
    %c1_251 = arith.constant 1 : index
    %c0_252 = arith.constant 0 : index
    %c0_253 = arith.constant 0 : index
    %430 = vector.load %arg16[%c1_251, %c0_252, %c0_253] : memref<3x1x32xf32, #tpu.memory_space<vmem>>, vector<1x1x32xf32>
    %431 = vector.shape_cast %430 : vector<1x1x32xf32> to vector<1x32xf32>
    %432 = vector.broadcast %431 : vector<1x32xf32> to vector<64x32xf32>
    %433 = arith.mulf %429, %432 : vector<64x32xf32>
    %c2_254 = arith.constant 2 : index
    %c0_255 = arith.constant 0 : index
    %c0_256 = arith.constant 0 : index
    %434 = vector.load %arg16[%c2_254, %c0_255, %c0_256] : memref<3x1x32xf32, #tpu.memory_space<vmem>>, vector<1x1x32xf32>
    %435 = vector.shape_cast %434 : vector<1x1x32xf32> to vector<1x32xf32>
    %436 = vector.broadcast %435 : vector<1x32xf32> to vector<64x32xf32>
    %437 = arith.addf %433, %436 : vector<64x32xf32>
    %cst_257 = arith.constant 0.000000e+00 : f32
    %438 = vector.broadcast %cst_257 : f32 to vector<64x32xf32>
    %439 = arith.maximumf %437, %438 : vector<64x32xf32>
    %c0_258 = arith.constant 0 : index
    %c0_259 = arith.constant 0 : index
    %440 = vector.load %arg17[%c0_258, %c0_259] : memref<32x32xf32, #tpu.memory_space<vmem>>, vector<32x32xf32>
    %cst_260 = arith.constant dense<0.000000e+00> : vector<64x32xf32>
    %441 = tpu.matmul %405, %440, %cst_260 {dimension_numbers = #tpu.dot_dimension_numbers<[1], [0], [0], [1], [0, 0, 1, 1], [], []>} : vector<64x32xf32>, vector<32x32xf32>, vector<64x32xf32> -> vector<64x32xf32>
    %c0_261 = arith.constant 0 : index
    %c0_262 = arith.constant 0 : index
    %c0_263 = arith.constant 0 : index
    %442 = vector.load %arg18[%c0_261, %c0_262, %c0_263] : memref<3x1x32xf32, #tpu.memory_space<vmem>>, vector<1x1x32xf32>
    %443 = vector.shape_cast %442 : vector<1x1x32xf32> to vector<1x32xf32>
    %444 = vector.broadcast %443 : vector<1x32xf32> to vector<64x32xf32>
    %445 = arith.addf %441, %444 : vector<64x32xf32>
    %cst_264 = arith.constant dense<0.000000e+00> : vector<64xf32>
    %446 = vector.multi_reduction <add>, %445, %cst_264 [1] : vector<64x32xf32> to vector<64xf32>
    %447 = vector.shape_cast %446 : vector<64xf32> to vector<64x1xf32>
    %cst_265 = arith.constant 3.200000e+01 : f32
    %448 = vector.broadcast %cst_265 : f32 to vector<64x1xf32>
    %449 = arith.divf %447, %448 : vector<64x1xf32>
    %450 = vector.broadcast %449 : vector<64x1xf32> to vector<64x32xf32>
    %451 = arith.subf %445, %450 : vector<64x32xf32>
    %452 = arith.mulf %451, %451 : vector<64x32xf32>
    %cst_266 = arith.constant dense<0.000000e+00> : vector<64xf32>
    %453 = vector.multi_reduction <add>, %452, %cst_266 [1] : vector<64x32xf32> to vector<64xf32>
    %454 = vector.shape_cast %453 : vector<64xf32> to vector<64x1xf32>
    %cst_267 = arith.constant 3.200000e+01 : f32
    %455 = vector.broadcast %cst_267 : f32 to vector<64x1xf32>
    %456 = arith.divf %454, %455 : vector<64x1xf32>
    %457 = vector.broadcast %449 : vector<64x1xf32> to vector<64x32xf32>
    %458 = arith.subf %445, %457 : vector<64x32xf32>
    %cst_268 = arith.constant 9.99999974E-6 : f32
    %459 = vector.broadcast %cst_268 : f32 to vector<64x1xf32>
    %460 = arith.addf %456, %459 : vector<64x1xf32>
    %461 = math.rsqrt %460 : vector<64x1xf32>
    %462 = vector.broadcast %461 : vector<64x1xf32> to vector<64x32xf32>
    %463 = arith.mulf %458, %462 : vector<64x32xf32>
    %c1_269 = arith.constant 1 : index
    %c0_270 = arith.constant 0 : index
    %c0_271 = arith.constant 0 : index
    %464 = vector.load %arg18[%c1_269, %c0_270, %c0_271] : memref<3x1x32xf32, #tpu.memory_space<vmem>>, vector<1x1x32xf32>
    %465 = vector.shape_cast %464 : vector<1x1x32xf32> to vector<1x32xf32>
    %466 = vector.broadcast %465 : vector<1x32xf32> to vector<64x32xf32>
    %467 = arith.mulf %463, %466 : vector<64x32xf32>
    %c2_272 = arith.constant 2 : index
    %c0_273 = arith.constant 0 : index
    %c0_274 = arith.constant 0 : index
    %468 = vector.load %arg18[%c2_272, %c0_273, %c0_274] : memref<3x1x32xf32, #tpu.memory_space<vmem>>, vector<1x1x32xf32>
    %469 = vector.shape_cast %468 : vector<1x1x32xf32> to vector<1x32xf32>
    %470 = vector.broadcast %469 : vector<1x32xf32> to vector<64x32xf32>
    %471 = arith.addf %467, %470 : vector<64x32xf32>
    %cst_275 = arith.constant 0.000000e+00 : f32
    %472 = vector.broadcast %cst_275 : f32 to vector<64x32xf32>
    %473 = arith.maximumf %471, %472 : vector<64x32xf32>
    %c0_276 = arith.constant 0 : index
    %c0_277 = arith.constant 0 : index
    %474 = vector.load %arg17[%c0_276, %c0_277] : memref<32x32xf32, #tpu.memory_space<vmem>>, vector<32x32xf32>
    %cst_278 = arith.constant dense<0.000000e+00> : vector<64x32xf32>
    %475 = tpu.matmul %439, %474, %cst_278 {dimension_numbers = #tpu.dot_dimension_numbers<[1], [0], [0], [1], [0, 0, 1, 1], [], []>} : vector<64x32xf32>, vector<32x32xf32>, vector<64x32xf32> -> vector<64x32xf32>
    %c0_279 = arith.constant 0 : index
    %c0_280 = arith.constant 0 : index
    %c0_281 = arith.constant 0 : index
    %476 = vector.load %arg18[%c0_279, %c0_280, %c0_281] : memref<3x1x32xf32, #tpu.memory_space<vmem>>, vector<1x1x32xf32>
    %477 = vector.shape_cast %476 : vector<1x1x32xf32> to vector<1x32xf32>
    %478 = vector.broadcast %477 : vector<1x32xf32> to vector<64x32xf32>
    %479 = arith.addf %475, %478 : vector<64x32xf32>
    %cst_282 = arith.constant dense<0.000000e+00> : vector<64xf32>
    %480 = vector.multi_reduction <add>, %479, %cst_282 [1] : vector<64x32xf32> to vector<64xf32>
    %481 = vector.shape_cast %480 : vector<64xf32> to vector<64x1xf32>
    %cst_283 = arith.constant 3.200000e+01 : f32
    %482 = vector.broadcast %cst_283 : f32 to vector<64x1xf32>
    %483 = arith.divf %481, %482 : vector<64x1xf32>
    %484 = vector.broadcast %483 : vector<64x1xf32> to vector<64x32xf32>
    %485 = arith.subf %479, %484 : vector<64x32xf32>
    %486 = arith.mulf %485, %485 : vector<64x32xf32>
    %cst_284 = arith.constant dense<0.000000e+00> : vector<64xf32>
    %487 = vector.multi_reduction <add>, %486, %cst_284 [1] : vector<64x32xf32> to vector<64xf32>
    %488 = vector.shape_cast %487 : vector<64xf32> to vector<64x1xf32>
    %cst_285 = arith.constant 3.200000e+01 : f32
    %489 = vector.broadcast %cst_285 : f32 to vector<64x1xf32>
    %490 = arith.divf %488, %489 : vector<64x1xf32>
    %491 = vector.broadcast %483 : vector<64x1xf32> to vector<64x32xf32>
    %492 = arith.subf %479, %491 : vector<64x32xf32>
    %cst_286 = arith.constant 9.99999974E-6 : f32
    %493 = vector.broadcast %cst_286 : f32 to vector<64x1xf32>
    %494 = arith.addf %490, %493 : vector<64x1xf32>
    %495 = math.rsqrt %494 : vector<64x1xf32>
    %496 = vector.broadcast %495 : vector<64x1xf32> to vector<64x32xf32>
    %497 = arith.mulf %492, %496 : vector<64x32xf32>
    %c1_287 = arith.constant 1 : index
    %c0_288 = arith.constant 0 : index
    %c0_289 = arith.constant 0 : index
    %498 = vector.load %arg18[%c1_287, %c0_288, %c0_289] : memref<3x1x32xf32, #tpu.memory_space<vmem>>, vector<1x1x32xf32>
    %499 = vector.shape_cast %498 : vector<1x1x32xf32> to vector<1x32xf32>
    %500 = vector.broadcast %499 : vector<1x32xf32> to vector<64x32xf32>
    %501 = arith.mulf %497, %500 : vector<64x32xf32>
    %c2_290 = arith.constant 2 : index
    %c0_291 = arith.constant 0 : index
    %c0_292 = arith.constant 0 : index
    %502 = vector.load %arg18[%c2_290, %c0_291, %c0_292] : memref<3x1x32xf32, #tpu.memory_space<vmem>>, vector<1x1x32xf32>
    %503 = vector.shape_cast %502 : vector<1x1x32xf32> to vector<1x32xf32>
    %504 = vector.broadcast %503 : vector<1x32xf32> to vector<64x32xf32>
    %505 = arith.addf %501, %504 : vector<64x32xf32>
    %cst_293 = arith.constant 0.000000e+00 : f32
    %506 = vector.broadcast %cst_293 : f32 to vector<64x32xf32>
    %507 = arith.maximumf %505, %506 : vector<64x32xf32>
    %c0_294 = arith.constant 0 : index
    %c0_295 = arith.constant 0 : index
    %508 = vector.load %arg19[%c0_294, %c0_295] : memref<32x32xf32, #tpu.memory_space<vmem>>, vector<32x32xf32>
    %cst_296 = arith.constant dense<0.000000e+00> : vector<64x32xf32>
    %509 = tpu.matmul %473, %508, %cst_296 {dimension_numbers = #tpu.dot_dimension_numbers<[1], [0], [0], [1], [0, 0, 1, 1], [], []>} : vector<64x32xf32>, vector<32x32xf32>, vector<64x32xf32> -> vector<64x32xf32>
    %c0_297 = arith.constant 0 : index
    %c0_298 = arith.constant 0 : index
    %c0_299 = arith.constant 0 : index
    %510 = vector.load %arg20[%c0_297, %c0_298, %c0_299] : memref<3x1x32xf32, #tpu.memory_space<vmem>>, vector<1x1x32xf32>
    %511 = vector.shape_cast %510 : vector<1x1x32xf32> to vector<1x32xf32>
    %512 = vector.broadcast %511 : vector<1x32xf32> to vector<64x32xf32>
    %513 = arith.addf %509, %512 : vector<64x32xf32>
    %cst_300 = arith.constant dense<0.000000e+00> : vector<64xf32>
    %514 = vector.multi_reduction <add>, %513, %cst_300 [1] : vector<64x32xf32> to vector<64xf32>
    %515 = vector.shape_cast %514 : vector<64xf32> to vector<64x1xf32>
    %cst_301 = arith.constant 3.200000e+01 : f32
    %516 = vector.broadcast %cst_301 : f32 to vector<64x1xf32>
    %517 = arith.divf %515, %516 : vector<64x1xf32>
    %518 = vector.broadcast %517 : vector<64x1xf32> to vector<64x32xf32>
    %519 = arith.subf %513, %518 : vector<64x32xf32>
    %520 = arith.mulf %519, %519 : vector<64x32xf32>
    %cst_302 = arith.constant dense<0.000000e+00> : vector<64xf32>
    %521 = vector.multi_reduction <add>, %520, %cst_302 [1] : vector<64x32xf32> to vector<64xf32>
    %522 = vector.shape_cast %521 : vector<64xf32> to vector<64x1xf32>
    %cst_303 = arith.constant 3.200000e+01 : f32
    %523 = vector.broadcast %cst_303 : f32 to vector<64x1xf32>
    %524 = arith.divf %522, %523 : vector<64x1xf32>
    %525 = vector.broadcast %517 : vector<64x1xf32> to vector<64x32xf32>
    %526 = arith.subf %513, %525 : vector<64x32xf32>
    %cst_304 = arith.constant 9.99999974E-6 : f32
    %527 = vector.broadcast %cst_304 : f32 to vector<64x1xf32>
    %528 = arith.addf %524, %527 : vector<64x1xf32>
    %529 = math.rsqrt %528 : vector<64x1xf32>
    %530 = vector.broadcast %529 : vector<64x1xf32> to vector<64x32xf32>
    %531 = arith.mulf %526, %530 : vector<64x32xf32>
    %c1_305 = arith.constant 1 : index
    %c0_306 = arith.constant 0 : index
    %c0_307 = arith.constant 0 : index
    %532 = vector.load %arg20[%c1_305, %c0_306, %c0_307] : memref<3x1x32xf32, #tpu.memory_space<vmem>>, vector<1x1x32xf32>
    %533 = vector.shape_cast %532 : vector<1x1x32xf32> to vector<1x32xf32>
    %534 = vector.broadcast %533 : vector<1x32xf32> to vector<64x32xf32>
    %535 = arith.mulf %531, %534 : vector<64x32xf32>
    %c2_308 = arith.constant 2 : index
    %c0_309 = arith.constant 0 : index
    %c0_310 = arith.constant 0 : index
    %536 = vector.load %arg20[%c2_308, %c0_309, %c0_310] : memref<3x1x32xf32, #tpu.memory_space<vmem>>, vector<1x1x32xf32>
    %537 = vector.shape_cast %536 : vector<1x1x32xf32> to vector<1x32xf32>
    %538 = vector.broadcast %537 : vector<1x32xf32> to vector<64x32xf32>
    %539 = arith.addf %535, %538 : vector<64x32xf32>
    %cst_311 = arith.constant 0.000000e+00 : f32
    %540 = vector.broadcast %cst_311 : f32 to vector<64x32xf32>
    %541 = arith.maximumf %539, %540 : vector<64x32xf32>
    %c0_312 = arith.constant 0 : index
    %c0_313 = arith.constant 0 : index
    %542 = vector.load %arg19[%c0_312, %c0_313] : memref<32x32xf32, #tpu.memory_space<vmem>>, vector<32x32xf32>
    %cst_314 = arith.constant dense<0.000000e+00> : vector<64x32xf32>
    %543 = tpu.matmul %507, %542, %cst_314 {dimension_numbers = #tpu.dot_dimension_numbers<[1], [0], [0], [1], [0, 0, 1, 1], [], []>} : vector<64x32xf32>, vector<32x32xf32>, vector<64x32xf32> -> vector<64x32xf32>
    %c0_315 = arith.constant 0 : index
    %c0_316 = arith.constant 0 : index
    %c0_317 = arith.constant 0 : index
    %544 = vector.load %arg20[%c0_315, %c0_316, %c0_317] : memref<3x1x32xf32, #tpu.memory_space<vmem>>, vector<1x1x32xf32>
    %545 = vector.shape_cast %544 : vector<1x1x32xf32> to vector<1x32xf32>
    %546 = vector.broadcast %545 : vector<1x32xf32> to vector<64x32xf32>
    %547 = arith.addf %543, %546 : vector<64x32xf32>
    %cst_318 = arith.constant dense<0.000000e+00> : vector<64xf32>
    %548 = vector.multi_reduction <add>, %547, %cst_318 [1] : vector<64x32xf32> to vector<64xf32>
    %549 = vector.shape_cast %548 : vector<64xf32> to vector<64x1xf32>
    %cst_319 = arith.constant 3.200000e+01 : f32
    %550 = vector.broadcast %cst_319 : f32 to vector<64x1xf32>
    %551 = arith.divf %549, %550 : vector<64x1xf32>
    %552 = vector.broadcast %551 : vector<64x1xf32> to vector<64x32xf32>
    %553 = arith.subf %547, %552 : vector<64x32xf32>
    %554 = arith.mulf %553, %553 : vector<64x32xf32>
    %cst_320 = arith.constant dense<0.000000e+00> : vector<64xf32>
    %555 = vector.multi_reduction <add>, %554, %cst_320 [1] : vector<64x32xf32> to vector<64xf32>
    %556 = vector.shape_cast %555 : vector<64xf32> to vector<64x1xf32>
    %cst_321 = arith.constant 3.200000e+01 : f32
    %557 = vector.broadcast %cst_321 : f32 to vector<64x1xf32>
    %558 = arith.divf %556, %557 : vector<64x1xf32>
    %559 = vector.broadcast %551 : vector<64x1xf32> to vector<64x32xf32>
    %560 = arith.subf %547, %559 : vector<64x32xf32>
    %cst_322 = arith.constant 9.99999974E-6 : f32
    %561 = vector.broadcast %cst_322 : f32 to vector<64x1xf32>
    %562 = arith.addf %558, %561 : vector<64x1xf32>
    %563 = math.rsqrt %562 : vector<64x1xf32>
    %564 = vector.broadcast %563 : vector<64x1xf32> to vector<64x32xf32>
    %565 = arith.mulf %560, %564 : vector<64x32xf32>
    %c1_323 = arith.constant 1 : index
    %c0_324 = arith.constant 0 : index
    %c0_325 = arith.constant 0 : index
    %566 = vector.load %arg20[%c1_323, %c0_324, %c0_325] : memref<3x1x32xf32, #tpu.memory_space<vmem>>, vector<1x1x32xf32>
    %567 = vector.shape_cast %566 : vector<1x1x32xf32> to vector<1x32xf32>
    %568 = vector.broadcast %567 : vector<1x32xf32> to vector<64x32xf32>
    %569 = arith.mulf %565, %568 : vector<64x32xf32>
    %c2_326 = arith.constant 2 : index
    %c0_327 = arith.constant 0 : index
    %c0_328 = arith.constant 0 : index
    %570 = vector.load %arg20[%c2_326, %c0_327, %c0_328] : memref<3x1x32xf32, #tpu.memory_space<vmem>>, vector<1x1x32xf32>
    %571 = vector.shape_cast %570 : vector<1x1x32xf32> to vector<1x32xf32>
    %572 = vector.broadcast %571 : vector<1x32xf32> to vector<64x32xf32>
    %573 = arith.addf %569, %572 : vector<64x32xf32>
    %cst_329 = arith.constant 0.000000e+00 : f32
    %574 = vector.broadcast %cst_329 : f32 to vector<64x32xf32>
    %575 = arith.maximumf %573, %574 : vector<64x32xf32>
    %c0_330 = arith.constant 0 : index
    %c0_331 = arith.constant 0 : index
    %c0_332 = arith.constant 0 : index
    %576 = vector.load %arg5[%c0_330, %c0_331, %c0_332] : memref<1x64x1xf32, #tpu.memory_space<vmem>>, vector<1x64x1xf32>
    %577 = vector.shape_cast %576 : vector<1x64x1xf32> to vector<64x1xf32>
    %578 = vector.broadcast %577 : vector<64x1xf32> to vector<64x32xf32>
    %579 = arith.mulf %541, %578 : vector<64x32xf32>
    %c0_333 = arith.constant 0 : index
    %c0_334 = arith.constant 0 : index
    %c0_335 = arith.constant 0 : index
    %580 = vector.load %arg6[%c0_333, %c0_334, %c0_335] : memref<1x64x1xf32, #tpu.memory_space<vmem>>, vector<1x64x1xf32>
    %581 = vector.shape_cast %580 : vector<1x64x1xf32> to vector<64x1xf32>
    %582 = vector.broadcast %581 : vector<64x1xf32> to vector<64x32xf32>
    %583 = arith.mulf %575, %582 : vector<64x32xf32>
    %584 = vector.extract_strided_slice %579 {offsets = [0, 0], sizes = [8, 32], strides = [1, 1]} : vector<64x32xf32> to vector<8x32xf32>
    %cst_336 = arith.constant dense<0xFF800000> : vector<32xf32>
    %585 = vector.multi_reduction <maximumf>, %584, %cst_336 [0] : vector<8x32xf32> to vector<32xf32>
    %586 = vector.shape_cast %585 : vector<32xf32> to vector<1x32xf32>
    %c0_337 = arith.constant 0 : index
    %c0_338 = arith.constant 0 : index
    %587 = vector.load %arg45[%c0_337, %c0_338] : memref<8x32xf32, #tpu.memory_space<vmem>>, vector<1x32xf32>
    tpu.vector_store %arg45[%c0_337, %c0_338], %586 {strides = array<i32>} : memref<8x32xf32, #tpu.memory_space<vmem>>, vector<1x32xf32>,
    %588 = vector.extract_strided_slice %579 {offsets = [8, 0], sizes = [8, 32], strides = [1, 1]} : vector<64x32xf32> to vector<8x32xf32>
    %cst_339 = arith.constant dense<0xFF800000> : vector<32xf32>
    %589 = vector.multi_reduction <maximumf>, %588, %cst_339 [0] : vector<8x32xf32> to vector<32xf32>
    %590 = vector.shape_cast %589 : vector<32xf32> to vector<1x32xf32>
    %c1_340 = arith.constant 1 : index
    %c0_341 = arith.constant 0 : index
    %591 = vector.load %arg45[%c1_340, %c0_341] : memref<8x32xf32, #tpu.memory_space<vmem>>, vector<1x32xf32>
    tpu.vector_store %arg45[%c1_340, %c0_341], %590 {strides = array<i32>} : memref<8x32xf32, #tpu.memory_space<vmem>>, vector<1x32xf32>,
    %592 = vector.extract_strided_slice %579 {offsets = [16, 0], sizes = [8, 32], strides = [1, 1]} : vector<64x32xf32> to vector<8x32xf32>
    %cst_342 = arith.constant dense<0xFF800000> : vector<32xf32>
    %593 = vector.multi_reduction <maximumf>, %592, %cst_342 [0] : vector<8x32xf32> to vector<32xf32>
    %594 = vector.shape_cast %593 : vector<32xf32> to vector<1x32xf32>
    %c2_343 = arith.constant 2 : index
    %c0_344 = arith.constant 0 : index
    %595 = vector.load %arg45[%c2_343, %c0_344] : memref<8x32xf32, #tpu.memory_space<vmem>>, vector<1x32xf32>
    tpu.vector_store %arg45[%c2_343, %c0_344], %594 {strides = array<i32>} : memref<8x32xf32, #tpu.memory_space<vmem>>, vector<1x32xf32>,
    %596 = vector.extract_strided_slice %579 {offsets = [24, 0], sizes = [8, 32], strides = [1, 1]} : vector<64x32xf32> to vector<8x32xf32>
    %cst_345 = arith.constant dense<0xFF800000> : vector<32xf32>
    %597 = vector.multi_reduction <maximumf>, %596, %cst_345 [0] : vector<8x32xf32> to vector<32xf32>
    %598 = vector.shape_cast %597 : vector<32xf32> to vector<1x32xf32>
    %c3 = arith.constant 3 : index
    %c0_346 = arith.constant 0 : index
    %599 = vector.load %arg45[%c3, %c0_346] : memref<8x32xf32, #tpu.memory_space<vmem>>, vector<1x32xf32>
    tpu.vector_store %arg45[%c3, %c0_346], %598 {strides = array<i32>} : memref<8x32xf32, #tpu.memory_space<vmem>>, vector<1x32xf32>,
    %600 = vector.extract_strided_slice %579 {offsets = [32, 0], sizes = [8, 32], strides = [1, 1]} : vector<64x32xf32> to vector<8x32xf32>
    %cst_347 = arith.constant dense<0xFF800000> : vector<32xf32>
    %601 = vector.multi_reduction <maximumf>, %600, %cst_347 [0] : vector<8x32xf32> to vector<32xf32>
    %602 = vector.shape_cast %601 : vector<32xf32> to vector<1x32xf32>
    %c4 = arith.constant 4 : index
    %c0_348 = arith.constant 0 : index
    %603 = vector.load %arg45[%c4, %c0_348] : memref<8x32xf32, #tpu.memory_space<vmem>>, vector<1x32xf32>
    tpu.vector_store %arg45[%c4, %c0_348], %602 {strides = array<i32>} : memref<8x32xf32, #tpu.memory_space<vmem>>, vector<1x32xf32>,
    %604 = vector.extract_strided_slice %579 {offsets = [40, 0], sizes = [8, 32], strides = [1, 1]} : vector<64x32xf32> to vector<8x32xf32>
    %cst_349 = arith.constant dense<0xFF800000> : vector<32xf32>
    %605 = vector.multi_reduction <maximumf>, %604, %cst_349 [0] : vector<8x32xf32> to vector<32xf32>
    %606 = vector.shape_cast %605 : vector<32xf32> to vector<1x32xf32>
    %c5 = arith.constant 5 : index
    %c0_350 = arith.constant 0 : index
    %607 = vector.load %arg45[%c5, %c0_350] : memref<8x32xf32, #tpu.memory_space<vmem>>, vector<1x32xf32>
    tpu.vector_store %arg45[%c5, %c0_350], %606 {strides = array<i32>} : memref<8x32xf32, #tpu.memory_space<vmem>>, vector<1x32xf32>,
    %608 = vector.extract_strided_slice %579 {offsets = [48, 0], sizes = [8, 32], strides = [1, 1]} : vector<64x32xf32> to vector<8x32xf32>
    %cst_351 = arith.constant dense<0xFF800000> : vector<32xf32>
    %609 = vector.multi_reduction <maximumf>, %608, %cst_351 [0] : vector<8x32xf32> to vector<32xf32>
    %610 = vector.shape_cast %609 : vector<32xf32> to vector<1x32xf32>
    %c6 = arith.constant 6 : index
    %c0_352 = arith.constant 0 : index
    %611 = vector.load %arg45[%c6, %c0_352] : memref<8x32xf32, #tpu.memory_space<vmem>>, vector<1x32xf32>
    tpu.vector_store %arg45[%c6, %c0_352], %610 {strides = array<i32>} : memref<8x32xf32, #tpu.memory_space<vmem>>, vector<1x32xf32>,
    %612 = vector.extract_strided_slice %579 {offsets = [56, 0], sizes = [8, 32], strides = [1, 1]} : vector<64x32xf32> to vector<8x32xf32>
    %cst_353 = arith.constant dense<0xFF800000> : vector<32xf32>
    %613 = vector.multi_reduction <maximumf>, %612, %cst_353 [0] : vector<8x32xf32> to vector<32xf32>
    %614 = vector.shape_cast %613 : vector<32xf32> to vector<1x32xf32>
    %c7 = arith.constant 7 : index
    %c0_354 = arith.constant 0 : index
    %615 = vector.load %arg45[%c7, %c0_354] : memref<8x32xf32, #tpu.memory_space<vmem>>, vector<1x32xf32>
    tpu.vector_store %arg45[%c7, %c0_354], %614 {strides = array<i32>} : memref<8x32xf32, #tpu.memory_space<vmem>>, vector<1x32xf32>,
    %616 = vector.extract_strided_slice %583 {offsets = [0, 0], sizes = [8, 32], strides = [1, 1]} : vector<64x32xf32> to vector<8x32xf32>
    %cst_355 = arith.constant dense<0xFF800000> : vector<32xf32>
    %617 = vector.multi_reduction <maximumf>, %616, %cst_355 [0] : vector<8x32xf32> to vector<32xf32>
    %618 = vector.shape_cast %617 : vector<32xf32> to vector<1x32xf32>
    %c0_356 = arith.constant 0 : index
    %c0_357 = arith.constant 0 : index
    %619 = vector.load %arg46[%c0_356, %c0_357] : memref<8x32xf32, #tpu.memory_space<vmem>>, vector<1x32xf32>
    tpu.vector_store %arg46[%c0_356, %c0_357], %618 {strides = array<i32>} : memref<8x32xf32, #tpu.memory_space<vmem>>, vector<1x32xf32>,
    %620 = vector.extract_strided_slice %583 {offsets = [8, 0], sizes = [8, 32], strides = [1, 1]} : vector<64x32xf32> to vector<8x32xf32>
    %cst_358 = arith.constant dense<0xFF800000> : vector<32xf32>
    %621 = vector.multi_reduction <maximumf>, %620, %cst_358 [0] : vector<8x32xf32> to vector<32xf32>
    %622 = vector.shape_cast %621 : vector<32xf32> to vector<1x32xf32>
    %c1_359 = arith.constant 1 : index
    %c0_360 = arith.constant 0 : index
    %623 = vector.load %arg46[%c1_359, %c0_360] : memref<8x32xf32, #tpu.memory_space<vmem>>, vector<1x32xf32>
    tpu.vector_store %arg46[%c1_359, %c0_360], %622 {strides = array<i32>} : memref<8x32xf32, #tpu.memory_space<vmem>>, vector<1x32xf32>,
    %624 = vector.extract_strided_slice %583 {offsets = [16, 0], sizes = [8, 32], strides = [1, 1]} : vector<64x32xf32> to vector<8x32xf32>
    %cst_361 = arith.constant dense<0xFF800000> : vector<32xf32>
    %625 = vector.multi_reduction <maximumf>, %624, %cst_361 [0] : vector<8x32xf32> to vector<32xf32>
    %626 = vector.shape_cast %625 : vector<32xf32> to vector<1x32xf32>
    %c2_362 = arith.constant 2 : index
    %c0_363 = arith.constant 0 : index
    %627 = vector.load %arg46[%c2_362, %c0_363] : memref<8x32xf32, #tpu.memory_space<vmem>>, vector<1x32xf32>
    tpu.vector_store %arg46[%c2_362, %c0_363], %626 {strides = array<i32>} : memref<8x32xf32, #tpu.memory_space<vmem>>, vector<1x32xf32>,
    %628 = vector.extract_strided_slice %583 {offsets = [24, 0], sizes = [8, 32], strides = [1, 1]} : vector<64x32xf32> to vector<8x32xf32>
    %cst_364 = arith.constant dense<0xFF800000> : vector<32xf32>
    %629 = vector.multi_reduction <maximumf>, %628, %cst_364 [0] : vector<8x32xf32> to vector<32xf32>
    %630 = vector.shape_cast %629 : vector<32xf32> to vector<1x32xf32>
    %c3_365 = arith.constant 3 : index
    %c0_366 = arith.constant 0 : index
    %631 = vector.load %arg46[%c3_365, %c0_366] : memref<8x32xf32, #tpu.memory_space<vmem>>, vector<1x32xf32>
    tpu.vector_store %arg46[%c3_365, %c0_366], %630 {strides = array<i32>} : memref<8x32xf32, #tpu.memory_space<vmem>>, vector<1x32xf32>,
    %632 = vector.extract_strided_slice %583 {offsets = [32, 0], sizes = [8, 32], strides = [1, 1]} : vector<64x32xf32> to vector<8x32xf32>
    %cst_367 = arith.constant dense<0xFF800000> : vector<32xf32>
    %633 = vector.multi_reduction <maximumf>, %632, %cst_367 [0] : vector<8x32xf32> to vector<32xf32>
    %634 = vector.shape_cast %633 : vector<32xf32> to vector<1x32xf32>
    %c4_368 = arith.constant 4 : index
    %c0_369 = arith.constant 0 : index
    %635 = vector.load %arg46[%c4_368, %c0_369] : memref<8x32xf32, #tpu.memory_space<vmem>>, vector<1x32xf32>
    tpu.vector_store %arg46[%c4_368, %c0_369], %634 {strides = array<i32>} : memref<8x32xf32, #tpu.memory_space<vmem>>, vector<1x32xf32>,
    %636 = vector.extract_strided_slice %583 {offsets = [40, 0], sizes = [8, 32], strides = [1, 1]} : vector<64x32xf32> to vector<8x32xf32>
    %cst_370 = arith.constant dense<0xFF800000> : vector<32xf32>
    %637 = vector.multi_reduction <maximumf>, %636, %cst_370 [0] : vector<8x32xf32> to vector<32xf32>
    %638 = vector.shape_cast %637 : vector<32xf32> to vector<1x32xf32>
    %c5_371 = arith.constant 5 : index
    %c0_372 = arith.constant 0 : index
    %639 = vector.load %arg46[%c5_371, %c0_372] : memref<8x32xf32, #tpu.memory_space<vmem>>, vector<1x32xf32>
    tpu.vector_store %arg46[%c5_371, %c0_372], %638 {strides = array<i32>} : memref<8x32xf32, #tpu.memory_space<vmem>>, vector<1x32xf32>,
    %640 = vector.extract_strided_slice %583 {offsets = [48, 0], sizes = [8, 32], strides = [1, 1]} : vector<64x32xf32> to vector<8x32xf32>
    %cst_373 = arith.constant dense<0xFF800000> : vector<32xf32>
    %641 = vector.multi_reduction <maximumf>, %640, %cst_373 [0] : vector<8x32xf32> to vector<32xf32>
    %642 = vector.shape_cast %641 : vector<32xf32> to vector<1x32xf32>
    %c6_374 = arith.constant 6 : index
    %c0_375 = arith.constant 0 : index
    %643 = vector.load %arg46[%c6_374, %c0_375] : memref<8x32xf32, #tpu.memory_space<vmem>>, vector<1x32xf32>
    tpu.vector_store %arg46[%c6_374, %c0_375], %642 {strides = array<i32>} : memref<8x32xf32, #tpu.memory_space<vmem>>, vector<1x32xf32>,
    %644 = vector.extract_strided_slice %583 {offsets = [56, 0], sizes = [8, 32], strides = [1, 1]} : vector<64x32xf32> to vector<8x32xf32>
    %cst_376 = arith.constant dense<0xFF800000> : vector<32xf32>
    %645 = vector.multi_reduction <maximumf>, %644, %cst_376 [0] : vector<8x32xf32> to vector<32xf32>
    %646 = vector.shape_cast %645 : vector<32xf32> to vector<1x32xf32>
    %c7_377 = arith.constant 7 : index
    %c0_378 = arith.constant 0 : index
    %647 = vector.load %arg46[%c7_377, %c0_378] : memref<8x32xf32, #tpu.memory_space<vmem>>, vector<1x32xf32>
    tpu.vector_store %arg46[%c7_377, %c0_378], %646 {strides = array<i32>} : memref<8x32xf32, #tpu.memory_space<vmem>>, vector<1x32xf32>,
    %c0_379 = arith.constant 0 : index
    %c0_380 = arith.constant 0 : index
    %648 = vector.load %arg45[%c0_379, %c0_380] : memref<8x32xf32, #tpu.memory_space<vmem>>, vector<8x32xf32>
    %c0_381 = arith.constant 0 : index
    %c0_382 = arith.constant 0 : index
    %649 = vector.load %arg46[%c0_381, %c0_382] : memref<8x32xf32, #tpu.memory_space<vmem>>, vector<8x32xf32>
    %c0_383 = arith.constant 0 : index
    %c0_384 = arith.constant 0 : index
    %c0_385 = arith.constant 0 : index
    %650 = vector.load %arg7[%c0_383, %c0_384, %c0_385] : memref<1x8x8xf32, #tpu.memory_space<vmem>>, vector<1x8x8xf32>
    %651 = vector.shape_cast %650 : vector<1x8x8xf32> to vector<8x8xf32>
    %cst_386 = arith.constant 1.000000e+00 : f32
    %652 = vector.broadcast %cst_386 : f32 to vector<8x8xf32>
    %653 = arith.subf %651, %652 : vector<8x8xf32>
    %cst_387 = arith.constant 1.000000e+09 : f32
    %654 = vector.broadcast %cst_387 : f32 to vector<8x8xf32>
    %655 = arith.mulf %653, %654 : vector<8x8xf32>
    %c0_388 = arith.constant 0 : index
    %c0_389 = arith.constant 0 : index
    %c0_390 = arith.constant 0 : index
    %656 = vector.load %arg36[%c0_388, %c0_389, %c0_390] : memref<3x32x32xf32, #tpu.memory_space<vmem>>, vector<1x32x32xf32>
    %657 = vector.shape_cast %656 : vector<1x32x32xf32> to vector<32x32xf32>
    %cst_391 = arith.constant dense<0.000000e+00> : vector<8x32xf32>
    %658 = tpu.matmul %648, %657, %cst_391 {dimension_numbers = #tpu.dot_dimension_numbers<[1], [0], [0], [1], [0, 0, 1, 1], [], []>} : vector<8x32xf32>, vector<32x32xf32>, vector<8x32xf32> -> vector<8x32xf32>
    %c0_392 = arith.constant 0 : index
    %c0_393 = arith.constant 0 : index
    %c0_394 = arith.constant 0 : index
    %659 = vector.load %arg37[%c0_392, %c0_393, %c0_394] : memref<3x1x32xf32, #tpu.memory_space<vmem>>, vector<1x1x32xf32>
    %660 = vector.shape_cast %659 : vector<1x1x32xf32> to vector<1x32xf32>
    %661 = vector.broadcast %660 : vector<1x32xf32> to vector<8x32xf32>
    %662 = arith.addf %658, %661 : vector<8x32xf32>
    %c1_395 = arith.constant 1 : index
    %c0_396 = arith.constant 0 : index
    %c0_397 = arith.constant 0 : index
    %663 = vector.load %arg36[%c1_395, %c0_396, %c0_397] : memref<3x32x32xf32, #tpu.memory_space<vmem>>, vector<1x32x32xf32>
    %664 = vector.shape_cast %663 : vector<1x32x32xf32> to vector<32x32xf32>
    %cst_398 = arith.constant dense<0.000000e+00> : vector<8x32xf32>
    %665 = tpu.matmul %649, %664, %cst_398 {dimension_numbers = #tpu.dot_dimension_numbers<[1], [0], [0], [1], [0, 0, 1, 1], [], []>} : vector<8x32xf32>, vector<32x32xf32>, vector<8x32xf32> -> vector<8x32xf32>
    %c1_399 = arith.constant 1 : index
    %c0_400 = arith.constant 0 : index
    %c0_401 = arith.constant 0 : index
    %666 = vector.load %arg37[%c1_399, %c0_400, %c0_401] : memref<3x1x32xf32, #tpu.memory_space<vmem>>, vector<1x1x32xf32>
    %667 = vector.shape_cast %666 : vector<1x1x32xf32> to vector<1x32xf32>
    %668 = vector.broadcast %667 : vector<1x32xf32> to vector<8x32xf32>
    %669 = arith.addf %665, %668 : vector<8x32xf32>
    %c2_402 = arith.constant 2 : index
    %c0_403 = arith.constant 0 : index
    %c0_404 = arith.constant 0 : index
    %670 = vector.load %arg36[%c2_402, %c0_403, %c0_404] : memref<3x32x32xf32, #tpu.memory_space<vmem>>, vector<1x32x32xf32>
    %671 = vector.shape_cast %670 : vector<1x32x32xf32> to vector<32x32xf32>
    %cst_405 = arith.constant dense<0.000000e+00> : vector<8x32xf32>
    %672 = tpu.matmul %649, %671, %cst_405 {dimension_numbers = #tpu.dot_dimension_numbers<[1], [0], [0], [1], [0, 0, 1, 1], [], []>} : vector<8x32xf32>, vector<32x32xf32>, vector<8x32xf32> -> vector<8x32xf32>
    %c2_406 = arith.constant 2 : index
    %c0_407 = arith.constant 0 : index
    %c0_408 = arith.constant 0 : index
    %673 = vector.load %arg37[%c2_406, %c0_407, %c0_408] : memref<3x1x32xf32, #tpu.memory_space<vmem>>, vector<1x1x32xf32>
    %674 = vector.shape_cast %673 : vector<1x1x32xf32> to vector<1x32xf32>
    %675 = vector.broadcast %674 : vector<1x32xf32> to vector<8x32xf32>
    %676 = arith.addf %672, %675 : vector<8x32xf32>
    %cst_409 = arith.constant dense<0.000000e+00> : vector<8x8xf32>
    %677 = tpu.matmul %662, %669, %cst_409 {dimension_numbers = #tpu.dot_dimension_numbers<[1], [1], [0], [0], [0, 0, 1, 0], [], []>} : vector<8x32xf32>, vector<8x32xf32>, vector<8x8xf32> -> vector<8x8xf32>
    %cst_410 = arith.constant 0.176776692 : f32
    %678 = vector.broadcast %cst_410 : f32 to vector<8x8xf32>
    %679 = arith.mulf %677, %678 : vector<8x8xf32>
    %680 = arith.addf %679, %655 : vector<8x8xf32>
    %cst_411 = arith.constant dense<0xFF800000> : vector<8xf32>
    %681 = vector.multi_reduction <maximumf>, %680, %cst_411 [1] : vector<8x8xf32> to vector<8xf32>
    %682 = vector.shape_cast %681 : vector<8xf32> to vector<8x1xf32>
    %683 = vector.broadcast %682 : vector<8x1xf32> to vector<8x8xf32>
    %684 = arith.subf %680, %683 : vector<8x8xf32>
    %685 = math.exp %684 : vector<8x8xf32>
    %cst_412 = arith.constant dense<0.000000e+00> : vector<8xf32>
    %686 = vector.multi_reduction <add>, %685, %cst_412 [1] : vector<8x8xf32> to vector<8xf32>
    %687 = vector.shape_cast %686 : vector<8xf32> to vector<8x1xf32>
    %688 = tpu.reciprocal %687 {approx = true} : vector<8x1xf32> -> vector<8x1xf32>
    %689 = vector.broadcast %688 : vector<8x1xf32> to vector<8x8xf32>
    %690 = arith.mulf %685, %689 : vector<8x8xf32>
    %cst_413 = arith.constant dense<0.000000e+00> : vector<8x32xf32>
    %691 = tpu.matmul %690, %676, %cst_413 {dimension_numbers = #tpu.dot_dimension_numbers<[1], [0], [0], [1], [0, 0, 1, 1], [], []>} : vector<8x8xf32>, vector<8x32xf32>, vector<8x32xf32> -> vector<8x32xf32>
    %c0_414 = arith.constant 0 : index
    %c0_415 = arith.constant 0 : index
    %c0_416 = arith.constant 0 : index
    %692 = vector.load %arg38[%c0_414, %c0_415, %c0_416] : memref<3x32x32xf32, #tpu.memory_space<vmem>>, vector<1x32x32xf32>
    %693 = vector.shape_cast %692 : vector<1x32x32xf32> to vector<32x32xf32>
    %cst_417 = arith.constant dense<0.000000e+00> : vector<8x32xf32>
    %694 = tpu.matmul %691, %693, %cst_417 {dimension_numbers = #tpu.dot_dimension_numbers<[1], [0], [0], [1], [0, 0, 1, 1], [], []>} : vector<8x32xf32>, vector<32x32xf32>, vector<8x32xf32> -> vector<8x32xf32>
    %c0_418 = arith.constant 0 : index
    %c0_419 = arith.constant 0 : index
    %c0_420 = arith.constant 0 : index
    %695 = vector.load %arg39[%c0_418, %c0_419, %c0_420] : memref<3x1x32xf32, #tpu.memory_space<vmem>>, vector<1x1x32xf32>
    %696 = vector.shape_cast %695 : vector<1x1x32xf32> to vector<1x32xf32>
    %697 = vector.broadcast %696 : vector<1x32xf32> to vector<8x32xf32>
    %698 = arith.addf %694, %697 : vector<8x32xf32>
    %c1_421 = arith.constant 1 : index
    %c0_422 = arith.constant 0 : index
    %c0_423 = arith.constant 0 : index
    %699 = vector.load %arg38[%c1_421, %c0_422, %c0_423] : memref<3x32x32xf32, #tpu.memory_space<vmem>>, vector<1x32x32xf32>
    %700 = vector.shape_cast %699 : vector<1x32x32xf32> to vector<32x32xf32>
    %cst_424 = arith.constant dense<0.000000e+00> : vector<8x32xf32>
    %701 = tpu.matmul %649, %700, %cst_424 {dimension_numbers = #tpu.dot_dimension_numbers<[1], [0], [0], [1], [0, 0, 1, 1], [], []>} : vector<8x32xf32>, vector<32x32xf32>, vector<8x32xf32> -> vector<8x32xf32>
    %c1_425 = arith.constant 1 : index
    %c0_426 = arith.constant 0 : index
    %c0_427 = arith.constant 0 : index
    %702 = vector.load %arg39[%c1_425, %c0_426, %c0_427] : memref<3x1x32xf32, #tpu.memory_space<vmem>>, vector<1x1x32xf32>
    %703 = vector.shape_cast %702 : vector<1x1x32xf32> to vector<1x32xf32>
    %704 = vector.broadcast %703 : vector<1x32xf32> to vector<8x32xf32>
    %705 = arith.addf %701, %704 : vector<8x32xf32>
    %c2_428 = arith.constant 2 : index
    %c0_429 = arith.constant 0 : index
    %c0_430 = arith.constant 0 : index
    %706 = vector.load %arg38[%c2_428, %c0_429, %c0_430] : memref<3x32x32xf32, #tpu.memory_space<vmem>>, vector<1x32x32xf32>
    %707 = vector.shape_cast %706 : vector<1x32x32xf32> to vector<32x32xf32>
    %cst_431 = arith.constant dense<0.000000e+00> : vector<8x32xf32>
    %708 = tpu.matmul %649, %707, %cst_431 {dimension_numbers = #tpu.dot_dimension_numbers<[1], [0], [0], [1], [0, 0, 1, 1], [], []>} : vector<8x32xf32>, vector<32x32xf32>, vector<8x32xf32> -> vector<8x32xf32>
    %c2_432 = arith.constant 2 : index
    %c0_433 = arith.constant 0 : index
    %c0_434 = arith.constant 0 : index
    %709 = vector.load %arg39[%c2_432, %c0_433, %c0_434] : memref<3x1x32xf32, #tpu.memory_space<vmem>>, vector<1x1x32xf32>
    %710 = vector.shape_cast %709 : vector<1x1x32xf32> to vector<1x32xf32>
    %711 = vector.broadcast %710 : vector<1x32xf32> to vector<8x32xf32>
    %712 = arith.addf %708, %711 : vector<8x32xf32>
    %cst_435 = arith.constant dense<0.000000e+00> : vector<8x8xf32>
    %713 = tpu.matmul %698, %705, %cst_435 {dimension_numbers = #tpu.dot_dimension_numbers<[1], [1], [0], [0], [0, 0, 1, 0], [], []>} : vector<8x32xf32>, vector<8x32xf32>, vector<8x8xf32> -> vector<8x8xf32>
    %cst_436 = arith.constant 0.176776692 : f32
    %714 = vector.broadcast %cst_436 : f32 to vector<8x8xf32>
    %715 = arith.mulf %713, %714 : vector<8x8xf32>
    %716 = arith.addf %715, %655 : vector<8x8xf32>
    %cst_437 = arith.constant dense<0xFF800000> : vector<8xf32>
    %717 = vector.multi_reduction <maximumf>, %716, %cst_437 [1] : vector<8x8xf32> to vector<8xf32>
    %718 = vector.shape_cast %717 : vector<8xf32> to vector<8x1xf32>
    %719 = vector.broadcast %718 : vector<8x1xf32> to vector<8x8xf32>
    %720 = arith.subf %716, %719 : vector<8x8xf32>
    %721 = math.exp %720 : vector<8x8xf32>
    %cst_438 = arith.constant dense<0.000000e+00> : vector<8xf32>
    %722 = vector.multi_reduction <add>, %721, %cst_438 [1] : vector<8x8xf32> to vector<8xf32>
    %723 = vector.shape_cast %722 : vector<8xf32> to vector<8x1xf32>
    %724 = tpu.reciprocal %723 {approx = true} : vector<8x1xf32> -> vector<8x1xf32>
    %725 = vector.broadcast %724 : vector<8x1xf32> to vector<8x8xf32>
    %726 = arith.mulf %721, %725 : vector<8x8xf32>
    %cst_439 = arith.constant dense<0.000000e+00> : vector<8x32xf32>
    %727 = tpu.matmul %726, %712, %cst_439 {dimension_numbers = #tpu.dot_dimension_numbers<[1], [0], [0], [1], [0, 0, 1, 1], [], []>} : vector<8x8xf32>, vector<8x32xf32>, vector<8x32xf32> -> vector<8x32xf32>
    %c0_440 = arith.constant 0 : index
    %c0_441 = arith.constant 0 : index
    %728 = vector.load %arg21[%c0_440, %c0_441] : memref<32x32xf32, #tpu.memory_space<vmem>>, vector<32x32xf32>
    %cst_442 = arith.constant dense<0.000000e+00> : vector<8x32xf32>
    %729 = tpu.matmul %727, %728, %cst_442 {dimension_numbers = #tpu.dot_dimension_numbers<[1], [0], [0], [1], [0, 0, 1, 1], [], []>} : vector<8x32xf32>, vector<32x32xf32>, vector<8x32xf32> -> vector<8x32xf32>
    %c0_443 = arith.constant 0 : index
    %c0_444 = arith.constant 0 : index
    %c0_445 = arith.constant 0 : index
    %730 = vector.load %arg22[%c0_443, %c0_444, %c0_445] : memref<3x1x32xf32, #tpu.memory_space<vmem>>, vector<1x1x32xf32>
    %731 = vector.shape_cast %730 : vector<1x1x32xf32> to vector<1x32xf32>
    %732 = vector.broadcast %731 : vector<1x32xf32> to vector<8x32xf32>
    %733 = arith.addf %729, %732 : vector<8x32xf32>
    %cst_446 = arith.constant dense<0.000000e+00> : vector<8xf32>
    %734 = vector.multi_reduction <add>, %733, %cst_446 [1] : vector<8x32xf32> to vector<8xf32>
    %735 = vector.shape_cast %734 : vector<8xf32> to vector<8x1xf32>
    %cst_447 = arith.constant 3.200000e+01 : f32
    %736 = vector.broadcast %cst_447 : f32 to vector<8x1xf32>
    %737 = arith.divf %735, %736 : vector<8x1xf32>
    %738 = vector.broadcast %737 : vector<8x1xf32> to vector<8x32xf32>
    %739 = arith.subf %733, %738 : vector<8x32xf32>
    %740 = arith.mulf %739, %739 : vector<8x32xf32>
    %cst_448 = arith.constant dense<0.000000e+00> : vector<8xf32>
    %741 = vector.multi_reduction <add>, %740, %cst_448 [1] : vector<8x32xf32> to vector<8xf32>
    %742 = vector.shape_cast %741 : vector<8xf32> to vector<8x1xf32>
    %cst_449 = arith.constant 3.200000e+01 : f32
    %743 = vector.broadcast %cst_449 : f32 to vector<8x1xf32>
    %744 = arith.divf %742, %743 : vector<8x1xf32>
    %745 = vector.broadcast %737 : vector<8x1xf32> to vector<8x32xf32>
    %746 = arith.subf %733, %745 : vector<8x32xf32>
    %cst_450 = arith.constant 9.99999974E-6 : f32
    %747 = vector.broadcast %cst_450 : f32 to vector<8x1xf32>
    %748 = arith.addf %744, %747 : vector<8x1xf32>
    %749 = math.rsqrt %748 : vector<8x1xf32>
    %750 = vector.broadcast %749 : vector<8x1xf32> to vector<8x32xf32>
    %751 = arith.mulf %746, %750 : vector<8x32xf32>
    %c1_451 = arith.constant 1 : index
    %c0_452 = arith.constant 0 : index
    %c0_453 = arith.constant 0 : index
    %752 = vector.load %arg22[%c1_451, %c0_452, %c0_453] : memref<3x1x32xf32, #tpu.memory_space<vmem>>, vector<1x1x32xf32>
    %753 = vector.shape_cast %752 : vector<1x1x32xf32> to vector<1x32xf32>
    %754 = vector.broadcast %753 : vector<1x32xf32> to vector<8x32xf32>
    %755 = arith.mulf %751, %754 : vector<8x32xf32>
    %c2_454 = arith.constant 2 : index
    %c0_455 = arith.constant 0 : index
    %c0_456 = arith.constant 0 : index
    %756 = vector.load %arg22[%c2_454, %c0_455, %c0_456] : memref<3x1x32xf32, #tpu.memory_space<vmem>>, vector<1x1x32xf32>
    %757 = vector.shape_cast %756 : vector<1x1x32xf32> to vector<1x32xf32>
    %758 = vector.broadcast %757 : vector<1x32xf32> to vector<8x32xf32>
    %759 = arith.addf %755, %758 : vector<8x32xf32>
    %cst_457 = arith.constant 0.000000e+00 : f32
    %760 = vector.broadcast %cst_457 : f32 to vector<8x32xf32>
    %761 = arith.maximumf %759, %760 : vector<8x32xf32>
    %c0_458 = arith.constant 0 : index
    %c0_459 = arith.constant 0 : index
    %762 = vector.load %arg23[%c0_458, %c0_459] : memref<32x32xf32, #tpu.memory_space<vmem>>, vector<32x32xf32>
    %cst_460 = arith.constant dense<0.000000e+00> : vector<8x32xf32>
    %763 = tpu.matmul %761, %762, %cst_460 {dimension_numbers = #tpu.dot_dimension_numbers<[1], [0], [0], [1], [0, 0, 1, 1], [], []>} : vector<8x32xf32>, vector<32x32xf32>, vector<8x32xf32> -> vector<8x32xf32>
    %c0_461 = arith.constant 0 : index
    %c0_462 = arith.constant 0 : index
    %c0_463 = arith.constant 0 : index
    %764 = vector.load %arg24[%c0_461, %c0_462, %c0_463] : memref<3x1x32xf32, #tpu.memory_space<vmem>>, vector<1x1x32xf32>
    %765 = vector.shape_cast %764 : vector<1x1x32xf32> to vector<1x32xf32>
    %766 = vector.broadcast %765 : vector<1x32xf32> to vector<8x32xf32>
    %767 = arith.addf %763, %766 : vector<8x32xf32>
    %cst_464 = arith.constant dense<0.000000e+00> : vector<8xf32>
    %768 = vector.multi_reduction <add>, %767, %cst_464 [1] : vector<8x32xf32> to vector<8xf32>
    %769 = vector.shape_cast %768 : vector<8xf32> to vector<8x1xf32>
    %cst_465 = arith.constant 3.200000e+01 : f32
    %770 = vector.broadcast %cst_465 : f32 to vector<8x1xf32>
    %771 = arith.divf %769, %770 : vector<8x1xf32>
    %772 = vector.broadcast %771 : vector<8x1xf32> to vector<8x32xf32>
    %773 = arith.subf %767, %772 : vector<8x32xf32>
    %774 = arith.mulf %773, %773 : vector<8x32xf32>
    %cst_466 = arith.constant dense<0.000000e+00> : vector<8xf32>
    %775 = vector.multi_reduction <add>, %774, %cst_466 [1] : vector<8x32xf32> to vector<8xf32>
    %776 = vector.shape_cast %775 : vector<8xf32> to vector<8x1xf32>
    %cst_467 = arith.constant 3.200000e+01 : f32
    %777 = vector.broadcast %cst_467 : f32 to vector<8x1xf32>
    %778 = arith.divf %776, %777 : vector<8x1xf32>
    %779 = vector.broadcast %771 : vector<8x1xf32> to vector<8x32xf32>
    %780 = arith.subf %767, %779 : vector<8x32xf32>
    %cst_468 = arith.constant 9.99999974E-6 : f32
    %781 = vector.broadcast %cst_468 : f32 to vector<8x1xf32>
    %782 = arith.addf %778, %781 : vector<8x1xf32>
    %783 = math.rsqrt %782 : vector<8x1xf32>
    %784 = vector.broadcast %783 : vector<8x1xf32> to vector<8x32xf32>
    %785 = arith.mulf %780, %784 : vector<8x32xf32>
    %c1_469 = arith.constant 1 : index
    %c0_470 = arith.constant 0 : index
    %c0_471 = arith.constant 0 : index
    %786 = vector.load %arg24[%c1_469, %c0_470, %c0_471] : memref<3x1x32xf32, #tpu.memory_space<vmem>>, vector<1x1x32xf32>
    %787 = vector.shape_cast %786 : vector<1x1x32xf32> to vector<1x32xf32>
    %788 = vector.broadcast %787 : vector<1x32xf32> to vector<8x32xf32>
    %789 = arith.mulf %785, %788 : vector<8x32xf32>
    %c2_472 = arith.constant 2 : index
    %c0_473 = arith.constant 0 : index
    %c0_474 = arith.constant 0 : index
    %790 = vector.load %arg24[%c2_472, %c0_473, %c0_474] : memref<3x1x32xf32, #tpu.memory_space<vmem>>, vector<1x1x32xf32>
    %791 = vector.shape_cast %790 : vector<1x1x32xf32> to vector<1x32xf32>
    %792 = vector.broadcast %791 : vector<1x32xf32> to vector<8x32xf32>
    %793 = arith.addf %789, %792 : vector<8x32xf32>
    %cst_475 = arith.constant 0.000000e+00 : f32
    %794 = vector.broadcast %cst_475 : f32 to vector<8x32xf32>
    %795 = arith.maximumf %793, %794 : vector<8x32xf32>
    %c0_476 = arith.constant 0 : index
    %c0_477 = arith.constant 0 : index
    %796 = vector.load %arg25[%c0_476, %c0_477] : memref<32x32xf32, #tpu.memory_space<vmem>>, vector<32x32xf32>
    %cst_478 = arith.constant dense<0.000000e+00> : vector<8x32xf32>
    %797 = tpu.matmul %795, %796, %cst_478 {dimension_numbers = #tpu.dot_dimension_numbers<[1], [0], [0], [1], [0, 0, 1, 1], [], []>} : vector<8x32xf32>, vector<32x32xf32>, vector<8x32xf32> -> vector<8x32xf32>
    %c0_479 = arith.constant 0 : index
    %c0_480 = arith.constant 0 : index
    %c0_481 = arith.constant 0 : index
    %798 = vector.load %arg26[%c0_479, %c0_480, %c0_481] : memref<3x1x32xf32, #tpu.memory_space<vmem>>, vector<1x1x32xf32>
    %799 = vector.shape_cast %798 : vector<1x1x32xf32> to vector<1x32xf32>
    %800 = vector.broadcast %799 : vector<1x32xf32> to vector<8x32xf32>
    %801 = arith.addf %797, %800 : vector<8x32xf32>
    %cst_482 = arith.constant dense<0.000000e+00> : vector<8xf32>
    %802 = vector.multi_reduction <add>, %801, %cst_482 [1] : vector<8x32xf32> to vector<8xf32>
    %803 = vector.shape_cast %802 : vector<8xf32> to vector<8x1xf32>
    %cst_483 = arith.constant 3.200000e+01 : f32
    %804 = vector.broadcast %cst_483 : f32 to vector<8x1xf32>
    %805 = arith.divf %803, %804 : vector<8x1xf32>
    %806 = vector.broadcast %805 : vector<8x1xf32> to vector<8x32xf32>
    %807 = arith.subf %801, %806 : vector<8x32xf32>
    %808 = arith.mulf %807, %807 : vector<8x32xf32>
    %cst_484 = arith.constant dense<0.000000e+00> : vector<8xf32>
    %809 = vector.multi_reduction <add>, %808, %cst_484 [1] : vector<8x32xf32> to vector<8xf32>
    %810 = vector.shape_cast %809 : vector<8xf32> to vector<8x1xf32>
    %cst_485 = arith.constant 3.200000e+01 : f32
    %811 = vector.broadcast %cst_485 : f32 to vector<8x1xf32>
    %812 = arith.divf %810, %811 : vector<8x1xf32>
    %813 = vector.broadcast %805 : vector<8x1xf32> to vector<8x32xf32>
    %814 = arith.subf %801, %813 : vector<8x32xf32>
    %cst_486 = arith.constant 9.99999974E-6 : f32
    %815 = vector.broadcast %cst_486 : f32 to vector<8x1xf32>
    %816 = arith.addf %812, %815 : vector<8x1xf32>
    %817 = math.rsqrt %816 : vector<8x1xf32>
    %818 = vector.broadcast %817 : vector<8x1xf32> to vector<8x32xf32>
    %819 = arith.mulf %814, %818 : vector<8x32xf32>
    %c1_487 = arith.constant 1 : index
    %c0_488 = arith.constant 0 : index
    %c0_489 = arith.constant 0 : index
    %820 = vector.load %arg26[%c1_487, %c0_488, %c0_489] : memref<3x1x32xf32, #tpu.memory_space<vmem>>, vector<1x1x32xf32>
    %821 = vector.shape_cast %820 : vector<1x1x32xf32> to vector<1x32xf32>
    %822 = vector.broadcast %821 : vector<1x32xf32> to vector<8x32xf32>
    %823 = arith.mulf %819, %822 : vector<8x32xf32>
    %c2_490 = arith.constant 2 : index
    %c0_491 = arith.constant 0 : index
    %c0_492 = arith.constant 0 : index
    %824 = vector.load %arg26[%c2_490, %c0_491, %c0_492] : memref<3x1x32xf32, #tpu.memory_space<vmem>>, vector<1x1x32xf32>
    %825 = vector.shape_cast %824 : vector<1x1x32xf32> to vector<1x32xf32>
    %826 = vector.broadcast %825 : vector<1x32xf32> to vector<8x32xf32>
    %827 = arith.addf %823, %826 : vector<8x32xf32>
    %cst_493 = arith.constant 0.000000e+00 : f32
    %828 = vector.broadcast %cst_493 : f32 to vector<8x32xf32>
    %829 = arith.maximumf %827, %828 : vector<8x32xf32>
    %cst_494 = arith.constant dense<0.000000e+00> : vector<8xf32>
    %830 = vector.multi_reduction <add>, %829, %cst_494 [1] : vector<8x32xf32> to vector<8xf32>
    %831 = vector.shape_cast %830 : vector<8xf32> to vector<8x1xf32>
    %cst_495 = arith.constant 3.200000e+01 : f32
    %832 = vector.broadcast %cst_495 : f32 to vector<8x1xf32>
    %833 = arith.divf %831, %832 : vector<8x1xf32>
    %834 = vector.broadcast %833 : vector<8x1xf32> to vector<8x32xf32>
    %835 = arith.subf %829, %834 : vector<8x32xf32>
    %836 = arith.mulf %835, %835 : vector<8x32xf32>
    %cst_496 = arith.constant dense<0.000000e+00> : vector<8xf32>
    %837 = vector.multi_reduction <add>, %836, %cst_496 [1] : vector<8x32xf32> to vector<8xf32>
    %838 = vector.shape_cast %837 : vector<8xf32> to vector<8x1xf32>
    %cst_497 = arith.constant 3.200000e+01 : f32
    %839 = vector.broadcast %cst_497 : f32 to vector<8x1xf32>
    %840 = arith.divf %838, %839 : vector<8x1xf32>
    %841 = vector.broadcast %833 : vector<8x1xf32> to vector<8x32xf32>
    %842 = arith.subf %829, %841 : vector<8x32xf32>
    %cst_498 = arith.constant 9.99999974E-6 : f32
    %843 = vector.broadcast %cst_498 : f32 to vector<8x1xf32>
    %844 = arith.addf %840, %843 : vector<8x1xf32>
    %845 = math.rsqrt %844 : vector<8x1xf32>
    %846 = vector.broadcast %845 : vector<8x1xf32> to vector<8x32xf32>
    %847 = arith.mulf %842, %846 : vector<8x32xf32>
    %c0_499 = arith.constant 0 : index
    %c0_500 = arith.constant 0 : index
    %c0_501 = arith.constant 0 : index
    %848 = vector.load %arg27[%c0_499, %c0_500, %c0_501] : memref<2x1x32xf32, #tpu.memory_space<vmem>>, vector<1x1x32xf32>
    %849 = vector.shape_cast %848 : vector<1x1x32xf32> to vector<1x32xf32>
    %850 = vector.broadcast %849 : vector<1x32xf32> to vector<8x32xf32>
    %851 = arith.mulf %847, %850 : vector<8x32xf32>
    %c1_502 = arith.constant 1 : index
    %c0_503 = arith.constant 0 : index
    %c0_504 = arith.constant 0 : index
    %852 = vector.load %arg27[%c1_502, %c0_503, %c0_504] : memref<2x1x32xf32, #tpu.memory_space<vmem>>, vector<1x1x32xf32>
    %853 = vector.shape_cast %852 : vector<1x1x32xf32> to vector<1x32xf32>
    %854 = vector.broadcast %853 : vector<1x32xf32> to vector<8x32xf32>
    %855 = arith.addf %851, %854 : vector<8x32xf32>
    %c0_505 = arith.constant 0 : index
    %c0_506 = arith.constant 0 : index
    %c0_507 = arith.constant 0 : index
    %856 = vector.load %arg8[%c0_505, %c0_506, %c0_507] : memref<1x1x8xf32, #tpu.memory_space<vmem>>, vector<1x1x8xf32>
    %857 = vector.shape_cast %856 : vector<1x1x8xf32> to vector<1x8xf32>
    %cst_508 = arith.constant 1.000000e+00 : f32
    %858 = vector.broadcast %cst_508 : f32 to vector<1x8xf32>
    %859 = arith.subf %857, %858 : vector<1x8xf32>
    %cst_509 = arith.constant 1.000000e+09 : f32
    %860 = vector.broadcast %cst_509 : f32 to vector<1x8xf32>
    %861 = arith.mulf %859, %860 : vector<1x8xf32>
    %c0_510 = arith.constant 0 : index
    %c0_511 = arith.constant 0 : index
    %c0_512 = arith.constant 0 : index
    %862 = vector.load %arg40[%c0_510, %c0_511, %c0_512] : memref<3x32x32xf32, #tpu.memory_space<vmem>>, vector<1x32x32xf32>
    %863 = vector.shape_cast %862 : vector<1x32x32xf32> to vector<32x32xf32>
    %cst_513 = arith.constant dense<0.000000e+00> : vector<8x32xf32>
    %864 = tpu.matmul %855, %863, %cst_513 {dimension_numbers = #tpu.dot_dimension_numbers<[1], [0], [0], [1], [0, 0, 1, 1], [], []>} : vector<8x32xf32>, vector<32x32xf32>, vector<8x32xf32> -> vector<8x32xf32>
    %c0_514 = arith.constant 0 : index
    %c0_515 = arith.constant 0 : index
    %c0_516 = arith.constant 0 : index
    %865 = vector.load %arg41[%c0_514, %c0_515, %c0_516] : memref<3x1x32xf32, #tpu.memory_space<vmem>>, vector<1x1x32xf32>
    %866 = vector.shape_cast %865 : vector<1x1x32xf32> to vector<1x32xf32>
    %867 = vector.broadcast %866 : vector<1x32xf32> to vector<8x32xf32>
    %868 = arith.addf %864, %867 : vector<8x32xf32>
    %c1_517 = arith.constant 1 : index
    %c0_518 = arith.constant 0 : index
    %c0_519 = arith.constant 0 : index
    %869 = vector.load %arg40[%c1_517, %c0_518, %c0_519] : memref<3x32x32xf32, #tpu.memory_space<vmem>>, vector<1x32x32xf32>
    %870 = vector.shape_cast %869 : vector<1x32x32xf32> to vector<32x32xf32>
    %cst_520 = arith.constant dense<0.000000e+00> : vector<8x32xf32>
    %871 = tpu.matmul %855, %870, %cst_520 {dimension_numbers = #tpu.dot_dimension_numbers<[1], [0], [0], [1], [0, 0, 1, 1], [], []>} : vector<8x32xf32>, vector<32x32xf32>, vector<8x32xf32> -> vector<8x32xf32>
    %c1_521 = arith.constant 1 : index
    %c0_522 = arith.constant 0 : index
    %c0_523 = arith.constant 0 : index
    %872 = vector.load %arg41[%c1_521, %c0_522, %c0_523] : memref<3x1x32xf32, #tpu.memory_space<vmem>>, vector<1x1x32xf32>
    %873 = vector.shape_cast %872 : vector<1x1x32xf32> to vector<1x32xf32>
    %874 = vector.broadcast %873 : vector<1x32xf32> to vector<8x32xf32>
    %875 = arith.addf %871, %874 : vector<8x32xf32>
    %c2_524 = arith.constant 2 : index
    %c0_525 = arith.constant 0 : index
    %c0_526 = arith.constant 0 : index
    %876 = vector.load %arg40[%c2_524, %c0_525, %c0_526] : memref<3x32x32xf32, #tpu.memory_space<vmem>>, vector<1x32x32xf32>
    %877 = vector.shape_cast %876 : vector<1x32x32xf32> to vector<32x32xf32>
    %cst_527 = arith.constant dense<0.000000e+00> : vector<8x32xf32>
    %878 = tpu.matmul %855, %877, %cst_527 {dimension_numbers = #tpu.dot_dimension_numbers<[1], [0], [0], [1], [0, 0, 1, 1], [], []>} : vector<8x32xf32>, vector<32x32xf32>, vector<8x32xf32> -> vector<8x32xf32>
    %c2_528 = arith.constant 2 : index
    %c0_529 = arith.constant 0 : index
    %c0_530 = arith.constant 0 : index
    %879 = vector.load %arg41[%c2_528, %c0_529, %c0_530] : memref<3x1x32xf32, #tpu.memory_space<vmem>>, vector<1x1x32xf32>
    %880 = vector.shape_cast %879 : vector<1x1x32xf32> to vector<1x32xf32>
    %881 = vector.broadcast %880 : vector<1x32xf32> to vector<8x32xf32>
    %882 = arith.addf %878, %881 : vector<8x32xf32>
    %cst_531 = arith.constant dense<0.000000e+00> : vector<8x8xf32>
    %883 = tpu.matmul %868, %875, %cst_531 {dimension_numbers = #tpu.dot_dimension_numbers<[1], [1], [0], [0], [0, 0, 1, 0], [], []>} : vector<8x32xf32>, vector<8x32xf32>, vector<8x8xf32> -> vector<8x8xf32>
    %cst_532 = arith.constant 0.176776692 : f32
    %884 = vector.broadcast %cst_532 : f32 to vector<8x8xf32>
    %885 = arith.mulf %883, %884 : vector<8x8xf32>
    %886 = vector.broadcast %861 : vector<1x8xf32> to vector<8x8xf32>
    %887 = arith.addf %885, %886 : vector<8x8xf32>
    %cst_533 = arith.constant dense<0xFF800000> : vector<8xf32>
    %888 = vector.multi_reduction <maximumf>, %887, %cst_533 [1] : vector<8x8xf32> to vector<8xf32>
    %889 = vector.shape_cast %888 : vector<8xf32> to vector<8x1xf32>
    %890 = vector.broadcast %889 : vector<8x1xf32> to vector<8x8xf32>
    %891 = arith.subf %887, %890 : vector<8x8xf32>
    %892 = math.exp %891 : vector<8x8xf32>
    %cst_534 = arith.constant dense<0.000000e+00> : vector<8xf32>
    %893 = vector.multi_reduction <add>, %892, %cst_534 [1] : vector<8x8xf32> to vector<8xf32>
    %894 = vector.shape_cast %893 : vector<8xf32> to vector<8x1xf32>
    %895 = tpu.reciprocal %894 {approx = true} : vector<8x1xf32> -> vector<8x1xf32>
    %896 = vector.broadcast %895 : vector<8x1xf32> to vector<8x8xf32>
    %897 = arith.mulf %892, %896 : vector<8x8xf32>
    %cst_535 = arith.constant dense<0.000000e+00> : vector<8x32xf32>
    %898 = tpu.matmul %897, %882, %cst_535 {dimension_numbers = #tpu.dot_dimension_numbers<[1], [0], [0], [1], [0, 0, 1, 1], [], []>} : vector<8x8xf32>, vector<8x32xf32>, vector<8x32xf32> -> vector<8x32xf32>
    %c0_536 = arith.constant 0 : index
    %c0_537 = arith.constant 0 : index
    %c0_538 = arith.constant 0 : index
    %899 = vector.load %arg42[%c0_536, %c0_537, %c0_538] : memref<3x32x32xf32, #tpu.memory_space<vmem>>, vector<1x32x32xf32>
    %900 = vector.shape_cast %899 : vector<1x32x32xf32> to vector<32x32xf32>
    %cst_539 = arith.constant dense<0.000000e+00> : vector<8x32xf32>
    %901 = tpu.matmul %898, %900, %cst_539 {dimension_numbers = #tpu.dot_dimension_numbers<[1], [0], [0], [1], [0, 0, 1, 1], [], []>} : vector<8x32xf32>, vector<32x32xf32>, vector<8x32xf32> -> vector<8x32xf32>
    %c0_540 = arith.constant 0 : index
    %c0_541 = arith.constant 0 : index
    %c0_542 = arith.constant 0 : index
    %902 = vector.load %arg43[%c0_540, %c0_541, %c0_542] : memref<3x1x32xf32, #tpu.memory_space<vmem>>, vector<1x1x32xf32>
    %903 = vector.shape_cast %902 : vector<1x1x32xf32> to vector<1x32xf32>
    %904 = vector.broadcast %903 : vector<1x32xf32> to vector<8x32xf32>
    %905 = arith.addf %901, %904 : vector<8x32xf32>
    %c1_543 = arith.constant 1 : index
    %c0_544 = arith.constant 0 : index
    %c0_545 = arith.constant 0 : index
    %906 = vector.load %arg42[%c1_543, %c0_544, %c0_545] : memref<3x32x32xf32, #tpu.memory_space<vmem>>, vector<1x32x32xf32>
    %907 = vector.shape_cast %906 : vector<1x32x32xf32> to vector<32x32xf32>
    %cst_546 = arith.constant dense<0.000000e+00> : vector<8x32xf32>
    %908 = tpu.matmul %898, %907, %cst_546 {dimension_numbers = #tpu.dot_dimension_numbers<[1], [0], [0], [1], [0, 0, 1, 1], [], []>} : vector<8x32xf32>, vector<32x32xf32>, vector<8x32xf32> -> vector<8x32xf32>
    %c1_547 = arith.constant 1 : index
    %c0_548 = arith.constant 0 : index
    %c0_549 = arith.constant 0 : index
    %909 = vector.load %arg43[%c1_547, %c0_548, %c0_549] : memref<3x1x32xf32, #tpu.memory_space<vmem>>, vector<1x1x32xf32>
    %910 = vector.shape_cast %909 : vector<1x1x32xf32> to vector<1x32xf32>
    %911 = vector.broadcast %910 : vector<1x32xf32> to vector<8x32xf32>
    %912 = arith.addf %908, %911 : vector<8x32xf32>
    %c2_550 = arith.constant 2 : index
    %c0_551 = arith.constant 0 : index
    %c0_552 = arith.constant 0 : index
    %913 = vector.load %arg42[%c2_550, %c0_551, %c0_552] : memref<3x32x32xf32, #tpu.memory_space<vmem>>, vector<1x32x32xf32>
    %914 = vector.shape_cast %913 : vector<1x32x32xf32> to vector<32x32xf32>
    %cst_553 = arith.constant dense<0.000000e+00> : vector<8x32xf32>
    %915 = tpu.matmul %898, %914, %cst_553 {dimension_numbers = #tpu.dot_dimension_numbers<[1], [0], [0], [1], [0, 0, 1, 1], [], []>} : vector<8x32xf32>, vector<32x32xf32>, vector<8x32xf32> -> vector<8x32xf32>
    %c2_554 = arith.constant 2 : index
    %c0_555 = arith.constant 0 : index
    %c0_556 = arith.constant 0 : index
    %916 = vector.load %arg43[%c2_554, %c0_555, %c0_556] : memref<3x1x32xf32, #tpu.memory_space<vmem>>, vector<1x1x32xf32>
    %917 = vector.shape_cast %916 : vector<1x1x32xf32> to vector<1x32xf32>
    %918 = vector.broadcast %917 : vector<1x32xf32> to vector<8x32xf32>
    %919 = arith.addf %915, %918 : vector<8x32xf32>
    %cst_557 = arith.constant dense<0.000000e+00> : vector<8x8xf32>
    %920 = tpu.matmul %905, %912, %cst_557 {dimension_numbers = #tpu.dot_dimension_numbers<[1], [1], [0], [0], [0, 0, 1, 0], [], []>} : vector<8x32xf32>, vector<8x32xf32>, vector<8x8xf32> -> vector<8x8xf32>
    %cst_558 = arith.constant 0.176776692 : f32
    %921 = vector.broadcast %cst_558 : f32 to vector<8x8xf32>
    %922 = arith.mulf %920, %921 : vector<8x8xf32>
    %923 = vector.broadcast %861 : vector<1x8xf32> to vector<8x8xf32>
    %924 = arith.addf %922, %923 : vector<8x8xf32>
    %cst_559 = arith.constant dense<0xFF800000> : vector<8xf32>
    %925 = vector.multi_reduction <maximumf>, %924, %cst_559 [1] : vector<8x8xf32> to vector<8xf32>
    %926 = vector.shape_cast %925 : vector<8xf32> to vector<8x1xf32>
    %927 = vector.broadcast %926 : vector<8x1xf32> to vector<8x8xf32>
    %928 = arith.subf %924, %927 : vector<8x8xf32>
    %929 = math.exp %928 : vector<8x8xf32>
    %cst_560 = arith.constant dense<0.000000e+00> : vector<8xf32>
    %930 = vector.multi_reduction <add>, %929, %cst_560 [1] : vector<8x8xf32> to vector<8xf32>
    %931 = vector.shape_cast %930 : vector<8xf32> to vector<8x1xf32>
    %932 = tpu.reciprocal %931 {approx = true} : vector<8x1xf32> -> vector<8x1xf32>
    %933 = vector.broadcast %932 : vector<8x1xf32> to vector<8x8xf32>
    %934 = arith.mulf %929, %933 : vector<8x8xf32>
    %cst_561 = arith.constant dense<0.000000e+00> : vector<8x32xf32>
    %935 = tpu.matmul %934, %919, %cst_561 {dimension_numbers = #tpu.dot_dimension_numbers<[1], [0], [0], [1], [0, 0, 1, 1], [], []>} : vector<8x8xf32>, vector<8x32xf32>, vector<8x32xf32> -> vector<8x32xf32>
    %936 = vector.shape_cast %935 : vector<8x32xf32> to vector<1x8x32xf32>
    %c0_562 = arith.constant 0 : index
    %c0_563 = arith.constant 0 : index
    %c0_564 = arith.constant 0 : index
    %937 = vector.load %arg44[%c0_562, %c0_563, %c0_564] : memref<1x8x32xf32, #tpu.memory_space<vmem>>, vector<1x8x32xf32>
    tpu.vector_store %arg44[%c0_562, %c0_563, %c0_564], %936 {strides = array<i32>} : memref<1x8x32xf32, #tpu.memory_space<vmem>>, vector<1x8x32xf32>,
    return
  }
  func.func @transform_0(%arg0: i32) -> (i32, i32, i32) {
    %c0_i32 = arith.constant 0 : i32
    %c0_i32_0 = arith.constant 0 : i32
    %c0_i32_1 = arith.constant 0 : i32
    return %arg0, %c0_i32, %c0_i32_0 : i32, i32, i32
  }
  func.func @transform_1(%arg0: i32) -> (i32, i32, i32) {
    %c0_i32 = arith.constant 0 : i32
    %c0_i32_0 = arith.constant 0 : i32
    %c0_i32_1 = arith.constant 0 : i32
    return %arg0, %c0_i32, %c0_i32_0 : i32, i32, i32
  }
  func.func @transform_2(%arg0: i32) -> (i32, i32, i32, i32) {
    %c0_i32 = arith.constant 0 : i32
    %c0_i32_0 = arith.constant 0 : i32
    %c0_i32_1 = arith.constant 0 : i32
    %c0_i32_2 = arith.constant 0 : i32
    return %arg0, %c0_i32, %c0_i32_0, %c0_i32_1 : i32, i32, i32, i32
  }
  func.func @transform_3(%arg0: i32) -> (i32, i32, i32, i32) {
    %c0_i32 = arith.constant 0 : i32
    %c0_i32_0 = arith.constant 0 : i32
    %c0_i32_1 = arith.constant 0 : i32
    %c0_i32_2 = arith.constant 0 : i32
    return %arg0, %c0_i32, %c0_i32_0, %c0_i32_1 : i32, i32, i32, i32
  }
  func.func @transform_4(%arg0: i32) -> (i32, i32, i32) {
    %c0_i32 = arith.constant 0 : i32
    %c0_i32_0 = arith.constant 0 : i32
    %c0_i32_1 = arith.constant 0 : i32
    return %arg0, %c0_i32, %c0_i32_0 : i32, i32, i32
  }
  func.func @transform_5(%arg0: i32) -> (i32, i32, i32) {
    %c0_i32 = arith.constant 0 : i32
    %c0_i32_0 = arith.constant 0 : i32
    %c0_i32_1 = arith.constant 0 : i32
    return %arg0, %c0_i32, %c0_i32_0 : i32, i32, i32
  }
  func.func @transform_6(%arg0: i32) -> (i32, i32, i32) {
    %c0_i32 = arith.constant 0 : i32
    %c0_i32_0 = arith.constant 0 : i32
    %c0_i32_1 = arith.constant 0 : i32
    return %arg0, %c0_i32, %c0_i32_0 : i32, i32, i32
  }
  func.func @transform_7(%arg0: i32) -> (i32, i32, i32) {
    %c0_i32 = arith.constant 0 : i32
    %c0_i32_0 = arith.constant 0 : i32
    %c0_i32_1 = arith.constant 0 : i32
    return %arg0, %c0_i32, %c0_i32_0 : i32, i32, i32
  }
  func.func @transform_8(%arg0: i32) -> (i32, i32) {
    %c0_i32 = arith.constant 0 : i32
    %c0_i32_0 = arith.constant 0 : i32
    %c0_i32_1 = arith.constant 0 : i32
    return %c0_i32, %c0_i32_0 : i32, i32
  }
  func.func @transform_9(%arg0: i32) -> (i32, i32, i32) {
    %c0_i32 = arith.constant 0 : i32
    %c0_i32_0 = arith.constant 0 : i32
    %c0_i32_1 = arith.constant 0 : i32
    %c0_i32_2 = arith.constant 0 : i32
    return %c0_i32, %c0_i32_0, %c0_i32_1 : i32, i32, i32
  }
  func.func @transform_10(%arg0: i32) -> (i32, i32) {
    %c0_i32 = arith.constant 0 : i32
    %c0_i32_0 = arith.constant 0 : i32
    %c0_i32_1 = arith.constant 0 : i32
    return %c0_i32, %c0_i32_0 : i32, i32
  }
  func.func @transform_11(%arg0: i32) -> (i32, i32, i32) {
    %c0_i32 = arith.constant 0 : i32
    %c0_i32_0 = arith.constant 0 : i32
    %c0_i32_1 = arith.constant 0 : i32
    %c0_i32_2 = arith.constant 0 : i32
    return %c0_i32, %c0_i32_0, %c0_i32_1 : i32, i32, i32
  }
  func.func @transform_12(%arg0: i32) -> (i32, i32) {
    %c0_i32 = arith.constant 0 : i32
    %c0_i32_0 = arith.constant 0 : i32
    %c0_i32_1 = arith.constant 0 : i32
    return %c0_i32, %c0_i32_0 : i32, i32
  }
  func.func @transform_13(%arg0: i32) -> (i32, i32, i32) {
    %c0_i32 = arith.constant 0 : i32
    %c0_i32_0 = arith.constant 0 : i32
    %c0_i32_1 = arith.constant 0 : i32
    %c0_i32_2 = arith.constant 0 : i32
    return %c0_i32, %c0_i32_0, %c0_i32_1 : i32, i32, i32
  }
  func.func @transform_14(%arg0: i32) -> (i32, i32) {
    %c0_i32 = arith.constant 0 : i32
    %c0_i32_0 = arith.constant 0 : i32
    %c0_i32_1 = arith.constant 0 : i32
    return %c0_i32, %c0_i32_0 : i32, i32
  }
  func.func @transform_15(%arg0: i32) -> (i32, i32, i32) {
    %c0_i32 = arith.constant 0 : i32
    %c0_i32_0 = arith.constant 0 : i32
    %c0_i32_1 = arith.constant 0 : i32
    %c0_i32_2 = arith.constant 0 : i32
    return %c0_i32, %c0_i32_0, %c0_i32_1 : i32, i32, i32
  }
  func.func @transform_16(%arg0: i32) -> (i32, i32) {
    %c0_i32 = arith.constant 0 : i32
    %c0_i32_0 = arith.constant 0 : i32
    %c0_i32_1 = arith.constant 0 : i32
    return %c0_i32, %c0_i32_0 : i32, i32
  }
  func.func @transform_17(%arg0: i32) -> (i32, i32, i32) {
    %c0_i32 = arith.constant 0 : i32
    %c0_i32_0 = arith.constant 0 : i32
    %c0_i32_1 = arith.constant 0 : i32
    %c0_i32_2 = arith.constant 0 : i32
    return %c0_i32, %c0_i32_0, %c0_i32_1 : i32, i32, i32
  }
  func.func @transform_18(%arg0: i32) -> (i32, i32) {
    %c0_i32 = arith.constant 0 : i32
    %c0_i32_0 = arith.constant 0 : i32
    %c0_i32_1 = arith.constant 0 : i32
    return %c0_i32, %c0_i32_0 : i32, i32
  }
  func.func @transform_19(%arg0: i32) -> (i32, i32, i32) {
    %c0_i32 = arith.constant 0 : i32
    %c0_i32_0 = arith.constant 0 : i32
    %c0_i32_1 = arith.constant 0 : i32
    %c0_i32_2 = arith.constant 0 : i32
    return %c0_i32, %c0_i32_0, %c0_i32_1 : i32, i32, i32
  }
  func.func @transform_20(%arg0: i32) -> (i32, i32) {
    %c0_i32 = arith.constant 0 : i32
    %c0_i32_0 = arith.constant 0 : i32
    %c0_i32_1 = arith.constant 0 : i32
    return %c0_i32, %c0_i32_0 : i32, i32
  }
  func.func @transform_21(%arg0: i32) -> (i32, i32, i32) {
    %c0_i32 = arith.constant 0 : i32
    %c0_i32_0 = arith.constant 0 : i32
    %c0_i32_1 = arith.constant 0 : i32
    %c0_i32_2 = arith.constant 0 : i32
    return %c0_i32, %c0_i32_0, %c0_i32_1 : i32, i32, i32
  }
  func.func @transform_22(%arg0: i32) -> (i32, i32) {
    %c0_i32 = arith.constant 0 : i32
    %c0_i32_0 = arith.constant 0 : i32
    %c0_i32_1 = arith.constant 0 : i32
    return %c0_i32, %c0_i32_0 : i32, i32
  }
  func.func @transform_23(%arg0: i32) -> (i32, i32, i32) {
    %c0_i32 = arith.constant 0 : i32
    %c0_i32_0 = arith.constant 0 : i32
    %c0_i32_1 = arith.constant 0 : i32
    %c0_i32_2 = arith.constant 0 : i32
    return %c0_i32, %c0_i32_0, %c0_i32_1 : i32, i32, i32
  }
  func.func @transform_24(%arg0: i32) -> (i32, i32) {
    %c0_i32 = arith.constant 0 : i32
    %c0_i32_0 = arith.constant 0 : i32
    %c0_i32_1 = arith.constant 0 : i32
    return %c0_i32, %c0_i32_0 : i32, i32
  }
  func.func @transform_25(%arg0: i32) -> (i32, i32, i32) {
    %c0_i32 = arith.constant 0 : i32
    %c0_i32_0 = arith.constant 0 : i32
    %c0_i32_1 = arith.constant 0 : i32
    %c0_i32_2 = arith.constant 0 : i32
    return %c0_i32, %c0_i32_0, %c0_i32_1 : i32, i32, i32
  }
  func.func @transform_26(%arg0: i32) -> (i32, i32, i32) {
    %c0_i32 = arith.constant 0 : i32
    %c0_i32_0 = arith.constant 0 : i32
    %c0_i32_1 = arith.constant 0 : i32
    %c0_i32_2 = arith.constant 0 : i32
    return %c0_i32, %c0_i32_0, %c0_i32_1 : i32, i32, i32
  }
  func.func @transform_27(%arg0: i32) -> (i32, i32, i32) {
    %c0_i32 = arith.constant 0 : i32
    %c0_i32_0 = arith.constant 0 : i32
    %c0_i32_1 = arith.constant 0 : i32
    %c0_i32_2 = arith.constant 0 : i32
    return %c0_i32, %c0_i32_0, %c0_i32_1 : i32, i32, i32
  }
  func.func @transform_28(%arg0: i32) -> (i32, i32, i32) {
    %c0_i32 = arith.constant 0 : i32
    %c0_i32_0 = arith.constant 0 : i32
    %c0_i32_1 = arith.constant 0 : i32
    %c0_i32_2 = arith.constant 0 : i32
    return %c0_i32, %c0_i32_0, %c0_i32_1 : i32, i32, i32
  }
  func.func @transform_29(%arg0: i32) -> (i32, i32, i32) {
    %c0_i32 = arith.constant 0 : i32
    %c0_i32_0 = arith.constant 0 : i32
    %c0_i32_1 = arith.constant 0 : i32
    %c0_i32_2 = arith.constant 0 : i32
    return %c0_i32, %c0_i32_0, %c0_i32_1 : i32, i32, i32
  }
  func.func @transform_30(%arg0: i32) -> (i32, i32, i32) {
    %c0_i32 = arith.constant 0 : i32
    %c0_i32_0 = arith.constant 0 : i32
    %c0_i32_1 = arith.constant 0 : i32
    %c0_i32_2 = arith.constant 0 : i32
    return %c0_i32, %c0_i32_0, %c0_i32_1 : i32, i32, i32
  }
  func.func @transform_31(%arg0: i32) -> (i32, i32, i32) {
    %c0_i32 = arith.constant 0 : i32
    %c0_i32_0 = arith.constant 0 : i32
    %c0_i32_1 = arith.constant 0 : i32
    %c0_i32_2 = arith.constant 0 : i32
    return %c0_i32, %c0_i32_0, %c0_i32_1 : i32, i32, i32
  }
  func.func @transform_32(%arg0: i32) -> (i32, i32, i32) {
    %c0_i32 = arith.constant 0 : i32
    %c0_i32_0 = arith.constant 0 : i32
    %c0_i32_1 = arith.constant 0 : i32
    %c0_i32_2 = arith.constant 0 : i32
    return %c0_i32, %c0_i32_0, %c0_i32_1 : i32, i32, i32
  }
  func.func @transform_33(%arg0: i32) -> (i32, i32, i32) {
    %c0_i32 = arith.constant 0 : i32
    %c0_i32_0 = arith.constant 0 : i32
    %c0_i32_1 = arith.constant 0 : i32
    %c0_i32_2 = arith.constant 0 : i32
    return %c0_i32, %c0_i32_0, %c0_i32_1 : i32, i32, i32
  }
  func.func @transform_34(%arg0: i32) -> (i32, i32, i32) {
    %c0_i32 = arith.constant 0 : i32
    %c0_i32_0 = arith.constant 0 : i32
    %c0_i32_1 = arith.constant 0 : i32
    %c0_i32_2 = arith.constant 0 : i32
    return %c0_i32, %c0_i32_0, %c0_i32_1 : i32, i32, i32
  }
  func.func @transform_35(%arg0: i32) -> (i32, i32, i32) {
    %c0_i32 = arith.constant 0 : i32
    %c0_i32_0 = arith.constant 0 : i32
    %c0_i32_1 = arith.constant 0 : i32
    %c0_i32_2 = arith.constant 0 : i32
    return %c0_i32, %c0_i32_0, %c0_i32_1 : i32, i32, i32
  }
  func.func @transform_36(%arg0: i32) -> (i32, i32, i32) {
    %c0_i32 = arith.constant 0 : i32
    %c0_i32_0 = arith.constant 0 : i32
    %c0_i32_1 = arith.constant 0 : i32
    %c0_i32_2 = arith.constant 0 : i32
    return %c0_i32, %c0_i32_0, %c0_i32_1 : i32, i32, i32
  }
  func.func @transform_37(%arg0: i32) -> (i32, i32, i32) {
    %c0_i32 = arith.constant 0 : i32
    %c0_i32_0 = arith.constant 0 : i32
    %c0_i32_1 = arith.constant 0 : i32
    %c0_i32_2 = arith.constant 0 : i32
    return %c0_i32, %c0_i32_0, %c0_i32_1 : i32, i32, i32
  }
  func.func @transform_38(%arg0: i32) -> (i32, i32, i32) {
    %c0_i32 = arith.constant 0 : i32
    %c0_i32_0 = arith.constant 0 : i32
    %c0_i32_1 = arith.constant 0 : i32
    %c0_i32_2 = arith.constant 0 : i32
    return %c0_i32, %c0_i32_0, %c0_i32_1 : i32, i32, i32
  }
  func.func @transform_39(%arg0: i32) -> (i32, i32, i32) {
    %c0_i32 = arith.constant 0 : i32
    %c0_i32_0 = arith.constant 0 : i32
    %c0_i32_1 = arith.constant 0 : i32
    %c0_i32_2 = arith.constant 0 : i32
    return %c0_i32, %c0_i32_0, %c0_i32_1 : i32, i32, i32
  }
  func.func @transform_40(%arg0: i32) -> (i32, i32, i32) {
    %c0_i32 = arith.constant 0 : i32
    %c0_i32_0 = arith.constant 0 : i32
    %c0_i32_1 = arith.constant 0 : i32
    %c0_i32_2 = arith.constant 0 : i32
    return %c0_i32, %c0_i32_0, %c0_i32_1 : i32, i32, i32
  }
  func.func @transform_41(%arg0: i32) -> (i32, i32, i32) {
    %c0_i32 = arith.constant 0 : i32
    %c0_i32_0 = arith.constant 0 : i32
    %c0_i32_1 = arith.constant 0 : i32
    %c0_i32_2 = arith.constant 0 : i32
    return %c0_i32, %c0_i32_0, %c0_i32_1 : i32, i32, i32
  }
  func.func @transform_42(%arg0: i32) -> (i32, i32, i32) {
    %c0_i32 = arith.constant 0 : i32
    %c0_i32_0 = arith.constant 0 : i32
    %c0_i32_1 = arith.constant 0 : i32
    %c0_i32_2 = arith.constant 0 : i32
    return %c0_i32, %c0_i32_0, %c0_i32_1 : i32, i32, i32
  }
  func.func @transform_43(%arg0: i32) -> (i32, i32, i32) {
    %c0_i32 = arith.constant 0 : i32
    %c0_i32_0 = arith.constant 0 : i32
    %c0_i32_1 = arith.constant 0 : i32
    return %arg0, %c0_i32, %c0_i32_0 : i32, i32, i32
  }
}

</mosaic_0001>

<bundles_post_ra>
// kernel: spatio_temporal_net.1
= control target key start
LH: loop header
LB: loop body
LE: loop exit
PB: predicated region body
PF: predicated region fallthrough
CT: control target
= control target key end

     0   :  { %s16253_s6 = smov 1   ;;  %s16254_s10 = smov 2   ;;  %s19200_s0 = inlined_call_operand.smem [shape: u32[44], index: -1, kind: input, shape index: {}] }
   0x1   :  { %s16307_s5 = sld [smem:[%s19200_s0]]   ;;  %s16255_s14 = smov 3  }
   0x2   :  { %s16312_s9 = sld [smem:[%s19200_s0 + %s16253_s6]]   ;;  %s16256_s18 = smov 4  }
   0x3   :  { %s16317_s13 = sld [smem:[%s19200_s0 + %s16254_s10]]   ;;  %s16257_s22 = smov 5  }
   0x4   :  { %s16322_s17 = sld [smem:[%s19200_s0 + %s16255_s14]]   ;;  %s16258_s26 = smov 6  }
   0x5   :  { %s16327_s21 = sld [smem:[%s19200_s0 + %s16256_s18]]   ;;  %s16259_s30 = smov 7  }
   0x6   :  { %s16332_s25 = sld [smem:[%s19200_s0 + %s16257_s22]]   ;;  %s16260_s4 = smov 8  }
   0x7   :  { %s16337_s29 = sld [smem:[%s19200_s0 + %s16258_s26]]   ;;  %s16261_s10 = smov 9  }
   0x8   :  { %s16342_s3 = sld [smem:[%s19200_s0 + %s16259_s30]]   ;;  %s16262_s15 = smov 10  }
   0x9   :  { %s16347_s8 = sld [smem:[%s19200_s0 + %s16260_s4]]   ;;  %s16263_s20 = smov 11  }
   0xa   :  { %19235 = sst [smem:[#allocation4_spill]] %s16322_s17  ;;  %s16264_s26 = smov 12  }
   0xb   :  { %19236 = sst [smem:[#allocation5_spill]] %s16327_s21  ;;  %s16265_s1 = smov 13  }
   0xc   :  { %19237 = sst [smem:[#allocation6_spill]] %s16332_s25  ;;  %s16266_s7 = smov 14  }
   0xd   :  { %19238 = sst [smem:[#allocation7_spill]] %s16337_s29  ;;  %s16268_s22 = smov 16  }
   0xe   :  { %19239 = sst [smem:[#allocation8_spill]] %s16342_s3  ;;  %s16269_s28 = smov 17  }
   0xf   :  { %s16352_s14 = sld [smem:[%s19200_s0 + %s16261_s10]]  }
  0x10   :  { %s16357_s19 = sld [smem:[%s19200_s0 + %s16262_s15]]   ;;  %s16267_s15 = smov 15  }
  0x11   :  { %s16362_s24 = sld [smem:[%s19200_s0 + %s16263_s20]]  }
  0x12   :  { %s16367_s30 = sld [smem:[%s19200_s0 + %s16264_s26]]  }
  0x13   :  { %s16372_s6 = sld [smem:[%s19200_s0 + %s16265_s1]]  }
  0x14   :  { %s16377_s12 = sld [smem:[%s19200_s0 + %s16266_s7]]   ;;  %s16270_s7 = smov 18  }
  0x15   :  { %s16382_s20 = sld [smem:[%s19200_s0 + %s16267_s15]]   ;;  %s16271_s15 = smov 19  }
  0x16   :  { %s16387_s27 = sld [smem:[%s19200_s0 + %s16268_s22]]   ;;  %s16272_s22 = smov 20  }
  0x17   :  { %s16392_s4 = sld [smem:[%s19200_s0 + %s16269_s28]]   ;;  %s16273_s28 = smov 21  }
  0x18   :  { %s16397_s3 = sld [smem:[%s19200_s0 + %s16270_s7]]   ;;  %s16274_s7 = smov 22  }
  0x19   :  { %s16402_s29 = sld [smem:[%s19200_s0 + %s16271_s15]]   ;;  %s16275_s15 = smov 23  }
  0x1a   :  { %19240 = sst [smem:[#allocation9_spill]] %s16377_s12 }
  0x1b   :  { %19241 = sst [smem:[#allocation10_spill]] %s16382_s20 }
  0x1c   :  { %19242 = sst [smem:[#allocation11_spill]] %s16387_s27 }
  0x1d   :  { %19243 = sst [smem:[#allocation12_spill]] %s16392_s4 }
  0x1e   :  { %19244 = sst [smem:[#allocation13_spill]] %s16397_s3 }
  0x1f   :  { %19245 = sst [smem:[#allocation14_spill]] %s16402_s29 }
  0x20   :  { %s16407_s21 = sld [smem:[%s19200_s0 + %s16272_s22]]   ;;  %s16276_s22 = smov 24  }
  0x21   :  { %s16412_s25 = sld [smem:[%s19200_s0 + %s16273_s28]]   ;;  %s16277_s28 = smov 25  }
  0x22   :  { %s16417_s3 = sld [smem:[%s19200_s0 + %s16274_s7]]   ;;  %s16278_s7 = smov 26  }
  0x23   :  { %s16422_s29 = sld [smem:[%s19200_s0 + %s16275_s15]]   ;;  %s16279_s15 = smov 27  }
  0x26   :  { %19246 = sst [smem:[#allocation15_spill]] %s16407_s21 }
  0x27   :  { %19247 = sst [smem:[#allocation16_spill]] %s16412_s25 }
  0x28   :  { %19248 = sst [smem:[#allocation17_spill]] %s16417_s3 }
  0x29   :  { %19249 = sst [smem:[#allocation18_spill]] %s16422_s29 }
  0x2a   :  { %s16427_s21 = sld [smem:[%s19200_s0 + %s16276_s22]]   ;;  %s16280_s22 = smov 28  }
  0x2b   :  { %s16432_s25 = sld [smem:[%s19200_s0 + %s16277_s28]]   ;;  %s16281_s28 = smov 29  }
  0x2c   :  { %s16437_s3 = sld [smem:[%s19200_s0 + %s16278_s7]]   ;;  %s16282_s7 = smov 30  }
  0x2d   :  { %s16442_s29 = sld [smem:[%s19200_s0 + %s16279_s15]]   ;;  %s16283_s15 = smov 31  }
  0x2e   :  { %s16462_s4 = sld [smem:[%s19200_s0 + %s16283_s15]]   ;;  %s16287_s15 = smov 35  }
  0x2f   :  { %s16482_s17 = sld [smem:[%s19200_s0 + %s16287_s15]]   ;;  %s16291_s15 = smov 39  }
  0x30   :  { %19250 = sst [smem:[#allocation19_spill]] %s16427_s21 }
  0x31   :  { %19251 = sst [smem:[#allocation20_spill]] %s16432_s25 }
  0x32   :  { %19252 = sst [smem:[#allocation21_spill]] %s16437_s3 }
  0x33   :  { %s16447_s21 = sld [smem:[%s19200_s0 + %s16280_s22]]   ;;  %s16284_s22 = smov 32  }
  0x34   :  { %s16452_s25 = sld [smem:[%s19200_s0 + %s16281_s28]]   ;;  %s16285_s28 = smov 33  }
  0x35   :  { %s16457_s3 = sld [smem:[%s19200_s0 + %s16282_s7]]   ;;  %s16286_s7 = smov 34  }
  0x36   :  { %s16467_s27 = sld [smem:[%s19200_s0 + %s16284_s22]]   ;;  %s16288_s22 = smov 36  }
  0x37   :  { %s16472_s20 = sld [smem:[%s19200_s0 + %s16285_s28]]   ;;  %s16289_s28 = smov 37  }
  0x38   :  { %s16477_s12 = sld [smem:[%s19200_s0 + %s16286_s7]]   ;;  %s16290_s7 = smov 38  }
  0x39   :  { %19257 = sst [smem:[#allocation26_spill]] %s16482_s17 }
  0x3a   :  { %s16502_s17 = sld [smem:[%s19200_s0 + %s16291_s15]]   ;;  %s16295_s15 = smov 43  }
  0x3b   :  { %19253 = sst [smem:[#allocation22_spill]] %s16457_s3 }
  0x3c   :  { %19254 = sst [smem:[#allocation23_spill]] %s16467_s27 }
  0x3d   :  { %19255 = sst [smem:[#allocation24_spill]] %s16472_s20 }
  0x3e   :  { %19256 = sst [smem:[#allocation25_spill]] %s16477_s12 }
  0x3f   :  { %s16487_s27 = sld [smem:[%s19200_s0 + %s16288_s22]]   ;;  %s16292_s22 = smov 40  }
  0x40   :  { %s16492_s20 = sld [smem:[%s19200_s0 + %s16289_s28]]   ;;  %s16293_s28 = smov 41  }
  0x41   :  { %s16497_s12 = sld [smem:[%s19200_s0 + %s16290_s7]]   ;;  %s16294_s7 = smov 42  }
  0x42   :  { %19261 = sst [smem:[#allocation30_spill]] %s16502_s17 }
  0x43   :  { %s16522_s17 = sld [smem:[%s19200_s0 + %s16295_s15]]  }
  0x45   :  { %19258 = sst [smem:[#allocation27_spill]] %s16487_s27 }
  0x46   :  { %19259 = sst [smem:[#allocation28_spill]] %s16492_s20 }
  0x47   :  { %19260 = sst [smem:[#allocation29_spill]] %s16497_s12 }
  0x48   :  { %s16507_s27 = sld [smem:[%s19200_s0 + %s16292_s22]]   ;;  %s16524_s22 = smov 0  }
  0x49   :  { %s16512_s20 = sld [smem:[%s19200_s0 + %s16293_s28]]  }
  0x4a   :  { %s16517_s12 = sld [smem:[%s19200_s0 + %s16294_s7]]  }
  0x4b LB: > { %s19262_s3 = sld [smem:[#allocation22_spill]]  ;;  %s13852_s23 = sadd.s32 4294967295, %s16251_s22   ;;  %s16251_s22 = sphi %s16524_s22, %s97_s22  }
  0x4c   : > { %p13856_p0 = scmp.ge.s32.totalorder %s16251_s22, 1  ;;  %p1248_p1 = scmp.lt.s32.totalorder %s16251_s22, 3 }
  0x4e   : > { %p1249_p2 = pnand %p13856_p0, %p1248_p1 }
  0x4f   : > { %p1383_p3 = scmp.lt.s32.totalorder (!%p1249_p2), %s13852_s23, 1  ;;  %s19263_s2 = sld [smem:[#allocation23_spill]] (!%p1249_p2) }
  0x50   : > { %1252 = sbr.rel (%p1249_p2) target bundleno = 12168 (0x2f88), region = 192  ;;  %s19264_s7 = sld [smem:[#allocation4_spill]] (!%p1249_p2) }
  0x51   : > { %s19265_s11 = sld [smem:[#allocation24_spill]] (!%p1249_p2) }
  0x52   : > { %s19266_s15 = sld [smem:[#allocation25_spill]] (!%p1249_p2) }
  0x53   : > { %s19267_s16 = sld [smem:[#allocation9_spill]] (!%p1249_p2) }
  0x54   : > { %s19268_s18 = sld [smem:[#allocation10_spill]] (!%p1249_p2) }
  0x55   : > { %v1440_v0 = vld [vmem:[%s16347_s8] sm:$0xff]  ;;  %s19291_s23 = smov (!%p1383_p3, %s13852_s23), 1  ;;  %vm1448_vm0 = vcmask 64512   ;;  %vm1578_vm1 = vcmask 261120   ;;  %vm16297_vm2 = vmmov 0   ;;  %vm11509_vm3 = vcmask 253952  }
  0x56   : > { %14849 = vmatprep.subr.mxu0 %v1440_v0  ;;  %14863 = vmatprep.subr.mxu1 %v1440_v0  ;;  %s16536_s0 = sshll.u32 %s19291_s23, 6  ;;  %v16549_v10 = vld [vmem:[%s16352_s14] ss:$0 sm:$0xff] }
  0x57   : > { %14850 = vmatpush3.msra.mxu0 %v1440_v0  ;;  %14864 = vmatpush3.msra.mxu1 %v1440_v0  ;;  %s1387_s26 = scalar_lea.vmem %s16307_s5, %s16536_s0  ;;  %s1392_s28 = scalar_lea.vmem %s16312_s9, %s16536_s0 }
  0x58   : > { %v1424_v1 = vld [vmem:[%s1387_s26] sm:$0xff]  ;;  %v1425_v2 = vld [vmem:[%s1387_s26 + $0x8] sm:$0xff]  ;;  %v1426_v3 = vld [vmem:[%s1387_s26 + $0x10] sm:$0xff]  ;;  %s17273_s1 = scalar_lea.vmem %s16317_s13, %s16536_s0  ;;  %s17840_s10 = scalar_lea.vmem %s19264_s7, %s16536_s0 }
  0x59   : > { %14851 = vmatprep.mubr.msk.f32.mxu0 %vm1448_vm0, %v1424_v1  ;;  %v1427_v4 = vld [vmem:[%s1387_s26 + $0x18] sm:$0xff]  ;;  %v1428_v5 = vld [vmem:[%s1387_s26 + $0x20] sm:$0xff]  ;;  %v1429_v6 = vld [vmem:[%s1387_s26 + $0x28] sm:$0xff]  ;;  %s19272_s7 = sld [smem:[#allocation14_spill]] }
  0x5a   : > { %14852 = vmatmul.mubr.msk.f32.vlgmr.msra.gmra.mxu0 %vm1448_vm0, %v1425_v2  ;;  %v1430_v7 = vld [vmem:[%s1387_s26 + $0x30] sm:$0xff]  ;;  %v1431_v8 = vld [vmem:[%s1387_s26 + $0x38] sm:$0xff]  ;;  %v1432_v34 = vld [vmem:[%s1392_s28] sm:$0xff]  ;;  %s19269_s26 = sld [smem:[#allocation11_spill]] }
  0x5b   : > { %14854 = vmatprep.mubr.msk.f32.mxu0 %vm1448_vm0, %v1426_v3  ;;  %14865 = vmatprep.mubr.msk.f32.mxu1 %vm1448_vm0, %v1432_v34  ;;  %v1433_v35 = vld [vmem:[%s1392_s28 + $0x8] sm:$0xff]  ;;  %v1434_v36 = vld [vmem:[%s1392_s28 + $0x10] sm:$0xff]  ;;  %v1435_v37 = vld [vmem:[%s1392_s28 + $0x18] sm:$0xff] }
  0x5c   : > { %14866 = vmatmul.mubr.msk.f32.vlgmr.msra.gmra.mxu1 %vm1448_vm0, %v1433_v35  ;;  %v1436_v38 = vld [vmem:[%s1392_s28 + $0x20] sm:$0xff]  ;;  %v1437_v39 = vld [vmem:[%s1392_s28 + $0x28] sm:$0xff]  ;;  %v1438_v40 = vld [vmem:[%s1392_s28 + $0x30] sm:$0xff] }
  0x5d   : > { %14868 = vmatprep.mubr.msk.f32.mxu1 %vm1448_vm0, %v1434_v36  ;;  %v1439_v41 = vld [vmem:[%s1392_s28 + $0x38] sm:$0xff]  ;;  %s19270_s28 = sld [smem:[#allocation12_spill]] }
  0x5e   : > { %14855 = vmatmul.mubr.msk.f32.gmra.mxu0 %vm1448_vm0, %v1427_v4 }
  0x5f   : > { %14857 = vmatprep.mubr.msk.f32.mxu0 %vm1448_vm0, %v1428_v5 }
  0x60   : > { %14869 = vmatmul.mubr.msk.f32.gmra.mxu1 %vm1448_vm0, %v1435_v37 }
  0x61   : > { %14871 = vmatprep.mubr.msk.f32.mxu1 %vm1448_vm0, %v1436_v38 }
  0x62   : > { %14858 = vmatmul.mubr.msk.f32.gmra.mxu0 %vm1448_vm0, %v1429_v6 }
  0x63   : > { %14860 = vmatprep.mubr.msk.f32.mxu0 %vm1448_vm0, %v1430_v7 }
  0x64   : > { %14872 = vmatmul.mubr.msk.f32.gmra.mxu1 %vm1448_vm0, %v1437_v39 }
  0x65   : > { %14874 = vmatprep.mubr.msk.f32.mxu1 %vm1448_vm0, %v1438_v40 }
  0x66   : > { %14861 = vmatmul.mubr.msk.f32.gmra.mxu0 %vm1448_vm0, %v1431_v8 }
  0x68   : > { %14875 = vmatmul.mubr.msk.f32.gmra.mxu1 %vm1448_vm0, %v1439_v41 }
 0x11a   : > { %v14853_v9 = vpop.f32.mrf.mxu0 }
 0x11b   : > { %v1545_v14 = vadd.f32 %v14853_v9, %v16549_v10 }
 0x11c   : > { %v1539_v11 = vpop.f32.mrf.mxu0 }
 0x11d   : > { %v1540_v12 = vadd.f32 %v16549_v10, %v1539_v11  ;;  %v1582_v21 = vsel %vm1578_vm1, %v1545_v14, 0.0 }
 0x11e   : > { %v14856_v13 = vpop.f32.mrf.mxu0 }
 0x11f   : > { %v1579_v15 = vsel %vm1578_vm1, %v1540_v12, 0.0  ;;  %v1555_v19 = vadd.f32 %v14856_v13, %v16549_v10 }
 0x120   : > { %v1549_v16 = vpop.f32.mrf.mxu0  ;;  %1580 = vadd.xlane.f32.xlu0 %v1579_v15 }
 0x121   : > { %v1550_v17 = vadd.f32 %v16549_v10, %v1549_v16  ;;  %v1588_v26 = vsel %vm1578_vm1, %v1555_v19, 0.0 }
 0x122   : > { %v14859_v18 = vpop.f32.mrf.mxu0 }
 0x123   : > { %v1585_v20 = vsel %vm1578_vm1, %v1550_v17, 0.0  ;;  %v16559_v23 = vadd.f32 %v14859_v18, %v16549_v10 }
 0x124   : > { %v1559_v22 = vpop.f32.mrf.mxu0  ;;  %1586 = vadd.xlane.f32.xlu1 %v1585_v20  ;;  %1583 = vadd.xlane.f32.xlu0 %v1582_v21  ;;  %v1983_v20 = vld [vmem:[%s16357_s19 + $0x10] sm:$0xff]  ;;  %v1982_v21 = vld [vmem:[%s16357_s19 + $0x8] sm:$0xff] }
 0x125   : > { %v1560_v24 = vadd.f32 %v16549_v10, %v1559_v22  ;;  %v1594_v31 = vsel %vm1578_vm1, %v16559_v23, 0.0  ;;  %v1981_v22 = vld [vmem:[%s16357_s19] sm:$0xff] }
 0x126   : > { %v14862_v25 = vpop.f32.mrf.mxu0 }
 0x127   : > { %v1591_v27 = vsel %vm1578_vm1, %v1560_v24, 0.0  ;;  %v16565_v29 = vadd.f32 %v14862_v25, %v16549_v10 }
 0x128   : > { %v1569_v28 = vpop.f32.mrf.mxu0  ;;  %1589 = vadd.xlane.f32.xlu1 %v1588_v26  ;;  %1592 = vadd.xlane.f32.xlu0 %v1591_v27 }
 0x129   : > { %v1570_v30 = vadd.f32 %v16549_v10, %v1569_v28  ;;  %v1600_v33 = vsel %vm1578_vm1, %v16565_v29, 0.0 }
 0x12b   : > { %v1597_v32 = vsel %vm1578_vm1, %v1570_v30, 0.0 }
 0x12c   : > { %1595 = vadd.xlane.f32.xlu1 %v1594_v31  ;;  %1598 = vadd.xlane.f32.xlu0 %v1597_v32 }
 0x130   : > { %1601 = vadd.xlane.f32.xlu1 %v1600_v33 }
 0x1a9   : > { %v1581_v42 = vpop.xlane.xlu0 %1580 }
 0x1aa   : > { %v1604_v43 = vmul.f32 0.03125, %v1581_v42 }
 0x1ac   : > { %v16583_v44 = vsub.f32 %v1540_v12, %v1604_v43 }
 0x1ad   : > { %v1587_v45 = vpop.xlane.xlu1 %1586  ;;  %v1584_v46 = vpop.xlane.xlu0 %1583 }
 0x1ae   : > { %v1606_v47 = vmul.f32 0.03125, %v1587_v45  ;;  %v1605_v48 = vmul.f32 0.03125, %v1584_v46  ;;  %v1620_v49 = vmul.f32 %v16583_v44, %v16583_v44 }
 0x1b0   : > { %v16587_v50 = vsub.f32 %v1550_v17, %v1606_v47  ;;  %v16589_v51 = vsub.f32 %v1545_v14, %v1605_v48  ;;  %v1628_v52 = vsel %vm1578_vm1, %v1620_v49, 0.0 }
 0x1b1   : > { %v1590_v53 = vpop.xlane.xlu1 %1589  ;;  %1629 = vadd.xlane.f32.xlu0 %v1628_v52  ;;  %v1593_v54 = vpop.xlane.xlu0 %1592 }
 0x1b2   : > { %v1607_v55 = vmul.f32 0.03125, %v1590_v53  ;;  %v1608_v56 = vmul.f32 0.03125, %v1593_v54  ;;  %v1622_v57 = vmul.f32 %v16587_v50, %v16587_v50  ;;  %v1621_v58 = vmul.f32 %v16589_v51, %v16589_v51 }
 0x1b4   : > { %v16596_v59 = vsub.f32 %v1555_v19, %v1607_v55  ;;  %v16598_v60 = vsub.f32 %v1560_v24, %v1608_v56  ;;  %v1634_v61 = vsel %vm1578_vm1, %v1622_v57, 0.0  ;;  %v1631_v62 = vsel %vm1578_vm1, %v1621_v58, 0.0  ;;  %v1984_v19 = vld [vmem:[%s16357_s19 + $0x18] sm:$0xff] }
 0x1b5   : > { %v1596_v63 = vpop.xlane.xlu1 %1595  ;;  %1635 = vadd.xlane.f32.xlu0 %v1634_v61  ;;  %1632 = vadd.xlane.f32.xlu1 %v1631_v62  ;;  %v1599_v0 = vpop.xlane.xlu0 %1598 }
 0x1b6   : > { %v1609_v1 = vmul.f32 0.03125, %v1596_v63  ;;  %v1610_v2 = vmul.f32 0.03125, %v1599_v0  ;;  %v1623_v3 = vmul.f32 %v16596_v59, %v16596_v59  ;;  %v1624_v4 = vmul.f32 %v16598_v60, %v16598_v60  ;;  %14877 = vmatprep.subr.mxu0 %v1984_v19  ;;  %14897 = vmatprep.subr.mxu1 %v1984_v19 }
 0x1b7   : > { %14878 = vmatpush3.msra.mxu0 %v1984_v19  ;;  %14898 = vmatpush3.msra.mxu1 %v1984_v19 }
 0x1b8   : > { %v16607_v5 = vsub.f32 %v16559_v23, %v1609_v1  ;;  %v16609_v6 = vsub.f32 %v1570_v30, %v1610_v2  ;;  %v1637_v7 = vsel %vm1578_vm1, %v1623_v3, 0.0  ;;  %v1640_v8 = vsel %vm1578_vm1, %v1624_v4, 0.0  ;;  %14879 = vmatprep.subr.mxu0 %v1983_v20  ;;  %14899 = vmatprep.subr.mxu1 %v1983_v20  ;;  %v14867_v23 = vpop.f32.mrf.mxu1 }
 0x1b9   : > { %v1602_v9 = vpop.xlane.xlu1 %1601  ;;  %1638 = vadd.xlane.f32.xlu1 %v1637_v7  ;;  %1641 = vadd.xlane.f32.xlu0 %v1640_v8  ;;  %v16630_v24 = vadd.f32 %v14867_v23, %v16549_v10 }
 0x1ba   : > { %v1611_v11 = vmul.f32 0.03125, %v1602_v9  ;;  %v1625_v12 = vmul.f32 %v16607_v5, %v16607_v5  ;;  %v1626_v13 = vmul.f32 %v16609_v6, %v16609_v6  ;;  %14880 = vmatpush3.msra.mxu0 %v1983_v20  ;;  %14900 = vmatpush3.msra.mxu1 %v1983_v20  ;;  %v1814_v25 = vpop.f32.mrf.mxu1 }
 0x1bb   : > { %14881 = vmatprep.subr.mxu0 %v1982_v21  ;;  %14901 = vmatprep.subr.mxu1 %v1982_v21  ;;  %v16633_v26 = vadd.f32 %v16549_v10, %v1814_v25  ;;  %v1856_v27 = vsel %vm1578_vm1, %v16630_v24, 0.0 }
 0x1bc   : > { %v16618_v14 = vsub.f32 %v16565_v29, %v1611_v11  ;;  %v1643_v15 = vsel %vm1578_vm1, %v1625_v12, 0.0  ;;  %v1646_v16 = vsel %vm1578_vm1, %v1626_v13, 0.0  ;;  %14882 = vmatpush3.msra.mxu0 %v1982_v21  ;;  %14902 = vmatpush3.msra.mxu1 %v1982_v21  ;;  %v14870_v28 = vpop.f32.mrf.mxu1 }
 0x1bd   : > { %1644 = vadd.xlane.f32.xlu1 %v1643_v15  ;;  %1647 = vadd.xlane.f32.xlu0 %v1646_v16  ;;  %v16638_v29 = vadd.f32 %v14870_v28, %v16549_v10  ;;  %v1853_v30 = vsel %vm1578_vm1, %v16633_v26, 0.0  ;;  %v16670_v15 = vld [vmem:[%s16352_s14 + $0x1] ss:$0 sm:$0xff] }
 0x1be   : > { %v1627_v17 = vmul.f32 %v16618_v14, %v16618_v14  ;;  %14883 = vmatprep.subr.mxu0 %v1981_v22  ;;  %14903 = vmatprep.subr.mxu1 %v1981_v22  ;;  %v1824_v31 = vpop.f32.mrf.mxu1 }
 0x1bf   : > { %14884 = vmatpush3.msra.mxu0 %v1981_v22  ;;  %14904 = vmatpush3.msra.mxu1 %v1981_v22  ;;  %v16643_v32 = vadd.f32 %v16549_v10, %v1824_v31  ;;  %v1862_v33 = vsel %vm1578_vm1, %v16638_v29, 0.0 }
 0x1c0   : > { %v1649_v18 = vsel %vm1578_vm1, %v1627_v17, 0.0  ;;  %v14873_v34 = vpop.f32.mrf.mxu1 }
 0x1c1   : > { %1650 = vadd.xlane.f32.xlu1 %v1649_v18  ;;  %1854 = vadd.xlane.f32.xlu0 %v1853_v30  ;;  %v16648_v35 = vadd.f32 %v14873_v34, %v16549_v10  ;;  %v1859_v36 = vsel %vm1578_vm1, %v16643_v32, 0.0  ;;  %v16674_v18 = vld [vmem:[%s16352_s14 + $0x2] ss:$0 sm:$0xff] }
 0x1c2   : > { %v1834_v37 = vpop.f32.mrf.mxu1 }
 0x1c3   : > { %v16653_v38 = vadd.f32 %v16549_v10, %v1834_v37  ;;  %v1868_v39 = vsel %vm1578_vm1, %v16648_v35, 0.0 }
 0x1c4   : > { %v14876_v40 = vpop.f32.mrf.mxu1 }
 0x1c5   : > { %1857 = vadd.xlane.f32.xlu1 %v1856_v27  ;;  %1860 = vadd.xlane.f32.xlu0 %v1859_v36  ;;  %v16658_v41 = vadd.f32 %v14876_v40, %v16549_v10  ;;  %v1865_v42 = vsel %vm1578_vm1, %v16653_v38, 0.0 }
 0x1c6   : > { %v1844_v43 = vpop.f32.mrf.mxu1 }
 0x1c7   : > { %v16663_v45 = vadd.f32 %v16549_v10, %v1844_v43  ;;  %v1874_v46 = vsel %vm1578_vm1, %v16658_v41, 0.0 }
 0x1c9   : > { %1863 = vadd.xlane.f32.xlu1 %v1862_v33  ;;  %1866 = vadd.xlane.f32.xlu0 %v1865_v42  ;;  %v1871_v47 = vsel %vm1578_vm1, %v16663_v45, 0.0 }
 0x1cd   : > { %1869 = vadd.xlane.f32.xlu1 %v1868_v39  ;;  %1872 = vadd.xlane.f32.xlu0 %v1871_v47 }
 0x1d1   : > { %1875 = vadd.xlane.f32.xlu1 %v1874_v46 }
 0x23a   : > { %v1630_v48 = vpop.xlane.xlu0 %1629 }
 0x23b   : > { %v1652_v49 = vmul.f32 0.03125, %v1630_v48 }
 0x23d   : > { %v1660_v52 = vadd.f32 1e-05, %v1652_v49 }
 0x23e   : > { %v1633_v53 = vpop.xlane.xlu1 %1632  ;;  %v1636_v54 = vpop.xlane.xlu0 %1635 }
 0x23f   : > { %15898 = vrsqrt.f32 %v1660_v52  ;;  %v1653_v55 = vmul.f32 0.03125, %v1633_v53  ;;  %v1654_v56 = vmul.f32 0.03125, %v1636_v54 }
 0x241   : > { %v1661_v57 = vadd.f32 1e-05, %v1653_v55  ;;  %v1662_v58 = vadd.f32 1e-05, %v1654_v56 }
 0x242   : > { %v1639_v10 = vpop.xlane.xlu1 %1638  ;;  %v1642_v61 = vpop.xlane.xlu0 %1641 }
 0x243   : > { %15900 = vrsqrt.f32 %v1661_v57  ;;  %v1655_v62 = vmul.f32 0.03125, %v1639_v10  ;;  %v1656_v63 = vmul.f32 0.03125, %v1642_v61 }
 0x244   : > { %15902 = vrsqrt.f32 %v1662_v58 }
 0x245   : > { %v1663_v0 = vadd.f32 1e-05, %v1655_v62  ;;  %v1664_v1 = vadd.f32 1e-05, %v1656_v63  ;;  %v16708_v63 = vld [vmem:[%s16362_s24] ss:$0 sm:$0xff] }
 0x246   : > { %v1645_v2 = vpop.xlane.xlu1 %1644  ;;  %v1648_v3 = vpop.xlane.xlu0 %1647 }
 0x247   : > { %15904 = vrsqrt.f32 %v1663_v0  ;;  %v1657_v4 = vmul.f32 0.03125, %v1645_v2  ;;  %v1658_v7 = vmul.f32 0.03125, %v1648_v3 }
 0x248   : > { %15906 = vrsqrt.f32 %v1664_v1 }
 0x249   : > { %v1665_v8 = vadd.f32 1e-05, %v1657_v4  ;;  %v1666_v9 = vadd.f32 1e-05, %v1658_v7 }
 0x24a   : > { %v1651_v11 = vpop.xlane.xlu1 %1650 }
 0x24b   : > { %15908 = vrsqrt.f32 %v1665_v8  ;;  %v1659_v12 = vmul.f32 0.03125, %v1651_v11 }
 0x24c   : > { %v15899_v13 = vpop.eup %15898  ;;  %15910 = vrsqrt.f32 %v1666_v9 }
 0x24d   : > { %v1667_v16 = vadd.f32 1e-05, %v1659_v12  ;;  %v1676_v17 = vmul.f32 %v15899_v13, %v16583_v44 }
 0x24e   : > { %v1858_v62 = vpop.xlane.xlu1 %1857 }
 0x24f   : > { %15912 = vrsqrt.f32 %v1667_v16  ;;  %v1692_v19 = vmul.f32 %v16670_v15, %v1676_v17  ;;  %v1878_v16 = vmul.f32 0.03125, %v1858_v62 }
 0x250   : > { %v15901_v20 = vpop.eup %15900 }
 0x251   : > { %v15903_v21 = vpop.eup %15902  ;;  %v1677_v22 = vmul.f32 %v15901_v20, %v16589_v51  ;;  %v1708_v23 = vadd.f32 %v16674_v18, %v1692_v19 }
 0x252   : > { %v1678_v25 = vmul.f32 %v15903_v21, %v16587_v50  ;;  %v1864_v7 = vpop.xlane.xlu1 %1863 }
 0x253   : > { %v1693_v27 = vmul.f32 %v16670_v15, %v1677_v22  ;;  %v1716_v28 = vmax.f32 %v1708_v23, 0.0 }
 0x254   : > { %v15905_v30 = vpop.eup %15904  ;;  %v1694_v31 = vmul.f32 %v16670_v15, %v1678_v25  ;;  %v1880_v25 = vmul.f32 0.03125, %v1864_v7 }
 0x255   : > { %v15907_v44 = vpop.eup %15906  ;;  %14885 = vmatprep.mubr.msk.f32.mxu0 %vm1578_vm1, %v1716_v28  ;;  %v1709_v33 = vadd.f32 %v16674_v18, %v1693_v27  ;;  %v1679_v34 = vmul.f32 %v15905_v30, %v16596_v59  ;;  %v16734_v30 = vsub.f32 %v16630_v24, %v1878_v16 }
 0x256   : > { %v1710_v36 = vadd.f32 %v16674_v18, %v1694_v31  ;;  %v1680_v51 = vmul.f32 %v15907_v44, %v16598_v60  ;;  %v1870_v27 = vpop.xlane.xlu1 %1869 }
 0x257   : > { %v1717_v37 = vmax.f32 %v1709_v33, 0.0  ;;  %v1695_v50 = vmul.f32 %v16670_v15, %v1679_v34 }
 0x258   : > { %v15909_v39 = vpop.eup %15908  ;;  %v1718_v40 = vmax.f32 %v1710_v36, 0.0  ;;  %v1696_v42 = vmul.f32 %v16670_v15, %v1680_v51 }
 0x259   : > { %v15911_v43 = vpop.eup %15910  ;;  %14886 = vmatmul.mubr.msk.f32.vlgmr.msra.gmra.mxu0 %vm1578_vm1, %v1717_v37  ;;  %v1711_v46 = vadd.f32 %v16674_v18, %v1695_v50  ;;  %v1681_v47 = vmul.f32 %v15909_v39, %v16607_v5  ;;  %v16750_v50 = vsub.f32 %v16638_v29, %v1880_v25 }
 0x25a   : > { %14888 = vmatprep.mubr.msk.f32.mxu0 %vm1578_vm1, %v1718_v40  ;;  %v1712_v59 = vadd.f32 %v16674_v18, %v1696_v42  ;;  %v1682_v60 = vmul.f32 %v15911_v43, %v16609_v6  ;;  %v1882_v40 = vmul.f32 0.03125, %v1870_v27  ;;  %v1894_v43 = vmul.f32 %v16734_v30, %v16734_v30 }
 0x25b   : > { %v1719_v48 = vmax.f32 %v1711_v46, 0.0  ;;  %v1697_v49 = vmul.f32 %v16670_v15, %v1681_v47  ;;  %v1876_v46 = vpop.xlane.xlu1 %1875 }
 0x25c   : > { %v15913_v52 = vpop.eup %15912  ;;  %v1720_v53 = vmax.f32 %v1712_v59, 0.0  ;;  %v1698_v54 = vmul.f32 %v16670_v15, %v1682_v60 }
 0x25d   : > { %14889 = vmatmul.mubr.msk.f32.gmra.mxu0 %vm1578_vm1, %v1719_v48  ;;  %v1713_v55 = vadd.f32 %v16674_v18, %v1697_v49  ;;  %v1683_v5 = vmul.f32 %v15913_v52, %v16618_v14  ;;  %v1855_v14 = vpop.xlane.xlu0 %1854  ;;  %v16767_v49 = vsub.f32 %v16648_v35, %v1882_v40  ;;  %v1884_v52 = vmul.f32 0.03125, %v1876_v46 }
 0x25e   : > { %14891 = vmatprep.mubr.msk.f32.mxu0 %vm1578_vm1, %v1720_v53  ;;  %v1714_v56 = vadd.f32 %v16674_v18, %v1698_v54  ;;  %v1877_v21 = vmul.f32 0.03125, %v1855_v14  ;;  %v1904_v53 = vsel %vm1578_vm1, %v1894_v43, 0.0  ;;  %v1896_v54 = vmul.f32 %v16750_v50, %v16750_v50 }
 0x25f   : > { %v1721_v57 = vmax.f32 %v1713_v55, 0.0  ;;  %v1699_v6 = vmul.f32 %v16670_v15, %v1683_v5  ;;  %v16779_v35 = vsub.f32 %v16658_v41, %v1884_v52 }
 0x260   : > { %v1722_v58 = vmax.f32 %v1714_v56, 0.0  ;;  %v16742_v36 = vsub.f32 %v16633_v26, %v1877_v21 }
 0x261   : > { %14892 = vmatmul.mubr.msk.f32.gmra.mxu0 %vm1578_vm1, %v1721_v57  ;;  %v1715_v10 = vadd.f32 %v16674_v18, %v1699_v6  ;;  %v1861_v12 = vpop.xlane.xlu0 %1860  ;;  %v1910_v57 = vsel %vm1578_vm1, %v1896_v54, 0.0  ;;  %v1898_v6 = vmul.f32 %v16767_v49, %v16767_v49  ;;  %v1900_v41 = vmul.f32 %v16779_v35, %v16779_v35 }
 0x262   : > { %14894 = vmatprep.mubr.msk.f32.mxu0 %vm1578_vm1, %v1722_v58  ;;  %v1879_v51 = vmul.f32 0.03125, %v1861_v12  ;;  %v1893_v60 = vmul.f32 %v16742_v36, %v16742_v36 }
 0x263   : > { %v1723_v61 = vmax.f32 %v1715_v10, 0.0 }
 0x264   : > { %v16760_v47 = vsub.f32 %v16643_v32, %v1879_v51  ;;  %v1901_v5 = vsel %vm1578_vm1, %v1893_v60, 0.0 }
 0x265   : > { %14895 = vmatmul.mubr.msk.f32.gmra.mxu0 %vm1578_vm1, %v1723_v61  ;;  %v1867_v33 = vpop.xlane.xlu0 %1866  ;;  %v1916_v61 = vsel %vm1578_vm1, %v1898_v6, 0.0 }
 0x266   : > { %v1881_v59 = vmul.f32 0.03125, %v1867_v33  ;;  %v1895_v56 = vmul.f32 %v16760_v47, %v16760_v47 }
 0x268   : > { %v16773_v32 = vsub.f32 %v16653_v38, %v1881_v59  ;;  %v1907_v38 = vsel %vm1578_vm1, %v1895_v56, 0.0 }
 0x269   : > { %v1873_v48 = vpop.xlane.xlu0 %1872 }
 0x26a   : > { %v1883_v55 = vmul.f32 0.03125, %v1873_v48  ;;  %v1897_v10 = vmul.f32 %v16773_v32, %v16773_v32 }
 0x26c   : > { %v16785_v58 = vsub.f32 %v16663_v45, %v1883_v55  ;;  %v1913_v62 = vsel %vm1578_vm1, %v1897_v10, 0.0  ;;  %v1922_v45 = vsel %vm1578_vm1, %v1900_v41, 0.0 }
 0x26e   : > { %v1899_v14 = vmul.f32 %v16785_v58, %v16785_v58 }
 0x319   : > { %v14887_v0 = vpop.f32.mrf.mxu0 }
 0x31a   : > { %v16711_v1 = vadd.f32 %v14887_v0, %v16708_v63  ;;  %v1919_v0 = vsel %vm1578_vm1, %v1899_v14, 0.0 }
 0x31b   : > { %v2082_v2 = vpop.f32.mrf.mxu0 }
 0x31c   : > { %v16714_v3 = vadd.f32 %v16708_v63, %v2082_v2  ;;  %v2124_v4 = vsel %vm1578_vm1, %v16711_v1, 0.0 }
 0x31d   : > { %2125 = vadd.xlane.f32.xlu1 %v2124_v4  ;;  %v14890_v8 = vpop.f32.mrf.mxu0 }
 0x31e   : > { %v16719_v9 = vadd.f32 %v14890_v8, %v16708_v63  ;;  %v2121_v11 = vsel %vm1578_vm1, %v16714_v3, 0.0 }
 0x31f   : > { %2122 = vadd.xlane.f32.xlu0 %v2121_v11  ;;  %v2092_v13 = vpop.f32.mrf.mxu0 }
 0x320   : > { %v16724_v17 = vadd.f32 %v16708_v63, %v2092_v13  ;;  %v2130_v19 = vsel %vm1578_vm1, %v16719_v9, 0.0 }
 0x321   : > { %2131 = vadd.xlane.f32.xlu1 %v2130_v19  ;;  %v14893_v20 = vpop.f32.mrf.mxu0 }
 0x322   : > { %v16729_v22 = vadd.f32 %v14893_v20, %v16708_v63  ;;  %v2127_v23 = vsel %vm1578_vm1, %v16724_v17, 0.0 }
 0x323   : > { %2128 = vadd.xlane.f32.xlu0 %v2127_v23  ;;  %v2102_v28 = vpop.f32.mrf.mxu0 }
 0x324   : > { %v16737_v31 = vadd.f32 %v16708_v63, %v2102_v28  ;;  %v2136_v44 = vsel %vm1578_vm1, %v16729_v22, 0.0 }
 0x325   : > { %2137 = vadd.xlane.f32.xlu1 %v2136_v44  ;;  %v14896_v34 = vpop.f32.mrf.mxu0 }
 0x326   : > { %v16745_v37 = vadd.f32 %v14896_v34, %v16708_v63  ;;  %v2133_v24 = vsel %vm1578_vm1, %v16737_v31, 0.0 }
 0x327   : > { %2134 = vadd.xlane.f32.xlu0 %v2133_v24  ;;  %v2112_v39 = vpop.f32.mrf.mxu0 }
 0x328   : > { %v16753_v42 = vadd.f32 %v16708_v63, %v2112_v39  ;;  %v2142_v26 = vsel %vm1578_vm1, %v16745_v37, 0.0 }
 0x329   : > { %2143 = vadd.xlane.f32.xlu1 %v2142_v26 }
 0x32a   : > { %v2139_v29 = vsel %vm1578_vm1, %v16753_v42, 0.0 }
 0x32b   : > { %2140 = vadd.xlane.f32.xlu0 %v2139_v29 }
 0x32d   : > { %1905 = vadd.xlane.f32.xlu1 %v1904_v53 }
 0x32f   : > { %1902 = vadd.xlane.f32.xlu0 %v1901_v5 }
 0x331   : > { %1911 = vadd.xlane.f32.xlu1 %v1910_v57 }
 0x333   : > { %1908 = vadd.xlane.f32.xlu0 %v1907_v38 }
 0x335   : > { %1917 = vadd.xlane.f32.xlu1 %v1916_v61 }
 0x337   : > { %1914 = vadd.xlane.f32.xlu0 %v1913_v62 }
 0x339   : > { %1923 = vadd.xlane.f32.xlu1 %v1922_v45 }
 0x33b   : > { %1920 = vadd.xlane.f32.xlu0 %v1919_v0 }
 0x3a6   : > { %v2126_v2 = vpop.xlane.xlu1 %2125 }
 0x3a7   : > { %v2146_v4 = vmul.f32 0.03125, %v2126_v2 }
 0x3a8   : > { %v2123_v7 = vpop.xlane.xlu0 %2122 }
 0x3a9   : > { %v16799_v8 = vsub.f32 %v16711_v1, %v2146_v4  ;;  %v2145_v11 = vmul.f32 0.03125, %v2123_v7 }
 0x3aa   : > { %v2132_v12 = vpop.xlane.xlu1 %2131 }
 0x3ab   : > { %v16802_v13 = vsub.f32 %v16714_v3, %v2145_v11  ;;  %v2148_v16 = vmul.f32 0.03125, %v2132_v12  ;;  %v2162_v19 = vmul.f32 %v16799_v8, %v16799_v8 }
 0x3ac   : > { %v2129_v20 = vpop.xlane.xlu0 %2128 }
 0x3ad   : > { %v16807_v21 = vsub.f32 %v16719_v9, %v2148_v16  ;;  %v2147_v23 = vmul.f32 0.03125, %v2129_v20  ;;  %v2172_v25 = vsel %vm1578_vm1, %v2162_v19, 0.0  ;;  %v2161_v1 = vmul.f32 %v16802_v13, %v16802_v13 }
 0x3ae   : > { %v2138_v27 = vpop.xlane.xlu1 %2137  ;;  %2173 = vadd.xlane.f32.xlu1 %v2172_v25 }
 0x3af   : > { %v16813_v28 = vsub.f32 %v16724_v17, %v2147_v23  ;;  %v2150_v3 = vmul.f32 0.03125, %v2138_v27  ;;  %v2169_v44 = vsel %vm1578_vm1, %v2161_v1, 0.0  ;;  %v2164_v33 = vmul.f32 %v16807_v21, %v16807_v21 }
 0x3b0   : > { %2170 = vadd.xlane.f32.xlu0 %v2169_v44  ;;  %v2135_v9 = vpop.xlane.xlu0 %2134 }
 0x3b1   : > { %v16819_v34 = vsub.f32 %v16729_v22, %v2150_v3  ;;  %v2149_v51 = vmul.f32 0.03125, %v2135_v9  ;;  %v2178_v24 = vsel %vm1578_vm1, %v2164_v33, 0.0  ;;  %v2163_v39 = vmul.f32 %v16813_v28, %v16813_v28 }
 0x3b2   : > { %2179 = vadd.xlane.f32.xlu1 %v2178_v24  ;;  %v2144_v17 = vpop.xlane.xlu1 %2143  ;;  %v2525_v24 = vld [vmem:[%s16367_s30 + $0x18] sm:$0xff] }
 0x3b3   : > { %v16825_v40 = vsub.f32 %v16737_v31, %v2149_v51  ;;  %v2152_v26 = vmul.f32 0.03125, %v2144_v17  ;;  %v2175_v43 = vsel %vm1578_vm1, %v2163_v39, 0.0  ;;  %v2166_v46 = vmul.f32 %v16819_v34, %v16819_v34  ;;  %v2524_v39 = vld [vmem:[%s16367_s30 + $0x10] sm:$0xff]  ;;  %14917 = vmatprep.subr.mxu0 %v2525_v24  ;;  %14937 = vmatprep.subr.mxu1 %v2525_v24 }
 0x3b4   : > { %2176 = vadd.xlane.f32.xlu0 %v2175_v43  ;;  %v2141_v22 = vpop.xlane.xlu0 %2140  ;;  %14918 = vmatpush3.msra.mxu0 %v2525_v24 }
 0x3b5   : > { %v16831_v59 = vsub.f32 %v16745_v37, %v2152_v26  ;;  %v2151_v29 = vmul.f32 0.03125, %v2141_v22  ;;  %v2184_v60 = vsel %vm1578_vm1, %v2166_v46, 0.0  ;;  %v2165_v48 = vmul.f32 %v16825_v40, %v16825_v40  ;;  %14919 = vmatprep.subr.mxu0 %v2524_v39 }
 0x3b6   : > { %2185 = vadd.xlane.f32.xlu1 %v2184_v60  ;;  %v1906_v31 = vpop.xlane.xlu1 %1905  ;;  %14920 = vmatpush3.msra.mxu0 %v2524_v39 }
 0x3b7   : > { %v16837_v52 = vsub.f32 %v16753_v42, %v2151_v29  ;;  %v1926_v53 = vmul.f32 0.03125, %v1906_v31  ;;  %v2181_v54 = vsel %vm1578_vm1, %v2165_v48, 0.0  ;;  %v2168_v55 = vmul.f32 %v16831_v59, %v16831_v59  ;;  %v2522_v48 = vld [vmem:[%s16367_s30] sm:$0xff] }
 0x3b8   : > { %2182 = vadd.xlane.f32.xlu0 %v2181_v54  ;;  %v1903_v37 = vpop.xlane.xlu0 %1902 }
 0x3b9   : > { %v1934_v5 = vadd.f32 1e-05, %v1926_v53  ;;  %v1925_v56 = vmul.f32 0.03125, %v1903_v37  ;;  %v2190_v57 = vsel %vm1578_vm1, %v2168_v55, 0.0  ;;  %v2167_v6 = vmul.f32 %v16837_v52, %v16837_v52 }
 0x3ba   : > { %2191 = vadd.xlane.f32.xlu1 %v2190_v57  ;;  %v1912_v38 = vpop.xlane.xlu1 %1911 }
 0x3bb   : > { %15914 = vrsqrt.f32 %v1934_v5  ;;  %v1933_v42 = vadd.f32 1e-05, %v1925_v56  ;;  %v1928_v10 = vmul.f32 0.03125, %v1912_v38  ;;  %v2187_v61 = vsel %vm1578_vm1, %v2167_v6, 0.0 }
 0x3bc   : > { %2188 = vadd.xlane.f32.xlu0 %v2187_v61  ;;  %v1909_v41 = vpop.xlane.xlu0 %1908 }
 0x3bd   : > { %15916 = vrsqrt.f32 %v1933_v42  ;;  %v1936_v62 = vadd.f32 1e-05, %v1928_v10  ;;  %v1927_v14 = vmul.f32 0.03125, %v1909_v41 }
 0x3be   : > { %v1918_v45 = vpop.xlane.xlu1 %1917 }
 0x3bf   : > { %15918 = vrsqrt.f32 %v1936_v62  ;;  %v1935_v0 = vadd.f32 1e-05, %v1927_v14  ;;  %v1930_v2 = vmul.f32 0.03125, %v1918_v45 }
 0x3c0   : > { %v1915_v4 = vpop.xlane.xlu0 %1914 }
 0x3c1   : > { %15920 = vrsqrt.f32 %v1935_v0  ;;  %v1938_v7 = vadd.f32 1e-05, %v1930_v2  ;;  %v1929_v11 = vmul.f32 0.03125, %v1915_v4 }
 0x3c2   : > { %v1924_v12 = vpop.xlane.xlu1 %1923 }
 0x3c3   : > { %15922 = vrsqrt.f32 %v1938_v7  ;;  %v1937_v16 = vadd.f32 1e-05, %v1929_v11  ;;  %v1932_v19 = vmul.f32 0.03125, %v1924_v12 }
 0x3c4   : > { %v1921_v20 = vpop.xlane.xlu0 %1920 }
 0x3c5   : > { %15924 = vrsqrt.f32 %v1937_v16  ;;  %v1940_v23 = vadd.f32 1e-05, %v1932_v19  ;;  %v1931_v25 = vmul.f32 0.03125, %v1921_v20 }
 0x3c7   : > { %15926 = vrsqrt.f32 %v1940_v23  ;;  %v1939_v1 = vadd.f32 1e-05, %v1931_v25 }
 0x3c8   : > { %v15915_v27 = vpop.eup %15914 }
 0x3c9   : > { %v1950_v3 = vmul.f32 %v15915_v27, %v16734_v30  ;;  %15928 = vrsqrt.f32 %v1939_v1  ;;  %v2523_v30 = vld [vmem:[%s16367_s30 + $0x8] sm:$0xff] }
 0x3ca   : > { %v15917_v44 = vpop.eup %15916  ;;  %14921 = vmatprep.subr.mxu0 %v2523_v30 }
 0x3cb   : > { %v1958_v33 = vmul.f32 %v16670_v15, %v1950_v3  ;;  %v1949_v9 = vmul.f32 %v15917_v44, %v16742_v36  ;;  %14922 = vmatpush3.msra.mxu0 %v2523_v30 }
 0x3cc   : > { %v15919_v51 = vpop.eup %15918  ;;  %14923 = vmatprep.subr.mxu0 %v2522_v48 }
 0x3cd   : > { %v1957_v17 = vmul.f32 %v16670_v15, %v1949_v9  ;;  %v1952_v26 = vmul.f32 %v15919_v51, %v16750_v50  ;;  %v1966_v46 = vadd.f32 %v16674_v18, %v1958_v33  ;;  %14924 = vmatpush3.msra.mxu0 %v2522_v48 }
 0x3ce   : > { %v15921_v43 = vpop.eup %15920 }
 0x3cf   : > { %v1965_v22 = vadd.f32 %v16674_v18, %v1957_v17  ;;  %v1951_v29 = vmul.f32 %v15921_v43, %v16760_v47  ;;  %v1960_v36 = vmul.f32 %v16670_v15, %v1952_v26  ;;  %v1974_v55 = vmax.f32 %v1966_v46, 0.0 }
 0x3d0   : > { %v15923_v60 = vpop.eup %15922 }
 0x3d1   : > { %v1973_v31 = vmax.f32 %v1965_v22, 0.0  ;;  %v1959_v50 = vmul.f32 %v16670_v15, %v1951_v29  ;;  %v1954_v53 = vmul.f32 %v15923_v60, %v16767_v49  ;;  %v1968_v37 = vadd.f32 %v16674_v18, %v1960_v36  ;;  %v16883_v29 = vld [vmem:[%s16362_s24 + $0x1] ss:$0 sm:$0xff] }
 0x3d2   : > { %v15925_v54 = vpop.eup %15924 }
 0x3d3   : > { %14905 = vmatprep.mubr.msk.f32.mxu1 %vm1578_vm1, %v1973_v31  ;;  %v1967_v47 = vadd.f32 %v16674_v18, %v1959_v50  ;;  %v1953_v5 = vmul.f32 %v15925_v54, %v16773_v32  ;;  %v1962_v56 = vmul.f32 %v16670_v15, %v1954_v53  ;;  %v1976_v10 = vmax.f32 %v1968_v37, 0.0  ;;  %v16889_v50 = vld [vmem:[%s16362_s24 + $0x2] ss:$0 sm:$0xff] }
 0x3d4   : > { %v15927_v57 = vpop.eup %15926  ;;  %14906 = vmatmul.mubr.msk.f32.vlgmr.msra.gmra.mxu1 %vm1578_vm1, %v1974_v55 }
 0x3d5   : > { %v1975_v49 = vmax.f32 %v1967_v47, 0.0  ;;  %v1961_v6 = vmul.f32 %v16670_v15, %v1953_v5  ;;  %v1956_v38 = vmul.f32 %v15927_v57, %v16779_v35  ;;  %14938 = vmatpush3.msra.mxu1 %v2525_v24  ;;  %v1970_v61 = vadd.f32 %v16674_v18, %v1962_v56 }
 0x3d6   : > { %v15929_v42 = vpop.eup %15928  ;;  %14939 = vmatprep.subr.mxu1 %v2524_v39 }
 0x3d7   : > { %14908 = vmatprep.mubr.msk.f32.mxu1 %vm1578_vm1, %v1975_v49  ;;  %v1969_v32 = vadd.f32 %v16674_v18, %v1961_v6  ;;  %v1955_v41 = vmul.f32 %v15929_v42, %v16785_v58  ;;  %v1964_v62 = vmul.f32 %v16670_v15, %v1956_v38  ;;  %14940 = vmatpush3.msra.mxu1 %v2524_v39  ;;  %v1978_v45 = vmax.f32 %v1970_v61, 0.0 }
 0x3d8   : > { %14909 = vmatmul.mubr.msk.f32.gmra.mxu1 %vm1578_vm1, %v1976_v10  ;;  %14941 = vmatprep.subr.mxu1 %v2523_v30 }
 0x3d9   : > { %v1977_v14 = vmax.f32 %v1969_v32, 0.0  ;;  %v1963_v35 = vmul.f32 %v16670_v15, %v1955_v41  ;;  %14942 = vmatpush3.msra.mxu1 %v2523_v30  ;;  %v1972_v0 = vadd.f32 %v16674_v18, %v1964_v62 }
 0x3da   : > { %14943 = vmatprep.subr.mxu1 %v2522_v48 }
 0x3db   : > { %14911 = vmatprep.mubr.msk.f32.mxu1 %vm1578_vm1, %v1977_v14  ;;  %v1971_v2 = vadd.f32 %v16674_v18, %v1963_v35  ;;  %14944 = vmatpush3.msra.mxu1 %v2522_v48  ;;  %v1980_v4 = vmax.f32 %v1972_v0, 0.0 }
 0x3dc   : > { %14912 = vmatmul.mubr.msk.f32.gmra.mxu1 %vm1578_vm1, %v1978_v45 }
 0x3dd   : > { %v1979_v58 = vmax.f32 %v1971_v2, 0.0 }
 0x3df   : > { %14914 = vmatprep.mubr.msk.f32.mxu1 %vm1578_vm1, %v1979_v58 }
 0x3e0   : > { %14915 = vmatmul.mubr.msk.f32.gmra.mxu1 %vm1578_vm1, %v1980_v4 }
 0x437   : > { %v2174_v7 = vpop.xlane.xlu1 %2173 }
 0x438   : > { %v2194_v15 = vmul.f32 0.03125, %v2174_v7 }
 0x439   : > { %v2171_v11 = vpop.xlane.xlu0 %2170 }
 0x43a   : > { %v2202_v12 = vadd.f32 1e-05, %v2194_v15  ;;  %v2193_v16 = vmul.f32 0.03125, %v2171_v11 }
 0x43b   : > { %v2180_v19 = vpop.xlane.xlu1 %2179 }
 0x43c   : > { %15930 = vrsqrt.f32 %v2202_v12  ;;  %v2201_v20 = vadd.f32 1e-05, %v2193_v16  ;;  %v2196_v23 = vmul.f32 0.03125, %v2180_v19 }
 0x43d   : > { %v2177_v25 = vpop.xlane.xlu0 %2176 }
 0x43e   : > { %15932 = vrsqrt.f32 %v2201_v20  ;;  %v2204_v18 = vadd.f32 1e-05, %v2196_v23  ;;  %v2195_v1 = vmul.f32 0.03125, %v2177_v25 }
 0x43f   : > { %v2186_v27 = vpop.xlane.xlu1 %2185 }
 0x440   : > { %15934 = vrsqrt.f32 %v2204_v18  ;;  %v2203_v3 = vadd.f32 1e-05, %v2195_v1  ;;  %v2198_v44 = vmul.f32 0.03125, %v2186_v27 }
 0x441   : > { %v2183_v33 = vpop.xlane.xlu0 %2182 }
 0x442   : > { %15936 = vrsqrt.f32 %v2203_v3  ;;  %v2206_v9 = vadd.f32 1e-05, %v2198_v44  ;;  %v2197_v51 = vmul.f32 0.03125, %v2183_v33 }
 0x443   : > { %v2192_v24 = vpop.xlane.xlu1 %2191 }
 0x444   : > { %15938 = vrsqrt.f32 %v2206_v9  ;;  %v2205_v39 = vadd.f32 1e-05, %v2197_v51  ;;  %v2200_v17 = vmul.f32 0.03125, %v2192_v24 }
 0x445   : > { %v2189_v26 = vpop.xlane.xlu0 %2188 }
 0x446   : > { %15940 = vrsqrt.f32 %v2205_v39  ;;  %v2208_v43 = vadd.f32 1e-05, %v2200_v17  ;;  %v2199_v46 = vmul.f32 0.03125, %v2189_v26 }
 0x448   : > { %15942 = vrsqrt.f32 %v2208_v43  ;;  %v2207_v30 = vadd.f32 1e-05, %v2199_v46 }
 0x449   : > { %v15931_v22 = vpop.eup %15930 }
 0x44a   : > { %v2218_v36 = vmul.f32 %v15931_v22, %v16799_v8  ;;  %15944 = vrsqrt.f32 %v2207_v30 }
 0x44b   : > { %v15933_v60 = vpop.eup %15932 }
 0x44c   : > { %v2234_v48 = vmul.f32 %v16883_v29, %v2218_v36  ;;  %v2217_v31 = vmul.f32 %v15933_v60, %v16802_v13 }
 0x44d   : > { %v15935_v53 = vpop.eup %15934 }
 0x44e   : > { %v2233_v54 = vmul.f32 %v16883_v29, %v2217_v31  ;;  %v2220_v55 = vmul.f32 %v15935_v53, %v16807_v21  ;;  %v2250_v47 = vadd.f32 %v16889_v50, %v2234_v48  ;;  %v13913_v48 = vld [vmem:[%s16372_s6] ss:$0 sm:$0xff] }
 0x44f   : > { %v15937_v37 = vpop.eup %15936 }
 0x450   : > { %v2249_v5 = vadd.f32 %v16889_v50, %v2233_v54  ;;  %v2219_v8 = vmul.f32 %v15937_v37, %v16813_v28  ;;  %v2236_v56 = vmul.f32 %v16883_v29, %v2220_v55  ;;  %v2258_v42 = vmax.f32 %v2250_v47, 0.0 }
 0x451   : > { %v15939_v57 = vpop.eup %15938 }
 0x452   : > { %v2257_v49 = vmax.f32 %v2249_v5, 0.0  ;;  %v2235_v13 = vmul.f32 %v16883_v29, %v2219_v8  ;;  %v2222_v6 = vmul.f32 %v15939_v57, %v16819_v34  ;;  %v2252_v10 = vadd.f32 %v16889_v50, %v2236_v56 }
 0x453   : > { %v15941_v38 = vpop.eup %15940 }
 0x454   : > { %14925 = vmatprep.mubr.msk.f32.mxu0 %vm1578_vm1, %v2257_v49  ;;  %v2251_v21 = vadd.f32 %v16889_v50, %v2235_v13  ;;  %v2221_v61 = vmul.f32 %v15941_v38, %v16825_v40  ;;  %v2238_v28 = vmul.f32 %v16883_v29, %v2222_v6  ;;  %v2260_v35 = vmax.f32 %v2252_v10, 0.0 }
 0x455   : > { %v15943_v32 = vpop.eup %15942  ;;  %14926 = vmatmul.mubr.msk.f32.vlgmr.msra.gmra.mxu0 %vm1578_vm1, %v2258_v42 }
 0x456   : > { %v2259_v41 = vmax.f32 %v2251_v21, 0.0  ;;  %v2237_v62 = vmul.f32 %v16883_v29, %v2221_v61  ;;  %v2224_v34 = vmul.f32 %v15943_v32, %v16831_v59  ;;  %v2254_v45 = vadd.f32 %v16889_v50, %v2238_v28 }
 0x457   : > { %v15945_v14 = vpop.eup %15944 }
 0x458   : > { %14928 = vmatprep.mubr.msk.f32.mxu0 %vm1578_vm1, %v2259_v41  ;;  %v2253_v0 = vadd.f32 %v16889_v50, %v2237_v62  ;;  %v2223_v40 = vmul.f32 %v15945_v14, %v16837_v52  ;;  %v2240_v2 = vmul.f32 %v16883_v29, %v2224_v34  ;;  %v2262_v7 = vmax.f32 %v2254_v45, 0.0 }
 0x459   : > { %14929 = vmatmul.mubr.msk.f32.gmra.mxu0 %vm1578_vm1, %v2260_v35 }
 0x45a   : > { %v2261_v58 = vmax.f32 %v2253_v0, 0.0  ;;  %v2239_v4 = vmul.f32 %v16883_v29, %v2223_v40  ;;  %v2256_v59 = vadd.f32 %v16889_v50, %v2240_v2 }
 0x45c   : > { %14931 = vmatprep.mubr.msk.f32.mxu0 %vm1578_vm1, %v2261_v58  ;;  %v2255_v15 = vadd.f32 %v16889_v50, %v2239_v4  ;;  %v2264_v12 = vmax.f32 %v2256_v59, 0.0 }
 0x45d   : > { %14932 = vmatmul.mubr.msk.f32.gmra.mxu0 %vm1578_vm1, %v2262_v7 }
 0x45e   : > { %v2263_v11 = vmax.f32 %v2255_v15, 0.0 }
 0x460   : > { %14934 = vmatprep.mubr.msk.f32.mxu0 %vm1578_vm1, %v2263_v11 }
 0x461   : > { %14935 = vmatmul.mubr.msk.f32.gmra.mxu0 %vm1578_vm1, %v2264_v12 }
 0x494   : > { %v14907_v52 = vpop.f32.mrf.mxu1 }
 0x495   : > { %v2361_v16 = vadd.f32 %v14907_v52, %v16708_v63 }
 0x496   : > { %v2355_v19 = vpop.f32.mrf.mxu1 }
 0x497   : > { %v16922_v20 = vadd.f32 %v16708_v63, %v2355_v19  ;;  %v2397_v23 = vsel %vm1578_vm1, %v2361_v16, 0.0 }
 0x498   : > { %2398 = vadd.xlane.f32.xlu1 %v2397_v23  ;;  %v14910_v25 = vpop.f32.mrf.mxu1 }
 0x499   : > { %v16926_v18 = vadd.f32 %v14910_v25, %v16708_v63  ;;  %v2394_v1 = vsel %vm1578_vm1, %v16922_v20, 0.0 }
 0x49a   : > { %2395 = vadd.xlane.f32.xlu0 %v2394_v1  ;;  %v2365_v27 = vpop.f32.mrf.mxu1 }
 0x49b   : > { %v16931_v3 = vadd.f32 %v16708_v63, %v2365_v27  ;;  %v2403_v44 = vsel %vm1578_vm1, %v16926_v18, 0.0 }
 0x49c   : > { %2404 = vadd.xlane.f32.xlu1 %v2403_v44  ;;  %v14913_v33 = vpop.f32.mrf.mxu1 }
 0x49d   : > { %v16936_v9 = vadd.f32 %v14913_v33, %v16708_v63  ;;  %v2400_v51 = vsel %vm1578_vm1, %v16931_v3, 0.0 }
 0x49e   : > { %2401 = vadd.xlane.f32.xlu0 %v2400_v51  ;;  %v2375_v24 = vpop.f32.mrf.mxu1 }
 0x49f   : > { %v16941_v39 = vadd.f32 %v16708_v63, %v2375_v24  ;;  %v2409_v17 = vsel %vm1578_vm1, %v16936_v9, 0.0 }
 0x4a0   : > { %2410 = vadd.xlane.f32.xlu1 %v2409_v17  ;;  %v14916_v26 = vpop.f32.mrf.mxu1 }
 0x4a1   : > { %v16946_v43 = vadd.f32 %v14916_v26, %v16708_v63  ;;  %v2406_v46 = vsel %vm1578_vm1, %v16941_v39, 0.0 }
 0x4a2   : > { %2407 = vadd.xlane.f32.xlu0 %v2406_v46  ;;  %v2385_v30 = vpop.f32.mrf.mxu1 }
 0x4a3   : > { %v16951_v22 = vadd.f32 %v16708_v63, %v2385_v30  ;;  %v2415_v36 = vsel %vm1578_vm1, %v16946_v43, 0.0 }
 0x4a4   : > { %2416 = vadd.xlane.f32.xlu1 %v2415_v36 }
 0x4a5   : > { %v2412_v60 = vsel %vm1578_vm1, %v16951_v22, 0.0 }
 0x4a6   : > { %2413 = vadd.xlane.f32.xlu0 %v2412_v60 }
 0x515   : > { %v14927_v31 = vpop.f32.mrf.mxu0 }
 0x516   : > { %v16958_v53 = vadd.f32 %v14927_v31, %v13913_v48 }
 0x517   : > { %v2623_v54 = vpop.f32.mrf.mxu0 }
 0x518   : > { %v16960_v55 = vadd.f32 %v13913_v48, %v2623_v54  ;;  %v2665_v37 = vsel %vm1578_vm1, %v16958_v53, 0.0 }
 0x519   : > { %2666 = vadd.xlane.f32.xlu1 %v2665_v37  ;;  %v14930_v63 = vpop.f32.mrf.mxu0 }
 0x51a   : > { %v16964_v47 = vadd.f32 %v14930_v63, %v13913_v48  ;;  %v2662_v5 = vsel %vm1578_vm1, %v16960_v55, 0.0 }
 0x51b   : > { %2663 = vadd.xlane.f32.xlu0 %v2662_v5  ;;  %v2633_v8 = vpop.f32.mrf.mxu0 }
 0x51c   : > { %v16968_v56 = vadd.f32 %v13913_v48, %v2633_v8  ;;  %v2671_v57 = vsel %vm1578_vm1, %v16964_v47, 0.0 }
 0x51d   : > { %2672 = vadd.xlane.f32.xlu1 %v2671_v57  ;;  %v14933_v49 = vpop.f32.mrf.mxu0 }
 0x51e   : > { %v16972_v13 = vadd.f32 %v14933_v49, %v13913_v48  ;;  %v2668_v6 = vsel %vm1578_vm1, %v16968_v56, 0.0 }
 0x51f   : > { %2669 = vadd.xlane.f32.xlu0 %v2668_v6  ;;  %v2643_v38 = vpop.f32.mrf.mxu0 }
 0x520   : > { %v16976_v42 = vadd.f32 %v13913_v48, %v2643_v38  ;;  %v2677_v10 = vsel %vm1578_vm1, %v16972_v13, 0.0 }
 0x521   : > { %v2399_v21 = vpop.xlane.xlu1 %2398  ;;  %2678 = vadd.xlane.f32.xlu1 %v2677_v10  ;;  %v14936_v61 = vpop.f32.mrf.mxu0 }
 0x522   : > { %v2419_v28 = vmul.f32 0.03125, %v2399_v21  ;;  %v16980_v32 = vadd.f32 %v14936_v61, %v13913_v48  ;;  %v2674_v41 = vsel %vm1578_vm1, %v16976_v42, 0.0 }
 0x523   : > { %2675 = vadd.xlane.f32.xlu0 %v2674_v41  ;;  %v2653_v62 = vpop.f32.mrf.mxu0  ;;  %v2396_v34 = vpop.xlane.xlu0 %2395 }
 0x524   : > { %v16984_v14 = vsub.f32 %v2361_v16, %v2419_v28  ;;  %v16986_v35 = vadd.f32 %v13913_v48, %v2653_v62  ;;  %v2418_v45 = vmul.f32 0.03125, %v2396_v34  ;;  %v2683_v0 = vsel %vm1578_vm1, %v16980_v32, 0.0 }
 0x525   : > { %v2405_v40 = vpop.xlane.xlu1 %2404  ;;  %2684 = vadd.xlane.f32.xlu1 %v2683_v0 }
 0x526   : > { %v16991_v2 = vsub.f32 %v16922_v20, %v2418_v45  ;;  %v2421_v58 = vmul.f32 0.03125, %v2405_v40  ;;  %v2680_v4 = vsel %vm1578_vm1, %v16986_v35, 0.0  ;;  %v2435_v7 = vmul.f32 %v16984_v14, %v16984_v14 }
 0x527   : > { %2681 = vadd.xlane.f32.xlu0 %v2680_v4  ;;  %v2402_v59 = vpop.xlane.xlu0 %2401 }
 0x528   : > { %v16998_v15 = vsub.f32 %v16926_v18, %v2421_v58  ;;  %v2420_v11 = vmul.f32 0.03125, %v2402_v59  ;;  %v2445_v12 = vsel %vm1578_vm1, %v2435_v7, 0.0  ;;  %v2434_v52 = vmul.f32 %v16991_v2, %v16991_v2 }
 0x529   : > { %v2411_v16 = vpop.xlane.xlu1 %2410  ;;  %2446 = vadd.xlane.f32.xlu1 %v2445_v12 }
 0x52a   : > { %v17004_v19 = vsub.f32 %v16931_v3, %v2420_v11  ;;  %v2423_v20 = vmul.f32 0.03125, %v2411_v16  ;;  %v2442_v23 = vsel %vm1578_vm1, %v2434_v52, 0.0  ;;  %v2437_v25 = vmul.f32 %v16998_v15, %v16998_v15 }
 0x52b   : > { %2443 = vadd.xlane.f32.xlu0 %v2442_v23  ;;  %v2408_v18 = vpop.xlane.xlu0 %2407 }
 0x52c   : > { %v17010_v1 = vsub.f32 %v16936_v9, %v2423_v20  ;;  %v2422_v27 = vmul.f32 0.03125, %v2408_v18  ;;  %v2451_v44 = vsel %vm1578_vm1, %v2437_v25, 0.0  ;;  %v2436_v33 = vmul.f32 %v17004_v19, %v17004_v19 }
 0x52d   : > { %v2417_v51 = vpop.xlane.xlu1 %2416  ;;  %2452 = vadd.xlane.f32.xlu1 %v2451_v44 }
 0x52e   : > { %v17016_v3 = vsub.f32 %v16941_v39, %v2422_v27  ;;  %v2425_v24 = vmul.f32 0.03125, %v2417_v51  ;;  %v2448_v17 = vsel %vm1578_vm1, %v2436_v33, 0.0  ;;  %v2439_v26 = vmul.f32 %v17010_v1, %v17010_v1 }
 0x52f   : > { %2449 = vadd.xlane.f32.xlu0 %v2448_v17  ;;  %v2414_v9 = vpop.xlane.xlu0 %2413 }
 0x530   : > { %v17022_v46 = vsub.f32 %v16946_v43, %v2425_v24  ;;  %v2424_v30 = vmul.f32 0.03125, %v2414_v9  ;;  %v2457_v36 = vsel %vm1578_vm1, %v2439_v26, 0.0  ;;  %v2438_v60 = vmul.f32 %v17016_v3, %v17016_v3 }
 0x531   : > { %2458 = vadd.xlane.f32.xlu1 %v2457_v36 }
 0x532   : > { %v17028_v39 = vsub.f32 %v16951_v22, %v2424_v30  ;;  %v2454_v48 = vsel %vm1578_vm1, %v2438_v60, 0.0  ;;  %v2441_v31 = vmul.f32 %v17022_v46, %v17022_v46 }
 0x533   : > { %2455 = vadd.xlane.f32.xlu0 %v2454_v48 }
 0x534   : > { %v2463_v54 = vsel %vm1578_vm1, %v2441_v31, 0.0  ;;  %v2440_v43 = vmul.f32 %v17028_v39, %v17028_v39 }
 0x535   : > { %2464 = vadd.xlane.f32.xlu1 %v2463_v54 }
 0x536   : > { %v2460_v37 = vsel %vm1578_vm1, %v2440_v43, 0.0 }
 0x537   : > { %2461 = vadd.xlane.f32.xlu0 %v2460_v37 }
 0x5a2   : > { %v2667_v63 = vpop.xlane.xlu1 %2666 }
 0x5a3   : > { %v2687_v5 = vmul.f32 0.03125, %v2667_v63 }
 0x5a4   : > { %v2664_v8 = vpop.xlane.xlu0 %2663 }
 0x5a5   : > { %v17038_v22 = vsub.f32 %v16958_v53, %v2687_v5  ;;  %v2686_v57 = vmul.f32 0.03125, %v2664_v8 }
 0x5a6   : > { %v2673_v49 = vpop.xlane.xlu1 %2672 }
 0x5a7   : > { %v17041_v6 = vsub.f32 %v16960_v55, %v2686_v57  ;;  %v2689_v38 = vmul.f32 0.03125, %v2673_v49  ;;  %v2703_v10 = vmul.f32 %v17038_v22, %v17038_v22 }
 0x5a8   : > { %v2670_v21 = vpop.xlane.xlu0 %2669 }
 0x5a9   : > { %v17046_v61 = vsub.f32 %v16964_v47, %v2689_v38  ;;  %v2688_v28 = vmul.f32 0.03125, %v2670_v21  ;;  %v2713_v41 = vsel %vm1578_vm1, %v2703_v10, 0.0  ;;  %v2702_v53 = vmul.f32 %v17041_v6, %v17041_v6 }
 0x5aa   : > { %v2679_v62 = vpop.xlane.xlu1 %2678  ;;  %2714 = vadd.xlane.f32.xlu1 %v2713_v41 }
 0x5ab   : > { %v17052_v34 = vsub.f32 %v16968_v56, %v2688_v28  ;;  %v2691_v55 = vmul.f32 0.03125, %v2679_v62  ;;  %v2710_v45 = vsel %vm1578_vm1, %v2702_v53, 0.0  ;;  %v2705_v0 = vmul.f32 %v17046_v61, %v17046_v61 }
 0x5ac   : > { %2711 = vadd.xlane.f32.xlu0 %v2710_v45  ;;  %v2676_v47 = vpop.xlane.xlu0 %2675 }
 0x5ad   : > { %v17058_v40 = vsub.f32 %v16972_v13, %v2691_v55  ;;  %v2690_v58 = vmul.f32 0.03125, %v2676_v47  ;;  %v2719_v4 = vsel %vm1578_vm1, %v2705_v0, 0.0  ;;  %v2704_v7 = vmul.f32 %v17052_v34, %v17052_v34 }
 0x5ae   : > { %2720 = vadd.xlane.f32.xlu1 %v2719_v4  ;;  %v2685_v56 = vpop.xlane.xlu1 %2684  ;;  %v13946_v4 = vld [vmem:[%s16442_s29 + $0x38] sm:$0xff] }
 0x5af   : > { %v17064_v59 = vsub.f32 %v16976_v42, %v2690_v58  ;;  %v2693_v11 = vmul.f32 0.03125, %v2685_v56  ;;  %v2716_v12 = vsel %vm1578_vm1, %v2704_v7, 0.0  ;;  %v2707_v52 = vmul.f32 %v17058_v40, %v17058_v40  ;;  %v3082_v58 = vld [vmem:[%s16442_s29 + $0x18] sm:$0xff]  ;;  %v3081_v7 = vld [vmem:[%s16442_s29 + $0x10] sm:$0xff]  ;;  %14977 = vmatprep.subr.mxu1 %v13946_v4 }
 0x5b0   : > { %2717 = vadd.xlane.f32.xlu0 %v2716_v12  ;;  %v2682_v13 = vpop.xlane.xlu0 %2681  ;;  %14957 = vmatprep.subr.mxu0 %v3082_v58 }
 0x5b1   : > { %v17070_v16 = vsub.f32 %v16980_v32, %v2693_v11  ;;  %v2692_v20 = vmul.f32 0.03125, %v2682_v13  ;;  %v2725_v23 = vsel %vm1578_vm1, %v2707_v52, 0.0  ;;  %v2706_v25 = vmul.f32 %v17064_v59, %v17064_v59  ;;  %14958 = vmatpush3.msra.mxu0 %v3082_v58  ;;  %v3080_v52 = vld [vmem:[%s16442_s29 + $0x8] sm:$0xff] }
 0x5b2   : > { %2726 = vadd.xlane.f32.xlu1 %v2725_v23  ;;  %v2447_v42 = vpop.xlane.xlu1 %2446  ;;  %14959 = vmatprep.subr.mxu0 %v3081_v7 }
 0x5b3   : > { %v17076_v18 = vsub.f32 %v16986_v35, %v2692_v20  ;;  %v2467_v27 = vmul.f32 0.03125, %v2447_v42  ;;  %v2722_v44 = vsel %vm1578_vm1, %v2706_v25, 0.0  ;;  %v2709_v33 = vmul.f32 %v17070_v16, %v17070_v16  ;;  %14960 = vmatpush3.msra.mxu0 %v3081_v7  ;;  %v3079_v25 = vld [vmem:[%s16442_s29] sm:$0xff] }
 0x5b4   : > { %2723 = vadd.xlane.f32.xlu0 %v2722_v44  ;;  %v2444_v32 = vpop.xlane.xlu0 %2443  ;;  %14961 = vmatprep.subr.mxu0 %v3080_v52 }
 0x5b5   : > { %v2475_v51 = vadd.f32 1e-05, %v2467_v27  ;;  %v2466_v24 = vmul.f32 0.03125, %v2444_v32  ;;  %v2731_v17 = vsel %vm1578_vm1, %v2709_v33, 0.0  ;;  %v2708_v26 = vmul.f32 %v17076_v18, %v17076_v18  ;;  %14962 = vmatpush3.msra.mxu0 %v3080_v52 }
 0x5b6   : > { %2732 = vadd.xlane.f32.xlu1 %v2731_v17  ;;  %v2453_v9 = vpop.xlane.xlu1 %2452  ;;  %v13945_v17 = vld [vmem:[%s16442_s29 + $0x30] sm:$0xff]  ;;  %14963 = vmatprep.subr.mxu0 %v3079_v25 }
 0x5b7   : > { %15946 = vrsqrt.f32 %v2475_v51  ;;  %v2474_v35 = vadd.f32 1e-05, %v2466_v24  ;;  %v2469_v30 = vmul.f32 0.03125, %v2453_v9  ;;  %v2728_v36 = vsel %vm1578_vm1, %v2708_v26, 0.0  ;;  %14964 = vmatpush3.msra.mxu0 %v3079_v25  ;;  %v13923_v25 = vld [vmem:[%s16372_s6 + $0x1] ss:$0 sm:$0xff] }
 0x5b8   : > { %2729 = vadd.xlane.f32.xlu0 %v2728_v36  ;;  %v2450_v60 = vpop.xlane.xlu0 %2449 }
 0x5b9   : > { %15948 = vrsqrt.f32 %v2474_v35  ;;  %v2477_v48 = vadd.f32 1e-05, %v2469_v30  ;;  %v2468_v31 = vmul.f32 0.03125, %v2450_v60  ;;  %v13944_v30 = vld [vmem:[%s16442_s29 + $0x28] sm:$0xff] }
 0x5ba   : > { %v2459_v54 = vpop.xlane.xlu1 %2458 }
 0x5bb   : > { %15950 = vrsqrt.f32 %v2477_v48  ;;  %v2476_v43 = vadd.f32 1e-05, %v2468_v31  ;;  %v2471_v37 = vmul.f32 0.03125, %v2459_v54 }
 0x5bc   : > { %v2456_v63 = vpop.xlane.xlu0 %2455 }
 0x5bd   : > { %15952 = vrsqrt.f32 %v2476_v43  ;;  %v2479_v5 = vadd.f32 1e-05, %v2471_v37  ;;  %v2470_v8 = vmul.f32 0.03125, %v2456_v63  ;;  %v13943_v43 = vld [vmem:[%s16442_s29 + $0x20] sm:$0xff] }
 0x5be   : > { %v2465_v57 = vpop.xlane.xlu1 %2464 }
 0x5bf   : > { %15954 = vrsqrt.f32 %v2479_v5  ;;  %v2478_v49 = vadd.f32 1e-05, %v2470_v8  ;;  %v2473_v38 = vmul.f32 0.03125, %v2465_v57  ;;  %v17124_v57 = vld [vmem:[%s16442_s29 + $0x58] sm:$0xff] }
 0x5c0   : > { %v2462_v10 = vpop.xlane.xlu0 %2461  ;;  %14997 = vmatprep.subr.mxu0 %v17124_v57 }
 0x5c1   : > { %15956 = vrsqrt.f32 %v2478_v49  ;;  %v2481_v21 = vadd.f32 1e-05, %v2473_v38  ;;  %v2472_v28 = vmul.f32 0.03125, %v2462_v10 }
 0x5c3   : > { %15958 = vrsqrt.f32 %v2481_v21  ;;  %v2480_v41 = vadd.f32 1e-05, %v2472_v28 }
 0x5c4   : > { %v15947_v53 = vpop.eup %15946 }
 0x5c5   : > { %v2491_v62 = vmul.f32 %v15947_v53, %v16984_v14  ;;  %15960 = vrsqrt.f32 %v2480_v41 }
 0x5c6   : > { %v15949_v55 = vpop.eup %15948 }
 0x5c7   : > { %v2499_v45 = vmul.f32 %v16883_v29, %v2491_v62  ;;  %v2490_v0 = vmul.f32 %v15949_v55, %v16991_v2 }
 0x5c8   : > { %v15951_v47 = vpop.eup %15950 }
 0x5c9   : > { %v2498_v56 = vmul.f32 %v16883_v29, %v2490_v0  ;;  %v2493_v11 = vmul.f32 %v15951_v47, %v16998_v15  ;;  %v2507_v14 = vadd.f32 %v16889_v50, %v2499_v45 }
 0x5ca   : > { %v15953_v12 = vpop.eup %15952 }
 0x5cb   : > { %v2506_v13 = vadd.f32 %v16889_v50, %v2498_v56  ;;  %v2492_v2 = vmul.f32 %v15953_v12, %v17004_v19  ;;  %v2501_v20 = vmul.f32 %v16883_v29, %v2493_v11  ;;  %v2515_v33 = vmax.f32 %v2507_v14, 0.0 }
 0x5cc   : > { %v15955_v23 = vpop.eup %15954 }
 0x5cd   : > { %v2514_v42 = vmax.f32 %v2506_v13, 0.0  ;;  %v2500_v15 = vmul.f32 %v16883_v29, %v2492_v2  ;;  %v2495_v27 = vmul.f32 %v15955_v23, %v17010_v1  ;;  %v2509_v32 = vadd.f32 %v16889_v50, %v2501_v20 }
 0x5ce   : > { %v15957_v44 = vpop.eup %15956 }
 0x5cf   : > { %14945 = vmatprep.mubr.msk.f32.mxu1 %vm1578_vm1, %v2514_v42  ;;  %v2508_v19 = vadd.f32 %v16889_v50, %v2500_v15  ;;  %v2494_v51 = vmul.f32 %v15957_v44, %v17016_v3  ;;  %v2503_v24 = vmul.f32 %v16883_v29, %v2495_v27  ;;  %v2517_v60 = vmax.f32 %v2509_v32, 0.0 }
 0x5d0   : > { %v15959_v26 = vpop.eup %15958  ;;  %14946 = vmatmul.mubr.msk.f32.vlgmr.msra.gmra.mxu1 %vm1578_vm1, %v2515_v33  ;;  %v13925_v33 = vld [vmem:[%s16372_s6 + $0x2] ss:$0 sm:$0xff] }
 0x5d1   : > { %v2516_v1 = vmax.f32 %v2508_v19, 0.0  ;;  %v2502_v9 = vmul.f32 %v16883_v29, %v2494_v51  ;;  %v2497_v35 = vmul.f32 %v15959_v26, %v17022_v46  ;;  %14978 = vmatpush3.msra.mxu1 %v13946_v4  ;;  %v2511_v3 = vadd.f32 %v16889_v50, %v2503_v24 }
 0x5d2   : > { %v15961_v36 = vpop.eup %15960  ;;  %14979 = vmatprep.subr.mxu1 %v13945_v17 }
 0x5d3   : > { %14948 = vmatprep.mubr.msk.f32.mxu1 %vm1578_vm1, %v2516_v1  ;;  %v2510_v48 = vadd.f32 %v16889_v50, %v2502_v9  ;;  %v2496_v31 = vmul.f32 %v15961_v36, %v17028_v39  ;;  %v2505_v54 = vmul.f32 %v16883_v29, %v2497_v35  ;;  %14980 = vmatpush3.msra.mxu1 %v13945_v17  ;;  %v2519_v63 = vmax.f32 %v2511_v3, 0.0 }
 0x5d4   : > { %14949 = vmatmul.mubr.msk.f32.gmra.mxu1 %vm1578_vm1, %v2517_v60  ;;  %14981 = vmatprep.subr.mxu1 %v13944_v30 }
 0x5d5   : > { %v2518_v46 = vmax.f32 %v2510_v48, 0.0  ;;  %v2504_v37 = vmul.f32 %v16883_v29, %v2496_v31  ;;  %14982 = vmatpush3.msra.mxu1 %v13944_v30  ;;  %v2513_v5 = vadd.f32 %v16889_v50, %v2505_v54  ;;  %v13959_v54 = vld [vmem:[%s16442_s29 + $0x50] sm:$0xff] }
 0x5d6   : > { %14983 = vmatprep.subr.mxu1 %v13943_v43 }
 0x5d7   : > { %14951 = vmatprep.mubr.msk.f32.mxu1 %vm1578_vm1, %v2518_v46  ;;  %v2512_v39 = vadd.f32 %v16889_v50, %v2504_v37  ;;  %14984 = vmatpush3.msra.mxu1 %v13943_v43  ;;  %v2521_v49 = vmax.f32 %v2513_v5, 0.0 }
 0x5d8   : > { %14952 = vmatmul.mubr.msk.f32.gmra.mxu1 %vm1578_vm1, %v2519_v63 }
 0x5d9   : > { %v2520_v8 = vmax.f32 %v2512_v39, 0.0 }
 0x5db   : > { %14954 = vmatprep.mubr.msk.f32.mxu1 %vm1578_vm1, %v2520_v8 }
 0x5dc   : > { %14955 = vmatmul.mubr.msk.f32.gmra.mxu1 %vm1578_vm1, %v2521_v49  ;;  %v13958_v49 = vld [vmem:[%s16442_s29 + $0x48] sm:$0xff] }
 0x633   : > { %v2715_v29 = vpop.xlane.xlu1 %2714 }
 0x634   : > { %v2735_v38 = vmul.f32 0.03125, %v2715_v29 }
 0x635   : > { %v2712_v10 = vpop.xlane.xlu0 %2711 }
 0x636   : > { %v2743_v21 = vadd.f32 1e-05, %v2735_v38  ;;  %v2734_v28 = vmul.f32 0.03125, %v2712_v10 }
 0x637   : > { %v2721_v41 = vpop.xlane.xlu1 %2720 }
 0x638   : > { %15962 = vrsqrt.f32 %v2743_v21  ;;  %v2742_v50 = vadd.f32 1e-05, %v2734_v28  ;;  %v2737_v53 = vmul.f32 0.03125, %v2721_v41  ;;  %v13957_v21 = vld [vmem:[%s16442_s29 + $0x40] sm:$0xff]  ;;  %v16296_v41 = vmov 0.0  }
 0x639   : > { %v2718_v62 = vpop.xlane.xlu0 %2717  ;;  %15017 = vmatprep.subr.mxu1 %v16296_v41 }
 0x63a   : > { %15964 = vrsqrt.f32 %v2742_v50  ;;  %v2745_v55 = vadd.f32 1e-05, %v2737_v53  ;;  %v2736_v45 = vmul.f32 0.03125, %v2718_v62 }
 0x63b   : > { %v2727_v0 = vpop.xlane.xlu1 %2726 }
 0x63c   : > { %15966 = vrsqrt.f32 %v2745_v55  ;;  %v2744_v47 = vadd.f32 1e-05, %v2736_v45  ;;  %v2739_v58 = vmul.f32 0.03125, %v2727_v0 }
 0x63d   : > { %v2724_v4 = vpop.xlane.xlu0 %2723 }
 0x63e   : > { %15968 = vrsqrt.f32 %v2744_v47  ;;  %v2747_v7 = vadd.f32 1e-05, %v2739_v58  ;;  %v2738_v56 = vmul.f32 0.03125, %v2724_v4 }
 0x63f   : > { %v2733_v11 = vpop.xlane.xlu1 %2732 }
 0x640   : > { %15970 = vrsqrt.f32 %v2747_v7  ;;  %v2746_v12 = vadd.f32 1e-05, %v2738_v56  ;;  %v2741_v14 = vmul.f32 0.03125, %v2733_v11  ;;  %v17190_v56 = vld [vmem:[%s16447_s21 + $0x1] ss:$0 sm:$0xff] }
 0x641   : > { %v2730_v52 = vpop.xlane.xlu0 %2729 }
 0x642   : > { %15972 = vrsqrt.f32 %v2746_v12  ;;  %v2749_v13 = vadd.f32 1e-05, %v2741_v14  ;;  %v2740_v2 = vmul.f32 0.03125, %v2730_v52 }
 0x644   : > { %15974 = vrsqrt.f32 %v2749_v13  ;;  %v2748_v20 = vadd.f32 1e-05, %v2740_v2  ;;  %v17194_v2 = vld [vmem:[%s16447_s21] ss:$0 sm:$0xff] }
 0x645   : > { %v15963_v23 = vpop.eup %15962 }
 0x646   : > { %v2759_v42 = vmul.f32 %v15963_v23, %v17038_v22  ;;  %15976 = vrsqrt.f32 %v2748_v20 }
 0x647   : > { %v15965_v15 = vpop.eup %15964 }
 0x648   : > { %v2775_v27 = vmul.f32 %v13923_v25, %v2759_v42  ;;  %v2758_v44 = vmul.f32 %v15965_v15, %v17041_v6 }
 0x649   : > { %v15967_v32 = vpop.eup %15966 }
 0x64a   : > { %v2774_v19 = vmul.f32 %v13923_v25, %v2758_v44  ;;  %v2761_v51 = vmul.f32 %v15967_v32, %v17046_v61  ;;  %v2791_v17 = vadd.f32 %v13925_v33, %v2775_v27 }
 0x64b   : > { %v15969_v24 = vpop.eup %15968 }
 0x64c   : > { %v2790_v26 = vadd.f32 %v13925_v33, %v2774_v19  ;;  %v2760_v1 = vmul.f32 %v15969_v24, %v17052_v34  ;;  %v2777_v9 = vmul.f32 %v13923_v25, %v2761_v51  ;;  %v2799_v3 = vmax.f32 %v2791_v17, 0.0 }
 0x64d   : > { %v15971_v35 = vpop.eup %15970 }
 0x64e   : > { %v2798_v30 = vmax.f32 %v2790_v26, 0.0  ;;  %v2776_v22 = vmul.f32 %v13923_v25, %v2760_v1  ;;  %v2763_v36 = vmul.f32 %v15971_v35, %v17058_v40  ;;  %v2793_v6 = vadd.f32 %v13925_v33, %v2777_v9 }
 0x64f   : > { %v15973_v60 = vpop.eup %15972 }
 0x650   : > { %14965 = vmatprep.mubr.msk.f32.mxu0 %vm1578_vm1, %v2798_v30  ;;  %14985 = vmatprep.mubr.msk.f32.mxu1 %vm1578_vm1, %v2798_v30  ;;  %v2792_v61 = vadd.f32 %v13925_v33, %v2776_v22  ;;  %v2762_v48 = vmul.f32 %v15973_v60, %v17064_v59  ;;  %v2779_v31 = vmul.f32 %v13923_v25, %v2763_v36  ;;  %v2801_v63 = vmax.f32 %v2793_v6, 0.0  ;;  %v17226_v6 = vld [vmem:[%s16447_s21 + $0x2] ss:$0 sm:$0xff] }
 0x651   : > { %v15975_v43 = vpop.eup %15974  ;;  %14966 = vmatmul.mubr.msk.f32.vlgmr.msra.gmra.mxu0 %vm1578_vm1, %v2799_v3  ;;  %14986 = vmatmul.mubr.msk.f32.vlgmr.msra.gmra.mxu1 %vm1578_vm1, %v2799_v3 }
 0x652   : > { %v2800_v34 = vmax.f32 %v2792_v61, 0.0  ;;  %v2778_v40 = vmul.f32 %v13923_v25, %v2762_v48  ;;  %14998 = vmatpush3.msra.mxu0 %v17124_v57  ;;  %v2765_v46 = vmul.f32 %v15975_v43, %v17070_v16  ;;  %v2795_v5 = vadd.f32 %v13925_v33, %v2779_v31 }
 0x653   : > { %v15977_v37 = vpop.eup %15976  ;;  %14999 = vmatprep.subr.mxu0 %v13959_v54 }
 0x654   : > { %14968 = vmatprep.mubr.msk.f32.mxu0 %vm1578_vm1, %v2800_v34  ;;  %14988 = vmatprep.mubr.msk.f32.mxu1 %vm1578_vm1, %v2800_v34  ;;  %v2794_v59 = vadd.f32 %v13925_v33, %v2778_v40  ;;  %v2764_v39 = vmul.f32 %v15977_v37, %v17076_v18  ;;  %v2781_v8 = vmul.f32 %v13923_v25, %v2765_v46  ;;  %v2803_v29 = vmax.f32 %v2795_v5, 0.0 }
 0x655   : > { %14969 = vmatmul.mubr.msk.f32.gmra.mxu0 %vm1578_vm1, %v2801_v63  ;;  %14989 = vmatmul.mubr.msk.f32.gmra.mxu1 %vm1578_vm1, %v2801_v63 }
 0x656   : > { %v2802_v57 = vmax.f32 %v2794_v59, 0.0  ;;  %v2780_v16 = vmul.f32 %v13923_v25, %v2764_v39  ;;  %15000 = vmatpush3.msra.mxu0 %v13959_v54  ;;  %v2797_v38 = vadd.f32 %v13925_v33, %v2781_v8 }
 0x657   : > { %15001 = vmatprep.subr.mxu0 %v13958_v49 }
 0x658   : > { %14971 = vmatprep.mubr.msk.f32.mxu0 %vm1578_vm1, %v2802_v57  ;;  %14991 = vmatprep.mubr.msk.f32.mxu1 %vm1578_vm1, %v2802_v57  ;;  %v2796_v10 = vadd.f32 %v13925_v33, %v2780_v16  ;;  %v2805_v28 = vmax.f32 %v2797_v38, 0.0  ;;  %v17276_v16 = vld [vmem:[%s17273_s1] sm:$0xff] }
 0x659   : > { %14972 = vmatmul.mubr.msk.f32.gmra.mxu0 %vm1578_vm1, %v2803_v29  ;;  %14992 = vmatmul.mubr.msk.f32.gmra.mxu1 %vm1578_vm1, %v2803_v29 }
 0x65a   : > { %v2804_v18 = vmax.f32 %v2796_v10, 0.0  ;;  %15002 = vmatpush3.msra.mxu0 %v13958_v49 }
 0x65b   : > { %15003 = vmatprep.subr.mxu0 %v13957_v21 }
 0x65c   : > { %14974 = vmatprep.mubr.msk.f32.mxu0 %vm1578_vm1, %v2804_v18  ;;  %14994 = vmatprep.mubr.msk.f32.mxu1 %vm1578_vm1, %v2804_v18 }
 0x65d   : > { %14975 = vmatmul.mubr.msk.f32.gmra.mxu0 %vm1578_vm1, %v2805_v28  ;;  %14995 = vmatmul.mubr.msk.f32.gmra.mxu1 %vm1578_vm1, %v2805_v28 }
 0x65e   : > { %15005 = vmatprep.mubr.msk.f32.mxu0 %vm1578_vm1, %v2798_v30  ;;  %15004 = vmatpush3.msra.mxu0 %v13957_v21 }
 0x65f   : > { %15037 = vmatprep.subr.mxu0 %v16296_v41  ;;  %15019 = vmatprep.mubr.msk.f32.mxu1 %vm16297_vm2, %v16296_v41 }
 0x661   : > { %15006 = vmatmul.mubr.msk.f32.vlgmr.msra.gmra.mxu0 %vm1578_vm1, %v2799_v3 }
 0x662   : > { %15008 = vmatprep.mubr.msk.f32.mxu0 %vm1578_vm1, %v2800_v34 }
 0x665   : > { %15009 = vmatmul.mubr.msk.f32.gmra.mxu0 %vm1578_vm1, %v2801_v63 }
 0x666   : > { %15011 = vmatprep.mubr.msk.f32.mxu0 %vm1578_vm1, %v2802_v57 }
 0x669   : > { %15012 = vmatmul.mubr.msk.f32.gmra.mxu0 %vm1578_vm1, %v2803_v29 }
 0x66a   : > { %15014 = vmatprep.mubr.msk.f32.mxu0 %vm1578_vm1, %v2804_v18  ;;  %v17280_v18 = vld [vmem:[%s17273_s1 + $0x8] sm:$0xff] }
 0x66d   : > { %15015 = vmatmul.mubr.msk.f32.gmra.mxu0 %vm1578_vm1, %v2805_v28 }
 0x66e   : > { %15039 = vmatprep.mubr.msk.f32.mxu0 %vm16297_vm2, %v16296_v41 }
 0x690   : > { %v17173_v50 = vpop.f32.mrf.mxu1 }
 0x692   : > { %v17175_v53 = vpop.f32.mrf.mxu1 }
 0x694   : > { %v17177_v62 = vpop.f32.mrf.mxu1 }
 0x696   : > { %v17179_v55 = vpop.f32.mrf.mxu1 }
 0x698   : > { %v17181_v45 = vpop.f32.mrf.mxu1 }
 0x69a   : > { %v17183_v0 = vpop.f32.mrf.mxu1 }
 0x69c   : > { %v17185_v47 = vpop.f32.mrf.mxu1 }
 0x69e   : > { %v17187_v58 = vpop.f32.mrf.mxu1 }
 0x711   : > { %v14967_v4 = vpop.f32.mrf.mxu0  ;;  %v14987_v7 = vpop.f32.mrf.mxu1 }
 0x712   : > { %v3304_v42 = vadd.f32 %v14987_v7, %v17190_v56  ;;  %v3186_v44 = vadd.f32 %v14967_v4, %v17194_v2 }
 0x713   : > { %v3180_v11 = vpop.f32.mrf.mxu0  ;;  %v3298_v12 = vpop.f32.mrf.mxu1 }
 0x714   : > { %v3299_v14 = vadd.f32 %v17190_v56, %v3298_v12  ;;  %v3181_v20 = vadd.f32 %v17194_v2, %v3180_v11 }
 0x715   : > { %v14970_v52 = vpop.f32.mrf.mxu0  ;;  %v14990_v13 = vpop.f32.mrf.mxu1 }
 0x716   : > { %15018 = vmatpush3.xpose.msk.msra.mxu1 %vm1578_vm1, %v3299_v14  ;;  %v3314_v30 = vadd.f32 %v14990_v13, %v17190_v56  ;;  %v3196_v60 = vadd.f32 %v14970_v52, %v17194_v2  ;;  %v17287_v52 = vld [vmem:[%s17273_s1 + $0x10] sm:$0xff] }
 0x717   : > { %v3190_v23 = vpop.f32.mrf.mxu0  ;;  %v3308_v25 = vpop.f32.mrf.mxu1  ;;  %15022 = vmatprep.subr.mxu1 %v16296_v41 }
 0x718   : > { %v3309_v19 = vadd.f32 %v17190_v56, %v3308_v25  ;;  %v3191_v26 = vadd.f32 %v17194_v2, %v3190_v23 }
 0x719   : > { %v14973_v15 = vpop.f32.mrf.mxu0  ;;  %v14993_v27 = vpop.f32.mrf.mxu1  ;;  %15020 = vmatmul.mubr.msk.f32.vlgmr.msra.gmra.mxu1 %vm1578_vm1, %v3181_v20 }
 0x71a   : > { %15023 = vmatpush3.xpose.msk.msra.mxu1 %vm1578_vm1, %v3304_v42  ;;  %15024 = vmatprep.mubr.msk.f32.mxu1 %vm16297_vm2, %v16296_v41  ;;  %v3324_v48 = vadd.f32 %v14993_v27, %v17190_v56  ;;  %v3206_v34 = vadd.f32 %v14973_v15, %v17194_v2  ;;  %v17291_v42 = vld [vmem:[%s17273_s1 + $0x20] sm:$0xff] }
 0x71b   : > { %v3200_v33 = vpop.f32.mrf.mxu0  ;;  %v3318_v32 = vpop.f32.mrf.mxu1  ;;  %15027 = vmatprep.subr.mxu1 %v16296_v41 }
 0x71c   : > { %v3319_v51 = vadd.f32 %v17190_v56, %v3318_v32  ;;  %v3201_v1 = vadd.f32 %v17194_v2, %v3200_v33  ;;  %v17295_v33 = vld [vmem:[%s17273_s1 + $0x18] sm:$0xff] }
 0x71d   : > { %v14976_v24 = vpop.f32.mrf.mxu0  ;;  %v14996_v17 = vpop.f32.mrf.mxu1  ;;  %15025 = vmatmul.mubr.msk.f32.vlgmr.msra.gmra.mxu1 %vm1578_vm1, %v3186_v44 }
 0x71e   : > { %15028 = vmatpush3.xpose.msk.msra.mxu1 %vm1578_vm1, %v3309_v19  ;;  %15038 = vmatpush3.xpose.msk.msra.mxu0 %vm1578_vm1, %v3319_v51  ;;  %v3334_v46 = vadd.f32 %v14996_v17, %v17190_v56  ;;  %v3216_v5 = vadd.f32 %v14976_v24, %v17194_v2 }
 0x71f   : > { %v3210_v9 = vpop.f32.mrf.mxu0  ;;  %v3328_v35 = vpop.f32.mrf.mxu1  ;;  %15029 = vmatprep.mubr.msk.f32.mxu1 %vm16297_vm2, %v16296_v41  ;;  %15032 = vmatprep.subr.mxu1 %v16296_v41 }
 0x720   : > { %v3329_v22 = vadd.f32 %v17190_v56, %v3328_v35  ;;  %15047 = vmatprep.subr.mxu0 %v16296_v41  ;;  %v3211_v3 = vadd.f32 %v17194_v2, %v3210_v9 }
 0x721   : > { %v15007_v36 = vpop.f32.mrf.mxu0  ;;  %15030 = vmatmul.mubr.msk.f32.vlgmr.msra.gmra.mxu1 %vm1578_vm1, %v3191_v26  ;;  %15040 = vmatmul.mubr.msk.f32.vlgmr.msra.gmra.mxu0 %vm1578_vm1, %v3201_v1  ;;  %v17300_v1 = vld [vmem:[%s17273_s1 + $0x30] sm:$0xff] }
 0x722   : > { %15033 = vmatpush3.xpose.msk.msra.mxu1 %vm1578_vm1, %v3314_v30  ;;  %15048 = vmatpush3.xpose.msk.msra.mxu0 %vm1578_vm1, %v3329_v22  ;;  %v3422_v39 = vadd.f32 %v15007_v36, %v17226_v6  ;;  %v17304_v30 = vld [vmem:[%s17273_s1 + $0x28] sm:$0xff] }
 0x723   : > { %v3416_v61 = vpop.f32.mrf.mxu0  ;;  %15034 = vmatprep.mubr.msk.f32.mxu1 %vm16297_vm2, %v16296_v41  ;;  %15049 = vmatprep.mubr.msk.f32.mxu0 %vm16297_vm2, %v16296_v41 }
 0x724   : > { %v3417_v31 = vadd.f32 %v17226_v6, %v3416_v61  ;;  %15042 = vmatprep.subr.mxu1 %v16296_v41  ;;  %15057 = vmatprep.subr.mxu0 %v16296_v41 }
 0x725   : > { %v15010_v54 = vpop.f32.mrf.mxu0  ;;  %15035 = vmatmul.mubr.msk.f32.vlgmr.msra.gmra.mxu1 %vm1578_vm1, %v3196_v60  ;;  %15050 = vmatmul.mubr.msk.f32.vlgmr.msra.gmra.mxu0 %vm1578_vm1, %v3211_v3 }
 0x726   : > { %v17239_v43 = vadd.f32 %v15010_v54, %v17226_v6  ;;  %15043 = vmatpush3.xpose.msk.msra.mxu1 %vm1578_vm1, %v3324_v48  ;;  %15058 = vmatpush3.msra.mxu0 %v3417_v31  ;;  %v17311_v54 = vld [vmem:[%s17273_s1 + $0x38] sm:$0xff]  ;;  %s19271_s1 = sld [smem:[#allocation13_spill]] }
 0x727   : > { %v17243_v40 = vpop.f32.mrf.mxu0  ;;  %15044 = vmatprep.mubr.msk.f32.mxu1 %vm16297_vm2, %v16296_v41  ;;  %15052 = vmatprep.subr.mxu1 %v16296_v41 }
 0x728   : > { %15059 = vmatprep.mubr.msk.f32.mxu0 %vm16297_vm2, %v16296_v41  ;;  %15067 = vmatprep.subr.mxu0 %v16296_v41 }
 0x729   : > { %v15013_v37 = vpop.f32.mrf.mxu0  ;;  %15045 = vmatmul.mubr.msk.f32.vlgmr.msra.gmra.mxu1 %vm1578_vm1, %v3206_v34 }
 0x72a   : > { %v17254_v63 = vadd.f32 %v15013_v37, %v17226_v6  ;;  %15053 = vmatpush3.xpose.msk.msra.mxu1 %vm1578_vm1, %v3334_v46  ;;  %15054 = vmatprep.mubr.msk.f32.mxu1 %vm16297_vm2, %v16296_v41 }
 0x72b   : > { %v17260_v59 = vpop.f32.mrf.mxu0  ;;  %15062 = vmatprep.subr.mxu1 %v16296_v41 }
 0x72d   : > { %v15016_v8 = vpop.f32.mrf.mxu0  ;;  %15055 = vmatmul.mubr.msk.f32.vlgmr.msra.gmra.mxu1 %vm1578_vm1, %v3216_v5 }
 0x72e   : > { %v17266_v49 = vadd.f32 %v15016_v8, %v17226_v6  ;;  %15063 = vmatpush3.msra.mxu1 %v3422_v39  ;;  %15064 = vmatprep.mubr.msk.f32.mxu1 %vm16297_vm2, %v16296_v41 }
 0x72f   : > { %15072 = vmatprep.subr.mxu1 %v16296_v41  ;;  %v17283_v7 = vpop.f32.mrf.mxu0 }
 0x7d9   : > { %v3527_v57 = vpop.f32.mrf.mxu1 }
 0x7da   : > { %v4063_v29 = vmul.f32 0.17677669, %v3527_v57 }
 0x7db   : > { %v15021_v38 = vpop.f32.mrf.mxu1 }
 0x7dc   : > { %v4071_v10 = vadd.f32 %v4063_v29, %v17276_v16 }
 0x7dd   : > { %v3603_v21 = vpop.f32.mrf.mxu1 }
 0x7de   : > { %v4064_v28 = vmul.f32 0.17677669, %v3603_v21  ;;  %v4079_v4 = vsel %vm1448_vm0, %v4071_v10, -inf }
 0x7df   : > { %4080 = vmax.xlane.f32.xlu0 %v4079_v4  ;;  %v15026_v56 = vpop.f32.mrf.mxu1 }
 0x7e0   : > { %v4072_v11 = vadd.f32 %v4064_v28, %v17280_v18 }
 0x7e1   : > { %v3679_v12 = vpop.f32.mrf.mxu1  ;;  %v3831_v14 = vpop.f32.mrf.mxu0 }
 0x7e2   : > { %v4065_v13 = vmul.f32 0.17677669, %v3679_v12  ;;  %v4067_v2 = vmul.f32 0.17677669, %v3831_v14  ;;  %v4082_v20 = vsel %vm1448_vm0, %v4072_v11, -inf }
 0x7e3   : > { %4083 = vmax.xlane.f32.xlu1 %v4082_v20  ;;  %v15031_v23 = vpop.f32.mrf.mxu1  ;;  %v15041_v25 = vpop.f32.mrf.mxu0 }
 0x7e4   : > { %v4073_v15 = vadd.f32 %v4065_v13, %v17287_v52  ;;  %v4075_v24 = vadd.f32 %v4067_v2, %v17291_v42 }
 0x7e5   : > { %v3755_v27 = vpop.f32.mrf.mxu1  ;;  %v3983_v44 = vpop.f32.mrf.mxu0 }
 0x7e6   : > { %v4066_v32 = vmul.f32 0.17677669, %v3755_v27  ;;  %v4069_v19 = vmul.f32 0.17677669, %v3983_v44  ;;  %v4085_v51 = vsel %vm1448_vm0, %v4073_v15, -inf  ;;  %v4091_v60 = vsel %vm1448_vm0, %v4075_v24, -inf }
 0x7e7   : > { %4086 = vmax.xlane.f32.xlu0 %v4085_v51  ;;  %v15036_v17 = vpop.f32.mrf.mxu1  ;;  %v15051_v26 = vpop.f32.mrf.mxu0 }
 0x7e8   : > { %v4074_v9 = vadd.f32 %v4066_v32, %v17295_v33  ;;  %v4077_v3 = vadd.f32 %v4069_v19, %v17300_v1 }
 0x7e9   : > { %v3907_v35 = vpop.f32.mrf.mxu1 }
 0x7ea   : > { %v4068_v22 = vmul.f32 0.17677669, %v3907_v35  ;;  %v4088_v36 = vsel %vm1448_vm0, %v4074_v9, -inf  ;;  %v4097_v37 = vsel %vm1448_vm0, %v4077_v3, -inf }
 0x7eb   : > { %4089 = vmax.xlane.f32.xlu1 %v4088_v36  ;;  %v15046_v61 = vpop.f32.mrf.mxu1  ;;  %4092 = vmax.xlane.f32.xlu0 %v4091_v60 }
 0x7ec   : > { %v4076_v48 = vadd.f32 %v4068_v22, %v17304_v30 }
 0x7ed   : > { %v4059_v31 = vpop.f32.mrf.mxu1 }
 0x7ee   : > { %v4070_v34 = vmul.f32 0.17677669, %v4059_v31  ;;  %v4094_v46 = vsel %vm1448_vm0, %v4076_v48, -inf }
 0x7ef   : > { %4095 = vmax.xlane.f32.xlu1 %v4094_v46  ;;  %v15056_v5 = vpop.f32.mrf.mxu1  ;;  %4098 = vmax.xlane.f32.xlu0 %v4097_v37 }
 0x7f0   : > { %v4078_v39 = vadd.f32 %v4070_v34, %v17311_v54 }
 0x7f2   : > { %v4100_v8 = vsel %vm1448_vm0, %v4078_v39, -inf }
 0x7f3   : > { %4101 = vmax.xlane.f32.xlu1 %v4100_v8 }
 0x868   : > { %v4081_v57 = vpop.xlane.xlu0 %4080 }
 0x869   : > { %v4103_v29 = vsub.f32 %v4071_v10, %v4081_v57 }
 0x86b   : > { %v4111_v38 = vmul.f32 1.442695, %v4103_v29 }
 0x86c   : > { %v4084_v21 = vpop.xlane.xlu1 %4083 }
 0x86d   : > { %15978 = vpow2.f32 %v4111_v38  ;;  %v4104_v28 = vsub.f32 %v4072_v11, %v4084_v21 }
 0x86f   : > { %v4113_v4 = vmul.f32 1.442695, %v4104_v28 }
 0x870   : > { %v4087_v56 = vpop.xlane.xlu0 %4086 }
 0x871   : > { %15980 = vpow2.f32 %v4113_v4  ;;  %v4105_v12 = vsub.f32 %v4073_v15, %v4087_v56 }
 0x873   : > { %v4115_v14 = vmul.f32 1.442695, %v4105_v12  ;;  %v3427_v12 = vadd.f32 %v17226_v6, %v17243_v40 }
 0x874   : > { %v4090_v13 = vpop.xlane.xlu1 %4089  ;;  %v4093_v2 = vpop.xlane.xlu0 %4092 }
 0x875   : > { %15982 = vpow2.f32 %v4115_v14  ;;  %v4106_v20 = vsub.f32 %v4074_v9, %v4090_v13  ;;  %v4107_v23 = vsub.f32 %v4075_v24, %v4093_v2 }
 0x877   : > { %v4117_v25 = vmul.f32 1.442695, %v4106_v20  ;;  %v4119_v27 = vmul.f32 1.442695, %v4107_v23 }
 0x878   : > { %v4096_v44 = vpop.xlane.xlu1 %4095  ;;  %v4099_v32 = vpop.xlane.xlu0 %4098 }
 0x879   : > { %15984 = vpow2.f32 %v4117_v25  ;;  %v4108_v10 = vsub.f32 %v4076_v48, %v4096_v44  ;;  %v4109_v19 = vsub.f32 %v4077_v3, %v4099_v32 }
 0x87a   : > { %v15979_v51 = vpop.eup %15978  ;;  %15986 = vpow2.f32 %v4119_v27  ;;  %v3437_v27 = vadd.f32 %v17226_v6, %v17260_v59  ;;  %v4754_v59 = vld [vmem:[%s16452_s25 + $0x18] sm:$0xff] }
 0x87b   : > { %v4121_v11 = vmul.f32 1.442695, %v4108_v10  ;;  %v4123_v17 = vmul.f32 1.442695, %v4109_v19  ;;  %v4127_v26 = vsel %vm1448_vm0, %v15979_v51, 0.0  ;;  %v3447_v19 = vadd.f32 %v17226_v6, %v17283_v7  ;;  %v14007_v7 = vld [vmem:[%s16452_s25 + $0x38] sm:$0xff] }
 0x87c   : > { %v4102_v15 = vpop.xlane.xlu1 %4101  ;;  %4128 = vadd.xlane.f32.xlu0 %v4127_v26  ;;  %v4753_v26 = vld [vmem:[%s16452_s25 + $0x10] sm:$0xff] }
 0x87d   : > { %15988 = vpow2.f32 %v4121_v11  ;;  %v4110_v35 = vsub.f32 %v4078_v39, %v4102_v15 }
 0x87e   : > { %v15981_v22 = vpop.eup %15980  ;;  %15990 = vpow2.f32 %v4123_v17 }
 0x87f   : > { %v4125_v24 = vmul.f32 1.442695, %v4110_v35  ;;  %v4130_v9 = vsel %vm1448_vm0, %v15981_v22, 0.0  ;;  %v14006_v35 = vld [vmem:[%s16452_s25 + $0x30] sm:$0xff] }
 0x880   : > { %4131 = vadd.xlane.f32.xlu1 %v4130_v9  ;;  %v14004_v9 = vld [vmem:[%s16452_s25 + $0x20] sm:$0xff] }
 0x881   : > { %15992 = vpow2.f32 %v4125_v24  ;;  %v4751_v24 = vld [vmem:[%s16452_s25] sm:$0xff] }
 0x882   : > { %v15983_v36 = vpop.eup %15982 }
 0x883   : > { %v4133_v60 = vsel %vm1448_vm0, %v15983_v36, 0.0 }
 0x884   : > { %4134 = vadd.xlane.f32.xlu0 %v4133_v60 }
 0x886   : > { %v15985_v3 = vpop.eup %15984 }
 0x887   : > { %v15987_v61 = vpop.eup %15986  ;;  %v4136_v48 = vsel %vm1448_vm0, %v15985_v3, 0.0 }
 0x888   : > { %4137 = vadd.xlane.f32.xlu1 %v4136_v48  ;;  %v4139_v31 = vsel %vm1448_vm0, %v15987_v61, 0.0  ;;  %v14020_v48 = vld [vmem:[%s16452_s25 + $0x50] sm:$0xff] }
 0x889   : > { %4140 = vadd.xlane.f32.xlu0 %v4139_v31 }
 0x88a   : > { %v15989_v34 = vpop.eup %15988 }
 0x88b   : > { %v15991_v46 = vpop.eup %15990  ;;  %v4142_v37 = vsel %vm1448_vm0, %v15989_v34, 0.0 }
 0x88c   : > { %4143 = vadd.xlane.f32.xlu1 %v4142_v37  ;;  %v4145_v5 = vsel %vm1448_vm0, %v15991_v46, 0.0  ;;  %v14018_v37 = vld [vmem:[%s16452_s25 + $0x40] sm:$0xff] }
 0x88d   : > { %4146 = vadd.xlane.f32.xlu0 %v4145_v5 }
 0x88e   : > { %v17324_v39 = vpop.eup %15992 }
 0x88f   : > { %v4148_v8 = vsel %vm1448_vm0, %v17324_v39, 0.0 }
 0x890   : > { %4149 = vadd.xlane.f32.xlu1 %v4148_v8 }
 0x905   : > { %v4129_v57 = vpop.xlane.xlu0 %4128 }
 0x906   : > { %15994 = vrcp.f32 %v4129_v57 }
 0x909   : > { %v4132_v29 = vpop.xlane.xlu1 %4131 }
 0x90a   : > { %15996 = vrcp.f32 %v4132_v29 }
 0x90d   : > { %v4135_v38 = vpop.xlane.xlu0 %4134 }
 0x90e   : > { %15998 = vrcp.f32 %v4135_v38 }
 0x911   : > { %v4138_v21 = vpop.xlane.xlu1 %4137 }
 0x912   : > { %16000 = vrcp.f32 %v4138_v21  ;;  %v4141_v28 = vpop.xlane.xlu0 %4140 }
 0x913   : > { %v15995_v4 = vpop.eup %15994  ;;  %16002 = vrcp.f32 %v4141_v28 }
 0x914   : > { %v4159_v56 = vmul.f32 %v15995_v4, %v15979_v51 }
 0x915   : > { %v4144_v14 = vpop.xlane.xlu1 %4143 }
 0x916   : > { %16004 = vrcp.f32 %v4144_v14  ;;  %v4147_v13 = vpop.xlane.xlu0 %4146  ;;  %15060 = vmatmul.mubr.msk.f32.vlgmr.msra.gmra.mxu0 %vm1448_vm0, %v4159_v56 }
 0x917   : > { %v15997_v2 = vpop.eup %15996  ;;  %16006 = vrcp.f32 %v4147_v13  ;;  %15068 = vmatpush3.msra.mxu0 %v3427_v12  ;;  %15069 = vmatprep.mubr.msk.f32.mxu0 %vm16297_vm2, %v16296_v41 }
 0x918   : > { %v4160_v20 = vmul.f32 %v15997_v2, %v15981_v22  ;;  %15077 = vmatprep.subr.mxu0 %v16296_v41  ;;  %v14005_v22 = vld [vmem:[%s16452_s25 + $0x28] sm:$0xff]  ;;  %v14009_v2 = vld [vmem:[%s19262_s3 + $0x1] ss:$0 sm:$0xff] }
 0x919   : > { %v4150_v23 = vpop.xlane.xlu1 %4149 }
 0x91a   : > { %16008 = vrcp.f32 %v4150_v23  ;;  %15065 = vmatmul.mubr.msk.f32.vlgmr.msra.gmra.mxu1 %vm1448_vm0, %v4160_v20 }
 0x91b   : > { %v15999_v25 = vpop.eup %15998  ;;  %15073 = vmatpush3.msra.mxu1 %v17239_v43  ;;  %15074 = vmatprep.mubr.msk.f32.mxu1 %vm16297_vm2, %v16296_v41 }
 0x91c   : > { %v4161_v40 = vmul.f32 %v15999_v25, %v15983_v36  ;;  %15082 = vmatprep.subr.mxu1 %v16296_v41  ;;  %v14021_v36 = vld [vmem:[%s16452_s25 + $0x58] sm:$0xff] }
 0x91e   : > { %15070 = vmatmul.mubr.msk.f32.vlgmr.msra.gmra.mxu0 %vm1448_vm0, %v4161_v40  ;;  %v13995_v40 = vld [vmem:[%s19262_s3] ss:$0 sm:$0xff] }
 0x91f   : > { %v16001_v44 = vpop.eup %16000  ;;  %15078 = vmatpush3.msra.mxu0 %v3437_v27  ;;  %15079 = vmatprep.mubr.msk.f32.mxu0 %vm16297_vm2, %v16296_v41 }
 0x920   : > { %v16003_v32 = vpop.eup %16002  ;;  %15087 = vmatprep.subr.mxu0 %v16296_v41  ;;  %v4162_v43 = vmul.f32 %v16001_v44, %v15985_v3 }
 0x921   : > { %v4163_v10 = vmul.f32 %v16003_v32, %v15987_v61 }
 0x922   : > { %15075 = vmatmul.mubr.msk.f32.vlgmr.msra.gmra.mxu1 %vm1448_vm0, %v4162_v43 }
 0x923   : > { %v16005_v51 = vpop.eup %16004  ;;  %15080 = vmatmul.mubr.msk.f32.vlgmr.msra.gmra.mxu0 %vm1448_vm0, %v4163_v10  ;;  %15083 = vmatpush3.msra.mxu1 %v17254_v63 }
 0x924   : > { %v16007_v11 = vpop.eup %16006  ;;  %15088 = vmatpush3.msra.mxu0 %v3447_v19  ;;  %15084 = vmatprep.mubr.msk.f32.mxu1 %vm16297_vm2, %v16296_v41  ;;  %v4164_v17 = vmul.f32 %v16005_v51, %v15989_v34  ;;  %v14019_v34 = vld [vmem:[%s16452_s25 + $0x48] sm:$0xff] }
 0x925   : > { %15089 = vmatprep.mubr.msk.f32.mxu0 %vm16297_vm2, %v16296_v41  ;;  %15092 = vmatprep.subr.mxu1 %v16296_v41  ;;  %v4165_v6 = vmul.f32 %v16007_v11, %v15991_v46 }
 0x926   : > { %15085 = vmatmul.mubr.msk.f32.vlgmr.msra.gmra.mxu1 %vm1448_vm0, %v4164_v17  ;;  %15097 = vmatprep.subr.mxu0 %v4754_v59 }
 0x927   : > { %v16009_v63 = vpop.eup %16008  ;;  %15090 = vmatmul.mubr.msk.f32.vlgmr.msra.gmra.mxu0 %vm1448_vm0, %v4165_v6  ;;  %15093 = vmatpush3.msra.mxu1 %v17266_v49  ;;  %v4752_v49 = vld [vmem:[%s16452_s25 + $0x8] sm:$0xff] }
 0x928   : > { %15094 = vmatprep.mubr.msk.f32.mxu1 %vm16297_vm2, %v16296_v41  ;;  %v4166_v15 = vmul.f32 %v16009_v63, %v17324_v39  ;;  %15117 = vmatprep.subr.mxu1 %v14007_v7 }
 0x929   : > { %15098 = vmatpush3.msra.mxu0 %v4754_v59 }
 0x92a   : > { %15095 = vmatmul.mubr.msk.f32.vlgmr.msra.gmra.mxu1 %vm1448_vm0, %v4166_v15  ;;  %15099 = vmatprep.subr.mxu0 %v4753_v26 }
 0x92b   : > { %15118 = vmatpush3.msra.mxu1 %v14007_v7  ;;  %15100 = vmatpush3.msra.mxu0 %v4753_v26 }
 0x92c   : > { %15119 = vmatprep.subr.mxu1 %v14006_v35  ;;  %15101 = vmatprep.subr.mxu0 %v4752_v49 }
 0x92d   : > { %15120 = vmatpush3.msra.mxu1 %v14006_v35  ;;  %15102 = vmatpush3.msra.mxu0 %v4752_v49 }
 0x92e   : > { %15121 = vmatprep.subr.mxu1 %v14005_v22  ;;  %15103 = vmatprep.subr.mxu0 %v4751_v24 }
 0x92f   : > { %15122 = vmatpush3.msra.mxu1 %v14005_v22  ;;  %15104 = vmatpush3.msra.mxu0 %v4751_v24 }
 0x930   : > { %15123 = vmatprep.subr.mxu1 %v14004_v9  ;;  %15137 = vmatprep.subr.mxu0 %v14021_v36 }
 0x931   : > { %15124 = vmatpush3.msra.mxu1 %v14004_v9 }
 0x932   : > { %15157 = vmatprep.subr.mxu1 %v16296_v41 }
 0x9d6   : > { %v4236_v60 = vpop.f32.mrf.mxu0 }
 0x9d7   : > { %15105 = vmatprep.mubr.msk.f32.mxu0 %vm1578_vm1, %v4236_v60  ;;  %15125 = vmatprep.mubr.msk.f32.mxu1 %vm1578_vm1, %v4236_v60 }
 0x9d8   : > { %v15061_v3 = vpop.f32.mrf.mxu0 }
 0x9da   : > { %v4309_v61 = vpop.f32.mrf.mxu1 }
 0x9db   : > { %15106 = vmatmul.mubr.msk.f32.vlgmr.msra.gmra.mxu0 %vm1578_vm1, %v4309_v61  ;;  %15126 = vmatmul.mubr.msk.f32.vlgmr.msra.gmra.mxu1 %vm1578_vm1, %v4309_v61 }
 0x9dc   : > { %v15066_v31 = vpop.f32.mrf.mxu1  ;;  %15138 = vmatpush3.msra.mxu0 %v14021_v36 }
 0x9dd   : > { %15139 = vmatprep.subr.mxu0 %v14020_v48 }
 0x9de   : > { %v4382_v46 = vpop.f32.mrf.mxu0  ;;  %15140 = vmatpush3.msra.mxu0 %v14020_v48 }
 0x9df   : > { %15108 = vmatprep.mubr.msk.f32.mxu0 %vm1578_vm1, %v4382_v46  ;;  %15128 = vmatprep.mubr.msk.f32.mxu1 %vm1578_vm1, %v4382_v46 }
 0x9e0   : > { %v15071_v5 = vpop.f32.mrf.mxu0  ;;  %15141 = vmatprep.subr.mxu0 %v14019_v34 }
 0x9e1   : > { %15142 = vmatpush3.msra.mxu0 %v14019_v34  ;;  %v17430_v34 = vld [vmem:[%s19262_s3 + $0x2] ss:$0 sm:$0xff] }
 0x9e2   : > { %v4455_v39 = vpop.f32.mrf.mxu1  ;;  %15143 = vmatprep.subr.mxu0 %v14018_v37 }
 0x9e3   : > { %v4528_v8 = vpop.f32.mrf.mxu0  ;;  %15109 = vmatmul.mubr.msk.f32.gmra.mxu0 %vm1578_vm1, %v4455_v39  ;;  %15129 = vmatmul.mubr.msk.f32.gmra.mxu1 %vm1578_vm1, %v4455_v39 }
 0x9e4   : > { %v15076_v57 = vpop.f32.mrf.mxu1  ;;  %15111 = vmatprep.mubr.msk.f32.mxu0 %vm1578_vm1, %v4528_v8  ;;  %15131 = vmatprep.mubr.msk.f32.mxu1 %vm1578_vm1, %v4528_v8 }
 0x9e5   : > { %v15081_v29 = vpop.f32.mrf.mxu0  ;;  %15144 = vmatpush3.msra.mxu0 %v14018_v37 }
 0x9e6   : > { %v4601_v38 = vpop.f32.mrf.mxu1  ;;  %15177 = vmatprep.subr.mxu0 %v16296_v41 }
 0x9e7   : > { %v4674_v21 = vpop.f32.mrf.mxu0  ;;  %15112 = vmatmul.mubr.msk.f32.gmra.mxu0 %vm1578_vm1, %v4601_v38  ;;  %15132 = vmatmul.mubr.msk.f32.gmra.mxu1 %vm1578_vm1, %v4601_v38 }
 0x9e8   : > { %v15086_v28 = vpop.f32.mrf.mxu1  ;;  %15114 = vmatprep.mubr.msk.f32.mxu0 %vm1578_vm1, %v4674_v21  ;;  %15134 = vmatprep.mubr.msk.f32.mxu1 %vm1578_vm1, %v4674_v21 }
 0x9e9   : > { %v15091_v4 = vpop.f32.mrf.mxu0 }
 0x9ea   : > { %v4747_v56 = vpop.f32.mrf.mxu1 }
 0x9eb   : > { %15115 = vmatmul.mubr.msk.f32.gmra.mxu0 %vm1578_vm1, %v4747_v56  ;;  %15135 = vmatmul.mubr.msk.f32.gmra.mxu1 %vm1578_vm1, %v4747_v56 }
 0x9ec   : > { %v15096_v12 = vpop.f32.mrf.mxu1  ;;  %15145 = vmatprep.mubr.msk.f32.mxu0 %vm1578_vm1, %v4236_v60  ;;  %15159 = vmatprep.mubr.msk.f32.mxu1 %vm16297_vm2, %v16296_v41 }
 0x9ef   : > { %15146 = vmatmul.mubr.msk.f32.vlgmr.msra.gmra.mxu0 %vm1578_vm1, %v4309_v61 }
 0x9f0   : > { %15148 = vmatprep.mubr.msk.f32.mxu0 %vm1578_vm1, %v4382_v46 }
 0x9f3   : > { %15149 = vmatmul.mubr.msk.f32.gmra.mxu0 %vm1578_vm1, %v4455_v39 }
 0x9f4   : > { %15151 = vmatprep.mubr.msk.f32.mxu0 %vm1578_vm1, %v4528_v8 }
 0x9f7   : > { %15152 = vmatmul.mubr.msk.f32.gmra.mxu0 %vm1578_vm1, %v4601_v38 }
 0x9f8   : > { %15154 = vmatprep.mubr.msk.f32.mxu0 %vm1578_vm1, %v4674_v21 }
 0x9fb   : > { %15155 = vmatmul.mubr.msk.f32.gmra.mxu0 %vm1578_vm1, %v4747_v56 }
 0x9fc   : > { %15179 = vmatprep.mubr.msk.f32.mxu0 %vm16297_vm2, %v16296_v41 }
 0xa9b   : > { %v15107_v14 = vpop.f32.mrf.mxu0  ;;  %v15127_v13 = vpop.f32.mrf.mxu1 }
 0xa9c   : > { %v4976_v44 = vadd.f32 %v15127_v13, %v14009_v2  ;;  %v4858_v10 = vadd.f32 %v15107_v14, %v13995_v40 }
 0xa9d   : > { %v4970_v20 = vpop.f32.mrf.mxu1  ;;  %v4852_v23 = vpop.f32.mrf.mxu0 }
 0xa9e   : > { %v4971_v25 = vadd.f32 %v14009_v2, %v4970_v20  ;;  %v4853_v27 = vadd.f32 %v13995_v40, %v4852_v23 }
 0xaa0   : > { %15158 = vmatpush3.xpose.msk.msra.mxu1 %vm1578_vm1, %v4971_v25 }
 0xaa1   : > { %15162 = vmatprep.subr.mxu1 %v16296_v41 }
 0xaa3   : > { %v15110_v32 = vpop.f32.mrf.mxu0  ;;  %v15130_v43 = vpop.f32.mrf.mxu1  ;;  %15160 = vmatmul.mubr.msk.f32.vlgmr.msra.gmra.mxu1 %vm1578_vm1, %v4853_v27 }
 0xaa4   : > { %15163 = vmatpush3.xpose.msk.msra.mxu1 %vm1578_vm1, %v4976_v44  ;;  %15164 = vmatprep.mubr.msk.f32.mxu1 %vm16297_vm2, %v16296_v41  ;;  %v4986_v26 = vadd.f32 %v15130_v43, %v14009_v2  ;;  %v4868_v22 = vadd.f32 %v15110_v32, %v13995_v40 }
 0xaa5   : > { %v4862_v19 = vpop.f32.mrf.mxu0  ;;  %v4980_v51 = vpop.f32.mrf.mxu1  ;;  %15167 = vmatprep.subr.mxu1 %v16296_v41 }
 0xaa6   : > { %v4981_v59 = vadd.f32 %v14009_v2, %v4980_v51  ;;  %v4863_v6 = vadd.f32 %v13995_v40, %v4862_v19 }
 0xaa7   : > { %v15113_v11 = vpop.f32.mrf.mxu0  ;;  %v15133_v17 = vpop.f32.mrf.mxu1  ;;  %15165 = vmatmul.mubr.msk.f32.vlgmr.msra.gmra.mxu1 %vm1578_vm1, %v4858_v10 }
 0xaa8   : > { %15168 = vmatpush3.xpose.msk.msra.mxu1 %vm1578_vm1, %v4981_v59  ;;  %15169 = vmatprep.mubr.msk.f32.mxu1 %vm16297_vm2, %v16296_v41  ;;  %v4996_v60 = vadd.f32 %v15133_v17, %v14009_v2  ;;  %v4878_v48 = vadd.f32 %v15113_v11, %v13995_v40 }
 0xaa9   : > { %v4872_v7 = vpop.f32.mrf.mxu0  ;;  %v4990_v63 = vpop.f32.mrf.mxu1  ;;  %15172 = vmatprep.subr.mxu1 %v16296_v41 }
 0xaaa   : > { %v4991_v15 = vadd.f32 %v14009_v2, %v4990_v63  ;;  %v4873_v24 = vadd.f32 %v13995_v40, %v4872_v7 }
 0xaab   : > { %v15116_v35 = vpop.f32.mrf.mxu0  ;;  %v15136_v49 = vpop.f32.mrf.mxu1  ;;  %15170 = vmatmul.mubr.msk.f32.vlgmr.msra.gmra.mxu1 %vm1578_vm1, %v4863_v6 }
 0xaac   : > { %15173 = vmatpush3.xpose.msk.msra.mxu1 %vm1578_vm1, %v4986_v26  ;;  %15178 = vmatpush3.xpose.msk.msra.mxu0 %vm1578_vm1, %v4991_v15  ;;  %v5006_v37 = vadd.f32 %v15136_v49, %v14009_v2  ;;  %v4888_v57 = vadd.f32 %v15116_v35, %v13995_v40 }
 0xaad   : > { %v4882_v9 = vpop.f32.mrf.mxu0  ;;  %v5000_v36 = vpop.f32.mrf.mxu1  ;;  %15174 = vmatprep.mubr.msk.f32.mxu1 %vm16297_vm2, %v16296_v41  ;;  %15182 = vmatprep.subr.mxu1 %v16296_v41 }
 0xaae   : > { %v5001_v3 = vadd.f32 %v14009_v2, %v5000_v36  ;;  %15187 = vmatprep.subr.mxu0 %v16296_v41  ;;  %v4883_v31 = vadd.f32 %v13995_v40, %v4882_v9 }
 0xaaf   : > { %v15147_v61 = vpop.f32.mrf.mxu0  ;;  %15175 = vmatmul.mubr.msk.f32.vlgmr.msra.gmra.mxu1 %vm1578_vm1, %v4868_v22  ;;  %15180 = vmatmul.mubr.msk.f32.vlgmr.msra.gmra.mxu0 %vm1578_vm1, %v4873_v24 }
 0xab0   : > { %15183 = vmatpush3.xpose.msk.msra.mxu1 %vm1578_vm1, %v4996_v60  ;;  %15188 = vmatpush3.xpose.msk.msra.mxu0 %vm1578_vm1, %v5001_v3  ;;  %v5094_v38 = vadd.f32 %v15147_v61, %v17430_v34  ;;  %v16242_v61 = vld [vmem:[%s16372_s6] ss:$0 sm:$0xff] }
 0xab1   : > { %v5088_v46 = vpop.f32.mrf.mxu0  ;;  %15184 = vmatprep.mubr.msk.f32.mxu1 %vm16297_vm2, %v16296_v41  ;;  %15189 = vmatprep.mubr.msk.f32.mxu0 %vm16297_vm2, %v16296_v41 }
 0xab2   : > { %v5089_v5 = vadd.f32 %v17430_v34, %v5088_v46  ;;  %15192 = vmatprep.subr.mxu1 %v16296_v41  ;;  %15197 = vmatprep.subr.mxu0 %v16296_v41 }
 0xab3   : > { %v15150_v39 = vpop.f32.mrf.mxu0  ;;  %15185 = vmatmul.mubr.msk.f32.vlgmr.msra.gmra.mxu1 %vm1578_vm1, %v4878_v48  ;;  %15190 = vmatmul.mubr.msk.f32.vlgmr.msra.gmra.mxu0 %vm1578_vm1, %v4883_v31  ;;  %v17499_v48 = vadd.f32 %v16242_v61, %v17173_v50 }
 0xab4   : > { %v17442_v8 = vadd.f32 %v15150_v39, %v17430_v34  ;;  %15193 = vmatpush3.xpose.msk.msra.mxu1 %vm1578_vm1, %v5006_v37  ;;  %15198 = vmatpush3.msra.mxu0 %v5089_v5 }
 0xab5   : > { %v17445_v29 = vpop.f32.mrf.mxu0  ;;  %15194 = vmatprep.mubr.msk.f32.mxu1 %vm16297_vm2, %v16296_v41  ;;  %15202 = vmatprep.subr.mxu1 %v16296_v41  ;;  %v2938_v50 = vsel %vm1578_vm1, %v17499_v48, 0.0 }
 0xab6   : > { %15199 = vmatprep.mubr.msk.f32.mxu0 %vm16297_vm2, %v16296_v41  ;;  %15207 = vmatprep.subr.mxu0 %v16296_v41 }
 0xab7   : > { %v15153_v21 = vpop.f32.mrf.mxu0  ;;  %15195 = vmatmul.mubr.msk.f32.vlgmr.msra.gmra.mxu1 %vm1578_vm1, %v4888_v57 }
 0xab8   : > { %v17456_v28 = vadd.f32 %v15153_v21, %v17430_v34  ;;  %15203 = vmatpush3.msra.mxu1 %v5094_v38  ;;  %15204 = vmatprep.mubr.msk.f32.mxu1 %vm16297_vm2, %v16296_v41  ;;  %v17513_v38 = vadd.f32 %v16242_v61, %v17179_v55  ;;  %v17516_v21 = vadd.f32 %v16242_v61, %v17181_v45 }
 0xab9   : > { %v17460_v4 = vpop.f32.mrf.mxu0  ;;  %15212 = vmatprep.subr.mxu1 %v16296_v41 }
 0xaba   : > { %v2950_v55 = vsel %vm1578_vm1, %v17516_v21, 0.0  ;;  %v2941_v45 = vsel %vm1578_vm1, %v17513_v38, 0.0 }
 0xabb   : > { %v15156_v56 = vpop.f32.mrf.mxu0 }
 0xabc   : > { %v17464_v12 = vadd.f32 %v15156_v56, %v17430_v34  ;;  %v17525_v56 = vadd.f32 %v16242_v61, %v17185_v47 }
 0xabd   : > { %v17476_v19 = vpop.f32.mrf.mxu0 }
 0xb63   : > { %v5199_v14 = vpop.f32.mrf.mxu1 }
 0xb64   : > { %v5735_v13 = vmul.f32 0.17677669, %v5199_v14  ;;  %v17532_v14 = vadd.f32 %v16242_v61, %v17187_v58 }
 0xb65   : > { %v15161_v2 = vpop.f32.mrf.mxu1 }
 0xb66   : > { %v17467_v20 = vadd.f32 %v5735_v13, %v17276_v16  ;;  %v2956_v13 = vsel %vm1578_vm1, %v17525_v56, 0.0  ;;  %v2953_v47 = vsel %vm1578_vm1, %v17532_v14, 0.0 }
 0xb67   : > { %v5275_v23 = vpop.f32.mrf.mxu1 }
 0xb68   : > { %v5736_v25 = vmul.f32 0.17677669, %v5275_v23  ;;  %v5751_v40 = vsel %vm1448_vm0, %v17467_v20, -inf }
 0xb69   : > { %5752 = vmax.xlane.f32.xlu1 %v5751_v40  ;;  %v15166_v27 = vpop.f32.mrf.mxu1 }
 0xb6a   : > { %v17472_v44 = vadd.f32 %v5736_v25, %v17280_v18 }
 0xb6b   : > { %v5351_v32 = vpop.f32.mrf.mxu1 }
 0xb6c   : > { %v5737_v43 = vmul.f32 0.17677669, %v5351_v32  ;;  %v5754_v10 = vsel %vm1448_vm0, %v17472_v44, -inf }
 0xb6d   : > { %5755 = vmax.xlane.f32.xlu0 %v5754_v10  ;;  %v15171_v16 = vpop.f32.mrf.mxu1 }
 0xb6e   : > { %v17479_v51 = vadd.f32 %v5737_v43, %v17287_v52 }
 0xb6f   : > { %v5427_v59 = vpop.f32.mrf.mxu1  ;;  %v5503_v11 = vpop.f32.mrf.mxu0 }
 0xb70   : > { %v5738_v17 = vmul.f32 0.17677669, %v5427_v59  ;;  %v5739_v6 = vmul.f32 0.17677669, %v5503_v11  ;;  %v5757_v18 = vsel %vm1448_vm0, %v17479_v51, -inf }
 0xb71   : > { %v15181_v7 = vpop.f32.mrf.mxu0  ;;  %5758 = vmax.xlane.f32.xlu1 %v5757_v18  ;;  %v15176_v63 = vpop.f32.mrf.mxu1 }
 0xb72   : > { %v17484_v26 = vadd.f32 %v5738_v17, %v17295_v33  ;;  %v17487_v15 = vadd.f32 %v5739_v6, %v17291_v42 }
 0xb73   : > { %v5579_v35 = vpop.f32.mrf.mxu1  ;;  %v5655_v52 = vpop.f32.mrf.mxu0 }
 0xb74   : > { %v5740_v49 = vmul.f32 0.17677669, %v5579_v35  ;;  %v5741_v22 = vmul.f32 0.17677669, %v5655_v52  ;;  %v5763_v24 = vsel %vm1448_vm0, %v17487_v15, -inf  ;;  %v5760_v9 = vsel %vm1448_vm0, %v17484_v26, -inf }
 0xb75   : > { %v15191_v36 = vpop.f32.mrf.mxu0  ;;  %5764 = vmax.xlane.f32.xlu1 %v5763_v24  ;;  %5761 = vmax.xlane.f32.xlu0 %v5760_v9  ;;  %v15186_v60 = vpop.f32.mrf.mxu1 }
 0xb76   : > { %v5748_v33 = vadd.f32 %v5740_v49, %v17304_v30  ;;  %v17495_v3 = vadd.f32 %v5741_v22, %v17300_v1  ;;  %v2897_v30 = vadd.f32 %v16242_v61, %v17175_v53  ;;  %v17507_v1 = vadd.f32 %v16242_v61, %v17177_v62 }
 0xb77   : > { %v5731_v42 = vpop.f32.mrf.mxu1  ;;  %v17522_v62 = vadd.f32 %v16242_v61, %v17183_v0 }
 0xb78   : > { %v5742_v31 = vmul.f32 0.17677669, %v5731_v42  ;;  %v5769_v46 = vsel %vm1448_vm0, %v17495_v3, -inf  ;;  %v5766_v37 = vsel %vm1448_vm0, %v5748_v33, -inf  ;;  %v2935_v53 = vsel %vm1578_vm1, %v2897_v30, 0.0 }
 0xb79   : > { %5770 = vmax.xlane.f32.xlu1 %v5769_v46  ;;  %5767 = vmax.xlane.f32.xlu0 %v5766_v37  ;;  %v15196_v5 = vpop.f32.mrf.mxu1  ;;  %v2947_v0 = vsel %vm1578_vm1, %v17522_v62, 0.0 }
 0xb7a   : > { %v5750_v39 = vadd.f32 %v5742_v31, %v17311_v54  ;;  %v2944_v54 = vsel %vm1578_vm1, %v17507_v1, 0.0 }
 0xb7c   : > { %v5772_v57 = vsel %vm1448_vm0, %v5750_v39, -inf }
 0xb7d   : > { %2939 = vadd.xlane.f32.xlu1 %v2938_v50  ;;  %5773 = vmax.xlane.f32.xlu0 %v5772_v57 }
 0xb81   : > { %2945 = vadd.xlane.f32.xlu1 %v2944_v54  ;;  %2936 = vadd.xlane.f32.xlu0 %v2935_v53 }
 0xb85   : > { %2951 = vadd.xlane.f32.xlu1 %v2950_v55  ;;  %2942 = vadd.xlane.f32.xlu0 %v2941_v45 }
 0xb89   : > { %2957 = vadd.xlane.f32.xlu1 %v2956_v13  ;;  %2948 = vadd.xlane.f32.xlu0 %v2947_v0 }
 0xb8d   : > { %2954 = vadd.xlane.f32.xlu0 %v2953_v47 }
 0xbf2   : > { %v5753_v2 = vpop.xlane.xlu1 %5752 }
 0xbf3   : > { %v5775_v23 = vsub.f32 %v17467_v20, %v5753_v2 }
 0xbf5   : > { %v5783_v25 = vmul.f32 1.442695, %v5775_v23 }
 0xbf6   : > { %v5756_v40 = vpop.xlane.xlu0 %5755 }
 0xbf7   : > { %16010 = vpow2.f32 %v5783_v25  ;;  %v5776_v32 = vsub.f32 %v17472_v44, %v5756_v40 }
 0xbf9   : > { %v5785_v59 = vmul.f32 1.442695, %v5776_v32 }
 0xbfa   : > { %v5759_v58 = vpop.xlane.xlu1 %5758 }
 0xbfb   : > { %v5777_v27 = vsub.f32 %v17479_v51, %v5759_v58 }
 0xbfd   : > { %v5787_v43 = vmul.f32 1.442695, %v5777_v27 }
 0xbfe   : > { %v5765_v10 = vpop.xlane.xlu1 %5764  ;;  %v5762_v16 = vpop.xlane.xlu0 %5761 }
 0xbff   : > { %16012 = vpow2.f32 %v5787_v43  ;;  %v5778_v11 = vsub.f32 %v17484_v26, %v5762_v16  ;;  %v5779_v17 = vsub.f32 %v17487_v15, %v5765_v10 }
 0xc00   : > { %16014 = vpow2.f32 %v5785_v59 }
 0xc01   : > { %v5789_v63 = vmul.f32 1.442695, %v5778_v11  ;;  %v5791_v51 = vmul.f32 1.442695, %v5779_v17 }
 0xc02   : > { %v5768_v6 = vpop.xlane.xlu0 %5767  ;;  %v5771_v18 = vpop.xlane.xlu1 %5770 }
 0xc03   : > { %v5780_v20 = vsub.f32 %v5748_v33, %v5768_v6  ;;  %v5781_v52 = vsub.f32 %v17495_v3, %v5771_v18 }
 0xc04   : > { %v17545_v7 = vpop.eup %16010 }
 0xc05   : > { %v5793_v35 = vmul.f32 1.442695, %v5780_v20  ;;  %v5799_v44 = vsel %vm1448_vm0, %v17545_v7, 0.0  ;;  %v5795_v22 = vmul.f32 1.442695, %v5781_v52 }
 0xc06   : > { %5800 = vadd.xlane.f32.xlu1 %v5799_v44  ;;  %v5774_v49 = vpop.xlane.xlu0 %5773  ;;  %v2940_v26 = vpop.xlane.xlu1 %2939 }
 0xc07   : > { %16016 = vpow2.f32 %v5793_v35  ;;  %v5782_v15 = vsub.f32 %v5750_v39, %v5774_v49  ;;  %v2960_v31 = vmul.f32 0.03125, %v2940_v26 }
 0xc08   : > { %16018 = vpow2.f32 %v5789_v63 }
 0xc09   : > { %16020 = vpow2.f32 %v5791_v51  ;;  %v5797_v60 = vmul.f32 1.442695, %v5782_v15 }
 0xc0a   : > { %v2937_v24 = vpop.xlane.xlu0 %2936  ;;  %16022 = vpow2.f32 %v5795_v22  ;;  %v2946_v3 = vpop.xlane.xlu1 %2945 }
 0xc0b   : > { %v2959_v9 = vmul.f32 0.03125, %v2937_v24  ;;  %16024 = vpow2.f32 %v5797_v60  ;;  %v2962_v53 = vmul.f32 0.03125, %v2946_v3 }
 0xc0c   : > { %v17550_v36 = vpop.eup %16012 }
 0xc0d   : > { %v17552_v33 = vsub.f32 %v2897_v30, %v2959_v9  ;;  %v5805_v42 = vsel %vm1448_vm0, %v17550_v36, 0.0  ;;  %v17559_v37 = vpop.eup %16014  ;;  %v17564_v30 = vsub.f32 %v17499_v48, %v2960_v31  ;;  %v17579_v2 = vsub.f32 %v17507_v1, %v2962_v53 }
 0xc0e   : > { %5806 = vadd.xlane.f32.xlu1 %v5805_v42  ;;  %v2943_v5 = vpop.xlane.xlu0 %2942  ;;  %v2952_v50 = vpop.xlane.xlu1 %2951  ;;  %v5802_v57 = vsel %vm1448_vm0, %v17559_v37, 0.0  ;;  %v5099_v31 = vadd.f32 %v17430_v34, %v17445_v29  ;;  %v5109_v29 = vadd.f32 %v17430_v34, %v17460_v4 }
 0xc0f   : > { %v2975_v61 = vmul.f32 %v17552_v33, %v17552_v33  ;;  %v2961_v0 = vmul.f32 0.03125, %v2943_v5  ;;  %v2976_v47 = vmul.f32 %v17564_v30, %v17564_v30  ;;  %v2964_v23 = vmul.f32 0.03125, %v2952_v50 }
 0xc10   : > { %v2978_v17 = vmul.f32 %v17579_v2, %v17579_v2 }
 0xc11   : > { %v2983_v46 = vsel %vm1578_vm1, %v2975_v61, 0.0  ;;  %v17586_v27 = vsub.f32 %v17513_v38, %v2961_v0  ;;  %v2986_v43 = vsel %vm1578_vm1, %v2976_v47, 0.0  ;;  %v17592_v1 = vsub.f32 %v17516_v21, %v2964_v23 }
 0xc12   : > { %2984 = vadd.xlane.f32.xlu0 %v2983_v46  ;;  %v2949_v13 = vpop.xlane.xlu0 %2948  ;;  %v2958_v58 = vpop.xlane.xlu1 %2957  ;;  %v2992_v63 = vsel %vm1578_vm1, %v2978_v17, 0.0  ;;  %v17642_v17 = vld [vmem:[%s16372_s6 + $0x1] ss:$0 sm:$0xff] }
 0xc13   : > { %v2963_v32 = vmul.f32 0.03125, %v2949_v13  ;;  %v2966_v16 = vmul.f32 0.03125, %v2958_v58  ;;  %v2977_v21 = vmul.f32 %v17586_v27, %v17586_v27  ;;  %v2980_v35 = vmul.f32 %v17592_v1, %v17592_v1 }
 0xc14   : > { %v17561_v39 = vpop.eup %16016 }
 0xc15   : > { %v17568_v54 = vpop.eup %16018  ;;  %v5814_v55 = vsel %vm1448_vm0, %v17561_v39, 0.0  ;;  %v17599_v38 = vsub.f32 %v17522_v62, %v2963_v32  ;;  %v17606_v20 = vsub.f32 %v17525_v56, %v2966_v16  ;;  %v2989_v44 = vsel %vm1578_vm1, %v2977_v21, 0.0 }
 0xc16   : > { %5803 = vadd.xlane.f32.xlu0 %v5802_v57  ;;  %v17572_v45 = vpop.eup %16020  ;;  %5815 = vadd.xlane.f32.xlu1 %v5814_v55  ;;  %v5808_v48 = vsel %vm1448_vm0, %v17568_v54, 0.0  ;;  %v2955_v59 = vpop.xlane.xlu0 %2954  ;;  %v2998_v52 = vsel %vm1578_vm1, %v2980_v35, 0.0 }
 0xc17   : > { %v5811_v25 = vsel %vm1448_vm0, %v17572_v45, 0.0  ;;  %v17583_v40 = vpop.eup %16022  ;;  %v2965_v6 = vmul.f32 0.03125, %v2955_v59  ;;  %v2979_v51 = vmul.f32 %v17599_v38, %v17599_v38  ;;  %v2982_v56 = vmul.f32 %v17606_v20, %v17606_v20 }
 0xc18   : > { %v17589_v10 = vpop.eup %16024  ;;  %v5817_v11 = vsel %vm1448_vm0, %v17583_v40, 0.0 }
 0xc19   : > { %v5820_v18 = vsel %vm1448_vm0, %v17589_v10, 0.0  ;;  %v17612_v62 = vsub.f32 %v17532_v14, %v2965_v6  ;;  %v2995_v49 = vsel %vm1578_vm1, %v2979_v51, 0.0  ;;  %v3004_v14 = vsel %vm1578_vm1, %v2982_v56, 0.0 }
 0xc1a   : > { %5809 = vadd.xlane.f32.xlu0 %v5808_v48  ;;  %5812 = vadd.xlane.f32.xlu1 %v5811_v25 }
 0xc1b   : > { %v2981_v26 = vmul.f32 %v17612_v62, %v17612_v62 }
 0xc1d   : > { %v3001_v15 = vsel %vm1578_vm1, %v2981_v26, 0.0  ;;  %v17655_v26 = vld [vmem:[%s16372_s6 + $0x2] ss:$0 sm:$0xff] }
 0xc1e   : > { %2987 = vadd.xlane.f32.xlu0 %v2986_v43  ;;  %5818 = vadd.xlane.f32.xlu1 %v5817_v11 }
 0xc22   : > { %5821 = vadd.xlane.f32.xlu0 %v5820_v18  ;;  %2993 = vadd.xlane.f32.xlu1 %v2992_v63 }
 0xc26   : > { %2990 = vadd.xlane.f32.xlu0 %v2989_v44  ;;  %2999 = vadd.xlane.f32.xlu1 %v2998_v52  ;;  %v5119_v52 = vadd.f32 %v17430_v34, %v17476_v19  ;;  %v6426_v34 = vld [vmem:[%s16462_s4 + $0x18] sm:$0xff] }
 0xc2a   : > { %2996 = vadd.xlane.f32.xlu0 %v2995_v49  ;;  %3005 = vadd.xlane.f32.xlu1 %v3004_v14 }
 0xc2e   : > { %3002 = vadd.xlane.f32.xlu0 %v3001_v15 }
 0xc8f   : > { %v5801_v22 = vpop.xlane.xlu1 %5800 }
 0xc90   : > { %16026 = vrcp.f32 %v5801_v22 }
 0xc97   : > { %v5807_v24 = vpop.xlane.xlu1 %5806 }
 0xc98   : > { %16028 = vrcp.f32 %v5807_v24 }
 0xc9b   : > { %v2985_v9 = vpop.xlane.xlu0 %2984 }
 0xc9c   : > { %v3007_v60 = vmul.f32 0.03125, %v2985_v9 }
 0xc9d   : > { %v16027_v42 = vpop.eup %16026 }
 0xc9e   : > { %v3015_v3 = vadd.f32 1e-05, %v3007_v60  ;;  %v5831_v61 = vmul.f32 %v16027_v42, %v17545_v7 }
 0xc9f   : > { %v5804_v46 = vpop.xlane.xlu0 %5803  ;;  %v5816_v5 = vpop.xlane.xlu1 %5815 }
 0xca0   : > { %16030 = vrsqrt.f32 %v3015_v3  ;;  %15200 = vmatmul.mubr.msk.f32.vlgmr.msra.gmra.mxu0 %vm1448_vm0, %v5831_v61 }
 0xca1   : > { %15208 = vmatpush3.msra.mxu0 %v5099_v31  ;;  %15209 = vmatprep.mubr.msk.f32.mxu0 %vm16297_vm2, %v16296_v41  ;;  %16032 = vrcp.f32 %v5804_v46  ;;  %v6425_v31 = vld [vmem:[%s16462_s4 + $0x10] sm:$0xff] }
 0xca2   : > { %15217 = vmatprep.subr.mxu0 %v16296_v41 }
 0xca3   : > { %v5810_v50 = vpop.xlane.xlu0 %5809  ;;  %v5813_v57 = vpop.xlane.xlu1 %5812 }
 0xca4   : > { %16034 = vrcp.f32 %v5810_v50  ;;  %v14067_v50 = vld [vmem:[%s16462_s4 + $0x30] sm:$0xff] }
 0xca5   : > { %v16029_v53 = vpop.eup %16028  ;;  %16036 = vrcp.f32 %v5813_v57  ;;  %v6424_v57 = vld [vmem:[%s16462_s4 + $0x8] sm:$0xff] }
 0xca6   : > { %v5833_v7 = vmul.f32 %v16029_v53, %v17550_v36  ;;  %16038 = vrcp.f32 %v5816_v5 }
 0xca7   : > { %v2988_v55 = vpop.xlane.xlu0 %2987  ;;  %v5819_v13 = vpop.xlane.xlu1 %5818 }
 0xca8   : > { %v3008_v0 = vmul.f32 0.03125, %v2988_v55  ;;  %15210 = vmatmul.mubr.msk.f32.vlgmr.msra.gmra.mxu0 %vm1448_vm0, %v5833_v7  ;;  %16040 = vrcp.f32 %v5819_v13  ;;  %v14065_v13 = vld [vmem:[%s16462_s4 + $0x20] sm:$0xff] }
 0xca9   : > { %15218 = vmatpush3.msra.mxu0 %v5109_v29  ;;  %15219 = vmatprep.mubr.msk.f32.mxu0 %vm16297_vm2, %v16296_v41 }
 0xcaa   : > { %v3016_v48 = vadd.f32 1e-05, %v3008_v0  ;;  %15227 = vmatprep.subr.mxu0 %v16296_v41 }
 0xcab   : > { %v5822_v47 = vpop.xlane.xlu0 %5821  ;;  %v2994_v36 = vpop.xlane.xlu1 %2993 }
 0xcac   : > { %16042 = vrsqrt.f32 %v3016_v48  ;;  %v3010_v4 = vmul.f32 0.03125, %v2994_v36  ;;  %v14082_v36 = vld [vmem:[%s16462_s4 + $0x58] sm:$0xff] }
 0xcad   : > { %v16031_v23 = vpop.eup %16030  ;;  %16044 = vrcp.f32 %v5822_v47 }
 0xcae   : > { %v3031_v25 = vmul.f32 %v16031_v23, %v17552_v33  ;;  %v16033_v58 = vpop.eup %16032  ;;  %v3018_v32 = vadd.f32 1e-05, %v3010_v4  ;;  %v14081_v4 = vld [vmem:[%s16462_s4 + $0x50] sm:$0xff] }
 0xcaf   : > { %v2991_v43 = vpop.xlane.xlu0 %2990  ;;  %v3000_v16 = vpop.xlane.xlu1 %2999  ;;  %v5832_v11 = vmul.f32 %v16033_v58, %v17559_v37 }
 0xcb0   : > { %v3009_v59 = vmul.f32 0.03125, %v2991_v43  ;;  %v3039_v6 = vmul.f32 %v17642_v17, %v3031_v25  ;;  %16046 = vrsqrt.f32 %v3018_v32  ;;  %v3012_v21 = vmul.f32 0.03125, %v3000_v16  ;;  %v14080_v16 = vld [vmem:[%s16462_s4 + $0x48] sm:$0xff] }
 0xcb1   : > { %v16035_v18 = vpop.eup %16034  ;;  %15205 = vmatmul.mubr.msk.f32.vlgmr.msra.gmra.mxu1 %vm1448_vm0, %v5832_v11 }
 0xcb2   : > { %v16037_v63 = vpop.eup %16036  ;;  %v3017_v35 = vadd.f32 1e-05, %v3009_v59  ;;  %v5834_v33 = vmul.f32 %v16035_v18, %v17568_v54  ;;  %v3020_v44 = vadd.f32 1e-05, %v3012_v21  ;;  %15213 = vmatpush3.msra.mxu1 %v17442_v8  ;;  %15214 = vmatprep.mubr.msk.f32.mxu1 %vm16297_vm2, %v16296_v41  ;;  %v3047_v54 = vadd.f32 %v17655_v26, %v3039_v6 }
 0xcb3   : > { %v2997_v37 = vpop.xlane.xlu0 %2996  ;;  %v5835_v51 = vmul.f32 %v16037_v63, %v17572_v45  ;;  %v3006_v56 = vpop.xlane.xlu1 %3005  ;;  %15222 = vmatprep.subr.mxu1 %v16296_v41 }
 0xcb4   : > { %16048 = vrsqrt.f32 %v3017_v35  ;;  %v3011_v49 = vmul.f32 0.03125, %v2997_v37  ;;  %v16039_v8 = vpop.eup %16038  ;;  %v3014_v14 = vmul.f32 0.03125, %v3006_v56  ;;  %v17669_v42 = vmax.f32 %v3047_v54, 0.0 }
 0xcb5   : > { %16050 = vrsqrt.f32 %v3020_v44  ;;  %15220 = vmatmul.mubr.msk.f32.vlgmr.msra.gmra.mxu0 %vm1448_vm0, %v5835_v51  ;;  %v16041_v15 = vpop.eup %16040  ;;  %15215 = vmatmul.mubr.msk.f32.vlgmr.msra.gmra.mxu1 %vm1448_vm0, %v5834_v33  ;;  %v5836_v60 = vmul.f32 %v16039_v8, %v17561_v39  ;;  %v14079_v33 = vld [vmem:[%s16462_s4 + $0x40] sm:$0xff] }
 0xcb6   : > { %v3019_v45 = vadd.f32 1e-05, %v3011_v49  ;;  %15228 = vmatpush3.msra.mxu0 %v5119_v52  ;;  %v3022_v19 = vadd.f32 1e-05, %v3014_v14  ;;  %15223 = vmatpush3.msra.mxu1 %v17456_v28  ;;  %v5837_v24 = vmul.f32 %v16041_v15, %v17583_v40  ;;  %v14068_v28 = vld [vmem:[%s16462_s4 + $0x38] sm:$0xff] }
 0xcb7   : > { %15224 = vmatprep.mubr.msk.f32.mxu1 %vm16297_vm2, %v16296_v41  ;;  %v3003_v22 = vpop.xlane.xlu0 %3002  ;;  %15229 = vmatprep.mubr.msk.f32.mxu0 %vm16297_vm2, %v16296_v41 }
 0xcb8   : > { %16052 = vrsqrt.f32 %v3019_v45  ;;  %15232 = vmatprep.subr.mxu1 %v16296_v41  ;;  %v3013_v9 = vmul.f32 0.03125, %v3003_v22  ;;  %15237 = vmatprep.subr.mxu0 %v6426_v34 }
 0xcb9   : > { %v16043_v3 = vpop.eup %16042  ;;  %16054 = vrsqrt.f32 %v3022_v19  ;;  %15230 = vmatmul.mubr.msk.f32.vlgmr.msra.gmra.mxu0 %vm1448_vm0, %v5837_v24  ;;  %15225 = vmatmul.mubr.msk.f32.vlgmr.msra.gmra.mxu1 %vm1448_vm0, %v5836_v60 }
 0xcba   : > { %v16045_v40 = vpop.eup %16044  ;;  %v3021_v61 = vadd.f32 1e-05, %v3013_v9  ;;  %15245 = vmatprep.mubr.msk.f32.mxu0 %vm1578_vm1, %v17669_v42  ;;  %v3032_v39 = vmul.f32 %v16043_v3, %v17564_v30  ;;  %15233 = vmatpush3.msra.mxu1 %v17464_v12  ;;  %v14066_v30 = vld [vmem:[%s16462_s4 + $0x28] sm:$0xff] }
 0xcbb   : > { %15234 = vmatprep.mubr.msk.f32.mxu1 %vm16297_vm2, %v16296_v41  ;;  %v5838_v46 = vmul.f32 %v16045_v40, %v17589_v10  ;;  %15238 = vmatpush3.msra.mxu0 %v6426_v34  ;;  %v6423_v10 = vld [vmem:[%s16462_s4] sm:$0xff] }
 0xcbc   : > { %16056 = vrsqrt.f32 %v3021_v61  ;;  %15257 = vmatprep.subr.mxu1 %v14068_v28  ;;  %v3040_v5 = vmul.f32 %v17642_v17, %v3032_v39  ;;  %15239 = vmatprep.subr.mxu0 %v6425_v31 }
 0xcbd   : > { %v16047_v53 = vpop.eup %16046  ;;  %15235 = vmatmul.mubr.msk.f32.vlgmr.msra.gmra.mxu1 %vm1448_vm0, %v5838_v46  ;;  %15240 = vmatpush3.msra.mxu0 %v6425_v31  ;;  %v14070_v31 = vld [vmem:[%s19263_s2 + $0x1] ss:$0 sm:$0xff] }
 0xcbe   : > { %v3048_v12 = vadd.f32 %v17655_v26, %v3040_v5  ;;  %15258 = vmatpush3.msra.mxu1 %v14068_v28  ;;  %15265 = vmatprep.mubr.msk.f32.mxu1 %vm1578_vm1, %v17669_v42  ;;  %v3034_v7 = vmul.f32 %v16047_v53, %v17579_v2 }
 0xcbf   : > { %15259 = vmatprep.subr.mxu1 %v14067_v50  ;;  %15241 = vmatprep.subr.mxu0 %v6424_v57 }
 0xcc0   : > { %v17692_v29 = vmax.f32 %v3048_v12, 0.0  ;;  %15260 = vmatpush3.msra.mxu1 %v14067_v50  ;;  %15242 = vmatpush3.msra.mxu0 %v6424_v57  ;;  %v3042_v0 = vmul.f32 %v17642_v17, %v3034_v7  ;;  %v17766_v50 = vld [vmem:[%s19263_s2] ss:$0 sm:$0xff] }
 0xcc1   : > { %v16049_v55 = vpop.eup %16048  ;;  %15261 = vmatprep.subr.mxu1 %v14066_v30  ;;  %15243 = vmatprep.subr.mxu0 %v6423_v10 }
 0xcc2   : > { %v16051_v48 = vpop.eup %16050  ;;  %v3033_v47 = vmul.f32 %v16049_v55, %v17586_v27  ;;  %15262 = vmatpush3.msra.mxu1 %v14066_v30  ;;  %15244 = vmatpush3.msra.mxu0 %v6423_v10  ;;  %v3050_v58 = vadd.f32 %v17655_v26, %v3042_v0 }
 0xcc3   : > { %v3036_v2 = vmul.f32 %v16051_v48, %v17592_v1  ;;  %15263 = vmatprep.subr.mxu1 %v14065_v13  ;;  %15246 = vmatmul.mubr.msk.f32.vlgmr.msra.gmra.mxu0 %vm1578_vm1, %v17692_v29 }
 0xcc4   : > { %v3041_v23 = vmul.f32 %v17642_v17, %v3033_v47  ;;  %15264 = vmatpush3.msra.mxu1 %v14065_v13  ;;  %15277 = vmatprep.subr.mxu0 %v14082_v36  ;;  %v3058_v21 = vmax.f32 %v3050_v58, 0.0 }
 0xcc5   : > { %v16053_v25 = vpop.eup %16052  ;;  %v3044_v32 = vmul.f32 %v17642_v17, %v3036_v2  ;;  %15266 = vmatmul.mubr.msk.f32.vlgmr.msra.gmra.mxu1 %vm1578_vm1, %v17692_v29  ;;  %15278 = vmatpush3.msra.mxu0 %v14082_v36 }
 0xcc6   : > { %v16055_v27 = vpop.eup %16054  ;;  %v3049_v1 = vadd.f32 %v17655_v26, %v3041_v23  ;;  %v3035_v43 = vmul.f32 %v16053_v25, %v17599_v38  ;;  %15279 = vmatprep.subr.mxu0 %v14081_v4  ;;  %15297 = vmatprep.subr.mxu1 %v16296_v41 }
 0xcc7   : > { %v3038_v59 = vmul.f32 %v16055_v27, %v17606_v20  ;;  %15280 = vmatpush3.msra.mxu0 %v14081_v4  ;;  %v3052_v63 = vadd.f32 %v17655_v26, %v3044_v32 }
 0xcc8   : > { %v3057_v11 = vmax.f32 %v3049_v1, 0.0  ;;  %v3043_v6 = vmul.f32 %v17642_v17, %v3035_v43  ;;  %15281 = vmatprep.subr.mxu0 %v14080_v16 }
 0xcc9   : > { %v16057_v18 = vpop.eup %16056  ;;  %v3046_v35 = vmul.f32 %v17642_v17, %v3038_v59  ;;  %15282 = vmatpush3.msra.mxu0 %v14080_v16  ;;  %v3060_v51 = vmax.f32 %v3052_v63, 0.0 }
 0xcca   : > { %15248 = vmatprep.mubr.msk.f32.mxu0 %vm1578_vm1, %v3057_v11  ;;  %15268 = vmatprep.mubr.msk.f32.mxu1 %vm1578_vm1, %v3057_v11  ;;  %v3051_v38 = vadd.f32 %v17655_v26, %v3043_v6  ;;  %v3037_v20 = vmul.f32 %v16057_v18, %v17612_v62 }
 0xccb   : > { %15249 = vmatmul.mubr.msk.f32.gmra.mxu0 %vm1578_vm1, %v3058_v21  ;;  %15269 = vmatmul.mubr.msk.f32.gmra.mxu1 %vm1578_vm1, %v3058_v21  ;;  %v3054_v52 = vadd.f32 %v17655_v26, %v3046_v35 }
 0xccc   : > { %v3059_v44 = vmax.f32 %v3051_v38, 0.0  ;;  %v3045_v37 = vmul.f32 %v17642_v17, %v3037_v20  ;;  %15283 = vmatprep.subr.mxu0 %v14079_v33 }
 0xccd   : > { %15284 = vmatpush3.msra.mxu0 %v14079_v33  ;;  %v3062_v49 = vmax.f32 %v3054_v52, 0.0 }
 0xcce   : > { %15251 = vmatprep.mubr.msk.f32.mxu0 %vm1578_vm1, %v3059_v44  ;;  %15271 = vmatprep.mubr.msk.f32.mxu1 %vm1578_vm1, %v3059_v44  ;;  %v3053_v56 = vadd.f32 %v17655_v26, %v3045_v37 }
 0xccf   : > { %15252 = vmatmul.mubr.msk.f32.gmra.mxu0 %vm1578_vm1, %v3060_v51  ;;  %15272 = vmatmul.mubr.msk.f32.gmra.mxu1 %vm1578_vm1, %v3060_v51 }
 0xcd0   : > { %v3061_v62 = vmax.f32 %v3053_v56, 0.0  ;;  %15317 = vmatprep.subr.mxu0 %v16296_v41 }
 0xcd2   : > { %15254 = vmatprep.mubr.msk.f32.mxu0 %vm1578_vm1, %v3061_v62  ;;  %15274 = vmatprep.mubr.msk.f32.mxu1 %vm1578_vm1, %v3061_v62 }
 0xcd3   : > { %15255 = vmatmul.mubr.msk.f32.gmra.mxu0 %vm1578_vm1, %v3062_v49  ;;  %15275 = vmatmul.mubr.msk.f32.gmra.mxu1 %vm1578_vm1, %v3062_v49 }
 0xcd4   : > { %15285 = vmatprep.mubr.msk.f32.mxu0 %vm1578_vm1, %v17669_v42  ;;  %15299 = vmatprep.mubr.msk.f32.mxu1 %vm16297_vm2, %v16296_v41 }
 0xcd7   : > { %15286 = vmatmul.mubr.msk.f32.vlgmr.msra.gmra.mxu0 %vm1578_vm1, %v17692_v29 }
 0xcd8   : > { %15288 = vmatprep.mubr.msk.f32.mxu0 %vm1578_vm1, %v3057_v11  ;;  %v17794_v11 = vld [vmem:[%s19263_s2 + $0x2] ss:$0 sm:$0xff] }
 0xcdb   : > { %15289 = vmatmul.mubr.msk.f32.gmra.mxu0 %vm1578_vm1, %v3058_v21 }
 0xcdc   : > { %15291 = vmatprep.mubr.msk.f32.mxu0 %vm1578_vm1, %v3059_v44 }
 0xcdf   : > { %15292 = vmatmul.mubr.msk.f32.gmra.mxu0 %vm1578_vm1, %v3060_v51 }
 0xce0   : > { %15294 = vmatprep.mubr.msk.f32.mxu0 %vm1578_vm1, %v3061_v62 }
 0xce3   : > { %15295 = vmatmul.mubr.msk.f32.gmra.mxu0 %vm1578_vm1, %v3062_v49 }
 0xce4   : > { %15319 = vmatprep.mubr.msk.f32.mxu0 %vm16297_vm2, %v16296_v41 }
 0xd60   : > { %v17748_v17 = vpop.f32.mrf.mxu0 }
 0xd62   : > { %v15201_v26 = vpop.f32.mrf.mxu0 }
 0xd68   : > { %v17750_v54 = vpop.f32.mrf.mxu0 }
 0xd6a   : > { %v15211_v8 = vpop.f32.mrf.mxu0 }
 0xd71   : > { %v17752_v14 = vpop.f32.mrf.mxu1 }
 0xd73   : > { %v15206_v15 = vpop.f32.mrf.mxu1 }
 0xd74   : > { %v17843_v15 = vld [vmem:[%s17840_s10] sm:$0xff] }
 0xd75   : > { %v17754_v45 = vpop.f32.mrf.mxu0  ;;  %v17756_v34 = vpop.f32.mrf.mxu1 }
 0xd77   : > { %v15221_v19 = vpop.f32.mrf.mxu0  ;;  %v15216_v22 = vpop.f32.mrf.mxu1 }
 0xd79   : > { %v17758_v24 = vpop.f32.mrf.mxu0  ;;  %v17760_v9 = vpop.f32.mrf.mxu1 }
 0xd7b   : > { %v15231_v60 = vpop.f32.mrf.mxu0  ;;  %v15226_v42 = vpop.f32.mrf.mxu1 }
 0xd7d   : > { %v17762_v3 = vpop.f32.mrf.mxu1 }
 0xd7f   : > { %v15236_v28 = vpop.f32.mrf.mxu1 }
 0xd80   : > { %v17847_v28 = vld [vmem:[%s17840_s10 + $0x8] sm:$0xff] }
 0xd83   : > { %v15247_v40 = vpop.f32.mrf.mxu0 }
 0xd84   : > { %v6530_v0 = vadd.f32 %v15247_v40, %v17766_v50 }
 0xd85   : > { %v15267_v61 = vpop.f32.mrf.mxu1  ;;  %v6524_v46 = vpop.f32.mrf.mxu0 }
 0xd86   : > { %v6525_v12 = vadd.f32 %v17766_v50, %v6524_v46  ;;  %v6648_v30 = vadd.f32 %v15267_v61, %v14070_v31 }
 0xd87   : > { %v6642_v39 = vpop.f32.mrf.mxu1 }
 0xd88   : > { %v6643_v5 = vadd.f32 %v14070_v31, %v6642_v39 }
 0xd8a   : > { %15298 = vmatpush3.xpose.msk.msra.mxu1 %vm1578_vm1, %v6643_v5 }
 0xd8b   : > { %v15250_v57 = vpop.f32.mrf.mxu0  ;;  %v15270_v53 = vpop.f32.mrf.mxu1  ;;  %15302 = vmatprep.subr.mxu1 %v16296_v41 }
 0xd8c   : > { %v6658_v25 = vadd.f32 %v15270_v53, %v14070_v31  ;;  %v6540_v16 = vadd.f32 %v15250_v57, %v17766_v50 }
 0xd8d   : > { %v6534_v10 = vpop.f32.mrf.mxu0  ;;  %v6652_v7 = vpop.f32.mrf.mxu1  ;;  %15300 = vmatmul.mubr.msk.f32.vlgmr.msra.gmra.mxu1 %vm1578_vm1, %v6525_v12 }
 0xd8e   : > { %15303 = vmatpush3.xpose.msk.msra.mxu1 %vm1578_vm1, %v6648_v30  ;;  %v6653_v29 = vadd.f32 %v14070_v31, %v6652_v7  ;;  %15304 = vmatprep.mubr.msk.f32.mxu1 %vm16297_vm2, %v16296_v41  ;;  %v6535_v4 = vadd.f32 %v17766_v50, %v6534_v10  ;;  %v17858_v10 = vld [vmem:[%s17840_s10 + $0x20] sm:$0xff] }
 0xd8f   : > { %v15253_v55 = vpop.f32.mrf.mxu0  ;;  %v15273_v13 = vpop.f32.mrf.mxu1  ;;  %15307 = vmatprep.subr.mxu1 %v16296_v41 }
 0xd90   : > { %v6668_v59 = vadd.f32 %v15273_v13, %v14070_v31  ;;  %v6550_v35 = vadd.f32 %v15253_v55, %v17766_v50  ;;  %v17862_v13 = vld [vmem:[%s17840_s10 + $0x18] sm:$0xff] }
 0xd91   : > { %v6544_v48 = vpop.f32.mrf.mxu0  ;;  %v6662_v47 = vpop.f32.mrf.mxu1  ;;  %15305 = vmatmul.mubr.msk.f32.vlgmr.msra.gmra.mxu1 %vm1578_vm1, %v6530_v0 }
 0xd92   : > { %v6663_v36 = vadd.f32 %v14070_v31, %v6662_v47  ;;  %15308 = vmatpush3.xpose.msk.msra.mxu1 %vm1578_vm1, %v6653_v29  ;;  %15309 = vmatprep.mubr.msk.f32.mxu1 %vm16297_vm2, %v16296_v41  ;;  %v6545_v27 = vadd.f32 %v17766_v50, %v6544_v48 }
 0xd93   : > { %v15256_v2 = vpop.f32.mrf.mxu0  ;;  %v15276_v23 = vpop.f32.mrf.mxu1  ;;  %15312 = vmatprep.subr.mxu1 %v16296_v41 }
 0xd94   : > { %15318 = vmatpush3.xpose.msk.msra.mxu0 %vm1578_vm1, %v6663_v36  ;;  %v6678_v20 = vadd.f32 %v15276_v23, %v14070_v31  ;;  %v6560_v51 = vadd.f32 %v15256_v2, %v17766_v50 }
 0xd95   : > { %v6554_v58 = vpop.f32.mrf.mxu0  ;;  %v6672_v32 = vpop.f32.mrf.mxu1  ;;  %15327 = vmatprep.subr.mxu0 %v16296_v41  ;;  %15310 = vmatmul.mubr.msk.f32.vlgmr.msra.gmra.mxu1 %vm1578_vm1, %v6535_v4  ;;  %v17867_v4 = vld [vmem:[%s17840_s10 + $0x30] sm:$0xff] }
 0xd96   : > { %v6673_v1 = vadd.f32 %v14070_v31, %v6672_v32  ;;  %15313 = vmatpush3.xpose.msk.msra.mxu1 %vm1578_vm1, %v6658_v25  ;;  %15314 = vmatprep.mubr.msk.f32.mxu1 %vm16297_vm2, %v16296_v41  ;;  %v6555_v18 = vadd.f32 %v17766_v50, %v6554_v58  ;;  %v17854_v50 = vld [vmem:[%s17840_s10 + $0x10] sm:$0xff] }
 0xd97   : > { %v15287_v43 = vpop.f32.mrf.mxu0  ;;  %15320 = vmatmul.mubr.msk.f32.vlgmr.msra.gmra.mxu0 %vm1578_vm1, %v6545_v27  ;;  %15322 = vmatprep.subr.mxu1 %v16296_v41 }
 0xd98   : > { %15328 = vmatpush3.xpose.msk.msra.mxu0 %vm1578_vm1, %v6673_v1  ;;  %15329 = vmatprep.mubr.msk.f32.mxu0 %vm16297_vm2, %v16296_v41  ;;  %v6766_v56 = vadd.f32 %v15287_v43, %v17794_v11  ;;  %v17872_v1 = vld [vmem:[%s17840_s10 + $0x28] sm:$0xff] }
 0xd99   : > { %v6760_v6 = vpop.f32.mrf.mxu0  ;;  %15315 = vmatmul.mubr.msk.f32.vlgmr.msra.gmra.mxu1 %vm1578_vm1, %v6540_v16  ;;  %15337 = vmatprep.subr.mxu0 %v16296_v41 }
 0xd9a   : > { %v6761_v21 = vadd.f32 %v17794_v11, %v6760_v6  ;;  %15323 = vmatpush3.xpose.msk.msra.mxu1 %vm1578_vm1, %v6668_v59  ;;  %15324 = vmatprep.mubr.msk.f32.mxu1 %vm16297_vm2, %v16296_v41 }
 0xd9b   : > { %v15290_v63 = vpop.f32.mrf.mxu0  ;;  %15330 = vmatmul.mubr.msk.f32.vlgmr.msra.gmra.mxu0 %vm1578_vm1, %v6555_v18  ;;  %15332 = vmatprep.subr.mxu1 %v16296_v41 }
 0xd9c   : > { %v17808_v38 = vadd.f32 %v15290_v63, %v17794_v11  ;;  %15338 = vmatpush3.msra.mxu0 %v6761_v21  ;;  %15339 = vmatprep.mubr.msk.f32.mxu0 %vm16297_vm2, %v16296_v41 }
 0xd9d   : > { %v6770_v33 = vpop.f32.mrf.mxu0  ;;  %15325 = vmatmul.mubr.msk.f32.vlgmr.msra.gmra.mxu1 %vm1578_vm1, %v6550_v35  ;;  %15347 = vmatprep.subr.mxu0 %v16296_v41 }
 0xd9e   : > { %v17816_v44 = vadd.f32 %v17794_v11, %v6770_v33  ;;  %15333 = vmatpush3.xpose.msk.msra.mxu1 %vm1578_vm1, %v6678_v20  ;;  %15334 = vmatprep.mubr.msk.f32.mxu1 %vm16297_vm2, %v16296_v41  ;;  %v17879_v20 = vld [vmem:[%s17840_s10 + $0x38] sm:$0xff]  ;;  %s19273_s10 = sld [smem:[#allocation6_spill]] }
 0xd9f   : > { %v15293_v37 = vpop.f32.mrf.mxu0  ;;  %15342 = vmatprep.subr.mxu1 %v16296_v41 }
 0xda0   : > { %v17824_v52 = vadd.f32 %v15293_v37, %v17794_v11 }
 0xda1   : > { %v6780_v62 = vpop.f32.mrf.mxu0  ;;  %15335 = vmatmul.mubr.msk.f32.vlgmr.msra.gmra.mxu1 %vm1578_vm1, %v6560_v51 }
 0xda2   : > { %v17830_v49 = vadd.f32 %v17794_v11, %v6780_v62  ;;  %15343 = vmatpush3.msra.mxu1 %v6766_v56  ;;  %15344 = vmatprep.mubr.msk.f32.mxu1 %vm16297_vm2, %v16296_v41 }
 0xda3   : > { %v15296_v26 = vpop.f32.mrf.mxu0  ;;  %15352 = vmatprep.subr.mxu1 %v16296_v41 }
 0xda4   : > { %v17835_v8 = vadd.f32 %v15296_v26, %v17794_v11  ;;  %s1412_s2 = scalar_lea.vmem %s19273_s10, %s16536_s0 }
 0xda5   : > { %v17851_v5 = vpop.f32.mrf.mxu0 }
 0xe4d   : > { %v6871_v19 = vpop.f32.mrf.mxu1 }
 0xe4e   : > { %v7407_v22 = vmul.f32 0.17677669, %v6871_v19 }
 0xe4f   : > { %v15301_v60 = vpop.f32.mrf.mxu1 }
 0xe50   : > { %v7415_v42 = vadd.f32 %v7407_v22, %v17843_v15 }
 0xe51   : > { %v6947_v40 = vpop.f32.mrf.mxu1 }
 0xe52   : > { %v7408_v61 = vmul.f32 0.17677669, %v6947_v40  ;;  %v7423_v31 = vsel %vm1448_vm0, %v7415_v42, -inf }
 0xe53   : > { %7424 = vmax.xlane.f32.xlu0 %v7423_v31  ;;  %v15306_v39 = vpop.f32.mrf.mxu1 }
 0xe54   : > { %v7416_v46 = vadd.f32 %v7408_v61, %v17847_v28 }
 0xe55   : > { %v7023_v57 = vpop.f32.mrf.mxu1 }
 0xe56   : > { %v7409_v53 = vmul.f32 0.17677669, %v7023_v57  ;;  %v7426_v12 = vsel %vm1448_vm0, %v7416_v46, -inf }
 0xe57   : > { %7427 = vmax.xlane.f32.xlu1 %v7426_v12  ;;  %v15311_v30 = vpop.f32.mrf.mxu1  ;;  %v7175_v7 = vpop.f32.mrf.mxu0 }
 0xe58   : > { %v7417_v29 = vadd.f32 %v7409_v53, %v17854_v50  ;;  %v7411_v55 = vmul.f32 0.17677669, %v7175_v7 }
 0xe59   : > { %v7099_v0 = vpop.f32.mrf.mxu1  ;;  %v15321_v48 = vpop.f32.mrf.mxu0 }
 0xe5a   : > { %v7410_v47 = vmul.f32 0.17677669, %v7099_v0  ;;  %v7419_v36 = vadd.f32 %v7411_v55, %v17858_v10  ;;  %v7429_v2 = vsel %vm1448_vm0, %v7417_v29, -inf }
 0xe5b   : > { %7430 = vmax.xlane.f32.xlu0 %v7429_v2  ;;  %v15316_v23 = vpop.f32.mrf.mxu1  ;;  %v7327_v25 = vpop.f32.mrf.mxu0 }
 0xe5c   : > { %v7418_v58 = vadd.f32 %v7410_v47, %v17862_v13  ;;  %v7413_v32 = vmul.f32 0.17677669, %v7327_v25  ;;  %v7435_v27 = vsel %vm1448_vm0, %v7419_v36, -inf }
 0xe5d   : > { %v7251_v43 = vpop.f32.mrf.mxu1  ;;  %v15331_v16 = vpop.f32.mrf.mxu0 }
 0xe5e   : > { %v7412_v59 = vmul.f32 0.17677669, %v7251_v43  ;;  %v7421_v6 = vadd.f32 %v7413_v32, %v17867_v4  ;;  %v7432_v18 = vsel %vm1448_vm0, %v7418_v58, -inf }
 0xe5f   : > { %7436 = vmax.xlane.f32.xlu0 %v7435_v27  ;;  %7433 = vmax.xlane.f32.xlu1 %v7432_v18  ;;  %v15326_v21 = vpop.f32.mrf.mxu1 }
 0xe60   : > { %v7420_v63 = vadd.f32 %v7412_v59, %v17872_v1  ;;  %v7441_v35 = vsel %vm1448_vm0, %v7421_v6, -inf }
 0xe61   : > { %v7403_v33 = vpop.f32.mrf.mxu1 }
 0xe62   : > { %v7414_v37 = vmul.f32 0.17677669, %v7403_v33  ;;  %v7438_v51 = vsel %vm1448_vm0, %v7420_v63, -inf }
 0xe63   : > { %7442 = vmax.xlane.f32.xlu0 %v7441_v35  ;;  %7439 = vmax.xlane.f32.xlu1 %v7438_v51  ;;  %v15336_v56 = vpop.f32.mrf.mxu1 }
 0xe64   : > { %v7422_v62 = vadd.f32 %v7414_v37, %v17879_v20 }
 0xe66   : > { %v7444_v26 = vsel %vm1448_vm0, %v7422_v62, -inf }
 0xe67   : > { %7445 = vmax.xlane.f32.xlu1 %v7444_v26 }
 0xedc   : > { %v7425_v19 = vpop.xlane.xlu0 %7424 }
 0xedd   : > { %v7447_v22 = vsub.f32 %v7415_v42, %v7425_v19 }
 0xedf   : > { %v7455_v60 = vmul.f32 1.442695, %v7447_v22 }
 0xee0   : > { %v7428_v40 = vpop.xlane.xlu1 %7427 }
 0xee1   : > { %16058 = vpow2.f32 %v7455_v60  ;;  %v7448_v61 = vsub.f32 %v7416_v46, %v7428_v40 }
 0xee3   : > { %v7457_v31 = vmul.f32 1.442695, %v7448_v61 }
 0xee4   : > { %v7431_v39 = vpop.xlane.xlu0 %7430 }
 0xee5   : > { %16060 = vpow2.f32 %v7457_v31  ;;  %v7449_v57 = vsub.f32 %v7417_v29, %v7431_v39 }
 0xee7   : > { %v7459_v53 = vmul.f32 1.442695, %v7449_v57 }
 0xee8   : > { %v7437_v12 = vpop.xlane.xlu0 %7436  ;;  %v7434_v30 = vpop.xlane.xlu1 %7433 }
 0xee9   : > { %16062 = vpow2.f32 %v7459_v53  ;;  %v7451_v7 = vsub.f32 %v7419_v36, %v7437_v12  ;;  %v7450_v55 = vsub.f32 %v7418_v58, %v7434_v30 }
 0xeeb   : > { %v7463_v0 = vmul.f32 1.442695, %v7451_v7  ;;  %v7461_v48 = vmul.f32 1.442695, %v7450_v55 }
 0xeec   : > { %v7443_v47 = vpop.xlane.xlu0 %7442  ;;  %v7440_v2 = vpop.xlane.xlu1 %7439 }
 0xeed   : > { %16064 = vpow2.f32 %v7463_v0  ;;  %v7453_v42 = vsub.f32 %v7421_v6, %v7443_v47  ;;  %v7452_v23 = vsub.f32 %v7420_v63, %v7440_v2 }
 0xeee   : > { %v16059_v25 = vpop.eup %16058  ;;  %16066 = vpow2.f32 %v7461_v48 }
 0xeef   : > { %v7467_v46 = vmul.f32 1.442695, %v7453_v42  ;;  %v7465_v32 = vmul.f32 1.442695, %v7452_v23  ;;  %v7471_v27 = vsel %vm1448_vm0, %v16059_v25, 0.0 }
 0xef0   : > { %7472 = vadd.xlane.f32.xlu0 %v7471_v27  ;;  %v7446_v29 = vpop.xlane.xlu1 %7445  ;;  %v14128_v27 = vld [vmem:[%s19265_s11 + $0x30] sm:$0xff] }
 0xef1   : > { %16068 = vpow2.f32 %v7467_v46  ;;  %v7454_v43 = vsub.f32 %v7422_v62, %v7446_v29  ;;  %v8097_v46 = vld [vmem:[%s19265_s11 + $0x10] sm:$0xff]  ;;  %v8096_v29 = vld [vmem:[%s19265_s11 + $0x8] sm:$0xff] }
 0xef2   : > { %v16061_v16 = vpop.eup %16060  ;;  %16070 = vpow2.f32 %v7465_v32 }
 0xef3   : > { %v7469_v36 = vmul.f32 1.442695, %v7454_v43  ;;  %v7474_v58 = vsel %vm1448_vm0, %v16061_v16, 0.0  ;;  %v8095_v43 = vld [vmem:[%s19265_s11] sm:$0xff] }
 0xef4   : > { %7475 = vadd.xlane.f32.xlu1 %v7474_v58 }
 0xef5   : > { %16072 = vpow2.f32 %v7469_v36  ;;  %v14143_v36 = vld [vmem:[%s19265_s11 + $0x58] sm:$0xff] }
 0xef6   : > { %v16063_v59 = vpop.eup %16062 }
 0xef7   : > { %v7477_v6 = vsel %vm1448_vm0, %v16063_v59, 0.0 }
 0xef8   : > { %7478 = vadd.xlane.f32.xlu0 %v7477_v6 }
 0xefa   : > { %v16065_v18 = vpop.eup %16064 }
 0xefb   : > { %v16067_v21 = vpop.eup %16066  ;;  %v7483_v63 = vsel %vm1448_vm0, %v16065_v18, 0.0 }
 0xefc   : > { %7484 = vadd.xlane.f32.xlu0 %v7483_v63  ;;  %v7480_v35 = vsel %vm1448_vm0, %v16067_v21, 0.0  ;;  %v14141_v63 = vld [vmem:[%s19265_s11 + $0x48] sm:$0xff] }
 0xefd   : > { %7481 = vadd.xlane.f32.xlu1 %v7480_v35 }
 0xefe   : > { %v16069_v33 = vpop.eup %16068 }
 0xeff   : > { %v16071_v37 = vpop.eup %16070  ;;  %v7489_v51 = vsel %vm1448_vm0, %v16069_v33, 0.0 }
 0xf00   : > { %7490 = vadd.xlane.f32.xlu0 %v7489_v51  ;;  %v7486_v56 = vsel %vm1448_vm0, %v16071_v37, 0.0 }
 0xf01   : > { %7487 = vadd.xlane.f32.xlu1 %v7486_v56 }
 0xf02   : > { %v17891_v62 = vpop.eup %16072 }
 0xf03   : > { %v7492_v26 = vsel %vm1448_vm0, %v17891_v62, 0.0 }
 0xf05   : > { %7493 = vadd.xlane.f32.xlu1 %v7492_v26 }
 0xf79   : > { %v7473_v19 = vpop.xlane.xlu0 %7472 }
 0xf7a   : > { %16074 = vrcp.f32 %v7473_v19 }
 0xf7d   : > { %v7476_v22 = vpop.xlane.xlu1 %7475 }
 0xf7e   : > { %16076 = vrcp.f32 %v7476_v22 }
 0xf81   : > { %v7479_v60 = vpop.xlane.xlu0 %7478 }
 0xf82   : > { %16078 = vrcp.f32 %v7479_v60 }
 0xf85   : > { %v7485_v40 = vpop.xlane.xlu0 %7484 }
 0xf86   : > { %16080 = vrcp.f32 %v7485_v40  ;;  %v7482_v61 = vpop.xlane.xlu1 %7481 }
 0xf87   : > { %v16075_v31 = vpop.eup %16074  ;;  %16082 = vrcp.f32 %v7482_v61 }
 0xf88   : > { %v7503_v39 = vmul.f32 %v16075_v31, %v16059_v25 }
 0xf89   : > { %v7491_v57 = vpop.xlane.xlu0 %7490 }
 0xf8a   : > { %16084 = vrcp.f32 %v7491_v57  ;;  %v7488_v53 = vpop.xlane.xlu1 %7487  ;;  %15340 = vmatmul.mubr.msk.f32.vlgmr.msra.gmra.mxu0 %vm1448_vm0, %v7503_v39 }
 0xf8b   : > { %v16077_v12 = vpop.eup %16076  ;;  %16086 = vrcp.f32 %v7488_v53  ;;  %15348 = vmatpush3.msra.mxu0 %v17816_v44  ;;  %15349 = vmatprep.mubr.msk.f32.mxu0 %vm16297_vm2, %v16296_v41  ;;  %v14131_v53 = vld [vmem:[%s19266_s15 + $0x1] ss:$0 sm:$0xff] }
 0xf8c   : > { %v7504_v30 = vmul.f32 %v16077_v12, %v16061_v16  ;;  %15357 = vmatprep.subr.mxu0 %v16296_v41  ;;  %v14126_v16 = vld [vmem:[%s19265_s11 + $0x20] sm:$0xff] }
 0xf8e   : > { %v7494_v7 = vpop.xlane.xlu1 %7493  ;;  %15345 = vmatmul.mubr.msk.f32.vlgmr.msra.gmra.mxu1 %vm1448_vm0, %v7504_v30 }
 0xf8f   : > { %v16079_v55 = vpop.eup %16078  ;;  %16088 = vrcp.f32 %v7494_v7  ;;  %15353 = vmatpush3.msra.mxu1 %v17808_v38  ;;  %15354 = vmatprep.mubr.msk.f32.mxu1 %vm16297_vm2, %v16296_v41  ;;  %v6791_v38 = vadd.f32 %v17794_v11, %v17851_v5  ;;  %v14129_v5 = vld [vmem:[%s19265_s11 + $0x38] sm:$0xff] }
 0xf90   : > { %v7505_v0 = vmul.f32 %v16079_v55, %v16063_v59  ;;  %15362 = vmatprep.subr.mxu1 %v16296_v41  ;;  %v14117_v55 = vld [vmem:[%s19266_s15] ss:$0 sm:$0xff] }
 0xf92   : > { %15350 = vmatmul.mubr.msk.f32.vlgmr.msra.gmra.mxu0 %vm1448_vm0, %v7505_v0 }
 0xf93   : > { %v16081_v44 = vpop.eup %16080  ;;  %15358 = vmatpush3.msra.mxu0 %v17830_v49  ;;  %15359 = vmatprep.mubr.msk.f32.mxu0 %vm16297_vm2, %v16296_v41  ;;  %v8098_v49 = vld [vmem:[%s19265_s11 + $0x18] sm:$0xff] }
 0xf94   : > { %v16083_v48 = vpop.eup %16082  ;;  %15367 = vmatprep.subr.mxu0 %v16296_v41  ;;  %v7507_v47 = vmul.f32 %v16081_v44, %v16065_v18  ;;  %v14142_v18 = vld [vmem:[%s19265_s11 + $0x50] sm:$0xff] }
 0xf95   : > { %v7506_v2 = vmul.f32 %v16083_v48, %v16067_v21 }
 0xf96   : > { %15360 = vmatmul.mubr.msk.f32.vlgmr.msra.gmra.mxu0 %vm1448_vm0, %v7507_v47 }
 0xf97   : > { %v16085_v42 = vpop.eup %16084  ;;  %15355 = vmatmul.mubr.msk.f32.vlgmr.msra.gmra.mxu1 %vm1448_vm0, %v7506_v2  ;;  %15368 = vmatpush3.msra.mxu0 %v6791_v38 }
 0xf98   : > { %v16087_v23 = vpop.eup %16086  ;;  %15363 = vmatpush3.msra.mxu1 %v17824_v52  ;;  %15364 = vmatprep.mubr.msk.f32.mxu1 %vm16297_vm2, %v16296_v41  ;;  %v7509_v25 = vmul.f32 %v16085_v42, %v16069_v33  ;;  %v14140_v33 = vld [vmem:[%s19265_s11 + $0x40] sm:$0xff] }
 0xf99   : > { %15369 = vmatprep.mubr.msk.f32.mxu0 %vm16297_vm2, %v16296_v41  ;;  %15372 = vmatprep.subr.mxu1 %v16296_v41  ;;  %v7508_v11 = vmul.f32 %v16087_v23, %v16071_v37 }
 0xf9a   : > { %15370 = vmatmul.mubr.msk.f32.vlgmr.msra.gmra.mxu0 %vm1448_vm0, %v7509_v25  ;;  %15377 = vmatprep.subr.mxu0 %v8098_v49 }
 0xf9b   : > { %15365 = vmatmul.mubr.msk.f32.vlgmr.msra.gmra.mxu1 %vm1448_vm0, %v7508_v11  ;;  %15378 = vmatpush3.msra.mxu0 %v8098_v49 }
 0xf9c   : > { %v16089_v52 = vpop.eup %16088  ;;  %15373 = vmatpush3.msra.mxu1 %v17835_v8  ;;  %15374 = vmatprep.mubr.msk.f32.mxu1 %vm16297_vm2, %v16296_v41  ;;  %v14127_v8 = vld [vmem:[%s19265_s11 + $0x28] sm:$0xff] }
 0xf9d   : > { %v7510_v32 = vmul.f32 %v16089_v52, %v17891_v62  ;;  %15397 = vmatprep.subr.mxu1 %v14129_v5  ;;  %15379 = vmatprep.subr.mxu0 %v8097_v46 }
 0xf9e   : > { %15380 = vmatpush3.msra.mxu0 %v8097_v46 }
 0xf9f   : > { %15375 = vmatmul.mubr.msk.f32.vlgmr.msra.gmra.mxu1 %vm1448_vm0, %v7510_v32  ;;  %15381 = vmatprep.subr.mxu0 %v8096_v29 }
 0xfa0   : > { %15398 = vmatpush3.msra.mxu1 %v14129_v5  ;;  %15382 = vmatpush3.msra.mxu0 %v8096_v29 }
 0xfa1   : > { %15399 = vmatprep.subr.mxu1 %v14128_v27  ;;  %15383 = vmatprep.subr.mxu0 %v8095_v43 }
 0xfa2   : > { %15400 = vmatpush3.msra.mxu1 %v14128_v27  ;;  %15384 = vmatpush3.msra.mxu0 %v8095_v43 }
 0xfa3   : > { %15401 = vmatprep.subr.mxu1 %v14127_v8  ;;  %15417 = vmatprep.subr.mxu0 %v14143_v36 }
 0xfa4   : > { %15402 = vmatpush3.msra.mxu1 %v14127_v8 }
 0xfa5   : > { %15403 = vmatprep.subr.mxu1 %v14126_v16 }
 0xfa6   : > { %15404 = vmatpush3.msra.mxu1 %v14126_v16 }
 0xfa7   : > { %15437 = vmatprep.subr.mxu1 %v16296_v41 }
0x104a   : > { %v7580_v58 = vpop.f32.mrf.mxu0 }
0x104b   : > { %15385 = vmatprep.mubr.msk.f32.mxu0 %vm1578_vm1, %v7580_v58  ;;  %15405 = vmatprep.mubr.msk.f32.mxu1 %vm1578_vm1, %v7580_v58 }
0x104c   : > { %v15341_v59 = vpop.f32.mrf.mxu0 }
0x104e   : > { %v7653_v6 = vpop.f32.mrf.mxu1 }
0x104f   : > { %15386 = vmatmul.mubr.msk.f32.vlgmr.msra.gmra.mxu0 %vm1578_vm1, %v7653_v6  ;;  %15406 = vmatmul.mubr.msk.f32.vlgmr.msra.gmra.mxu1 %vm1578_vm1, %v7653_v6 }
0x1050   : > { %v15346_v21 = vpop.f32.mrf.mxu1  ;;  %15418 = vmatpush3.msra.mxu0 %v14143_v36 }
0x1051   : > { %15419 = vmatprep.subr.mxu0 %v14142_v18 }
0x1052   : > { %v7726_v35 = vpop.f32.mrf.mxu0  ;;  %15420 = vmatpush3.msra.mxu0 %v14142_v18 }
0x1053   : > { %15388 = vmatprep.mubr.msk.f32.mxu0 %vm1578_vm1, %v7726_v35  ;;  %15408 = vmatprep.mubr.msk.f32.mxu1 %vm1578_vm1, %v7726_v35 }
0x1054   : > { %v15351_v37 = vpop.f32.mrf.mxu0  ;;  %15421 = vmatprep.subr.mxu0 %v14141_v63 }
0x1055   : > { %15422 = vmatpush3.msra.mxu0 %v14141_v63  ;;  %v17995_v63 = vld [vmem:[%s19266_s15 + $0x2] ss:$0 sm:$0xff] }
0x1056   : > { %v7872_v51 = vpop.f32.mrf.mxu0  ;;  %15423 = vmatprep.subr.mxu0 %v14140_v33 }
0x1057   : > { %v7799_v56 = vpop.f32.mrf.mxu1  ;;  %15424 = vmatpush3.msra.mxu0 %v14140_v33 }
0x1058   : > { %15389 = vmatmul.mubr.msk.f32.gmra.mxu0 %vm1578_vm1, %v7799_v56  ;;  %15409 = vmatmul.mubr.msk.f32.gmra.mxu1 %vm1578_vm1, %v7799_v56  ;;  %v15361_v62 = vpop.f32.mrf.mxu0 }
0x1059   : > { %v15356_v26 = vpop.f32.mrf.mxu1  ;;  %15391 = vmatprep.mubr.msk.f32.mxu0 %vm1578_vm1, %v7872_v51  ;;  %15411 = vmatprep.mubr.msk.f32.mxu1 %vm1578_vm1, %v7872_v51 }
0x105a   : > { %v8018_v19 = vpop.f32.mrf.mxu0  ;;  %15457 = vmatprep.subr.mxu0 %v16296_v41 }
0x105b   : > { %v7945_v22 = vpop.f32.mrf.mxu1 }
0x105c   : > { %15392 = vmatmul.mubr.msk.f32.gmra.mxu0 %vm1578_vm1, %v7945_v22  ;;  %15412 = vmatmul.mubr.msk.f32.gmra.mxu1 %vm1578_vm1, %v7945_v22  ;;  %v15371_v60 = vpop.f32.mrf.mxu0 }
0x105d   : > { %v15366_v40 = vpop.f32.mrf.mxu1  ;;  %15394 = vmatprep.mubr.msk.f32.mxu0 %vm1578_vm1, %v8018_v19  ;;  %15414 = vmatprep.mubr.msk.f32.mxu1 %vm1578_vm1, %v8018_v19 }
0x105f   : > { %v8091_v61 = vpop.f32.mrf.mxu1 }
0x1060   : > { %15395 = vmatmul.mubr.msk.f32.gmra.mxu0 %vm1578_vm1, %v8091_v61  ;;  %15415 = vmatmul.mubr.msk.f32.gmra.mxu1 %vm1578_vm1, %v8091_v61 }
0x1061   : > { %v15376_v31 = vpop.f32.mrf.mxu1  ;;  %15425 = vmatprep.mubr.msk.f32.mxu0 %vm1578_vm1, %v7580_v58  ;;  %15439 = vmatprep.mubr.msk.f32.mxu1 %vm16297_vm2, %v16296_v41 }
0x1064   : > { %15426 = vmatmul.mubr.msk.f32.vlgmr.msra.gmra.mxu0 %vm1578_vm1, %v7653_v6 }
0x1065   : > { %15428 = vmatprep.mubr.msk.f32.mxu0 %vm1578_vm1, %v7726_v35 }
0x1068   : > { %15429 = vmatmul.mubr.msk.f32.gmra.mxu0 %vm1578_vm1, %v7799_v56 }
0x1069   : > { %15431 = vmatprep.mubr.msk.f32.mxu0 %vm1578_vm1, %v7872_v51 }
0x106c   : > { %15432 = vmatmul.mubr.msk.f32.gmra.mxu0 %vm1578_vm1, %v7945_v22 }
0x106d   : > { %15434 = vmatprep.mubr.msk.f32.mxu0 %vm1578_vm1, %v8018_v19 }
0x1070   : > { %15435 = vmatmul.mubr.msk.f32.gmra.mxu0 %vm1578_vm1, %v8091_v61 }
0x1071   : > { %15459 = vmatprep.mubr.msk.f32.mxu0 %vm16297_vm2, %v16296_v41 }
0x110f   : > { %v15387_v39 = vpop.f32.mrf.mxu0  ;;  %v15407_v57 = vpop.f32.mrf.mxu1 }
0x1110   : > { %v8320_v44 = vadd.f32 %v15407_v57, %v14131_v53  ;;  %v8202_v38 = vadd.f32 %v15387_v39, %v14117_v55 }
0x1111   : > { %v8314_v12 = vpop.f32.mrf.mxu1  ;;  %v8196_v30 = vpop.f32.mrf.mxu0 }
0x1112   : > { %v8315_v7 = vadd.f32 %v14131_v53, %v8314_v12  ;;  %v8197_v0 = vadd.f32 %v14117_v55, %v8196_v30 }
0x1114   : > { %15438 = vmatpush3.xpose.msk.msra.mxu1 %vm1578_vm1, %v8315_v7 }
0x1115   : > { %15442 = vmatprep.subr.mxu1 %v16296_v41 }
0x1117   : > { %15440 = vmatmul.mubr.msk.f32.vlgmr.msra.gmra.mxu1 %vm1578_vm1, %v8197_v0 }
0x1118   : > { %v15390_v48 = vpop.f32.mrf.mxu0  ;;  %v15410_v47 = vpop.f32.mrf.mxu1  ;;  %15443 = vmatpush3.xpose.msk.msra.mxu1 %vm1578_vm1, %v8320_v44  ;;  %15444 = vmatprep.mubr.msk.f32.mxu1 %vm16297_vm2, %v16296_v41 }
0x1119   : > { %15447 = vmatprep.subr.mxu1 %v16296_v41  ;;  %v8330_v52 = vadd.f32 %v15410_v47, %v14131_v53  ;;  %v8212_v8 = vadd.f32 %v15390_v48, %v14117_v55 }
0x111a   : > { %v8206_v2 = vpop.f32.mrf.mxu0  ;;  %v8324_v42 = vpop.f32.mrf.mxu1 }
0x111b   : > { %v8325_v49 = vadd.f32 %v14131_v53, %v8324_v42  ;;  %15445 = vmatmul.mubr.msk.f32.vlgmr.msra.gmra.mxu1 %vm1578_vm1, %v8202_v38  ;;  %v8207_v11 = vadd.f32 %v14117_v55, %v8206_v2 }
0x111c   : > { %v15393_v23 = vpop.f32.mrf.mxu0  ;;  %v15413_v25 = vpop.f32.mrf.mxu1  ;;  %15449 = vmatprep.mubr.msk.f32.mxu1 %vm16297_vm2, %v16296_v41 }
0x111d   : > { %15448 = vmatpush3.xpose.msk.msra.mxu1 %vm1578_vm1, %v8325_v49  ;;  %v8340_v58 = vadd.f32 %v15413_v25, %v14131_v53  ;;  %v8222_v18 = vadd.f32 %v15393_v23, %v14117_v55 }
0x111e   : > { %v8216_v5 = vpop.f32.mrf.mxu0  ;;  %v8334_v46 = vpop.f32.mrf.mxu1  ;;  %15452 = vmatprep.subr.mxu1 %v16296_v41 }
0x111f   : > { %v8335_v32 = vadd.f32 %v14131_v53, %v8334_v46  ;;  %v8217_v43 = vadd.f32 %v14117_v55, %v8216_v5 }
0x1120   : > { %v15396_v27 = vpop.f32.mrf.mxu0  ;;  %v15416_v29 = vpop.f32.mrf.mxu1  ;;  %15450 = vmatmul.mubr.msk.f32.vlgmr.msra.gmra.mxu1 %vm1578_vm1, %v8207_v11 }
0x1121   : > { %15453 = vmatpush3.xpose.msk.msra.mxu1 %vm1578_vm1, %v8330_v52  ;;  %15458 = vmatpush3.xpose.msk.msra.mxu0 %vm1578_vm1, %v8335_v32  ;;  %v8350_v33 = vadd.f32 %v15416_v29, %v14131_v53  ;;  %v8232_v62 = vadd.f32 %v15396_v27, %v14117_v55 }
0x1122   : > { %v8226_v16 = vpop.f32.mrf.mxu0  ;;  %v8344_v36 = vpop.f32.mrf.mxu1  ;;  %15454 = vmatprep.mubr.msk.f32.mxu1 %vm16297_vm2, %v16296_v41  ;;  %15462 = vmatprep.subr.mxu1 %v16296_v41 }
0x1123   : > { %v8345_v59 = vadd.f32 %v14131_v53, %v8344_v36  ;;  %15467 = vmatprep.subr.mxu0 %v16296_v41  ;;  %v8227_v21 = vadd.f32 %v14117_v55, %v8226_v16 }
0x1124   : > { %v15427_v6 = vpop.f32.mrf.mxu0  ;;  %15455 = vmatmul.mubr.msk.f32.vlgmr.msra.gmra.mxu1 %vm1578_vm1, %v8212_v8  ;;  %15460 = vmatmul.mubr.msk.f32.vlgmr.msra.gmra.mxu0 %vm1578_vm1, %v8217_v43 }
0x1125   : > { %15463 = vmatpush3.xpose.msk.msra.mxu1 %vm1578_vm1, %v8340_v58  ;;  %15468 = vmatpush3.xpose.msk.msra.mxu0 %vm1578_vm1, %v8345_v59  ;;  %v8438_v19 = vadd.f32 %v15427_v6, %v17995_v63 }
0x1126   : > { %v8432_v35 = vpop.f32.mrf.mxu0  ;;  %15464 = vmatprep.mubr.msk.f32.mxu1 %vm16297_vm2, %v16296_v41  ;;  %15469 = vmatprep.mubr.msk.f32.mxu0 %vm16297_vm2, %v16296_v41 }
0x1127   : > { %v8433_v37 = vadd.f32 %v17995_v63, %v8432_v35  ;;  %15472 = vmatprep.subr.mxu1 %v16296_v41  ;;  %15477 = vmatprep.subr.mxu0 %v16296_v41 }
0x1128   : > { %v15430_v51 = vpop.f32.mrf.mxu0  ;;  %15465 = vmatmul.mubr.msk.f32.vlgmr.msra.gmra.mxu1 %vm1578_vm1, %v8222_v18  ;;  %15470 = vmatmul.mubr.msk.f32.vlgmr.msra.gmra.mxu0 %vm1578_vm1, %v8227_v21 }
0x1129   : > { %v18007_v56 = vadd.f32 %v15430_v51, %v17995_v63  ;;  %15473 = vmatpush3.xpose.msk.msra.mxu1 %vm1578_vm1, %v8350_v33  ;;  %15478 = vmatpush3.msra.mxu0 %v8433_v37 }
0x112a   : > { %v8442_v26 = vpop.f32.mrf.mxu0  ;;  %15474 = vmatprep.mubr.msk.f32.mxu1 %vm16297_vm2, %v16296_v41  ;;  %15482 = vmatprep.subr.mxu1 %v16296_v41 }
0x112b   : > { %v18015_v22 = vadd.f32 %v17995_v63, %v8442_v26  ;;  %15479 = vmatprep.mubr.msk.f32.mxu0 %vm16297_vm2, %v16296_v41  ;;  %15487 = vmatprep.subr.mxu0 %v16296_v41 }
0x112c   : > { %v15433_v60 = vpop.f32.mrf.mxu0  ;;  %15475 = vmatmul.mubr.msk.f32.vlgmr.msra.gmra.mxu1 %vm1578_vm1, %v8232_v62 }
0x112d   : > { %v18022_v40 = vadd.f32 %v15433_v60, %v17995_v63  ;;  %15483 = vmatpush3.msra.mxu1 %v8438_v19  ;;  %15484 = vmatprep.mubr.msk.f32.mxu1 %vm16297_vm2, %v16296_v41 }
0x112e   : > { %v8452_v61 = vpop.f32.mrf.mxu0  ;;  %15492 = vmatprep.subr.mxu1 %v16296_v41 }
0x112f   : > { %v18028_v31 = vadd.f32 %v17995_v63, %v8452_v61 }
0x1130   : > { %v15436_v39 = vpop.f32.mrf.mxu0 }
0x1131   : > { %v18031_v57 = vadd.f32 %v15436_v39, %v17995_v63 }
0x1132   : > { %v18037_v49 = vpop.f32.mrf.mxu0 }
0x11d7   : > { %v8543_v53 = vpop.f32.mrf.mxu1 }
0x11d8   : > { %v9079_v12 = vmul.f32 0.17677669, %v8543_v53 }
0x11d9   : > { %v15441_v30 = vpop.f32.mrf.mxu1 }
0x11da   : > { %v9087_v7 = vadd.f32 %v9079_v12, %v17843_v15 }
0x11db   : > { %v8619_v55 = vpop.f32.mrf.mxu1 }
0x11dc   : > { %v9080_v0 = vmul.f32 0.17677669, %v8619_v55  ;;  %v9095_v44 = vsel %vm1448_vm0, %v9087_v7, -inf }
0x11dd   : > { %9096 = vmax.xlane.f32.xlu0 %v9095_v44  ;;  %v15446_v48 = vpop.f32.mrf.mxu1 }
0x11de   : > { %v9088_v47 = vadd.f32 %v9080_v0, %v17847_v28 }
0x11e0   : > { %v8695_v38 = vpop.f32.mrf.mxu1  ;;  %v9098_v2 = vsel %vm1448_vm0, %v9088_v47, -inf }
0x11e1   : > { %v9081_v42 = vmul.f32 0.17677669, %v8695_v38  ;;  %9099 = vmax.xlane.f32.xlu1 %v9098_v2 }
0x11e2   : > { %v15451_v23 = vpop.f32.mrf.mxu1 }
0x11e3   : > { %v9089_v25 = vadd.f32 %v9081_v42, %v17854_v50 }
0x11e4   : > { %v8771_v11 = vpop.f32.mrf.mxu1  ;;  %v8847_v15 = vpop.f32.mrf.mxu0 }
0x11e5   : > { %v9082_v5 = vmul.f32 0.17677669, %v8771_v11  ;;  %v9083_v46 = vmul.f32 0.17677669, %v8847_v15  ;;  %v9101_v52 = vsel %vm1448_vm0, %v9089_v25, -inf }
0x11e6   : > { %v15461_v32 = vpop.f32.mrf.mxu0  ;;  %9102 = vmax.xlane.f32.xlu0 %v9101_v52  ;;  %v15456_v27 = vpop.f32.mrf.mxu1 }
0x11e7   : > { %v9090_v28 = vadd.f32 %v9082_v5, %v17862_v13  ;;  %v9091_v29 = vadd.f32 %v9083_v46, %v17858_v10 }
0x11e8   : > { %v8923_v8 = vpop.f32.mrf.mxu1  ;;  %v8999_v43 = vpop.f32.mrf.mxu0 }
0x11e9   : > { %v9084_v16 = vmul.f32 0.17677669, %v8923_v8  ;;  %v9085_v36 = vmul.f32 0.17677669, %v8999_v43  ;;  %v9107_v58 = vsel %vm1448_vm0, %v9091_v29, -inf  ;;  %v9104_v50 = vsel %vm1448_vm0, %v9090_v28, -inf }
0x11ea   : > { %v15471_v59 = vpop.f32.mrf.mxu0  ;;  %9108 = vmax.xlane.f32.xlu0 %v9107_v58  ;;  %9105 = vmax.xlane.f32.xlu1 %v9104_v50  ;;  %v15466_v6 = vpop.f32.mrf.mxu1 }
0x11eb   : > { %v9092_v18 = vadd.f32 %v9084_v16, %v17872_v1  ;;  %v9093_v21 = vadd.f32 %v9085_v36, %v17867_v4 }
0x11ec   : > { %v9075_v35 = vpop.f32.mrf.mxu1 }
0x11ed   : > { %v9086_v13 = vmul.f32 0.17677669, %v9075_v35  ;;  %v9113_v10 = vsel %vm1448_vm0, %v9093_v21, -inf  ;;  %v9110_v33 = vsel %vm1448_vm0, %v9092_v18, -inf }
0x11ee   : > { %9114 = vmax.xlane.f32.xlu0 %v9113_v10  ;;  %9111 = vmax.xlane.f32.xlu1 %v9110_v33  ;;  %v15476_v37 = vpop.f32.mrf.mxu1 }
0x11ef   : > { %v9094_v51 = vadd.f32 %v9086_v13, %v17879_v20 }
0x11f1   : > { %v9116_v62 = vsel %vm1448_vm0, %v9094_v51, -inf }
0x11f2   : > { %9117 = vmax.xlane.f32.xlu1 %v9116_v62 }
0x1266   : > { %v9097_v26 = vpop.xlane.xlu0 %9096 }
0x1267   : > { %v9119_v19 = vsub.f32 %v9087_v7, %v9097_v26 }
0x1269   : > { %v9127_v60 = vmul.f32 1.442695, %v9119_v19 }
0x126a   : > { %v9100_v1 = vpop.xlane.xlu1 %9099 }
0x126b   : > { %16090 = vpow2.f32 %v9127_v60  ;;  %v9120_v4 = vsub.f32 %v9088_v47, %v9100_v1 }
0x126d   : > { %v9129_v61 = vmul.f32 1.442695, %v9120_v4 }
0x126f   : > { %16092 = vpow2.f32 %v9129_v61  ;;  %v9103_v39 = vpop.xlane.xlu0 %9102 }
0x1270   : > { %v9121_v53 = vsub.f32 %v9089_v25, %v9103_v39 }
0x1272   : > { %v9131_v12 = vmul.f32 1.442695, %v9121_v53 }
0x1273   : > { %v9109_v30 = vpop.xlane.xlu0 %9108  ;;  %v9106_v55 = vpop.xlane.xlu1 %9105 }
0x1274   : > { %16094 = vpow2.f32 %v9131_v12  ;;  %v9123_v0 = vsub.f32 %v9091_v29, %v9109_v30  ;;  %v9122_v44 = vsub.f32 %v9090_v28, %v9106_v55 }
0x1276   : > { %v9135_v20 = vmul.f32 1.442695, %v9123_v0  ;;  %v9133_v48 = vmul.f32 1.442695, %v9122_v44 }
0x1277   : > { %v9115_v38 = vpop.xlane.xlu0 %9114  ;;  %v9112_v2 = vpop.xlane.xlu1 %9111 }
0x1278   : > { %v16091_v42 = vpop.eup %16090  ;;  %16096 = vpow2.f32 %v9135_v20  ;;  %v9125_v7 = vsub.f32 %v9093_v21, %v9115_v38  ;;  %v9124_v23 = vsub.f32 %v9092_v18, %v9112_v2 }
0x1279   : > { %16098 = vpow2.f32 %v9133_v48  ;;  %v9143_v47 = vsel %vm1448_vm0, %v16091_v42, 0.0  ;;  %v9767_v48 = vld [vmem:[%s19267_s16] sm:$0xff] }
0x127a   : > { %v9139_v11 = vmul.f32 1.442695, %v9125_v7  ;;  %v9137_v15 = vmul.f32 1.442695, %v9124_v23  ;;  %9144 = vadd.xlane.f32.xlu0 %v9143_v47 }
0x127b   : > { %v9118_v25 = vpop.xlane.xlu1 %9117 }
0x127c   : > { %v16093_v5 = vpop.eup %16092  ;;  %16100 = vpow2.f32 %v9139_v11  ;;  %v9126_v46 = vsub.f32 %v9094_v51, %v9118_v25  ;;  %v18123_v11 = vld [vmem:[%s19268_s18] ss:$0 sm:$0xff] }
0x127d   : > { %16102 = vpow2.f32 %v9137_v15  ;;  %v9146_v52 = vsel %vm1448_vm0, %v16093_v5, 0.0 }
0x127e   : > { %v9141_v32 = vmul.f32 1.442695, %v9126_v46  ;;  %9147 = vadd.xlane.f32.xlu1 %v9146_v52 }
0x1280   : > { %16104 = vpow2.f32 %v9141_v32 }
0x1281   : > { %v16095_v27 = vpop.eup %16094 }
0x1282   : > { %v9149_v28 = vsel %vm1448_vm0, %v16095_v27, 0.0 }
0x1283   : > { %9150 = vadd.xlane.f32.xlu0 %v9149_v28 }
0x1285   : > { %v16097_v29 = vpop.eup %16096 }
0x1286   : > { %v16099_v8 = vpop.eup %16098  ;;  %v9155_v43 = vsel %vm1448_vm0, %v16097_v29, 0.0 }
0x1287   : > { %9156 = vadd.xlane.f32.xlu0 %v9155_v43  ;;  %v9152_v16 = vsel %vm1448_vm0, %v16099_v8, 0.0 }
0x1288   : > { %9153 = vadd.xlane.f32.xlu1 %v9152_v16 }
0x1289   : > { %v16101_v36 = vpop.eup %16100 }
0x128a   : > { %v16103_v58 = vpop.eup %16102  ;;  %v9161_v50 = vsel %vm1448_vm0, %v16101_v36, 0.0 }
0x128b   : > { %9162 = vadd.xlane.f32.xlu0 %v9161_v50  ;;  %v9158_v59 = vsel %vm1448_vm0, %v16103_v58, 0.0 }
0x128c   : > { %9159 = vadd.xlane.f32.xlu1 %v9158_v59 }
0x128d   : > { %v18058_v6 = vpop.eup %16104 }
0x128e   : > { %v9164_v18 = vsel %vm1448_vm0, %v18058_v6, 0.0 }
0x1290   : > { %9165 = vadd.xlane.f32.xlu1 %v9164_v18 }
0x1303   : > { %v9145_v21 = vpop.xlane.xlu0 %9144 }
0x1304   : > { %16106 = vrcp.f32 %v9145_v21 }
0x1307   : > { %v9148_v35 = vpop.xlane.xlu1 %9147 }
0x1308   : > { %16108 = vrcp.f32 %v9148_v35 }
0x130c   : > { %v9151_v13 = vpop.xlane.xlu0 %9150 }
0x130d   : > { %16110 = vrcp.f32 %v9151_v13 }
0x1310   : > { %v9157_v10 = vpop.xlane.xlu0 %9156 }
0x1311   : > { %v16107_v33 = vpop.eup %16106  ;;  %16112 = vrcp.f32 %v9157_v10  ;;  %v9154_v37 = vpop.xlane.xlu1 %9153 }
0x1312   : > { %v9175_v51 = vmul.f32 %v16107_v33, %v16091_v42  ;;  %16114 = vrcp.f32 %v9154_v37 }
0x1314   : > { %v9163_v62 = vpop.xlane.xlu0 %9162  ;;  %15480 = vmatmul.mubr.msk.f32.vlgmr.msra.gmra.mxu0 %vm1448_vm0, %v9175_v51 }
0x1315   : > { %v16109_v26 = vpop.eup %16108  ;;  %16116 = vrcp.f32 %v9163_v62  ;;  %v9160_v19 = vpop.xlane.xlu1 %9159  ;;  %15488 = vmatpush3.msra.mxu0 %v18015_v22  ;;  %15489 = vmatprep.mubr.msk.f32.mxu0 %vm16297_vm2, %v16296_v41 }
0x1316   : > { %v9176_v60 = vmul.f32 %v16109_v26, %v16093_v5  ;;  %16118 = vrcp.f32 %v9160_v19  ;;  %15497 = vmatprep.subr.mxu0 %v16296_v41 }
0x1318   : > { %15485 = vmatmul.mubr.msk.f32.vlgmr.msra.gmra.mxu1 %vm1448_vm0, %v9176_v60 }
0x1319   : > { %v9166_v1 = vpop.xlane.xlu1 %9165  ;;  %15493 = vmatpush3.msra.mxu1 %v18007_v56  ;;  %15494 = vmatprep.mubr.msk.f32.mxu1 %vm16297_vm2, %v16296_v41  ;;  %v8463_v56 = vadd.f32 %v17995_v63, %v18037_v49  ;;  %v9769_v63 = vld [vmem:[%s19267_s16 + $0x10] sm:$0xff]  ;;  %v9768_v49 = vld [vmem:[%s19267_s16 + $0x8] sm:$0xff] }
0x131a   : > { %v16111_v4 = vpop.eup %16110  ;;  %16120 = vrcp.f32 %v9166_v1  ;;  %15502 = vmatprep.subr.mxu1 %v16296_v41 }
0x131b   : > { %v9177_v22 = vmul.f32 %v16111_v4, %v16095_v27 }
0x131d   : > { %15490 = vmatmul.mubr.msk.f32.vlgmr.msra.gmra.mxu0 %vm1448_vm0, %v9177_v22 }
0x131e   : > { %v16113_v61 = vpop.eup %16112  ;;  %15498 = vmatpush3.msra.mxu0 %v18028_v31  ;;  %15499 = vmatprep.mubr.msk.f32.mxu0 %vm16297_vm2, %v16296_v41  ;;  %v9770_v31 = vld [vmem:[%s19267_s16 + $0x18] sm:$0xff] }
0x131f   : > { %v16115_v39 = vpop.eup %16114  ;;  %v9179_v53 = vmul.f32 %v16113_v61, %v16097_v29  ;;  %15507 = vmatprep.subr.mxu0 %v16296_v41 }
0x1320   : > { %v9178_v12 = vmul.f32 %v16115_v39, %v16099_v8 }
0x1321   : > { %15500 = vmatmul.mubr.msk.f32.vlgmr.msra.gmra.mxu0 %vm1448_vm0, %v9179_v53 }
0x1322   : > { %v16117_v30 = vpop.eup %16116  ;;  %15495 = vmatmul.mubr.msk.f32.vlgmr.msra.gmra.mxu1 %vm1448_vm0, %v9178_v12  ;;  %15508 = vmatpush3.msra.mxu0 %v8463_v56 }
0x1323   : > { %v16119_v55 = vpop.eup %16118  ;;  %v9181_v0 = vmul.f32 %v16117_v30, %v16101_v36  ;;  %15503 = vmatpush3.msra.mxu1 %v18022_v40  ;;  %15504 = vmatprep.mubr.msk.f32.mxu1 %vm16297_vm2, %v16296_v41 }
0x1324   : > { %v9180_v44 = vmul.f32 %v16119_v55, %v16103_v58  ;;  %15509 = vmatprep.mubr.msk.f32.mxu0 %vm16297_vm2, %v16296_v41  ;;  %15512 = vmatprep.subr.mxu1 %v16296_v41 }
0x1325   : > { %15517 = vmatprep.subr.mxu0 %v9770_v31  ;;  %15510 = vmatmul.mubr.msk.f32.vlgmr.msra.gmra.mxu0 %vm1448_vm0, %v9181_v0 }
0x1326   : > { %15505 = vmatmul.mubr.msk.f32.vlgmr.msra.gmra.mxu1 %vm1448_vm0, %v9180_v44  ;;  %15518 = vmatpush3.msra.mxu0 %v9770_v31 }
0x1327   : > { %v16121_v20 = vpop.eup %16120  ;;  %15513 = vmatpush3.msra.mxu1 %v18031_v57  ;;  %15519 = vmatprep.subr.mxu0 %v9769_v63 }
0x1328   : > { %v9182_v40 = vmul.f32 %v16121_v20, %v18058_v6  ;;  %15525 = vmatprep.mubr.msk.f32.mxu0 %vm1578_vm1, %v17748_v17  ;;  %15520 = vmatpush3.msra.mxu0 %v9769_v63 }
0x1329   : > { %15514 = vmatprep.mubr.msk.f32.mxu1 %vm16297_vm2, %v16296_v41  ;;  %15521 = vmatprep.subr.mxu0 %v9768_v49 }
0x132a   : > { %15515 = vmatmul.mubr.msk.f32.vlgmr.msra.gmra.mxu1 %vm1448_vm0, %v9182_v40  ;;  %15522 = vmatpush3.msra.mxu0 %v9768_v49 }
0x132b   : > { %15523 = vmatprep.subr.mxu0 %v9767_v48  ;;  %15537 = vmatprep.subr.mxu1 %v9770_v31 }
0x132c   : > { %15524 = vmatpush3.msra.mxu0 %v9767_v48  ;;  %15538 = vmatpush3.msra.mxu1 %v9770_v31 }
0x132d   : > { %15526 = vmatmul.mubr.msk.f32.vlgmr.msra.gmra.mxu0 %vm1578_vm1, %v17752_v14  ;;  %15539 = vmatprep.subr.mxu1 %v9769_v63 }
0x132e   : > { %15528 = vmatprep.mubr.msk.f32.mxu0 %vm1578_vm1, %v17750_v54  ;;  %15540 = vmatpush3.msra.mxu1 %v9769_v63 }
0x132f   : > { %15541 = vmatprep.subr.mxu1 %v9768_v49 }
0x1330   : > { %15542 = vmatpush3.msra.mxu1 %v9768_v49 }
0x1331   : > { %15529 = vmatmul.mubr.msk.f32.gmra.mxu0 %vm1578_vm1, %v17756_v34  ;;  %15543 = vmatprep.subr.mxu1 %v9767_v48 }
0x1332   : > { %15531 = vmatprep.mubr.msk.f32.mxu0 %vm1578_vm1, %v17754_v45  ;;  %15544 = vmatpush3.msra.mxu1 %v9767_v48 }
0x1335   : > { %15532 = vmatmul.mubr.msk.f32.gmra.mxu0 %vm1578_vm1, %v17760_v9 }
0x1336   : > { %15534 = vmatprep.mubr.msk.f32.mxu0 %vm1578_vm1, %v17758_v24 }
0x1339   : > { %15535 = vmatmul.mubr.msk.f32.gmra.mxu0 %vm1578_vm1, %v17762_v3 }
0x13d4   : > { %v9252_v17 = vpop.f32.mrf.mxu0 }
0x13d5   : > { %15545 = vmatprep.mubr.msk.f32.mxu1 %vm1578_vm1, %v9252_v17 }
0x13d6   : > { %v15481_v54 = vpop.f32.mrf.mxu0 }
0x13d8   : > { %v9325_v14 = vpop.f32.mrf.mxu1 }
0x13d9   : > { %15546 = vmatmul.mubr.msk.f32.vlgmr.msra.gmra.mxu1 %vm1578_vm1, %v9325_v14 }
0x13da   : > { %v15486_v34 = vpop.f32.mrf.mxu1 }
0x13dd   : > { %v9398_v57 = vpop.f32.mrf.mxu0 }
0x13de   : > { %15548 = vmatprep.mubr.msk.f32.mxu1 %vm1578_vm1, %v9398_v57 }
0x13df   : > { %v15491_v45 = vpop.f32.mrf.mxu0 }
0x13e1   : > { %v9544_v9 = vpop.f32.mrf.mxu0 }
0x13e2   : > { %v9471_v38 = vpop.f32.mrf.mxu1 }
0x13e3   : > { %15549 = vmatmul.mubr.msk.f32.gmra.mxu1 %vm1578_vm1, %v9471_v38  ;;  %v15501_v24 = vpop.f32.mrf.mxu0 }
0x13e4   : > { %v15496_v2 = vpop.f32.mrf.mxu1  ;;  %15551 = vmatprep.mubr.msk.f32.mxu1 %vm1578_vm1, %v9544_v9 }
0x13e5   : > { %v9690_v3 = vpop.f32.mrf.mxu0 }
0x13e6   : > { %v9617_v42 = vpop.f32.mrf.mxu1 }
0x13e7   : > { %15552 = vmatmul.mubr.msk.f32.gmra.mxu1 %vm1578_vm1, %v9617_v42  ;;  %v15511_v7 = vpop.f32.mrf.mxu0 }
0x13e8   : > { %v15506_v23 = vpop.f32.mrf.mxu1  ;;  %15554 = vmatprep.mubr.msk.f32.mxu1 %vm1578_vm1, %v9690_v3 }
0x13ea   : > { %v9763_v47 = vpop.f32.mrf.mxu1 }
0x13eb   : > { %15555 = vmatmul.mubr.msk.f32.gmra.mxu1 %vm1578_vm1, %v9763_v47 }
0x13ec   : > { %v15516_v15 = vpop.f32.mrf.mxu1 }
0x13ed   : > { %v15527_v25 = vpop.f32.mrf.mxu0 }
0x13ee   : > { %v9874_v5 = vadd.f32 %v15527_v25, %v18123_v11 }
0x13ef   : > { %v9868_v46 = vpop.f32.mrf.mxu0 }
0x13f0   : > { %v18127_v52 = vadd.f32 %v18123_v11, %v9868_v46  ;;  %v9910_v32 = vsel %vm1578_vm1, %v9874_v5, 0.0 }
0x13f1   : > { %v15530_v27 = vpop.f32.mrf.mxu0  ;;  %9911 = vadd.xlane.f32.xlu1 %v9910_v32 }
0x13f2   : > { %v18131_v28 = vadd.f32 %v15530_v27, %v18123_v11  ;;  %v9907_v29 = vsel %vm1578_vm1, %v18127_v52, 0.0 }
0x13f3   : > { %v9878_v8 = vpop.f32.mrf.mxu0  ;;  %9908 = vadd.xlane.f32.xlu0 %v9907_v29 }
0x13f4   : > { %v18136_v43 = vadd.f32 %v18123_v11, %v9878_v8  ;;  %v9916_v16 = vsel %vm1578_vm1, %v18131_v28, 0.0 }
0x13f5   : > { %v15533_v36 = vpop.f32.mrf.mxu0  ;;  %9917 = vadd.xlane.f32.xlu1 %v9916_v16 }
0x13f6   : > { %v18141_v58 = vadd.f32 %v15533_v36, %v18123_v11  ;;  %v9913_v50 = vsel %vm1578_vm1, %v18136_v43, 0.0 }
0x13f7   : > { %v9888_v59 = vpop.f32.mrf.mxu0  ;;  %9914 = vadd.xlane.f32.xlu0 %v9913_v50 }
0x13f8   : > { %v18146_v6 = vadd.f32 %v18123_v11, %v9888_v59  ;;  %v9922_v18 = vsel %vm1578_vm1, %v18141_v58, 0.0 }
0x13f9   : > { %9923 = vadd.xlane.f32.xlu1 %v9922_v18  ;;  %v15536_v39 = vpop.f32.mrf.mxu0  ;;  %v10310_v18 = vld [vmem:[%s19269_s26 + $0x10] sm:$0xff] }
0x13fa   : > { %v9919_v21 = vsel %vm1578_vm1, %v18146_v6, 0.0  ;;  %v18186_v48 = vadd.f32 %v15536_v39, %v18123_v11 }
0x13fb   : > { %9920 = vadd.xlane.f32.xlu0 %v9919_v21  ;;  %v9898_v17 = vpop.f32.mrf.mxu0  ;;  %v10309_v21 = vld [vmem:[%s19269_s26 + $0x8] sm:$0xff] }
0x13fc   : > { %v18196_v38 = vadd.f32 %v18123_v11, %v9898_v17  ;;  %v9928_v47 = vsel %vm1578_vm1, %v18186_v48, 0.0 }
0x147a   : > { %v9912_v62 = vpop.xlane.xlu1 %9911 }
0x147b   : > { %v9932_v31 = vmul.f32 0.03125, %v9912_v62 }
0x147c   : > { %v9909_v60 = vpop.xlane.xlu0 %9908 }
0x147d   : > { %v9931_v49 = vmul.f32 0.03125, %v9909_v60  ;;  %v18188_v14 = vsub.f32 %v9874_v5, %v9932_v31  ;;  %v9925_v5 = vsel %vm1578_vm1, %v18196_v38, 0.0 }
0x147e   : > { %v9918_v12 = vpop.xlane.xlu1 %9917 }
0x147f   : > { %v9934_v34 = vmul.f32 0.03125, %v9918_v12  ;;  %v18199_v24 = vsub.f32 %v18127_v52, %v9931_v49 }
0x1480   : > { %v9915_v44 = vpop.xlane.xlu0 %9914 }
0x1481   : > { %v9933_v2 = vmul.f32 0.03125, %v9915_v44  ;;  %v18204_v7 = vsub.f32 %v18131_v28, %v9934_v34  ;;  %v9947_v46 = vmul.f32 %v18199_v24, %v18199_v24 }
0x1482   : > { %v9924_v9 = vpop.xlane.xlu1 %9923 }
0x1483   : > { %v9936_v23 = vmul.f32 0.03125, %v9924_v9  ;;  %v18211_v15 = vsub.f32 %v18136_v43, %v9933_v2  ;;  %v9950_v27 = vmul.f32 %v18204_v7, %v18204_v7  ;;  %v9955_v29 = vsel %vm1578_vm1, %v9947_v46, 0.0 }
0x1484   : > { %v9921_v42 = vpop.xlane.xlu0 %9920 }
0x1485   : > { %v9935_v25 = vmul.f32 0.03125, %v9921_v42  ;;  %v18218_v52 = vsub.f32 %v18141_v58, %v9936_v23  ;;  %v9949_v8 = vmul.f32 %v18211_v15, %v18211_v15  ;;  %v9964_v43 = vsel %vm1578_vm1, %v9950_v27, 0.0 }
0x1487   : > { %v18224_v28 = vsub.f32 %v18146_v6, %v9935_v25  ;;  %v9952_v16 = vmul.f32 %v18218_v52, %v18218_v52  ;;  %v9961_v36 = vsel %vm1578_vm1, %v9949_v8, 0.0  ;;  %v10311_v6 = vld [vmem:[%s19269_s26 + $0x18] sm:$0xff] }
0x1488   : > { %15557 = vmatprep.subr.mxu0 %v10311_v6  ;;  %15577 = vmatprep.subr.mxu1 %v10311_v6 }
0x1489   : > { %v9951_v58 = vmul.f32 %v18224_v28, %v18224_v28  ;;  %v9970_v50 = vsel %vm1578_vm1, %v9952_v16, 0.0  ;;  %15558 = vmatpush3.msra.mxu0 %v10311_v6  ;;  %15578 = vmatpush3.msra.mxu1 %v10311_v6 }
0x148a   : > { %15559 = vmatprep.subr.mxu0 %v10310_v18  ;;  %15579 = vmatprep.subr.mxu1 %v10310_v18 }
0x148b   : > { %v9967_v59 = vsel %vm1578_vm1, %v9951_v58, 0.0  ;;  %15560 = vmatpush3.msra.mxu0 %v10310_v18  ;;  %15580 = vmatpush3.msra.mxu1 %v10310_v18 }
0x148c   : > { %15561 = vmatprep.subr.mxu0 %v10309_v21  ;;  %15581 = vmatprep.subr.mxu1 %v10309_v21 }
0x148d   : > { %15562 = vmatpush3.msra.mxu0 %v10309_v21  ;;  %15582 = vmatpush3.msra.mxu1 %v10309_v21 }
0x1499   : > { %v15547_v35 = vpop.f32.mrf.mxu1 }
0x149a   : > { %v18153_v13 = vadd.f32 %v15547_v35, %v18123_v11  ;;  %v10308_v35 = vld [vmem:[%s19269_s26] sm:$0xff] }
0x149b   : > { %v10141_v10 = vpop.f32.mrf.mxu1  ;;  %15563 = vmatprep.subr.mxu0 %v10308_v35  ;;  %15583 = vmatprep.subr.mxu1 %v10308_v35 }
0x149c   : > { %v18156_v33 = vadd.f32 %v18123_v11, %v10141_v10  ;;  %v10183_v37 = vsel %vm1578_vm1, %v18153_v13, 0.0  ;;  %15564 = vmatpush3.msra.mxu0 %v10308_v35  ;;  %15584 = vmatpush3.msra.mxu1 %v10308_v35 }
0x149d   : > { %10184 = vadd.xlane.f32.xlu1 %v10183_v37 }
0x149e   : > { %v10180_v51 = vsel %vm1578_vm1, %v18156_v33, 0.0 }
0x149f   : > { %10181 = vadd.xlane.f32.xlu0 %v10180_v51 }
0x14a3   : > { %v15550_v26 = vpop.f32.mrf.mxu1 }
0x14a4   : > { %v18163_v19 = vadd.f32 %v15550_v26, %v18123_v11 }
0x14a5   : > { %v10151_v1 = vpop.f32.mrf.mxu1 }
0x14a6   : > { %v18166_v4 = vadd.f32 %v18123_v11, %v10151_v1  ;;  %v10189_v22 = vsel %vm1578_vm1, %v18163_v19, 0.0 }
0x14a7   : > { %10190 = vadd.xlane.f32.xlu1 %v10189_v22  ;;  %v15553_v61 = vpop.f32.mrf.mxu1 }
0x14a8   : > { %v18171_v53 = vadd.f32 %v15553_v61, %v18123_v11  ;;  %v10186_v56 = vsel %vm1578_vm1, %v18166_v4, 0.0 }
0x14a9   : > { %v10161_v30 = vpop.f32.mrf.mxu1  ;;  %10187 = vadd.xlane.f32.xlu0 %v10186_v56 }
0x14aa   : > { %v18176_v55 = vadd.f32 %v18123_v11, %v10161_v30  ;;  %v10195_v0 = vsel %vm1578_vm1, %v18171_v53, 0.0 }
0x14ab   : > { %10196 = vadd.xlane.f32.xlu1 %v10195_v0  ;;  %v15556_v63 = vpop.f32.mrf.mxu1 }
0x14ac   : > { %v18181_v20 = vadd.f32 %v15556_v63, %v18123_v11  ;;  %v10192_v40 = vsel %vm1578_vm1, %v18176_v55, 0.0 }
0x14ad   : > { %v10171_v54 = vpop.f32.mrf.mxu1  ;;  %10193 = vadd.xlane.f32.xlu0 %v10192_v40 }
0x14ae   : > { %v18191_v57 = vadd.f32 %v18123_v11, %v10171_v54  ;;  %v10201_v45 = vsel %vm1578_vm1, %v18181_v20, 0.0  ;;  %v9948_v11 = vmul.f32 %v18188_v14, %v18188_v14 }
0x14af   : > { %10202 = vadd.xlane.f32.xlu1 %v10201_v45 }
0x14b0   : > { %v10198_v3 = vsel %vm1578_vm1, %v18191_v57, 0.0  ;;  %v9958_v32 = vsel %vm1578_vm1, %v9948_v11, 0.0 }
0x14b1   : > { %10199 = vadd.xlane.f32.xlu0 %v10198_v3 }
0x14b3   : > { %9929 = vadd.xlane.f32.xlu1 %v9928_v47 }
0x14b5   : > { %9926 = vadd.xlane.f32.xlu0 %v9925_v5 }
0x14b7   : > { %9959 = vadd.xlane.f32.xlu1 %v9958_v32 }
0x14b9   : > { %9956 = vadd.xlane.f32.xlu0 %v9955_v29 }
0x14bb   : > { %9965 = vadd.xlane.f32.xlu1 %v9964_v43 }
0x14bd   : > { %9962 = vadd.xlane.f32.xlu0 %v9961_v36 }
0x14bf   : > { %9971 = vadd.xlane.f32.xlu1 %v9970_v50 }
0x14c1   : > { %9968 = vadd.xlane.f32.xlu0 %v9967_v59 }
0x1526   : > { %v10185_v10 = vpop.xlane.xlu1 %10184 }
0x1527   : > { %v10205_v37 = vmul.f32 0.03125, %v10185_v10 }
0x1528   : > { %v10182_v51 = vpop.xlane.xlu0 %10181 }
0x1529   : > { %v18242_v62 = vsub.f32 %v18153_v13, %v10205_v37  ;;  %v10204_v26 = vmul.f32 0.03125, %v10182_v51 }
0x152b   : > { %v18245_v60 = vsub.f32 %v18156_v33, %v10204_v26  ;;  %v10221_v1 = vmul.f32 %v18242_v62, %v18242_v62 }
0x152d   : > { %v10231_v22 = vsel %vm1578_vm1, %v10221_v1, 0.0  ;;  %v10220_v61 = vmul.f32 %v18245_v60, %v18245_v60 }
0x152e   : > { %10232 = vadd.xlane.f32.xlu1 %v10231_v22 }
0x152f   : > { %v10228_v39 = vsel %vm1578_vm1, %v10220_v61, 0.0 }
0x1530   : > { %v10191_v56 = vpop.xlane.xlu1 %10190  ;;  %10229 = vadd.xlane.f32.xlu0 %v10228_v39 }
0x1531   : > { %v10207_v12 = vmul.f32 0.03125, %v10191_v56 }
0x1532   : > { %v10188_v13 = vpop.xlane.xlu0 %10187 }
0x1533   : > { %v18254_v30 = vsub.f32 %v18163_v19, %v10207_v12  ;;  %v10206_v33 = vmul.f32 0.03125, %v10188_v13 }
0x1534   : > { %v10197_v31 = vpop.xlane.xlu1 %10196 }
0x1535   : > { %v18257_v0 = vsub.f32 %v18166_v4, %v10206_v33  ;;  %v10209_v44 = vmul.f32 0.03125, %v10197_v31  ;;  %v10223_v63 = vmul.f32 %v18254_v30, %v18254_v30  ;;  %v18302_v31 = vld [vmem:[%s19268_s18 + $0x1] ss:$0 sm:$0xff] }
0x1536   : > { %v10194_v49 = vpop.xlane.xlu0 %10193 }
0x1537   : > { %v18262_v40 = vsub.f32 %v18171_v53, %v10209_v44  ;;  %v10208_v17 = vmul.f32 0.03125, %v10194_v49  ;;  %v10237_v54 = vsel %vm1578_vm1, %v10223_v63, 0.0  ;;  %v10222_v19 = vmul.f32 %v18257_v0, %v18257_v0  ;;  %v18306_v49 = vld [vmem:[%s19268_s18 + $0x2] ss:$0 sm:$0xff] }
0x1538   : > { %10238 = vadd.xlane.f32.xlu1 %v10237_v54  ;;  %v10203_v34 = vpop.xlane.xlu1 %10202 }
0x1539   : > { %v18268_v45 = vsub.f32 %v18176_v55, %v10208_v17  ;;  %v10211_v4 = vmul.f32 0.03125, %v10203_v34  ;;  %v10234_v9 = vsel %vm1578_vm1, %v10222_v19, 0.0  ;;  %v10225_v2 = vmul.f32 %v18262_v40, %v18262_v40 }
0x153a   : > { %10235 = vadd.xlane.f32.xlu0 %v10234_v9  ;;  %v10200_v53 = vpop.xlane.xlu0 %10199 }
0x153b   : > { %v18274_v3 = vsub.f32 %v18181_v20, %v10211_v4  ;;  %v10210_v42 = vmul.f32 0.03125, %v10200_v53  ;;  %v10243_v23 = vsel %vm1578_vm1, %v10225_v2, 0.0  ;;  %v10224_v47 = vmul.f32 %v18268_v45, %v18268_v45 }
0x153c   : > { %10244 = vadd.xlane.f32.xlu1 %v10243_v23  ;;  %v9930_v55 = vpop.xlane.xlu1 %9929 }
0x153d   : > { %v18280_v11 = vsub.f32 %v18191_v57, %v10210_v42  ;;  %v9938_v25 = vmul.f32 0.03125, %v9930_v55  ;;  %v10240_v5 = vsel %vm1578_vm1, %v10224_v47, 0.0  ;;  %v10227_v46 = vmul.f32 %v18274_v3, %v18274_v3 }
0x153e   : > { %10241 = vadd.xlane.f32.xlu0 %v10240_v5  ;;  %v9927_v20 = vpop.xlane.xlu0 %9926 }
0x153f   : > { %v18286_v32 = vsub.f32 %v18186_v48, %v9938_v25  ;;  %v9937_v27 = vmul.f32 0.03125, %v9927_v20  ;;  %v10249_v29 = vsel %vm1578_vm1, %v10227_v46, 0.0  ;;  %v10226_v8 = vmul.f32 %v18280_v11, %v18280_v11 }
0x1540   : > { %10250 = vadd.xlane.f32.xlu1 %v10249_v29  ;;  %v9960_v57 = vpop.xlane.xlu1 %9959 }
0x1541   : > { %v18292_v43 = vsub.f32 %v18196_v38, %v9937_v27  ;;  %v9980_v16 = vmul.f32 0.03125, %v9960_v57  ;;  %v10246_v36 = vsel %vm1578_vm1, %v10226_v8, 0.0  ;;  %v9954_v58 = vmul.f32 %v18286_v32, %v18286_v32 }
0x1542   : > { %10247 = vadd.xlane.f32.xlu0 %v10246_v36  ;;  %v9957_v48 = vpop.xlane.xlu0 %9956 }
0x1543   : > { %v9988_v50 = vadd.f32 1e-05, %v9980_v16  ;;  %v9979_v59 = vmul.f32 0.03125, %v9957_v48  ;;  %v9976_v6 = vsel %vm1578_vm1, %v9954_v58, 0.0  ;;  %v9953_v18 = vmul.f32 %v18292_v43, %v18292_v43 }
0x1544   : > { %9977 = vadd.xlane.f32.xlu1 %v9976_v6  ;;  %v9966_v21 = vpop.xlane.xlu1 %9965 }
0x1545   : > { %16122 = vrsqrt.f32 %v9988_v50  ;;  %v9987_v38 = vadd.f32 1e-05, %v9979_v59  ;;  %v9982_v35 = vmul.f32 0.03125, %v9966_v21  ;;  %v9973_v10 = vsel %vm1578_vm1, %v9953_v18, 0.0 }
0x1546   : > { %9974 = vadd.xlane.f32.xlu0 %v9973_v10  ;;  %v9963_v37 = vpop.xlane.xlu0 %9962 }
0x1547   : > { %16124 = vrsqrt.f32 %v9987_v38  ;;  %v9990_v51 = vadd.f32 1e-05, %v9982_v35  ;;  %v9981_v26 = vmul.f32 0.03125, %v9963_v37 }
0x1548   : > { %v9972_v1 = vpop.xlane.xlu1 %9971 }
0x1549   : > { %16126 = vrsqrt.f32 %v9990_v51  ;;  %v9989_v22 = vadd.f32 1e-05, %v9981_v26  ;;  %v9984_v61 = vmul.f32 0.03125, %v9972_v1 }
0x154a   : > { %v9969_v39 = vpop.xlane.xlu0 %9968 }
0x154b   : > { %16128 = vrsqrt.f32 %v9989_v22  ;;  %v9992_v56 = vadd.f32 1e-05, %v9984_v61  ;;  %v9983_v12 = vmul.f32 0.03125, %v9969_v39 }
0x154d   : > { %16130 = vrsqrt.f32 %v9992_v56  ;;  %v9991_v13 = vadd.f32 1e-05, %v9983_v12 }
0x154f   : > { %16132 = vrsqrt.f32 %v9991_v13 }
0x1552   : > { %v16123_v33 = vpop.eup %16122 }
0x1553   : > { %v10004_v44 = vmul.f32 %v16123_v33, %v18188_v14 }
0x1554   : > { %v16125_v63 = vpop.eup %16124 }
0x1555   : > { %v10020_v17 = vmul.f32 %v18302_v31, %v10004_v44  ;;  %v10003_v54 = vmul.f32 %v16125_v63, %v18199_v24 }
0x1556   : > { %v16127_v19 = vpop.eup %16126 }
0x1557   : > { %v10019_v34 = vmul.f32 %v18302_v31, %v10003_v54  ;;  %v10006_v4 = vmul.f32 %v16127_v19, %v18204_v7  ;;  %v10036_v2 = vadd.f32 %v18306_v49, %v10020_v17 }
0x1558   : > { %v16129_v9 = vpop.eup %16128 }
0x1559   : > { %v10035_v53 = vadd.f32 %v18306_v49, %v10019_v34  ;;  %v10005_v42 = vmul.f32 %v16129_v9, %v18211_v15  ;;  %v10022_v14 = vmul.f32 %v18302_v31, %v10006_v4  ;;  %v10044_v5 = vmax.f32 %v10036_v2, 0.0 }
0x155a   : > { %v16131_v23 = vpop.eup %16130 }
0x155b   : > { %v10043_v47 = vmax.f32 %v10035_v53, 0.0  ;;  %v10021_v55 = vmul.f32 %v18302_v31, %v10005_v42  ;;  %v10008_v24 = vmul.f32 %v16131_v23, %v18218_v52  ;;  %v10038_v46 = vadd.f32 %v18306_v49, %v10022_v14 }
0x155c   : > { %v16133_v25 = vpop.eup %16132 }
0x155d   : > { %15565 = vmatprep.mubr.msk.f32.mxu0 %vm1578_vm1, %v10043_v47  ;;  %v10037_v7 = vadd.f32 %v18306_v49, %v10021_v55  ;;  %v10007_v20 = vmul.f32 %v16133_v25, %v18224_v28  ;;  %v10024_v15 = vmul.f32 %v18302_v31, %v10008_v24  ;;  %v10046_v8 = vmax.f32 %v10038_v46, 0.0 }
0x155e   : > { %15566 = vmatmul.mubr.msk.f32.vlgmr.msra.gmra.mxu0 %vm1578_vm1, %v10044_v5 }
0x155f   : > { %v10045_v27 = vmax.f32 %v10037_v7, 0.0  ;;  %v10023_v29 = vmul.f32 %v18302_v31, %v10007_v20  ;;  %v10040_v52 = vadd.f32 %v18306_v49, %v10024_v15 }
0x1561   : > { %15568 = vmatprep.mubr.msk.f32.mxu0 %vm1578_vm1, %v10045_v27  ;;  %v10039_v57 = vadd.f32 %v18306_v49, %v10023_v29  ;;  %v10048_v36 = vmax.f32 %v10040_v52, 0.0 }
0x1562   : > { %15569 = vmatmul.mubr.msk.f32.gmra.mxu0 %vm1578_vm1, %v10046_v8 }
0x1563   : > { %v10047_v16 = vmax.f32 %v10039_v57, 0.0 }
0x1565   : > { %15571 = vmatprep.mubr.msk.f32.mxu0 %vm1578_vm1, %v10047_v16 }
0x1566   : > { %15572 = vmatmul.mubr.msk.f32.gmra.mxu0 %vm1578_vm1, %v10048_v36 }
0x15b7   : > { %v10233_v28 = vpop.xlane.xlu1 %10232 }
0x15b8   : > { %v10253_v58 = vmul.f32 0.03125, %v10233_v28 }
0x15b9   : > { %v10230_v48 = vpop.xlane.xlu0 %10229 }
0x15ba   : > { %v10261_v50 = vadd.f32 1e-05, %v10253_v58  ;;  %v10252_v59 = vmul.f32 0.03125, %v10230_v48 }
0x15bc   : > { %16134 = vrsqrt.f32 %v10261_v50  ;;  %v10260_v6 = vadd.f32 1e-05, %v10252_v59 }
0x15be   : > { %16136 = vrsqrt.f32 %v10260_v6 }
0x15c1   : > { %v10239_v18 = vpop.xlane.xlu1 %10238 }
0x15c2   : > { %v10255_v21 = vmul.f32 0.03125, %v10239_v18 }
0x15c3   : > { %v10236_v38 = vpop.xlane.xlu0 %10235 }
0x15c4   : > { %v10263_v35 = vadd.f32 1e-05, %v10255_v21  ;;  %v10254_v10 = vmul.f32 0.03125, %v10236_v38 }
0x15c5   : > { %v10245_v37 = vpop.xlane.xlu1 %10244 }
0x15c6   : > { %16138 = vrsqrt.f32 %v10263_v35  ;;  %v10262_v51 = vadd.f32 1e-05, %v10254_v10  ;;  %v10257_v26 = vmul.f32 0.03125, %v10245_v37 }
0x15c7   : > { %v10242_v1 = vpop.xlane.xlu0 %10241 }
0x15c8   : > { %16140 = vrsqrt.f32 %v10262_v51  ;;  %v10265_v22 = vadd.f32 1e-05, %v10257_v26  ;;  %v10256_v61 = vmul.f32 0.03125, %v10242_v1 }
0x15c9   : > { %v16135_v39 = vpop.eup %16134  ;;  %v10251_v56 = vpop.xlane.xlu1 %10250 }
0x15ca   : > { %v10277_v12 = vmul.f32 %v16135_v39, %v18242_v62  ;;  %16142 = vrsqrt.f32 %v10265_v22  ;;  %v10264_v13 = vadd.f32 1e-05, %v10256_v61  ;;  %v10259_v33 = vmul.f32 0.03125, %v10251_v56 }
0x15cb   : > { %v16137_v44 = vpop.eup %16136  ;;  %v10248_v63 = vpop.xlane.xlu0 %10247 }
0x15cc   : > { %v10285_v17 = vmul.f32 %v18302_v31, %v10277_v12  ;;  %16144 = vrsqrt.f32 %v10264_v13  ;;  %v10267_v54 = vadd.f32 1e-05, %v10259_v33  ;;  %v10258_v19 = vmul.f32 0.03125, %v10248_v63 }
0x15cd   : > { %v9978_v34 = vpop.xlane.xlu1 %9977  ;;  %v10276_v4 = vmul.f32 %v16137_v44, %v18245_v60 }
0x15ce   : > { %16146 = vrsqrt.f32 %v10267_v54  ;;  %v10266_v9 = vadd.f32 1e-05, %v10258_v19  ;;  %v9986_v2 = vmul.f32 0.03125, %v9978_v34  ;;  %v10293_v62 = vadd.f32 %v18306_v49, %v10285_v17 }
0x15cf   : > { %v9975_v53 = vpop.xlane.xlu0 %9974  ;;  %v10284_v42 = vmul.f32 %v18302_v31, %v10276_v4 }
0x15d0   : > { %16148 = vrsqrt.f32 %v10266_v9  ;;  %v9994_v14 = vadd.f32 1e-05, %v9986_v2  ;;  %v9985_v23 = vmul.f32 0.03125, %v9975_v53  ;;  %v10301_v5 = vmax.f32 %v10293_v62, 0.0 }
0x15d1   : > { %v10292_v47 = vadd.f32 %v18306_v49, %v10284_v42 }
0x15d2   : > { %16150 = vrsqrt.f32 %v9994_v14  ;;  %v9993_v55 = vadd.f32 1e-05, %v9985_v23 }
0x15d3   : > { %v16139_v24 = vpop.eup %16138  ;;  %v10300_v25 = vmax.f32 %v10292_v47, 0.0 }
0x15d4   : > { %16152 = vrsqrt.f32 %v9993_v55  ;;  %v10279_v60 = vmul.f32 %v16139_v24, %v18254_v30 }
0x15d5   : > { %v16141_v46 = vpop.eup %16140  ;;  %15585 = vmatprep.mubr.msk.f32.mxu1 %vm1578_vm1, %v10300_v25 }
0x15d6   : > { %15586 = vmatmul.mubr.msk.f32.vlgmr.msra.gmra.mxu1 %vm1578_vm1, %v10301_v5  ;;  %v10278_v7 = vmul.f32 %v16141_v46, %v18257_v0  ;;  %v10287_v20 = vmul.f32 %v18302_v31, %v10279_v60 }
0x15d7   : > { %v16143_v15 = vpop.eup %16142 }
0x15d8   : > { %v10286_v27 = vmul.f32 %v18302_v31, %v10278_v7  ;;  %v10281_v29 = vmul.f32 %v16143_v15, %v18262_v40  ;;  %v10295_v52 = vadd.f32 %v18306_v49, %v10287_v20 }
0x15d9   : > { %v16145_v8 = vpop.eup %16144 }
0x15da   : > { %v10294_v57 = vadd.f32 %v18306_v49, %v10286_v27  ;;  %v10280_v30 = vmul.f32 %v16145_v8, %v18268_v45  ;;  %v10289_v16 = vmul.f32 %v18302_v31, %v10281_v29  ;;  %v10303_v50 = vmax.f32 %v10295_v52, 0.0 }
0x15db   : > { %v16147_v36 = vpop.eup %16146 }
0x15dc   : > { %v10302_v28 = vmax.f32 %v10294_v57, 0.0  ;;  %v10288_v0 = vmul.f32 %v18302_v31, %v10280_v30  ;;  %v10283_v58 = vmul.f32 %v16147_v36, %v18274_v3  ;;  %v10297_v59 = vadd.f32 %v18306_v49, %v10289_v16 }
0x15dd   : > { %v16149_v48 = vpop.eup %16148 }
0x15de   : > { %15588 = vmatprep.mubr.msk.f32.mxu1 %vm1578_vm1, %v10302_v28  ;;  %v10296_v40 = vadd.f32 %v18306_v49, %v10288_v0  ;;  %v10282_v6 = vmul.f32 %v16149_v48, %v18280_v11  ;;  %v10291_v45 = vmul.f32 %v18302_v31, %v10283_v58  ;;  %v10305_v10 = vmax.f32 %v10297_v59, 0.0 }
0x15df   : > { %v16151_v18 = vpop.eup %16150  ;;  %15589 = vmatmul.mubr.msk.f32.gmra.mxu1 %vm1578_vm1, %v10303_v50 }
0x15e0   : > { %v10304_v21 = vmax.f32 %v10296_v40, 0.0  ;;  %v10290_v38 = vmul.f32 %v18302_v31, %v10282_v6  ;;  %v10010_v3 = vmul.f32 %v16151_v18, %v18286_v32  ;;  %v10299_v37 = vadd.f32 %v18306_v49, %v10291_v45 }
0x15e1   : > { %v16153_v35 = vpop.eup %16152 }
0x15e2   : > { %15591 = vmatprep.mubr.msk.f32.mxu1 %vm1578_vm1, %v10304_v21  ;;  %v10298_v51 = vadd.f32 %v18306_v49, %v10290_v38  ;;  %v10009_v11 = vmul.f32 %v16153_v35, %v18292_v43  ;;  %v10026_v26 = vmul.f32 %v18302_v31, %v10010_v3  ;;  %v10307_v61 = vmax.f32 %v10299_v37, 0.0  ;;  %v18372_v43 = vld [vmem:[%s19270_s28] ss:$0 sm:$0xff] }
0x15e3   : > { %15592 = vmatmul.mubr.msk.f32.gmra.mxu1 %vm1578_vm1, %v10305_v10 }
0x15e4   : > { %v10306_v1 = vmax.f32 %v10298_v51, 0.0  ;;  %v10025_v22 = vmul.f32 %v18302_v31, %v10009_v11  ;;  %v10042_v32 = vadd.f32 %v18306_v49, %v10026_v26 }
0x15e6   : > { %15594 = vmatprep.mubr.msk.f32.mxu1 %vm1578_vm1, %v10306_v1  ;;  %v10041_v39 = vadd.f32 %v18306_v49, %v10025_v22  ;;  %v10050_v12 = vmax.f32 %v10042_v32, 0.0 }
0x15e7   : > { %15595 = vmatmul.mubr.msk.f32.gmra.mxu1 %vm1578_vm1, %v10307_v61 }
0x15e8   : > { %v10049_v56 = vmax.f32 %v10041_v39, 0.0 }
0x15ea   : > { %15574 = vmatprep.mubr.msk.f32.mxu0 %vm1578_vm1, %v10049_v56 }
0x15eb   : > { %15575 = vmatmul.mubr.msk.f32.gmra.mxu0 %vm1578_vm1, %v10050_v12 }
0x161e   : > { %v15567_v13 = vpop.f32.mrf.mxu0 }
0x161f   : > { %v10415_v31 = vadd.f32 %v15567_v13, %v18372_v43 }
0x1620   : > { %v10409_v33 = vpop.f32.mrf.mxu0 }
0x1621   : > { %v18376_v44 = vadd.f32 %v18372_v43, %v10409_v33  ;;  %v10451_v63 = vsel %vm1578_vm1, %v10415_v31, 0.0 }
0x1622   : > { %10452 = vadd.xlane.f32.xlu1 %v10451_v63  ;;  %v15570_v49 = vpop.f32.mrf.mxu0 }
0x1623   : > { %v18380_v17 = vadd.f32 %v15570_v49, %v18372_v43  ;;  %v10448_v54 = vsel %vm1578_vm1, %v18376_v44, 0.0 }
0x1624   : > { %10449 = vadd.xlane.f32.xlu0 %v10448_v54  ;;  %v10419_v19 = vpop.f32.mrf.mxu0 }
0x1625   : > { %v18385_v34 = vadd.f32 %v18372_v43, %v10419_v19  ;;  %v10457_v4 = vsel %vm1578_vm1, %v18380_v17, 0.0 }
0x1626   : > { %10458 = vadd.xlane.f32.xlu1 %v10457_v4  ;;  %v15573_v9 = vpop.f32.mrf.mxu0 }
0x1627   : > { %v18390_v2 = vadd.f32 %v15573_v9, %v18372_v43  ;;  %v10454_v53 = vsel %vm1578_vm1, %v18385_v34, 0.0 }
0x1628   : > { %10455 = vadd.xlane.f32.xlu0 %v10454_v53  ;;  %v10429_v42 = vpop.f32.mrf.mxu0 }
0x1629   : > { %v18395_v62 = vadd.f32 %v18372_v43, %v10429_v42  ;;  %v10463_v14 = vsel %vm1578_vm1, %v18390_v2, 0.0 }
0x162a   : > { %10464 = vadd.xlane.f32.xlu1 %v10463_v14  ;;  %v10852_v14 = vld [vmem:[%s19271_s1 + $0x18] sm:$0xff] }
0x162b   : > { %v10460_v23 = vsel %vm1578_vm1, %v18395_v62, 0.0  ;;  %15597 = vmatprep.subr.mxu0 %v10852_v14  ;;  %15617 = vmatprep.subr.mxu1 %v10852_v14 }
0x162c   : > { %10461 = vadd.xlane.f32.xlu0 %v10460_v23  ;;  %15598 = vmatpush3.msra.mxu0 %v10852_v14  ;;  %v10850_v23 = vld [vmem:[%s19271_s1 + $0x8] sm:$0xff] }
0x162d   : > { %15618 = vmatpush3.msra.mxu1 %v10852_v14 }
0x1696   : > { %v15587_v47 = vpop.f32.mrf.mxu1 }
0x1697   : > { %v18402_v55 = vadd.f32 %v15587_v47, %v18372_v43  ;;  %v10849_v47 = vld [vmem:[%s19271_s1] sm:$0xff] }
0x1698   : > { %v10682_v24 = vpop.f32.mrf.mxu1 }
0x1699   : > { %v18405_v25 = vadd.f32 %v18372_v43, %v10682_v24  ;;  %v10724_v5 = vsel %vm1578_vm1, %v18402_v55, 0.0 }
0x169a   : > { %10725 = vadd.xlane.f32.xlu1 %v10724_v5 }
0x169b   : > { %v10721_v60 = vsel %vm1578_vm1, %v18405_v25, 0.0 }
0x169c   : > { %10722 = vadd.xlane.f32.xlu0 %v10721_v60 }
0x169f   : > { %v15590_v46 = vpop.f32.mrf.mxu1 }
0x16a0   : > { %v18412_v7 = vadd.f32 %v15590_v46, %v18372_v43 }
0x16a1   : > { %v10692_v20 = vpop.f32.mrf.mxu1 }
0x16a2   : > { %v18415_v15 = vadd.f32 %v18372_v43, %v10692_v20  ;;  %v10730_v27 = vsel %vm1578_vm1, %v18412_v7, 0.0 }
0x16a3   : > { %10731 = vadd.xlane.f32.xlu1 %v10730_v27  ;;  %v15593_v29 = vpop.f32.mrf.mxu1 }
0x16a4   : > { %v18420_v8 = vadd.f32 %v15593_v29, %v18372_v43  ;;  %v10727_v52 = vsel %vm1578_vm1, %v18415_v15, 0.0 }
0x16a5   : > { %10728 = vadd.xlane.f32.xlu0 %v10727_v52  ;;  %v10702_v57 = vpop.f32.mrf.mxu1 }
0x16a6   : > { %v18425_v30 = vadd.f32 %v18372_v43, %v10702_v57  ;;  %v10736_v16 = vsel %vm1578_vm1, %v18420_v8, 0.0 }
0x16a7   : > { %10737 = vadd.xlane.f32.xlu1 %v10736_v16  ;;  %v15596_v36 = vpop.f32.mrf.mxu1 }
0x16a8   : > { %v18430_v28 = vadd.f32 %v15596_v36, %v18372_v43  ;;  %v10733_v0 = vsel %vm1578_vm1, %v18425_v30, 0.0 }
0x16a9   : > { %10734 = vadd.xlane.f32.xlu0 %v10733_v0  ;;  %v10712_v58 = vpop.f32.mrf.mxu1 }
0x16aa   : > { %v18435_v48 = vadd.f32 %v18372_v43, %v10712_v58  ;;  %v10742_v50 = vsel %vm1578_vm1, %v18430_v28, 0.0 }
0x16ab   : > { %v10453_v59 = vpop.xlane.xlu1 %10452  ;;  %10743 = vadd.xlane.f32.xlu1 %v10742_v50  ;;  %v15576_v40 = vpop.f32.mrf.mxu0 }
0x16ac   : > { %v10473_v6 = vmul.f32 0.03125, %v10453_v59  ;;  %v18440_v45 = vadd.f32 %v15576_v40, %v18372_v43  ;;  %v10739_v18 = vsel %vm1578_vm1, %v18435_v48, 0.0 }
0x16ad   : > { %10740 = vadd.xlane.f32.xlu0 %v10739_v18  ;;  %v10439_v21 = vpop.f32.mrf.mxu0  ;;  %v10450_v38 = vpop.xlane.xlu0 %10449 }
0x16ae   : > { %v18444_v3 = vsub.f32 %v10415_v31, %v10473_v6  ;;  %v18447_v35 = vadd.f32 %v18372_v43, %v10439_v21  ;;  %v10472_v10 = vmul.f32 0.03125, %v10450_v38  ;;  %v10469_v37 = vsel %vm1578_vm1, %v18440_v45, 0.0 }
0x16af   : > { %v10459_v51 = vpop.xlane.xlu1 %10458  ;;  %10470 = vadd.xlane.f32.xlu1 %v10469_v37 }
0x16b0   : > { %v18452_v11 = vsub.f32 %v18376_v44, %v10472_v10  ;;  %v10475_v26 = vmul.f32 0.03125, %v10459_v51  ;;  %v10466_v1 = vsel %vm1578_vm1, %v18447_v35, 0.0  ;;  %v10489_v22 = vmul.f32 %v18444_v3, %v18444_v3 }
0x16b1   : > { %10467 = vadd.xlane.f32.xlu0 %v10466_v1  ;;  %v10456_v61 = vpop.xlane.xlu0 %10455 }
0x16b2   : > { %v18459_v32 = vsub.f32 %v18380_v17, %v10475_v26  ;;  %v10474_v39 = vmul.f32 0.03125, %v10456_v61  ;;  %v10499_v56 = vsel %vm1578_vm1, %v10489_v22, 0.0  ;;  %v10488_v12 = vmul.f32 %v18452_v11, %v18452_v11 }
0x16b3   : > { %v10465_v43 = vpop.xlane.xlu1 %10464  ;;  %10500 = vadd.xlane.f32.xlu1 %v10499_v56 }
0x16b4   : > { %v18465_v13 = vsub.f32 %v18385_v34, %v10474_v39  ;;  %v10477_v31 = vmul.f32 0.03125, %v10465_v43  ;;  %v10496_v33 = vsel %vm1578_vm1, %v10488_v12, 0.0  ;;  %v10491_v44 = vmul.f32 %v18459_v32, %v18459_v32 }
0x16b5   : > { %10497 = vadd.xlane.f32.xlu0 %v10496_v33  ;;  %v10462_v63 = vpop.xlane.xlu0 %10461 }
0x16b6   : > { %v18471_v49 = vsub.f32 %v18390_v2, %v10477_v31  ;;  %v10476_v17 = vmul.f32 0.03125, %v10462_v63  ;;  %v10505_v54 = vsel %vm1578_vm1, %v10491_v44, 0.0  ;;  %v10490_v19 = vmul.f32 %v18465_v13, %v18465_v13 }
0x16b7   : > { %10506 = vadd.xlane.f32.xlu1 %v10505_v54 }
0x16b8   : > { %v18477_v34 = vsub.f32 %v18395_v62, %v10476_v17  ;;  %v10502_v4 = vsel %vm1578_vm1, %v10490_v19, 0.0  ;;  %v10493_v9 = vmul.f32 %v18471_v49, %v18471_v49  ;;  %v10851_v62 = vld [vmem:[%s19271_s1 + $0x10] sm:$0xff]  ;;  %s19274_s1 = sld [smem:[#allocation5_spill]] }
0x16b9   : > { %10503 = vadd.xlane.f32.xlu0 %v10502_v4  ;;  %15599 = vmatprep.subr.mxu0 %v10851_v62 }
0x16ba   : > { %v10511_v2 = vsel %vm1578_vm1, %v10493_v9, 0.0  ;;  %v10492_v53 = vmul.f32 %v18477_v34, %v18477_v34  ;;  %15619 = vmatprep.subr.mxu1 %v10851_v62  ;;  %15600 = vmatpush3.msra.mxu0 %v10851_v62 }
0x16bb   : > { %10512 = vadd.xlane.f32.xlu1 %v10511_v2  ;;  %15620 = vmatpush3.msra.mxu1 %v10851_v62 }
0x16bc   : > { %v10508_v42 = vsel %vm1578_vm1, %v10492_v53, 0.0  ;;  %15601 = vmatprep.subr.mxu0 %v10850_v23  ;;  %15621 = vmatprep.subr.mxu1 %v10850_v23 }
0x16bd   : > { %10509 = vadd.xlane.f32.xlu0 %v10508_v42  ;;  %15602 = vmatpush3.msra.mxu0 %v10850_v23 }
0x16be   : > { %15622 = vmatpush3.msra.mxu1 %v10850_v23  ;;  %15603 = vmatprep.subr.mxu0 %v10849_v47  ;;  %s18745_s3 = scalar_lea.vmem %s19274_s1, %s16536_s0  ;;  %s19275_s0 = sld [smem:[#allocation26_spill]] }
0x16bf   : > { %15623 = vmatprep.subr.mxu1 %v10849_v47  ;;  %15604 = vmatpush3.msra.mxu0 %v10849_v47  ;;  %s19226_s1 = sshll.u32 %s19291_s23, 3 }
0x16c0   : > { %15624 = vmatpush3.msra.mxu1 %v10849_v47  ;;  %15637 = vmatprep.subr.mxu0 %v16296_v41 }
0x16c1   : > { %15648 = vmatprep.subr.mxu1 %v16296_v41 }
0x1723   : > { %v10726_v24 = vpop.xlane.xlu1 %10725 }
0x1724   : > { %v10746_v5 = vmul.f32 0.03125, %v10726_v24 }
0x1725   : > { %v10723_v60 = vpop.xlane.xlu0 %10722 }
0x1726   : > { %v18493_v46 = vsub.f32 %v18402_v55, %v10746_v5  ;;  %v10745_v20 = vmul.f32 0.03125, %v10723_v60 }
0x1728   : > { %v18496_v27 = vsub.f32 %v18405_v25, %v10745_v20  ;;  %v10762_v29 = vmul.f32 %v18493_v46, %v18493_v46 }
0x172a   : > { %v10772_v52 = vsel %vm1578_vm1, %v10762_v29, 0.0  ;;  %v10761_v57 = vmul.f32 %v18496_v27, %v18496_v27 }
0x172b   : > { %10773 = vadd.xlane.f32.xlu1 %v10772_v52 }
0x172c   : > { %v10732_v16 = vpop.xlane.xlu1 %10731  ;;  %v10769_v36 = vsel %vm1578_vm1, %v10761_v57, 0.0 }
0x172d   : > { %v10748_v0 = vmul.f32 0.03125, %v10732_v16  ;;  %10770 = vadd.xlane.f32.xlu0 %v10769_v36 }
0x172e   : > { %v10729_v55 = vpop.xlane.xlu0 %10728 }
0x172f   : > { %v18505_v58 = vsub.f32 %v18412_v7, %v10748_v0  ;;  %v10747_v25 = vmul.f32 0.03125, %v10729_v55 }
0x1730   : > { %v10738_v50 = vpop.xlane.xlu1 %10737 }
0x1731   : > { %v18508_v59 = vsub.f32 %v18415_v15, %v10747_v25  ;;  %v10750_v40 = vmul.f32 0.03125, %v10738_v50  ;;  %v10764_v6 = vmul.f32 %v18505_v58, %v18505_v58  ;;  %v18553_v50 = vld [vmem:[%s19270_s28 + $0x1] ss:$0 sm:$0xff] }
0x1732   : > { %v10735_v18 = vpop.xlane.xlu0 %10734 }
0x1733   : > { %v18513_v21 = vsub.f32 %v18420_v8, %v10750_v40  ;;  %v10749_v38 = vmul.f32 0.03125, %v10735_v18  ;;  %v10778_v10 = vsel %vm1578_vm1, %v10764_v6, 0.0  ;;  %v10763_v7 = vmul.f32 %v18508_v59, %v18508_v59  ;;  %v18557_v18 = vld [vmem:[%s19270_s28 + $0x2] ss:$0 sm:$0xff] }
0x1734   : > { %v10744_v37 = vpop.xlane.xlu1 %10743  ;;  %10779 = vadd.xlane.f32.xlu1 %v10778_v10 }
0x1735   : > { %v18519_v51 = vsub.f32 %v18425_v30, %v10749_v38  ;;  %v10752_v15 = vmul.f32 0.03125, %v10744_v37  ;;  %v10775_v26 = vsel %vm1578_vm1, %v10763_v7, 0.0  ;;  %v10766_v1 = vmul.f32 %v18513_v21, %v18513_v21 }
0x1736   : > { %10776 = vadd.xlane.f32.xlu0 %v10775_v26  ;;  %v10741_v8 = vpop.xlane.xlu0 %10740 }
0x1737   : > { %v18525_v22 = vsub.f32 %v18430_v28, %v10752_v15  ;;  %v10751_v61 = vmul.f32 0.03125, %v10741_v8  ;;  %v10784_v39 = vsel %vm1578_vm1, %v10766_v1, 0.0  ;;  %v10765_v56 = vmul.f32 %v18519_v51, %v18519_v51 }
0x1738   : > { %10785 = vadd.xlane.f32.xlu1 %v10784_v39  ;;  %v10471_v30 = vpop.xlane.xlu1 %10470 }
0x1739   : > { %v18531_v12 = vsub.f32 %v18435_v48, %v10751_v61  ;;  %v10479_v43 = vmul.f32 0.03125, %v10471_v30  ;;  %v10781_v31 = vsel %vm1578_vm1, %v10765_v56, 0.0  ;;  %v10768_v33 = vmul.f32 %v18525_v22, %v18525_v22 }
0x173a   : > { %10782 = vadd.xlane.f32.xlu0 %v10781_v31  ;;  %v10468_v28 = vpop.xlane.xlu0 %10467 }
0x173b   : > { %v18537_v44 = vsub.f32 %v18440_v45, %v10479_v43  ;;  %v10478_v63 = vmul.f32 0.03125, %v10468_v28  ;;  %v10790_v17 = vsel %vm1578_vm1, %v10768_v33, 0.0  ;;  %v10767_v54 = vmul.f32 %v18531_v12, %v18531_v12 }
0x173c   : > { %10791 = vadd.xlane.f32.xlu1 %v10790_v17  ;;  %v10501_v48 = vpop.xlane.xlu1 %10500 }
0x173d   : > { %v18543_v19 = vsub.f32 %v18447_v35, %v10478_v63  ;;  %v10521_v4 = vmul.f32 0.03125, %v10501_v48  ;;  %v10787_v9 = vsel %vm1578_vm1, %v10767_v54, 0.0  ;;  %v10495_v2 = vmul.f32 %v18537_v44, %v18537_v44 }
0x173e   : > { %10788 = vadd.xlane.f32.xlu0 %v10787_v9  ;;  %v10498_v45 = vpop.xlane.xlu0 %10497 }
0x173f   : > { %v10529_v53 = vadd.f32 1e-05, %v10521_v4  ;;  %v10520_v42 = vmul.f32 0.03125, %v10498_v45  ;;  %v10517_v14 = vsel %vm1578_vm1, %v10495_v2, 0.0  ;;  %v10494_v62 = vmul.f32 %v18543_v19, %v18543_v19 }
0x1740   : > { %10518 = vadd.xlane.f32.xlu1 %v10517_v14  ;;  %v10507_v23 = vpop.xlane.xlu1 %10506 }
0x1741   : > { %16154 = vrsqrt.f32 %v10529_v53  ;;  %v10528_v35 = vadd.f32 1e-05, %v10520_v42  ;;  %v10523_v47 = vmul.f32 0.03125, %v10507_v23  ;;  %v10514_v24 = vsel %vm1578_vm1, %v10494_v62, 0.0 }
0x1742   : > { %10515 = vadd.xlane.f32.xlu0 %v10514_v24  ;;  %v10504_v5 = vpop.xlane.xlu0 %10503 }
0x1743   : > { %16156 = vrsqrt.f32 %v10528_v35  ;;  %v10531_v60 = vadd.f32 1e-05, %v10523_v47  ;;  %v10522_v20 = vmul.f32 0.03125, %v10504_v5 }
0x1744   : > { %v10513_v29 = vpop.xlane.xlu1 %10512 }
0x1745   : > { %16158 = vrsqrt.f32 %v10531_v60  ;;  %v10530_v52 = vadd.f32 1e-05, %v10522_v20  ;;  %v10525_v57 = vmul.f32 0.03125, %v10513_v29 }
0x1746   : > { %v10510_v16 = vpop.xlane.xlu0 %10509 }
0x1747   : > { %16160 = vrsqrt.f32 %v10530_v52  ;;  %v10533_v36 = vadd.f32 1e-05, %v10525_v57  ;;  %v10524_v0 = vmul.f32 0.03125, %v10510_v16 }
0x1749   : > { %16162 = vrsqrt.f32 %v10533_v36  ;;  %v10532_v55 = vadd.f32 1e-05, %v10524_v0 }
0x174b   : > { %16164 = vrsqrt.f32 %v10532_v55 }
0x174e   : > { %v16155_v25 = vpop.eup %16154 }
0x174f   : > { %v10545_v40 = vmul.f32 %v16155_v25, %v18444_v3 }
0x1750   : > { %v16157_v6 = vpop.eup %16156 }
0x1751   : > { %v10561_v38 = vmul.f32 %v18553_v50, %v10545_v40  ;;  %v10544_v10 = vmul.f32 %v16157_v6, %v18452_v11 }
0x1752   : > { %v16159_v7 = vpop.eup %16158 }
0x1753   : > { %v10547_v37 = vmul.f32 %v16159_v7, %v18459_v32  ;;  %v10560_v15 = vmul.f32 %v18553_v50, %v10544_v10  ;;  %v10577_v1 = vadd.f32 %v18557_v18, %v10561_v38 }
0x1754   : > { %v16161_v26 = vpop.eup %16160 }
0x1755   : > { %v10576_v8 = vadd.f32 %v18557_v18, %v10560_v15  ;;  %v10546_v61 = vmul.f32 %v16161_v26, %v18465_v13  ;;  %v10563_v3 = vmul.f32 %v18553_v50, %v10547_v37  ;;  %v10585_v31 = vmax.f32 %v10577_v1, 0.0 }
0x1756   : > { %v16163_v39 = vpop.eup %16162 }
0x1757   : > { %v10549_v56 = vmul.f32 %v16163_v39, %v18471_v49  ;;  %v10584_v30 = vmax.f32 %v10576_v8, 0.0  ;;  %v10562_v11 = vmul.f32 %v18553_v50, %v10546_v61  ;;  %v10579_v32 = vadd.f32 %v18557_v18, %v10563_v3 }
0x1758   : > { %v16165_v43 = vpop.eup %16164 }
0x1759   : > { %15605 = vmatprep.mubr.msk.f32.mxu0 %vm1578_vm1, %v10584_v30  ;;  %v10578_v33 = vadd.f32 %v18557_v18, %v10562_v11  ;;  %v10548_v28 = vmul.f32 %v16165_v43, %v18477_v34  ;;  %v10565_v13 = vmul.f32 %v18553_v50, %v10549_v56  ;;  %v10587_v17 = vmax.f32 %v10579_v32, 0.0 }
0x175a   : > { %15606 = vmatmul.mubr.msk.f32.vlgmr.msra.gmra.mxu0 %vm1578_vm1, %v10585_v31 }
0x175b   : > { %v10586_v63 = vmax.f32 %v10578_v33, 0.0  ;;  %v10564_v49 = vmul.f32 %v18553_v50, %v10548_v28  ;;  %v10581_v54 = vadd.f32 %v18557_v18, %v10565_v13 }
0x175d   : > { %15608 = vmatprep.mubr.msk.f32.mxu0 %vm1578_vm1, %v10586_v63  ;;  %v10580_v48 = vadd.f32 %v18557_v18, %v10564_v49  ;;  %v10589_v9 = vmax.f32 %v10581_v54, 0.0 }
0x175e   : > { %15609 = vmatmul.mubr.msk.f32.gmra.mxu0 %vm1578_vm1, %v10587_v17 }
0x175f   : > { %v10588_v4 = vmax.f32 %v10580_v48, 0.0 }
0x1761   : > { %15611 = vmatprep.mubr.msk.f32.mxu0 %vm1578_vm1, %v10588_v4 }
0x1762   : > { %15612 = vmatmul.mubr.msk.f32.gmra.mxu0 %vm1578_vm1, %v10589_v9 }
0x17b4   : > { %v10774_v34 = vpop.xlane.xlu1 %10773 }
0x17b5   : > { %v10794_v2 = vmul.f32 0.03125, %v10774_v34 }
0x17b6   : > { %v10771_v45 = vpop.xlane.xlu0 %10770 }
0x17b7   : > { %v10802_v53 = vadd.f32 1e-05, %v10794_v2  ;;  %v10793_v42 = vmul.f32 0.03125, %v10771_v45 }
0x17b9   : > { %16166 = vrsqrt.f32 %v10802_v53  ;;  %v10801_v14 = vadd.f32 1e-05, %v10793_v42 }
0x17bb   : > { %16168 = vrsqrt.f32 %v10801_v14 }
0x17bd   : > { %v10780_v62 = vpop.xlane.xlu1 %10779 }
0x17be   : > { %v10796_v23 = vmul.f32 0.03125, %v10780_v62 }
0x17bf   : > { %v10777_v35 = vpop.xlane.xlu0 %10776 }
0x17c0   : > { %v10804_v47 = vadd.f32 1e-05, %v10796_v23  ;;  %v10795_v24 = vmul.f32 0.03125, %v10777_v35 }
0x17c1   : > { %v10786_v5 = vpop.xlane.xlu1 %10785 }
0x17c2   : > { %16170 = vrsqrt.f32 %v10804_v47  ;;  %v10803_v60 = vadd.f32 1e-05, %v10795_v24  ;;  %v10798_v20 = vmul.f32 0.03125, %v10786_v5 }
0x17c3   : > { %v10783_v29 = vpop.xlane.xlu0 %10782 }
0x17c4   : > { %16172 = vrsqrt.f32 %v10803_v60  ;;  %v10806_v52 = vadd.f32 1e-05, %v10798_v20  ;;  %v10797_v57 = vmul.f32 0.03125, %v10783_v29 }
0x17c5   : > { %v10792_v16 = vpop.xlane.xlu1 %10791 }
0x17c6   : > { %v16167_v36 = vpop.eup %16166  ;;  %16174 = vrsqrt.f32 %v10806_v52  ;;  %v10805_v0 = vadd.f32 1e-05, %v10797_v57  ;;  %v10800_v55 = vmul.f32 0.03125, %v10792_v16 }
0x17c7   : > { %v10818_v25 = vmul.f32 %v16167_v36, %v18493_v46  ;;  %v10789_v40 = vpop.xlane.xlu0 %10788 }
0x17c8   : > { %v16169_v6 = vpop.eup %16168  ;;  %16176 = vrsqrt.f32 %v10805_v0  ;;  %v10808_v38 = vadd.f32 1e-05, %v10800_v55  ;;  %v10799_v10 = vmul.f32 0.03125, %v10789_v40 }
0x17c9   : > { %v10826_v7 = vmul.f32 %v18553_v50, %v10818_v25  ;;  %v10519_v37 = vpop.xlane.xlu1 %10518  ;;  %v10817_v15 = vmul.f32 %v16169_v6, %v18496_v27 }
0x17ca   : > { %16178 = vrsqrt.f32 %v10808_v38  ;;  %v10807_v26 = vadd.f32 1e-05, %v10799_v10  ;;  %v10527_v1 = vmul.f32 0.03125, %v10519_v37 }
0x17cb   : > { %v10516_v8 = vpop.xlane.xlu0 %10515  ;;  %v10825_v61 = vmul.f32 %v18553_v50, %v10817_v15  ;;  %v10834_v3 = vadd.f32 %v18557_v18, %v10826_v7 }
0x17cc   : > { %16180 = vrsqrt.f32 %v10807_v26  ;;  %v10535_v46 = vadd.f32 1e-05, %v10527_v1  ;;  %v10526_v39 = vmul.f32 0.03125, %v10516_v8 }
0x17cd   : > { %v10833_v56 = vadd.f32 %v18557_v18, %v10825_v61  ;;  %v10842_v31 = vmax.f32 %v10834_v3, 0.0 }
0x17ce   : > { %16182 = vrsqrt.f32 %v10535_v46  ;;  %v10534_v30 = vadd.f32 1e-05, %v10526_v39 }
0x17cf   : > { %v16171_v11 = vpop.eup %16170  ;;  %v10841_v43 = vmax.f32 %v10833_v56, 0.0 }
0x17d0   : > { %v10820_v27 = vmul.f32 %v16171_v11, %v18505_v58  ;;  %16184 = vrsqrt.f32 %v10534_v30 }
0x17d1   : > { %v16173_v32 = vpop.eup %16172  ;;  %15625 = vmatprep.mubr.msk.f32.mxu1 %vm1578_vm1, %v10841_v43 }
0x17d2   : > { %15626 = vmatmul.mubr.msk.f32.vlgmr.msra.gmra.mxu1 %vm1578_vm1, %v10842_v31  ;;  %v10819_v33 = vmul.f32 %v16173_v32, %v18508_v59  ;;  %v10828_v28 = vmul.f32 %v18553_v50, %v10820_v27 }
0x17d3   : > { %v16175_v13 = vpop.eup %16174 }
0x17d4   : > { %v10822_v63 = vmul.f32 %v16175_v13, %v18513_v21  ;;  %v10827_v49 = vmul.f32 %v18553_v50, %v10819_v33  ;;  %v10836_v54 = vadd.f32 %v18557_v18, %v10828_v28 }
0x17d5   : > { %v16177_v17 = vpop.eup %16176 }
0x17d6   : > { %v10835_v58 = vadd.f32 %v18557_v18, %v10827_v49  ;;  %v10821_v48 = vmul.f32 %v16177_v17, %v18519_v51  ;;  %v10830_v4 = vmul.f32 %v18553_v50, %v10822_v63  ;;  %v10844_v53 = vmax.f32 %v10836_v54, 0.0 }
0x17d7   : > { %v16179_v9 = vpop.eup %16178 }
0x17d8   : > { %v10824_v34 = vmul.f32 %v16179_v9, %v18525_v22  ;;  %v10843_v59 = vmax.f32 %v10835_v58, 0.0  ;;  %v10829_v2 = vmul.f32 %v18553_v50, %v10821_v48  ;;  %v10838_v21 = vadd.f32 %v18557_v18, %v10830_v4 }
0x17d9   : > { %v16181_v45 = vpop.eup %16180 }
0x17da   : > { %15628 = vmatprep.mubr.msk.f32.mxu1 %vm1578_vm1, %v10843_v59  ;;  %v10837_v42 = vadd.f32 %v18557_v18, %v10829_v2  ;;  %v10823_v14 = vmul.f32 %v16181_v45, %v18531_v12  ;;  %v10832_v51 = vmul.f32 %v18553_v50, %v10824_v34  ;;  %v10846_v24 = vmax.f32 %v10838_v21, 0.0 }
0x17db   : > { %v16183_v62 = vpop.eup %16182  ;;  %15629 = vmatmul.mubr.msk.f32.gmra.mxu1 %vm1578_vm1, %v10844_v53 }
0x17dc   : > { %v10551_v22 = vmul.f32 %v16183_v62, %v18537_v44  ;;  %v10845_v23 = vmax.f32 %v10837_v42, 0.0  ;;  %v10831_v35 = vmul.f32 %v18553_v50, %v10823_v14  ;;  %v10840_v5 = vadd.f32 %v18557_v18, %v10832_v51 }
0x17dd   : > { %v16185_v47 = vpop.eup %16184 }
0x17de   : > { %15631 = vmatprep.mubr.msk.f32.mxu1 %vm1578_vm1, %v10845_v23  ;;  %v10839_v60 = vadd.f32 %v18557_v18, %v10831_v35  ;;  %v10550_v12 = vmul.f32 %v16185_v47, %v18543_v19  ;;  %v10567_v20 = vmul.f32 %v18553_v50, %v10551_v22  ;;  %v10848_v52 = vmax.f32 %v10840_v5, 0.0 }
0x17df   : > { %15632 = vmatmul.mubr.msk.f32.gmra.mxu1 %vm1578_vm1, %v10846_v24 }
0x17e0   : > { %v10847_v29 = vmax.f32 %v10839_v60, 0.0  ;;  %v10566_v44 = vmul.f32 %v18553_v50, %v10550_v12  ;;  %v10583_v57 = vadd.f32 %v18557_v18, %v10567_v20  ;;  %v18627_v50 = vld [vmem:[%s19272_s7] ss:$0 sm:$0xff] }
0x17e2   : > { %15634 = vmatprep.mubr.msk.f32.mxu1 %vm1578_vm1, %v10847_v29  ;;  %v10582_v16 = vadd.f32 %v18557_v18, %v10566_v44  ;;  %v10591_v19 = vmax.f32 %v10583_v57, 0.0 }
0x17e3   : > { %15635 = vmatmul.mubr.msk.f32.gmra.mxu1 %vm1578_vm1, %v10848_v52 }
0x17e4   : > { %v10590_v36 = vmax.f32 %v10582_v16, 0.0  ;;  %15656 = vmatprep.mubr.msk.f32.mxu1 %vm16297_vm2, %v16296_v41 }
0x17e6   : > { %15614 = vmatprep.mubr.msk.f32.mxu0 %vm1578_vm1, %v10590_v36 }
0x17e7   : > { %15615 = vmatmul.mubr.msk.f32.gmra.mxu0 %vm1578_vm1, %v10591_v19 }
0x17e8   : > { %15645 = vmatprep.mubr.msk.f32.mxu0 %vm16297_vm2, %v16296_v41 }
0x181a   : > { %v15607_v0 = vpop.f32.mrf.mxu0 }
0x181b   : > { %v10956_v55 = vadd.f32 %v15607_v0, %v18627_v50 }
0x181c   : > { %v10950_v18 = vpop.f32.mrf.mxu0 }
0x181d   : > { %v10951_v25 = vadd.f32 %v18627_v50, %v10950_v18  ;;  %v10992_v40 = vsel %vm1578_vm1, %v10956_v55, 0.0 }
0x181e   : > { %10993 = vadd.xlane.f32.xlu1 %v10992_v40  ;;  %v15610_v6 = vpop.f32.mrf.mxu0 }
0x181f   : > { %v10966_v38 = vadd.f32 %v15610_v6, %v18627_v50  ;;  %v10989_v10 = vsel %vm1578_vm1, %v10951_v25, 0.0 }
0x1820   : > { %10990 = vadd.xlane.f32.xlu0 %v10989_v10  ;;  %v10960_v7 = vpop.f32.mrf.mxu0 }
0x1821   : > { %v10961_v37 = vadd.f32 %v18627_v50, %v10960_v7  ;;  %v10998_v15 = vsel %vm1578_vm1, %v10966_v38, 0.0 }
0x1822   : > { %10999 = vadd.xlane.f32.xlu1 %v10998_v15  ;;  %v15613_v26 = vpop.f32.mrf.mxu0 }
0x1823   : > { %v18637_v1 = vadd.f32 %v15613_v26, %v18627_v50  ;;  %v10995_v8 = vsel %vm1578_vm1, %v10961_v37, 0.0 }
0x1824   : > { %10996 = vadd.xlane.f32.xlu0 %v10995_v8  ;;  %v10970_v61 = vpop.f32.mrf.mxu0 }
0x1825   : > { %v18641_v3 = vadd.f32 %v18627_v50, %v10970_v61  ;;  %v11004_v46 = vsel %vm1578_vm1, %v18637_v1, 0.0 }
0x1826   : > { %11005 = vadd.xlane.f32.xlu1 %v11004_v46 }
0x1827   : > { %v11001_v39 = vsel %vm1578_vm1, %v18641_v3, 0.0 }
0x1828   : > { %11002 = vadd.xlane.f32.xlu0 %v11001_v39 }
0x1892   : > { %v15627_v56 = vpop.f32.mrf.mxu1 }
0x1893   : > { %v18674_v22 = vadd.f32 %v15627_v56, %v18627_v50 }
0x1894   : > { %v11223_v30 = vpop.f32.mrf.mxu1 }
0x1895   : > { %v18680_v47 = vadd.f32 %v18627_v50, %v11223_v30  ;;  %v11265_v12 = vsel %vm1578_vm1, %v18674_v22, 0.0 }
0x1897   : > { %v11262_v44 = vsel %vm1578_vm1, %v18680_v47, 0.0 }
0x189b   : > { %v15630_v31 = vpop.f32.mrf.mxu1 }
0x189c   : > { %v18684_v60 = vadd.f32 %v15630_v31, %v18627_v50 }
0x189d   : > { %v11233_v34 = vpop.f32.mrf.mxu1 }
0x189e   : > { %v18689_v29 = vadd.f32 %v18627_v50, %v11233_v34  ;;  %v11271_v19 = vsel %vm1578_vm1, %v18684_v60, 0.0 }
0x189f   : > { %v15633_v62 = vpop.f32.mrf.mxu1 }
0x18a0   : > { %v18694_v16 = vadd.f32 %v15633_v62, %v18627_v50  ;;  %v11268_v18 = vsel %vm1578_vm1, %v18689_v29, 0.0  ;;  %v11392_v62 = vld [vmem:[%s18745_s3 + $0x10] sm:$0xff] }
0x18a1   : > { %v11243_v5 = vpop.f32.mrf.mxu1 }
0x18a2   : > { %v18699_v0 = vadd.f32 %v18627_v50, %v11243_v5 }
0x18a3   : > { %v15636_v52 = vpop.f32.mrf.mxu1 }
0x18a4   : > { %v18704_v40 = vadd.f32 %v15636_v52, %v18627_v50 }
0x18a6   : > { %v11283_v15 = vsel %vm1578_vm1, %v18704_v40, 0.0 }
0x18a7   : > { %v10994_v11 = vpop.xlane.xlu1 %10993  ;;  %v15616_v43 = vpop.f32.mrf.mxu0 }
0x18a8   : > { %v11014_v27 = vmul.f32 0.03125, %v10994_v11  ;;  %v18648_v32 = vadd.f32 %v15616_v43, %v18627_v50 }
0x18a9   : > { %v10980_v33 = vpop.f32.mrf.mxu0  ;;  %v10991_v28 = vpop.xlane.xlu0 %10990 }
0x18aa   : > { %v18650_v13 = vsub.f32 %v10956_v55, %v11014_v27  ;;  %v18653_v63 = vadd.f32 %v18627_v50, %v10980_v33  ;;  %v11013_v49 = vmul.f32 0.03125, %v10991_v28  ;;  %v11010_v17 = vsel %vm1578_vm1, %v18648_v32, 0.0 }
0x18ab   : > { %v11000_v54 = vpop.xlane.xlu1 %10999  ;;  %11011 = vadd.xlane.f32.xlu1 %v11010_v17  ;;  %v11446_v17 = vld [vmem:[%s1412_s2] sm:$0xff] }
0x18ac   : > { %v18657_v58 = vsub.f32 %v10951_v25, %v11013_v49  ;;  %v11016_v48 = vmul.f32 0.03125, %v11000_v54  ;;  %v11007_v4 = vsel %vm1578_vm1, %v18653_v63, 0.0  ;;  %v11030_v9 = vmul.f32 %v18650_v13, %v18650_v13  ;;  %v11253_v25 = vpop.f32.mrf.mxu1  ;;  %v11448_v49 = vld [vmem:[%s1412_s2 + $0x10] sm:$0xff] }
0x18ad   : > { %11008 = vadd.xlane.f32.xlu0 %v11007_v4  ;;  %v10997_v59 = vpop.xlane.xlu0 %10996  ;;  %v18712_v10 = vadd.f32 %v18627_v50, %v11253_v25  ;;  %v11450_v4 = vld [vmem:[%s1412_s2 + $0x20] sm:$0xff] }
0x18ae   : > { %v18663_v2 = vsub.f32 %v10966_v38, %v11016_v48  ;;  %v11015_v45 = vmul.f32 0.03125, %v10997_v59  ;;  %v11040_v53 = vsel %vm1578_vm1, %v11030_v9, 0.0  ;;  %v11029_v21 = vmul.f32 %v18657_v58, %v18657_v58  ;;  %v11391_v48 = vld [vmem:[%s18745_s3 + $0x8] sm:$0xff]  ;;  %v11452_v59 = vld [vmem:[%s1412_s2 + $0x30] sm:$0xff] }
0x18af   : > { %11041 = vadd.xlane.f32.xlu1 %v11040_v53  ;;  %v11006_v20 = vpop.xlane.xlu1 %11005  ;;  %v11277_v38 = vsel %vm1578_vm1, %v18694_v16, 0.0  ;;  %v11451_v9 = vld [vmem:[%s1412_s2 + $0x28] sm:$0xff]  ;;  %v11453_v53 = vld [vmem:[%s1412_s2 + $0x38] sm:$0xff] }
0x18b0   : > { %v18668_v42 = vsub.f32 %v10961_v37, %v11015_v45  ;;  %v11037_v14 = vsel %vm1578_vm1, %v11029_v21, 0.0  ;;  %v11032_v51 = vmul.f32 %v18663_v2, %v18663_v2  ;;  %v11018_v36 = vmul.f32 0.03125, %v11006_v20  ;;  %v11390_v21 = vld [vmem:[%s18745_s3] sm:$0xff] }
0x18b1   : > { %11038 = vadd.xlane.f32.xlu0 %v11037_v14  ;;  %v11003_v57 = vpop.xlane.xlu0 %11002  ;;  %v11274_v37 = vsel %vm1578_vm1, %v18699_v0, 0.0 }
0x18b2   : > { %v11046_v23 = vsel %vm1578_vm1, %v11032_v51, 0.0  ;;  %v11031_v35 = vmul.f32 %v18668_v42, %v18668_v42  ;;  %v11017_v55 = vmul.f32 0.03125, %v11003_v57  ;;  %v18707_v6 = vsub.f32 %v18637_v1, %v11018_v36 }
0x18b3   : > { %11047 = vadd.xlane.f32.xlu1 %v11046_v23  ;;  %v11280_v1 = vsel %vm1578_vm1, %v18712_v10, 0.0 }
0x18b4   : > { %v11043_v24 = vsel %vm1578_vm1, %v11031_v35, 0.0  ;;  %v18715_v7 = vsub.f32 %v18641_v3, %v11017_v55  ;;  %v11034_v26 = vmul.f32 %v18707_v6, %v18707_v6  ;;  %v16298_v3 = vmov 0  }
0x18b5   : > { %11044 = vadd.xlane.f32.xlu0 %v11043_v24  ;;  %15897 = vset.pattern.permute.xlu1 %v16298_v3 }
0x18b6   : > { %v11033_v50 = vmul.f32 %v18715_v7, %v18715_v7  ;;  %v11052_v8 = vsel %vm1578_vm1, %v11034_v26, 0.0  ;;  %15896 = vset.pattern.permute.xlu0 %v16298_v3 }
0x18b7   : > { %11266 = vadd.xlane.f32.xlu1 %v11265_v12 }
0x18b8   : > { %v11049_v61 = vsel %vm1578_vm1, %v11033_v50, 0.0 }
0x18b9   : > { %11263 = vadd.xlane.f32.xlu0 %v11262_v44 }
0x18bb   : > { %11272 = vadd.xlane.f32.xlu1 %v11271_v19 }
0x18bd   : > { %11269 = vadd.xlane.f32.xlu0 %v11268_v18 }
0x18bf   : > { %11278 = vadd.xlane.f32.xlu1 %v11277_v38 }
0x18c1   : > { %11275 = vadd.xlane.f32.xlu0 %v11274_v37 }
0x18c3   : > { %11284 = vadd.xlane.f32.xlu1 %v11283_v15 }
0x18c5   : > { %11281 = vadd.xlane.f32.xlu0 %v11280_v1 }
0x18c7   : > { %11053 = vadd.xlane.f32.xlu1 %v11052_v8 }
0x18c9   : > { %11050 = vadd.xlane.f32.xlu0 %v11049_v61 }
0x1934   : > { %v11012_v46 = vpop.xlane.xlu1 %11011 }
0x1935   : > { %v11020_v39 = vmul.f32 0.03125, %v11012_v46 }
0x1936   : > { %v11009_v56 = vpop.xlane.xlu0 %11008 }
0x1937   : > { %v18730_v30 = vsub.f32 %v18648_v32, %v11020_v39  ;;  %v11019_v11 = vmul.f32 0.03125, %v11009_v56  ;;  %v11447_v32 = vld [vmem:[%s1412_s2 + $0x8] sm:$0xff] }
0x1938   : > { %v11042_v5 = vpop.xlane.xlu1 %11041 }
0x1939   : > { %v18733_v43 = vsub.f32 %v18653_v63, %v11019_v11  ;;  %v11036_v31 = vmul.f32 %v18730_v30, %v18730_v30  ;;  %v11449_v63 = vld [vmem:[%s1412_s2 + $0x18] sm:$0xff]  ;;  %s19277_s2 = sld [smem:[#allocation7_spill]] }
0x193a   : > { %v18747_v54 = vpop.xlane.xlu0 %11038 }
0x193b   : > { %v11058_v27 = vsel %vm1578_vm1, %v11036_v31, 0.0  ;;  %v11035_v33 = vmul.f32 %v18733_v43, %v18733_v43 }
0x193c   : > { %11059 = vadd.xlane.f32.xlu1 %v11058_v27  ;;  %v18762_v57 = vpop.xlane.xlu1 %11047 }
0x193d   : > { %v11055_v28 = vsel %vm1578_vm1, %v11035_v33, 0.0 }
0x193e   : > { %11056 = vadd.xlane.f32.xlu0 %v11055_v28  ;;  %v18750_v34 = vpop.xlane.xlu0 %11044 }
0x193f   : > { %s1416_s10 = scalar_lea.vmem %s19277_s2, %s19226_s1  ;;  %s19279_s2 = sld [smem:[#allocation29_spill]] }
0x1940   : > { %v11267_v38 = vpop.xlane.xlu1 %11266  ;;  %s19281_s1 = sld [smem:[#allocation16_spill]] }
0x1941   : > { %v11287_v1 = vmul.f32 0.03125, %v11267_v38 }
0x1942   : > { %v11264_v45 = vpop.xlane.xlu0 %11263 }
0x1943   : > { %v11286_v51 = vmul.f32 0.03125, %v11264_v45  ;;  %v18781_v50 = vsub.f32 %v18674_v22, %v11287_v1  ;;  %v14245_v1 = vld [vmem:[%s19275_s0 + $0x28] sm:$0xff] }
0x1944   : > { %v11273_v15 = vpop.xlane.xlu1 %11272 }
0x1945   : > { %v18755_v35 = vsub.f32 %v18680_v47, %v11286_v51  ;;  %v11289_v8 = vmul.f32 0.03125, %v11273_v15  ;;  %v11303_v46 = vmul.f32 %v18781_v50, %v18781_v50  ;;  %v11063_v51 = vmul.f32 0.03125, %v18750_v34 }
0x1946   : > { %v11270_v14 = vpop.xlane.xlu0 %11269 }
0x1947   : > { %v11288_v24 = vmul.f32 0.03125, %v11270_v14  ;;  %v11302_v44 = vmul.f32 %v18755_v35, %v18755_v35  ;;  %v18784_v61 = vsub.f32 %v18684_v60, %v11289_v8  ;;  %v11313_v31 = vsel %vm1578_vm1, %v11303_v46, 0.0  ;;  %v14244_v46 = vld [vmem:[%s19275_s0 + $0x20] sm:$0xff] }
0x1948   : > { %v11071_v34 = vadd.f32 1e-05, %v11063_v51 }
0x1949   : > { %v18758_v12 = vsub.f32 %v18689_v29, %v11288_v24  ;;  %v11310_v55 = vsel %vm1578_vm1, %v11302_v44, 0.0  ;;  %v11305_v22 = vmul.f32 %v18784_v61, %v18784_v61  ;;  %v11636_v44 = vld [vmem:[%s19275_s0] sm:$0xff] }
0x194a   : > { %v11276_v23 = vpop.xlane.xlu0 %11275 }
0x194b   : > { %v11290_v20 = vmul.f32 0.03125, %v11276_v23  ;;  %v11304_v47 = vmul.f32 %v18758_v12, %v18758_v12  ;;  %v11319_v27 = vsel %vm1578_vm1, %v11305_v22, 0.0 }
0x194d   : > { %11461 = vperm.xlu1 %15897, %v11447_v32   ;;  %v18765_v36 = vsub.f32 %v18699_v0, %v11290_v20  ;;  %v11316_v18 = vsel %vm1578_vm1, %v11304_v47, 0.0  ;;  %v18824_v20 = vld [vmem:[%s19272_s7 + $0x1] ss:$0 sm:$0xff] }
0x194e   : > { %v11282_v52 = vpop.xlane.xlu0 %11281 }
0x194f   : > { %v11292_v19 = vmul.f32 0.03125, %v11282_v52  ;;  %v11306_v25 = vmul.f32 %v18765_v36, %v18765_v36 }
0x1951   : > { %11466 = vperm.xlu1 %15897, %v11448_v49   ;;  %v18771_v29 = vsub.f32 %v18712_v10, %v11292_v19  ;;  %v11322_v0 = vsel %vm1578_vm1, %v11306_v25, 0.0  ;;  %v11279_v10 = vpop.xlane.xlu1 %11278  ;;  %v11395_v49 = vld [vmem:[%s18745_s3 + $0x28] sm:$0xff] }
0x1952   : > { %v11291_v3 = vmul.f32 0.03125, %v11279_v10 }
0x1953   : > { %v11308_v37 = vmul.f32 %v18771_v29, %v18771_v29 }
0x1954   : > { %11456 = vperm.xlu0 %15896, %v11446_v17   ;;  %v18789_v56 = vsub.f32 %v18694_v16, %v11291_v3  ;;  %v11393_v16 = vld [vmem:[%s18745_s3 + $0x18] sm:$0xff] }
0x1955   : > { %11471 = vperm.xlu1 %15897, %v11449_v63   ;;  %v11328_v26 = vsel %vm1578_vm1, %v11308_v37, 0.0  ;;  %v11285_v39 = vpop.xlane.xlu1 %11284  ;;  %v11397_v17 = vld [vmem:[%s18745_s3 + $0x38] sm:$0xff]  ;;  %v11394_v63 = vld [vmem:[%s18745_s3 + $0x20] sm:$0xff]  ;;  %v14246_v37 = vld [vmem:[%s19275_s0 + $0x30] sm:$0xff] }
0x1956   : > { %v11293_v11 = vmul.f32 0.03125, %v11285_v39  ;;  %v11307_v33 = vmul.f32 %v18789_v56, %v18789_v56 }
0x1958   : > { %11405 = vperm.xlu0 %15896, %v11391_v48   ;;  %v18795_v60 = vsub.f32 %v18704_v40, %v11293_v11  ;;  %v11325_v28 = vsel %vm1578_vm1, %v11307_v33, 0.0  ;;  %v11062_v48 = vmul.f32 0.03125, %v11042_v5  ;;  %v18821_v5 = vpop.xlane.xlu0 %11050 }
0x1959   : > { %11476 = vperm.xlu1 %15897, %v11450_v4   ;;  %v11396_v4 = vld [vmem:[%s18745_s3 + $0x30] sm:$0xff]  ;;  %v18810_v45 = vpop.xlane.xlu1 %11053  ;;  %s19276_s3 = sld [smem:[#allocation27_spill]] }
0x195a   : > { %v11309_v32 = vmul.f32 %v18795_v60, %v18795_v60 }
0x195c   : > { %v11331_v40 = vsel %vm1578_vm1, %v11309_v32, 0.0 }
0x195d   : > { %11481 = vperm.xlu1 %15897, %v11451_v9   ;;  %v11070_v9 = vadd.f32 1e-05, %v11062_v48 }
0x195f   : > { %16186 = vrsqrt.f32 %v11070_v9 }
0x1961   : > { %11486 = vperm.xlu1 %15897, %v11452_v59   ;;  %v11061_v59 = vmul.f32 0.03125, %v18747_v54  ;;  %v11637_v54 = vld [vmem:[%s19275_s0 + $0x8] sm:$0xff] }
0x1963   : > { %v11069_v14 = vadd.f32 1e-05, %v11061_v59 }
0x1965   : > { %11491 = vperm.xlu1 %15897, %v11453_v53   ;;  %v11639_v53 = vld [vmem:[%s19275_s0 + $0x18] sm:$0xff]  ;;  %16188 = vrsqrt.f32 %v11069_v14 }
0x1966   : > { %15638 = vmatpush3.msra.mxu0 %v11639_v53  ;;  %16190 = vrsqrt.f32 %v11071_v34 }
0x1967   : > { %15639 = vmatprep.subr.mxu0 %v16296_v41 }
0x1969   : > { %11400 = vperm.xlu1 %15897, %v11390_v21  }
0x196c   : > { %v16187_v21 = vpop.eup %16186 }
0x196d   : > { %11410 = vperm.xlu1 %15897, %v11392_v62   ;;  %v11638_v62 = vld [vmem:[%s19275_s0 + $0x10] sm:$0xff]  ;;  %v11086_v24 = vmul.f32 %v16187_v21, %v18650_v13 }
0x196e   : > { %15640 = vmatpush3.msra.mxu0 %v11638_v62 }
0x196f   : > { %15641 = vmatprep.subr.mxu0 %v16296_v41  ;;  %v11102_v13 = vmul.f32 %v18824_v20, %v11086_v24 }
0x1970   : > { %15642 = vmatpush3.msra.mxu0 %v11637_v54 }
0x1971   : > { %15643 = vmatprep.subr.mxu0 %v16296_v41 }
0x1972   : > { %15644 = vmatpush3.msra.mxu0 %v11636_v44  ;;  %v16189_v8 = vpop.eup %16188 }
0x1973   : > { %15659 = vmatprep.subr.mxu0 %v16296_v41  ;;  %v16191_v22 = vpop.eup %16190 }
0x1974   : > { %v11087_v32 = vmul.f32 %v16191_v22, %v18668_v42 }
0x1977   : > { %11311 = vadd.xlane.f32.xlu0 %v11310_v55  ;;  %v18835_v55 = vld [vmem:[%s19272_s7 + $0x2] ss:$0 sm:$0xff] }
0x197b   : > { %11317 = vadd.xlane.f32.xlu0 %v11316_v18  ;;  %v11118_v18 = vadd.f32 %v18835_v55, %v11102_v13 }
0x197d   : > { %v11126_v15 = vmax.f32 %v11118_v18, 0.0  ;;  %v11064_v18 = vmul.f32 0.03125, %v18762_v57 }
0x197f   : > { %11323 = vadd.xlane.f32.xlu0 %v11322_v0  ;;  %v14247_v0 = vld [vmem:[%s19275_s0 + $0x38] sm:$0xff] }
0x1980   : > { %15649 = vmatpush3.msra.mxu1 %v14247_v0 }
0x1981   : > { %15650 = vmatprep.subr.mxu1 %v16296_v41 }
0x1982   : > { %15651 = vmatpush3.msra.mxu1 %v14246_v37 }
0x1983   : > { %11329 = vadd.xlane.f32.xlu0 %v11328_v26  ;;  %15652 = vmatprep.subr.mxu1 %v16296_v41 }
0x1984   : > { %15653 = vmatpush3.msra.mxu1 %v14245_v1  ;;  %v11072_v1 = vadd.f32 1e-05, %v11064_v18 }
0x1985   : > { %15654 = vmatprep.subr.mxu1 %v16296_v41 }
0x1986   : > { %15655 = vmatpush3.msra.mxu1 %v14244_v46  ;;  %16192 = vrsqrt.f32 %v11072_v1 }
0x1987   : > { %15670 = vmatprep.subr.mxu1 %v16296_v41 }
0x1991   : > { %11314 = vadd.xlane.f32.xlu1 %v11313_v31  ;;  %v11085_v31 = vmul.f32 %v16189_v8, %v18657_v58  ;;  %v11103_v58 = vmul.f32 %v18824_v20, %v11087_v32 }
0x1993   : > { %v11119_v59 = vadd.f32 %v18835_v55, %v11103_v58 }
0x1995   : > { %11320 = vadd.xlane.f32.xlu1 %v11319_v27  ;;  %v11127_v14 = vmax.f32 %v11119_v59, 0.0 }
0x1999   : > { %11326 = vadd.xlane.f32.xlu1 %v11325_v28  ;;  %11415 = vperm.xlu0 %15896, %v11393_v16   ;;  %v11101_v28 = vmul.f32 %v18824_v20, %v11085_v31 }
0x199d   : > { %11332 = vadd.xlane.f32.xlu1 %v11331_v40  ;;  %11425 = vperm.xlu0 %15896, %v11395_v49  }
0x19a1   : > { %11435 = vperm.xlu0 %15896, %v11397_v17  }
0x19ae   : > { %11420 = vperm.xlu1 %15897, %v11394_v63   ;;  %v11117_v63 = vadd.f32 %v18835_v55, %v11101_v28 }
0x19b0   : > { %v11125_v9 = vmax.f32 %v11117_v63, 0.0 }
0x19b2   : > { %11430 = vperm.xlu1 %15897, %v11396_v4  }
0x19c5   : > { %v18816_v23 = vpop.xlane.xlu1 %11059 }
0x19c6   : > { %v11068_v31 = vmul.f32 0.03125, %v18816_v23 }
0x19c7   : > { %v18832_v19 = vpop.xlane.xlu0 %11056 }
0x19c9   : > { %v18828_v52 = vpop.permute.xlu1 %11461 }
0x19cd   : > { %v18837_v47 = vpop.permute.xlu1 %11466 }
0x19cf   : > { %v18840_v25 = vpop.permute.xlu0 %11456 }
0x19d1   : > { %v18842_v38 = vpop.permute.xlu1 %11471 }
0x19d3   : > { %v11406_v26 = vpop.permute.xlu0 %11405 }
0x19d4   : > { %v11439_v10 = vmul.f32 %v11406_v26, %v11126_v15 }
0x19d5   : > { %v18848_v3 = vpop.permute.xlu1 %11476 }
0x19d6   : > { %v11511_v39 = vsel %vm1578_vm1, %v11439_v10, -inf  ;;  %v11066_v10 = vmul.f32 0.03125, %v18810_v45  ;;  %v11067_v45 = vmul.f32 0.03125, %v18832_v19 }
0x19d7   : > { %v11512_v11 = vrot.slane %v11511_v39, 4 }
0x19d8   : > { %v11074_v22 = vadd.f32 1e-05, %v11066_v10 }
0x19d9   : > { %v11513_v27 = vmax.f32 %v11511_v39, %v11512_v11  ;;  %v18855_v33 = vpop.permute.xlu1 %11481  ;;  %v11065_v39 = vmul.f32 0.03125, %v18821_v5 }
0x19da   : > { %16194 = vrsqrt.f32 %v11074_v22 }
0x19db   : > { %v11514_v16 = vrot.slane %v11513_v27, 2  ;;  %v11073_v57 = vadd.f32 1e-05, %v11065_v39 }
0x19dd   : > { %v11515_v49 = vmax.f32 %v11513_v27, %v11514_v16  ;;  %v18860_v40 = vpop.permute.xlu1 %11486  ;;  %v11076_v16 = vadd.f32 1e-05, %v11068_v31  ;;  %16196 = vrsqrt.f32 %v11073_v57 }
0x19df   : > { %v11516_v17 = vrot.slane %v11515_v49, 1  ;;  %16198 = vrsqrt.f32 %v11076_v16 }
0x19e1   : > { %v11517_v48 = vmax.f32 %v11515_v49, %v11516_v17  ;;  %v18864_v4 = vpop.permute.xlu1 %11491  ;;  %v16193_v49 = vpop.eup %16192  ;;  %v11075_v17 = vadd.f32 1e-05, %v11067_v45 }
0x19e3   : > { %11518 = vst.msk [vmem:[#allocation2 + $0x1] sm:$0x1] %vm11509_vm3, %v11517_v48  ;;  %v11088_v48 = vmul.f32 %v16193_v49, %v18663_v2 }
0x19e5   : > { %v11401_v53 = vpop.permute.xlu1 %11400  ;;  %v11104_v19 = vmul.f32 %v18824_v20, %v11088_v48 }
0x19e6   : > { %v11438_v21 = vmul.f32 %v11401_v53, %v11125_v9 }
0x19e7   : > { %v16195_v9 = vpop.eup %16194 }
0x19e8   : > { %v11502_v42 = vsel %vm1578_vm1, %v11438_v21, -inf }
0x19e9   : > { %v11503_v51 = vrot.slane %v11502_v42, 4  ;;  %v11411_v62 = vpop.permute.xlu1 %11410 }
0x19ea   : > { %v11440_v24 = vmul.f32 %v11411_v62, %v11127_v14  ;;  %v16197_v21 = vpop.eup %16196 }
0x19eb   : > { %v11504_v54 = vmax.f32 %v11502_v42, %v11503_v51  ;;  %v11090_v51 = vmul.f32 %v16195_v9, %v18707_v6 }
0x19ec   : > { %v11519_v34 = vsel %vm1578_vm1, %v11440_v24, -inf  ;;  %v16199_v42 = vpop.eup %16198 }
0x19ed   : > { %v11505_v44 = vrot.slane %v11504_v54, 2  ;;  %v11520_v13 = vrot.slane %v11519_v34, 4 }
0x19ef   : > { %v11506_v0 = vmax.f32 %v11504_v54, %v11505_v44  ;;  %v11521_v37 = vmax.f32 %v11519_v34, %v11520_v13  ;;  %v11092_v54 = vmul.f32 %v16199_v42, %v18730_v30  ;;  %v11089_v34 = vmul.f32 %v16197_v21, %v18715_v7 }
0x19f0   : > { %v11120_v44 = vadd.f32 %v18835_v55, %v11104_v19  ;;  %v11106_v13 = vmul.f32 %v18824_v20, %v11090_v51 }
0x19f1   : > { %v11507_v15 = vrot.slane %v11506_v0, 1  ;;  %v11522_v26 = vrot.slane %v11521_v37, 2 }
0x19f3   : > { %v11508_v8 = vmax.f32 %v11506_v0, %v11507_v15  ;;  %v11523_v46 = vmax.f32 %v11521_v37, %v11522_v26  ;;  %v11108_v0 = vmul.f32 %v18824_v20, %v11092_v54  ;;  %v11105_v37 = vmul.f32 %v18824_v20, %v11089_v34 }
0x19f4   : > { %v11128_v15 = vmax.f32 %v11120_v44, 0.0  ;;  %v11122_v26 = vadd.f32 %v18835_v55, %v11106_v13 }
0x19f5   : > { %11510 = vst.msk [vmem:[#allocation2] sm:$0x1] %vm11509_vm3, %v11508_v8  ;;  %v11524_v11 = vrot.slane %v11523_v46, 1  ;;  %v18891_v39 = vadd.f32 %v18835_v55, %v11105_v37 }
0x19f6   : > { %v11130_v22 = vmax.f32 %v11122_v26, 0.0 }
0x19f7   : > { %v11525_v27 = vmax.f32 %v11523_v46, %v11524_v11  ;;  %v11124_v46 = vadd.f32 %v18835_v55, %v11108_v0 }
0x19f9   : > { %11526 = vst.msk [vmem:[#allocation2 + $0x2] sm:$0x1] %vm11509_vm3, %v11525_v27 }
0x1a00   : > { %v11312_v28 = vpop.xlane.xlu0 %11311 }
0x1a01   : > { %v11334_v32 = vmul.f32 0.03125, %v11312_v28 }
0x1a03   : > { %v11342_v5 = vadd.f32 1e-05, %v11334_v32 }
0x1a04   : > { %v11318_v63 = vpop.xlane.xlu0 %11317 }
0x1a05   : > { %16200 = vrsqrt.f32 %v11342_v5  ;;  %v11336_v23 = vmul.f32 0.03125, %v11318_v63  ;;  %v11132_v63 = vmax.f32 %v11124_v46, 0.0 }
0x1a06   : > { %16202 = vrsqrt.f32 %v11075_v17 }
0x1a07   : > { %v11344_v58 = vadd.f32 1e-05, %v11336_v23  ;;  %v11129_v23 = vmax.f32 %v18891_v39, 0.0 }
0x1a08   : > { %v11324_v59 = vpop.xlane.xlu0 %11323 }
0x1a09   : > { %16204 = vrsqrt.f32 %v11344_v58  ;;  %v11338_v53 = vmul.f32 0.03125, %v11324_v59 }
0x1a0b   : > { %v11346_v14 = vadd.f32 1e-05, %v11338_v53 }
0x1a0c   : > { %v11330_v62 = vpop.xlane.xlu0 %11329 }
0x1a0d   : > { %16206 = vrsqrt.f32 %v11346_v14  ;;  %v11340_v24 = vmul.f32 0.03125, %v11330_v62 }
0x1a0f   : > { %v11348_v2 = vadd.f32 1e-05, %v11340_v24 }
0x1a11   : > { %16208 = vrsqrt.f32 %v11348_v2 }
0x1a12   : > { %v16201_v18 = vpop.eup %16200 }
0x1a13   : > { %v11358_v6 = vmul.f32 %v16201_v18, %v18755_v35  ;;  %v16203_v30 = vpop.eup %16202 }
0x1a14   : > { %v11416_v1 = vpop.permute.xlu0 %11415  ;;  %v11091_v16 = vmul.f32 %v16203_v30, %v18733_v43 }
0x1a15   : > { %v11366_v7 = vmul.f32 %v18824_v20, %v11358_v6  ;;  %v11441_v10 = vmul.f32 %v11416_v1, %v11128_v15 }
0x1a16   : > { %v16205_v8 = vpop.eup %16204  ;;  %v11107_v42 = vmul.f32 %v18824_v20, %v11091_v16 }
0x1a17   : > { %v11374_v11 = vadd.f32 %v18835_v55, %v11366_v7  ;;  %v11360_v31 = vmul.f32 %v16205_v8, %v18758_v12  ;;  %v11527_v35 = vsel %vm1578_vm1, %v11441_v10, -inf }
0x1a18   : > { %v11528_v27 = vrot.slane %v11527_v35, 4  ;;  %v11426_v57 = vpop.permute.xlu0 %11425 }
0x1a19   : > { %v11382_v45 = vmax.f32 %v11374_v11, 0.0  ;;  %v11368_v28 = vmul.f32 %v18824_v20, %v11360_v31  ;;  %v11443_v32 = vmul.f32 %v11426_v57, %v11130_v22 }
0x1a1a   : > { %v16207_v5 = vpop.eup %16206  ;;  %v11529_v49 = vmax.f32 %v11527_v35, %v11528_v27  ;;  %v11315_v17 = vpop.xlane.xlu1 %11314 }
0x1a1b   : > { %v11494_v58 = vmul.f32 %v18840_v25, %v11382_v45  ;;  %v11376_v12 = vadd.f32 %v18835_v55, %v11368_v28  ;;  %v11362_v48 = vmul.f32 %v16207_v5, %v18765_v36  ;;  %v11543_v9 = vsel %vm1578_vm1, %v11443_v32, -inf }
0x1a1c   : > { %v11530_v59 = vrot.slane %v11529_v49, 2  ;;  %v11544_v43 = vrot.slane %v11543_v9, 4  ;;  %v11335_v53 = vmul.f32 0.03125, %v11315_v17  ;;  %v11436_v21 = vpop.permute.xlu0 %11435 }
0x1a1d   : > { %v11567_v14 = vsel %vm1578_vm1, %v11494_v58, -inf  ;;  %v11384_v19 = vmax.f32 %v11376_v12, 0.0  ;;  %v11370_v51 = vmul.f32 %v18824_v20, %v11362_v48  ;;  %v11445_v62 = vmul.f32 %v11436_v21, %v11132_v63 }
0x1a1e   : > { %v16209_v24 = vpop.eup %16208  ;;  %v11568_v25 = vrot.slane %v11567_v14, 4  ;;  %v11531_v54 = vmax.f32 %v11529_v49, %v11530_v59  ;;  %v11545_v34 = vmax.f32 %v11543_v9, %v11544_v43  ;;  %v11343_v2 = vadd.f32 1e-05, %v11335_v53  ;;  %v11321_v36 = vpop.xlane.xlu1 %11320 }
0x1a1f   : > { %v11496_v44 = vmul.f32 %v18837_v47, %v11384_v19  ;;  %v11378_v13 = vadd.f32 %v18835_v55, %v11370_v51  ;;  %v11364_v18 = vmul.f32 %v16209_v24, %v18771_v29  ;;  %v11559_v0 = vsel %vm1578_vm1, %v11445_v62, -inf }
0x1a20   : > { %v11569_v37 = vmax.f32 %v11567_v14, %v11568_v25  ;;  %v11532_v6 = vrot.slane %v11531_v54, 1  ;;  %v11546_v15 = vrot.slane %v11545_v34, 2  ;;  %16210 = vrsqrt.f32 %v11343_v2 }
0x1a21   : > { %v11583_v26 = vsel %vm1578_vm1, %v11496_v44, -inf  ;;  %v11386_v1 = vmax.f32 %v11378_v13, 0.0  ;;  %v11372_v30 = vmul.f32 %v18824_v20, %v11364_v18  ;;  %v11560_v7 = vrot.slane %v11559_v0, 4 }
0x1a22   : > { %v11570_v10 = vrot.slane %v11569_v37, 2  ;;  %v11584_v8 = vrot.slane %v11583_v26, 4  ;;  %v11533_v46 = vmax.f32 %v11531_v54, %v11532_v6  ;;  %v11547_v47 = vmax.f32 %v11545_v34, %v11546_v15  ;;  %v11327_v11 = vpop.xlane.xlu1 %11326 }
0x1a23   : > { %v11498_v31 = vmul.f32 %v18848_v3, %v11386_v1  ;;  %v11380_v29 = vadd.f32 %v18835_v55, %v11372_v30  ;;  %v11561_v35 = vmax.f32 %v11559_v0, %v11560_v7  ;;  %v11337_v22 = vmul.f32 0.03125, %v11321_v36 }
0x1a24   : > { %v11571_v27 = vmax.f32 %v11569_v37, %v11570_v10  ;;  %v11585_v57 = vmax.f32 %v11583_v26, %v11584_v8  ;;  %11534 = vst.msk [vmem:[#allocation2 + $0x3] sm:$0x1] %vm11509_vm3, %v11533_v46  ;;  %v11548_v16 = vrot.slane %v11547_v47, 1  ;;  %v11339_v45 = vmul.f32 0.03125, %v11327_v11 }
0x1a25   : > { %v11599_v28 = vsel %vm1578_vm1, %v11498_v31, -inf  ;;  %v11388_v32 = vmax.f32 %v11380_v29, 0.0  ;;  %v11562_v5 = vrot.slane %v11561_v35, 2  ;;  %v11345_v49 = vadd.f32 1e-05, %v11337_v22 }
0x1a26   : > { %v11572_v17 = vrot.slane %v11571_v27, 1  ;;  %v11586_v63 = vrot.slane %v11585_v57, 2  ;;  %v11600_v58 = vrot.slane %v11599_v28, 4  ;;  %v11549_v12 = vmax.f32 %v11547_v47, %v11548_v16  ;;  %v11333_v3 = vpop.xlane.xlu1 %11332 }
0x1a27   : > { %v11500_v48 = vmul.f32 %v18860_v40, %v11388_v32  ;;  %v11563_v9 = vmax.f32 %v11561_v35, %v11562_v5  ;;  %16212 = vrsqrt.f32 %v11345_v49  ;;  %v11347_v59 = vadd.f32 1e-05, %v11339_v45 }
0x1a28   : > { %v11573_v43 = vmax.f32 %v11571_v27, %v11572_v17  ;;  %v11587_v53 = vmax.f32 %v11585_v57, %v11586_v63  ;;  %v11601_v21 = vmax.f32 %v11599_v28, %v11600_v58  ;;  %11550 = vst.msk [vmem:[#allocation2 + $0x5] sm:$0x1] %vm11509_vm3, %v11549_v12  ;;  %v11341_v14 = vmul.f32 0.03125, %v11333_v3 }
0x1a29   : > { %v11615_v19 = vsel %vm1578_vm1, %v11500_v48, -inf  ;;  %v11564_v51 = vrot.slane %v11563_v9, 1  ;;  %16214 = vrsqrt.f32 %v11347_v59  ;;  %v11123_v62 = vadd.f32 %v18835_v55, %v11107_v42 }
0x1a2a   : > { %11574 = vst.msk [vmem:[#allocation3] sm:$0x1] %vm11509_vm3, %v11573_v43  ;;  %v11588_v24 = vrot.slane %v11587_v53, 1  ;;  %v11602_v25 = vrot.slane %v11601_v21, 2  ;;  %v11616_v40 = vrot.slane %v11615_v19, 4  ;;  %v11421_v34 = vpop.permute.xlu1 %11420 }
0x1a2b   : > { %v11349_v54 = vadd.f32 1e-05, %v11341_v14  ;;  %v11565_v2 = vmax.f32 %v11563_v9, %v11564_v51  ;;  %v11442_v36 = vmul.f32 %v11421_v34, %v11129_v23  ;;  %v11131_v37 = vmax.f32 %v11123_v62, 0.0 }
0x1a2c   : > { %v11589_v44 = vmax.f32 %v11587_v53, %v11588_v24  ;;  %v11603_v13 = vmax.f32 %v11601_v21, %v11602_v25  ;;  %v11617_v18 = vmax.f32 %v11615_v19, %v11616_v40 }
0x1a2d   : > { %16216 = vrsqrt.f32 %v11349_v54  ;;  %v16211_v0 = vpop.eup %16210  ;;  %11566 = vst.msk [vmem:[#allocation2 + $0x7] sm:$0x1] %vm11509_vm3, %v11565_v2  ;;  %v11535_v42 = vsel %vm1578_vm1, %v11442_v36, -inf }
0x1a2e   : > { %11590 = vst.msk [vmem:[#allocation3 + $0x2] sm:$0x1] %vm11509_vm3, %v11589_v44  ;;  %v11604_v6 = vrot.slane %v11603_v13, 1  ;;  %v11618_v15 = vrot.slane %v11617_v18, 2  ;;  %v11359_v26 = vmul.f32 %v16211_v0, %v18781_v50  ;;  %v11536_v1 = vrot.slane %v11535_v42, 4  ;;  %v11431_v30 = vpop.permute.xlu1 %11430 }
0x1a2f   : > { %v11444_v39 = vmul.f32 %v11431_v30, %v11131_v37 }
0x1a30   : > { %v11605_v23 = vmax.f32 %v11603_v13, %v11604_v6  ;;  %v11619_v7 = vmax.f32 %v11617_v18, %v11618_v15  ;;  %v11367_v10 = vmul.f32 %v18824_v20, %v11359_v26  ;;  %v11537_v8 = vmax.f32 %v11535_v42, %v11536_v1  ;;  %v14254_v42 = vld [vmem:[%s19275_s0 + $0x58] sm:$0xff]  ;;  %v14253_v26 = vld [vmem:[%s19275_s0 + $0x50] sm:$0xff] }
0x1a31   : > { %v11551_v46 = vsel %vm1578_vm1, %v11444_v39, -inf  ;;  %v14252_v39 = vld [vmem:[%s19275_s0 + $0x48] sm:$0xff] }
0x1a32   : > { %11606 = vst.msk [vmem:[#allocation3 + $0x4] sm:$0x1] %vm11509_vm3, %v11605_v23  ;;  %v11620_v47 = vrot.slane %v11619_v7, 1  ;;  %v11375_v11 = vadd.f32 %v18835_v55, %v11367_v10  ;;  %v11538_v31 = vrot.slane %v11537_v8, 2  ;;  %v11552_v29 = vrot.slane %v11551_v46, 4 }
0x1a34   : > { %v16213_v35 = vpop.eup %16212  ;;  %v11621_v22 = vmax.f32 %v11619_v7, %v11620_v47  ;;  %v11383_v50 = vmax.f32 %v11375_v11, 0.0  ;;  %v11539_v27 = vmax.f32 %v11537_v8, %v11538_v31  ;;  %v11553_v57 = vmax.f32 %v11551_v46, %v11552_v29  ;;  %v14251_v8 = vld [vmem:[%s19275_s0 + $0x40] sm:$0xff]  ;;  %s19278_s0 = sld [smem:[#allocation28_spill]] }
0x1a35   : > { %v11361_v16 = vmul.f32 %v16213_v35, %v18784_v61 }
0x1a36   : > { %v16215_v45 = vpop.eup %16214  ;;  %11622 = vst.msk [vmem:[#allocation3 + $0x6] sm:$0x1] %vm11509_vm3, %v11621_v22  ;;  %v11495_v28 = vmul.f32 %v18828_v52, %v11383_v50  ;;  %v11540_v32 = vrot.slane %v11539_v27, 1  ;;  %v11554_v5 = vrot.slane %v11553_v57, 2  ;;  %v14249_v50 = vld [vmem:[%s19276_s3 + $0x1] ss:$0 sm:$0xff] }
0x1a37   : > { %v11369_v49 = vmul.f32 %v18824_v20, %v11361_v16  ;;  %v11363_v17 = vmul.f32 %v16215_v45, %v18789_v56  ;;  %v14242_v16 = vld [vmem:[%s19276_s3] ss:$0 sm:$0xff] }
0x1a38   : > { %v11575_v63 = vsel %vm1578_vm1, %v11495_v28, -inf  ;;  %v11541_v58 = vmax.f32 %v11539_v27, %v11540_v32  ;;  %v11555_v12 = vmax.f32 %v11553_v57, %v11554_v5  ;;  %v14256_v28 = vld [vmem:[%s19276_s3 + $0x2] ss:$0 sm:$0xff]  ;;  %s19284_s3 = sld [smem:[#allocation19_spill]] }
0x1a39   : > { %v11576_v48 = vrot.slane %v11575_v63, 4  ;;  %v11377_v9 = vadd.f32 %v18835_v55, %v11369_v49  ;;  %v11371_v61 = vmul.f32 %v18824_v20, %v11363_v17 }
0x1a3a   : > { %v16217_v3 = vpop.eup %16216  ;;  %11542 = vst.msk [vmem:[#allocation2 + $0x4] sm:$0x1] %vm11509_vm3, %v11541_v58  ;;  %v11556_v52 = vrot.slane %v11555_v12, 1 }
0x1a3b   : > { %v11365_v59 = vmul.f32 %v16217_v3, %v18795_v60  ;;  %v11577_v43 = vmax.f32 %v11575_v63, %v11576_v48  ;;  %v11385_v53 = vmax.f32 %v11377_v9, 0.0  ;;  %v11379_v21 = vadd.f32 %v18835_v55, %v11371_v61  ;;  %v11633_v63 = vld [vmem:[%s1416_s10] sm:$0xff]  ;;  %s19280_s10 = sld [smem:[#allocation15_spill]] }
0x1a3c   : > { %v11557_v14 = vmax.f32 %v11555_v12, %v11556_v52  ;;  %v14241_v58 = vadd.f32 -1.0, %v11633_v63 }
0x1a3d   : > { %v11373_v56 = vmul.f32 %v18824_v20, %v11365_v59  ;;  %v11578_v19 = vrot.slane %v11577_v43, 2  ;;  %v11497_v51 = vmul.f32 %v18842_v38, %v11385_v53  ;;  %v11387_v62 = vmax.f32 %v11379_v21, 0.0 }
0x1a3e   : > { %11558 = vst.msk [vmem:[#allocation2 + $0x6] sm:$0x1] %vm11509_vm3, %v11557_v14  ;;  %v18989_v12 = vmul.f32 1e+09, %v14241_v58  ;;  %v12054_v14 = vld [vmem:[%s19278_s0 + $0x18] sm:$0xff] }
0x1a3f   : > { %v11381_v24 = vadd.f32 %v18835_v55, %v11373_v56  ;;  %v11579_v60 = vmax.f32 %v11577_v43, %v11578_v19  ;;  %v11591_v25 = vsel %vm1578_vm1, %v11497_v51, -inf  ;;  %v11499_v40 = vmul.f32 %v18855_v33, %v11387_v62  ;;  %v12053_v19 = vld [vmem:[%s19278_s0 + $0x10] sm:$0xff]  ;;  %v12052_v51 = vld [vmem:[%s19278_s0 + $0x8] sm:$0xff]  ;;  %v12051_v62 = vld [vmem:[%s19278_s0] sm:$0xff] }
0x1a40   : > { %v11592_v54 = vrot.slane %v11591_v25, 4 }
0x1a41   : > { %v11389_v34 = vmax.f32 %v11381_v24, 0.0  ;;  %v11580_v2 = vrot.slane %v11579_v60, 1  ;;  %v11607_v20 = vsel %vm1578_vm1, %v11499_v40, -inf  ;;  %v14266_v40 = vld [vmem:[%s19278_s0 + $0x38] sm:$0xff] }
0x1a42   : > { %v11593_v36 = vmax.f32 %v11591_v25, %v11592_v54  ;;  %v11608_v44 = vrot.slane %v11607_v20, 4  ;;  %v14265_v54 = vld [vmem:[%s19278_s0 + $0x30] sm:$0xff] }
0x1a43   : > { %v11501_v38 = vmul.f32 %v18864_v4, %v11389_v34  ;;  %v11581_v13 = vmax.f32 %v11579_v60, %v11580_v2  ;;  %v14264_v34 = vld [vmem:[%s19278_s0 + $0x28] sm:$0xff]  ;;  %v14263_v2 = vld [vmem:[%s19278_s0 + $0x20] sm:$0xff] }
0x1a44   : > { %v11594_v55 = vrot.slane %v11593_v36, 2  ;;  %v11609_v18 = vmax.f32 %v11607_v20, %v11608_v44  ;;  %v14273_v20 = vld [vmem:[%s19278_s0 + $0x58] sm:$0xff]  ;;  %v14272_v44 = vld [vmem:[%s19278_s0 + $0x50] sm:$0xff] }
0x1a45   : > { %v11623_v0 = vsel %vm1578_vm1, %v11501_v38, -inf  ;;  %11582 = vst.msk [vmem:[#allocation3 + $0x1] sm:$0x1] %vm11509_vm3, %v11581_v13  ;;  %v11631_v37 = vld [vmem:[#allocation2] sm:$0xff]  ;;  %v14271_v13 = vld [vmem:[%s19278_s0 + $0x48] sm:$0xff] }
0x1a46   : > { %v11624_v33 = vrot.slane %v11623_v0, 4  ;;  %v11595_v6 = vmax.f32 %v11593_v36, %v11594_v55  ;;  %v11610_v15 = vrot.slane %v11609_v18, 2  ;;  %15646 = vmatmul.mubr.msk.f32.vlgmr.msra.gmra.mxu0 %vm1578_vm1, %v11631_v37  ;;  %v14270_v55 = vld [vmem:[%s19278_s0 + $0x40] sm:$0xff]  ;;  %s19282_s0 = sld [smem:[#allocation17_spill]] }
0x1a47   : > { %15660 = vmatpush3.msra.mxu0 %v14254_v42  ;;  %15667 = vmatprep.mubr.msk.f32.mxu0 %vm16297_vm2, %v16296_v41  ;;  %v14261_v37 = vld [vmem:[%s19279_s2] ss:$0 sm:$0xff] }
0x1a48   : > { %v11625_v1 = vmax.f32 %v11623_v0, %v11624_v33  ;;  %v11596_v4 = vrot.slane %v11595_v6, 1  ;;  %v11611_v30 = vmax.f32 %v11609_v18, %v11610_v15  ;;  %15661 = vmatprep.subr.mxu0 %v16296_v41  ;;  %v14268_v18 = vld [vmem:[%s19279_s2 + $0x1] ss:$0 sm:$0xff] }
0x1a49   : > { %15662 = vmatpush3.msra.mxu0 %v14253_v26 }
0x1a4a   : > { %v11626_v23 = vrot.slane %v11625_v1, 2  ;;  %v11597_v7 = vmax.f32 %v11595_v6, %v11596_v4  ;;  %v11612_v10 = vrot.slane %v11611_v30, 1  ;;  %15663 = vmatprep.subr.mxu0 %v16296_v41 }
0x1a4b   : > { %15664 = vmatpush3.msra.mxu0 %v14252_v39 }
0x1a4c   : > { %v11627_v46 = vmax.f32 %v11625_v1, %v11626_v23  ;;  %11598 = vst.msk [vmem:[#allocation3 + $0x3] sm:$0x1] %vm11509_vm3, %v11597_v7  ;;  %v11613_v47 = vmax.f32 %v11611_v30, %v11612_v10  ;;  %15665 = vmatprep.subr.mxu0 %v16296_v41  ;;  %v14275_v1 = vld [vmem:[%s19279_s2 + $0x2] ss:$0 sm:$0xff]  ;;  %s19283_s2 = sld [smem:[#allocation18_spill]] }
0x1a4d   : > { %15666 = vmatpush3.msra.mxu0 %v14251_v8 }
0x1a4e   : > { %v11628_v11 = vrot.slane %v11627_v46, 1  ;;  %11614 = vst.msk [vmem:[#allocation3 + $0x5] sm:$0x1] %vm11509_vm3, %v11613_v47  ;;  %15680 = vmatprep.subr.mxu0 %v16296_v41 }
0x1a50   : > { %v11629_v31 = vmax.f32 %v11627_v46, %v11628_v11 }
0x1a52   : > { %11630 = vst.msk [vmem:[#allocation3 + $0x7] sm:$0x1] %vm11509_vm3, %v11629_v31 }
0x1a59   : > { %v18966_v29 = vld [vmem:[#allocation3] sm:$0xff] }
0x1a5a   : > { %15657 = vmatmul.mubr.msk.f32.vlgmr.msra.gmra.mxu1 %vm1578_vm1, %v18966_v29  ;;  %15668 = vmatmul.mubr.msk.f32.vlgmr.msra.gmra.mxu0 %vm1578_vm1, %v18966_v29 }
0x1a5b   : > { %15672 = vmatprep.mubr.msk.f32.mxu1 %vm16297_vm2, %v16296_v41  ;;  %15688 = vmatprep.mubr.msk.f32.mxu0 %vm16297_vm2, %v16296_v41 }
0x1a5c   : > { %15681 = vmatpush3.msra.mxu0 %v12054_v14 }
0x1a5d   : > { %15682 = vmatprep.subr.mxu0 %v16296_v41 }
0x1a5e   : > { %15683 = vmatpush3.msra.mxu0 %v12053_v19 }
0x1a5f   : > { %15684 = vmatprep.subr.mxu0 %v16296_v41 }
0x1a60   : > { %15685 = vmatpush3.msra.mxu0 %v12052_v51 }
0x1a61   : > { %15686 = vmatprep.subr.mxu0 %v16296_v41 }
0x1a62   : > { %15687 = vmatpush3.msra.mxu0 %v12051_v62  ;;  %v14283_v62 = vld [vmem:[%s19281_s1 + $0x1] ss:$0 sm:$0xff] }
0x1a63   : > { %15702 = vmatprep.subr.mxu0 %v16296_v41 }
0x1b06   : > { %v11716_v35 = vpop.f32.mrf.mxu0 }
0x1b07   : > { %v11717_v49 = vadd.f32 %v14242_v16, %v11716_v35 }
0x1b08   : > { %v15647_v22 = vpop.f32.mrf.mxu0 }
0x1b09   : > { %v12466_v22 = vld [vmem:[%s19280_s10 + $0x18] sm:$0xff] }
0x1b1a   : > { %v11802_v27 = vpop.f32.mrf.mxu1  ;;  %v11885_v57 = vpop.f32.mrf.mxu0 }
0x1b1b   : > { %v11803_v45 = vadd.f32 %v14249_v50, %v11802_v27  ;;  %v11886_v17 = vadd.f32 %v14256_v28, %v11885_v57  ;;  %v12465_v50 = vld [vmem:[%s19280_s10 + $0x10] sm:$0xff]  ;;  %v12464_v27 = vld [vmem:[%s19280_s10 + $0x8] sm:$0xff]  ;;  %v12463_v28 = vld [vmem:[%s19280_s10] sm:$0xff] }
0x1b1c   : > { %v15658_v32 = vpop.f32.mrf.mxu1  ;;  %v15669_v5 = vpop.f32.mrf.mxu0 }
0x1b1d   : > { %15671 = vmatpush3.xpose.msk.msra.mxu1 %vm1578_vm1, %v11803_v45 }
0x1b1e   : > { %15675 = vmatprep.subr.mxu1 %v16296_v41 }
0x1b20   : > { %15673 = vmatmul.mubr.msk.f32.vlgmr.msra.gmra.mxu1 %vm1578_vm1, %v11717_v49  ;;  %v14280_v49 = vld [vmem:[%s19281_s1] ss:$0 sm:$0xff] }
0x1b21   : > { %15676 = vmatpush3.msra.mxu1 %v11886_v17  ;;  %15677 = vmatprep.mubr.msk.f32.mxu1 %vm16297_vm2, %v16296_v41 }
0x1b22   : > { %15691 = vmatprep.subr.mxu1 %v16296_v41 }
0x1be0   : > { %v11961_v3 = vpop.f32.mrf.mxu1 }
0x1be1   : > { %v11965_v48 = vmul.f32 0.17677669, %v11961_v3 }
0x1be2   : > { %v15674_v9 = vpop.f32.mrf.mxu1 }
0x1be3   : > { %v11966_v61 = vadd.f32 %v11965_v48, %v18989_v12 }
0x1be5   : > { %v11967_v59 = vsel %vm1448_vm0, %v11966_v61, -inf }
0x1be6   : > { %11968 = vmax.xlane.f32.xlu1 %v11967_v59 }
0x1c6f   : > { %v11969_v52 = vpop.xlane.xlu1 %11968 }
0x1c70   : > { %v11970_v43 = vsub.f32 %v11966_v61, %v11969_v52  ;;  %v12582_v52 = vld [vmem:[%s19282_s0 + $0x18] sm:$0xff] }
0x1c72   : > { %v11971_v53 = vmul.f32 1.442695, %v11970_v43  ;;  %v12581_v43 = vld [vmem:[%s19282_s0 + $0x10] sm:$0xff] }
0x1c74   : > { %16218 = vpow2.f32 %v11971_v53  ;;  %v12580_v53 = vld [vmem:[%s19282_s0 + $0x8] sm:$0xff] }
0x1c81   : > { %v16219_v21 = vpop.eup %16218 }
0x1c82   : > { %v11973_v56 = vsel %vm1448_vm0, %v16219_v21, 0.0 }
0x1c83   : > { %11974 = vadd.xlane.f32.xlu0 %v11973_v56 }
0x1d0c   : > { %v11975_v24 = vpop.xlane.xlu0 %11974 }
0x1d0d   : > { %16220 = vrcp.f32 %v11975_v24 }
0x1d1a   : > { %v16221_v60 = vpop.eup %16220 }
0x1d1b   : > { %v11977_v25 = vmul.f32 %v16221_v60, %v16219_v21  ;;  %v12579_v21 = vld [vmem:[%s19282_s0] sm:$0xff]  ;;  %s19285_s0 = sld [smem:[#allocation20_spill]] }
0x1d1c   : > { %v14285_v60 = vld [vmem:[%s19281_s1 + $0x2] ss:$0 sm:$0xff]  ;;  %s19286_s1 = sld [smem:[#allocation30_spill]] }
0x1d1d   : > { %15678 = vmatmul.mubr.msk.f32.vlgmr.msra.gmra.mxu1 %vm1448_vm0, %v11977_v25 }
0x1d1e   : > { %15692 = vmatpush3.msra.mxu1 %v14266_v40  ;;  %15699 = vmatprep.mubr.msk.f32.mxu1 %vm16297_vm2, %v16296_v41 }
0x1d1f   : > { %15693 = vmatprep.subr.mxu1 %v16296_v41 }
0x1d20   : > { %15694 = vmatpush3.msra.mxu1 %v14265_v54 }
0x1d21   : > { %15695 = vmatprep.subr.mxu1 %v16296_v41 }
0x1d22   : > { %15696 = vmatpush3.msra.mxu1 %v14264_v34  ;;  %v14286_v34 = vld [vmem:[%s19283_s2] ss:$0 sm:$0xff] }
0x1d23   : > { %15697 = vmatprep.subr.mxu1 %v16296_v41 }
0x1d24   : > { %15698 = vmatpush3.msra.mxu1 %v14263_v2 }
0x1d25   : > { %15700 = vmatmul.mubr.msk.f32.vlgmr.msra.gmra.mxu1 %vm1578_vm1, %v18966_v29  ;;  %15713 = vmatprep.subr.mxu1 %v16296_v41 }
0x1d26   : > { %15715 = vmatprep.mubr.msk.f32.mxu1 %vm16297_vm2, %v16296_v41 }
0x1ddd   : > { %v12047_v36 = vpop.f32.mrf.mxu1 }
0x1dde   : > { %15689 = vmatmul.mubr.msk.f32.vlgmr.msra.gmra.mxu0 %vm1578_vm1, %v12047_v36 }
0x1ddf   : > { %15703 = vmatpush3.msra.mxu0 %v14273_v20  ;;  %v15679_v38 = vpop.f32.mrf.mxu1  ;;  %15710 = vmatprep.mubr.msk.f32.mxu0 %vm16297_vm2, %v16296_v41 }
0x1de0   : > { %15704 = vmatprep.subr.mxu0 %v16296_v41 }
0x1de1   : > { %15705 = vmatpush3.msra.mxu0 %v14272_v44 }
0x1de2   : > { %15706 = vmatprep.subr.mxu0 %v16296_v41 }
0x1de3   : > { %15707 = vmatpush3.msra.mxu0 %v14271_v13 }
0x1de4   : > { %15708 = vmatprep.subr.mxu0 %v16296_v41 }
0x1de5   : > { %v12214_v0 = vpop.f32.mrf.mxu1  ;;  %15709 = vmatpush3.msra.mxu0 %v14270_v55 }
0x1de6   : > { %v12215_v42 = vadd.f32 %v14268_v18, %v12214_v0  ;;  %15711 = vmatmul.mubr.msk.f32.vlgmr.msra.gmra.mxu0 %vm1578_vm1, %v18966_v29  ;;  %15723 = vmatprep.subr.mxu0 %v16296_v41 }
0x1de7   : > { %v15701_v33 = vpop.f32.mrf.mxu1  ;;  %15731 = vmatprep.mubr.msk.f32.mxu0 %vm16297_vm2, %v16296_v41  ;;  %15724 = vmatpush3.msra.mxu0 %v12466_v22 }
0x1de8   : > { %15714 = vmatpush3.xpose.msk.msra.mxu1 %vm1578_vm1, %v12215_v42  ;;  %15725 = vmatprep.subr.mxu0 %v16296_v41  ;;  %v12698_v42 = vld [vmem:[%s19284_s3 + $0x18] sm:$0xff]  ;;  %v12697_v33 = vld [vmem:[%s19284_s3 + $0x10] sm:$0xff] }
0x1de9   : > { %15718 = vmatprep.subr.mxu1 %v16296_v41  ;;  %15726 = vmatpush3.msra.mxu0 %v12465_v50 }
0x1dea   : > { %15727 = vmatprep.subr.mxu0 %v16296_v41 }
0x1deb   : > { %15728 = vmatpush3.msra.mxu0 %v12464_v27 }
0x1dec   : > { %15729 = vmatprep.subr.mxu0 %v16296_v41 }
0x1ded   : > { %15730 = vmatpush3.msra.mxu0 %v12463_v28 }
0x1dee   : > { %15745 = vmatprep.subr.mxu0 %v16296_v41 }
0x1e9e   : > { %v12131_v6 = vpop.f32.mrf.mxu0 }
0x1e9f   : > { %v12132_v15 = vadd.f32 %v14261_v37, %v12131_v6  ;;  %v12696_v37 = vld [vmem:[%s19284_s3 + $0x8] sm:$0xff]  ;;  %v12695_v6 = vld [vmem:[%s19284_s3] sm:$0xff] }
0x1ea0   : > { %v15690_v26 = vpop.f32.mrf.mxu0 }
0x1ea1   : > { %15716 = vmatmul.mubr.msk.f32.vlgmr.msra.gmra.mxu1 %vm1578_vm1, %v12132_v15 }
0x1ea2   : > { %15720 = vmatprep.mubr.msk.f32.mxu1 %vm16297_vm2, %v16296_v41 }
0x1ea6   : > { %v12297_v4 = vpop.f32.mrf.mxu0 }
0x1ea7   : > { %v12298_v30 = vadd.f32 %v14275_v1, %v12297_v4 }
0x1ea8   : > { %v15712_v39 = vpop.f32.mrf.mxu0 }
0x1ea9   : > { %15719 = vmatpush3.msra.mxu1 %v12298_v30  ;;  %v14289_v30 = vld [vmem:[%s19283_s2 + $0x1] ss:$0 sm:$0xff] }
0x1eaa   : > { %15734 = vmatprep.subr.mxu1 %v16296_v41 }
0x1f61   : > { %v12373_v23 = vpop.f32.mrf.mxu1 }
0x1f62   : > { %v12377_v7 = vmul.f32 0.17677669, %v12373_v23  ;;  %v14291_v23 = vld [vmem:[%s19283_s2 + $0x2] ss:$0 sm:$0xff] }
0x1f63   : > { %v15717_v10 = vpop.f32.mrf.mxu1 }
0x1f64   : > { %v12378_v8 = vadd.f32 %v12377_v7, %v18989_v12 }
0x1f66   : > { %v12379_v46 = vsel %vm1448_vm0, %v12378_v8, -inf }
0x1f67   : > { %12380 = vmax.xlane.f32.xlu0 %v12379_v46  ;;  %v14292_v46 = vld [vmem:[%s19285_s0] ss:$0 sm:$0xff] }
0x1ff0   : > { %v12381_v47 = vpop.xlane.xlu0 %12380 }
0x1ff1   : > { %v12382_v11 = vsub.f32 %v12378_v8, %v12381_v47 }
0x1ff3   : > { %v12383_v31 = vmul.f32 1.442695, %v12382_v11 }
0x1ff5   : > { %16222 = vpow2.f32 %v12383_v31 }
0x2002   : > { %v16223_v29 = vpop.eup %16222 }
0x2003   : > { %v12385_v35 = vsel %vm1448_vm0, %v16223_v29, 0.0 }
0x2004   : > { %12386 = vadd.xlane.f32.xlu1 %v12385_v35 }
0x208d   : > { %v12387_v57 = vpop.xlane.xlu1 %12386 }
0x208e   : > { %16224 = vrcp.f32 %v12387_v57 }
0x209b   : > { %v16225_v16 = vpop.eup %16224 }
0x209c   : > { %v12389_v45 = vmul.f32 %v16225_v16, %v16223_v29 }
0x209e   : > { %15721 = vmatmul.mubr.msk.f32.vlgmr.msra.gmra.mxu1 %vm1448_vm0, %v12389_v45 }
0x209f   : > { %15742 = vmatprep.mubr.msk.f32.mxu1 %vm16297_vm2, %v16296_v41  ;;  %15735 = vmatpush3.msra.mxu1 %v12582_v52 }
0x20a0   : > { %15736 = vmatprep.subr.mxu1 %v16296_v41 }
0x20a1   : > { %15737 = vmatpush3.msra.mxu1 %v12581_v43  ;;  %v12847_v43 = vld [vmem:[%s19286_s1 + $0x18] sm:$0xff] }
0x20a2   : > { %15738 = vmatprep.subr.mxu1 %v16296_v41 }
0x20a3   : > { %15739 = vmatpush3.msra.mxu1 %v12580_v53  ;;  %v14307_v53 = vld [vmem:[%s19286_s1 + $0x38] sm:$0xff] }
0x20a4   : > { %15740 = vmatprep.subr.mxu1 %v16296_v41 }
0x20a5   : > { %15741 = vmatpush3.msra.mxu1 %v12579_v21  ;;  %v12846_v21 = vld [vmem:[%s19286_s1 + $0x10] sm:$0xff] }
0x20a6   : > { %15756 = vmatprep.subr.mxu1 %v16296_v41 }
0x215e   : > { %v12459_v32 = vpop.f32.mrf.mxu1 }
0x215f   : > { %15732 = vmatmul.mubr.msk.f32.vlgmr.msra.gmra.mxu0 %vm1578_vm1, %v12459_v32 }
0x2160   : > { %v15722_v5 = vpop.f32.mrf.mxu1  ;;  %15753 = vmatprep.mubr.msk.f32.mxu0 %vm16297_vm2, %v16296_v41  ;;  %15746 = vmatpush3.msra.mxu0 %v12698_v42 }
0x2161   : > { %15747 = vmatprep.subr.mxu0 %v16296_v41  ;;  %v14295_v5 = vld [vmem:[%s19285_s0 + $0x1] ss:$0 sm:$0xff] }
0x2162   : > { %15748 = vmatpush3.msra.mxu0 %v12697_v33  ;;  %v14302_v33 = vld [vmem:[%s16507_s27] ss:$0 sm:$0xff] }
0x2163   : > { %15749 = vmatprep.subr.mxu0 %v16296_v41 }
0x2164   : > { %15750 = vmatpush3.msra.mxu0 %v12696_v37 }
0x2165   : > { %15751 = vmatprep.subr.mxu0 %v16296_v41 }
0x2166   : > { %15752 = vmatpush3.msra.mxu0 %v12695_v6 }
0x2167   : > { %15767 = vmatprep.subr.mxu0 %v16296_v41 }
0x221f   : > { %v12543_v17 = vpop.f32.mrf.mxu0 }
0x2220   : > { %v12544_v63 = vadd.f32 %v14280_v49, %v12543_v17  ;;  %v14297_v17 = vld [vmem:[%s19285_s0 + $0x2] ss:$0 sm:$0xff]  ;;  %s19287_s0 = sld [smem:[#allocation21_spill]] }
0x2221   : > { %v15733_v58 = vpop.f32.mrf.mxu0 }
0x2222   : > { %v12547_v12 = vsel %vm1578_vm1, %v12544_v63, 0.0 }
0x2223   : > { %12548 = vadd.xlane.f32.xlu0 %v12547_v12 }
0x22ac   : > { %v12549_v3 = vpop.xlane.xlu0 %12548 }
0x22ad   : > { %v12550_v48 = vmul.f32 0.03125, %v12549_v3 }
0x22af   : > { %v12551_v9 = vsub.f32 %v12544_v63, %v12550_v48 }
0x22b1   : > { %v12552_v61 = vmul.f32 %v12551_v9, %v12551_v9 }
0x22b3   : > { %v12553_v59 = vsel %vm1578_vm1, %v12552_v61, 0.0 }
0x22b4   : > { %12554 = vadd.xlane.f32.xlu1 %v12553_v59 }
0x233d   : > { %v12555_v56 = vpop.xlane.xlu1 %12554 }
0x233e   : > { %v12556_v14 = vmul.f32 0.03125, %v12555_v56  ;;  %v14306_v56 = vld [vmem:[%s19286_s1 + $0x30] sm:$0xff] }
0x2340   : > { %v12557_v19 = vadd.f32 1e-05, %v12556_v14  ;;  %v12845_v14 = vld [vmem:[%s19286_s1 + $0x8] sm:$0xff] }
0x2342   : > { %16226 = vrsqrt.f32 %v12557_v19  ;;  %v14305_v19 = vld [vmem:[%s19286_s1 + $0x28] sm:$0xff] }
0x234f   : > { %v16227_v51 = vpop.eup %16226 }
0x2350   : > { %v12559_v24 = vmul.f32 %v16227_v51, %v12551_v9  ;;  %v12844_v51 = vld [vmem:[%s19286_s1] sm:$0xff] }
0x2352   : > { %v12568_v25 = vmul.f32 %v14283_v62, %v12559_v24  ;;  %v14304_v62 = vld [vmem:[%s19286_s1 + $0x20] sm:$0xff] }
0x2354   : > { %v12577_v40 = vadd.f32 %v14285_v60, %v12568_v25 }
0x2356   : > { %v12578_v54 = vmax.f32 %v12577_v40, 0.0 }
0x2358   : > { %15743 = vmatmul.mubr.msk.f32.vlgmr.msra.gmra.mxu1 %vm1578_vm1, %v12578_v54  ;;  %v14298_v54 = vld [vmem:[%s19287_s0] ss:$0 sm:$0xff] }
0x2359   : > { %15764 = vmatprep.mubr.msk.f32.mxu1 %vm16297_vm2, %v16296_v41  ;;  %15757 = vmatpush3.msra.mxu1 %v12847_v43  ;;  %v14332_v43 = vld [vmem:[%s16512_s20 + $0x50] sm:$0xff] }
0x235a   : > { %15758 = vmatprep.subr.mxu1 %v16296_v41 }
0x235b   : > { %15759 = vmatpush3.msra.mxu1 %v12846_v21  ;;  %v14331_v21 = vld [vmem:[%s16512_s20 + $0x48] sm:$0xff] }
0x235c   : > { %15760 = vmatprep.subr.mxu1 %v16296_v41 }
0x235d   : > { %15761 = vmatpush3.msra.mxu1 %v12845_v14  ;;  %v14328_v14 = vld [vmem:[%s16517_s12 + $0x1] ss:$0 sm:$0xff] }
0x235e   : > { %15762 = vmatprep.subr.mxu1 %v16296_v41 }
0x235f   : > { %15763 = vmatpush3.msra.mxu1 %v12844_v51 }
0x2360   : > { %15778 = vmatprep.subr.mxu1 %v16296_v41 }
0x2418   : > { %v12659_v2 = vpop.f32.mrf.mxu1 }
0x2419   : > { %v12660_v20 = vadd.f32 %v14286_v34, %v12659_v2  ;;  %v14300_v2 = vld [vmem:[%s19287_s0 + $0x1] ss:$0 sm:$0xff]  ;;  %s19288_s0 = sld [smem:[#allocation8_spill]] }
0x241a   : > { %v15744_v36 = vpop.f32.mrf.mxu1 }
0x241b   : > { %v12663_v44 = vsel %vm1578_vm1, %v12660_v20, 0.0 }
0x241c   : > { %12664 = vadd.xlane.f32.xlu0 %v12663_v44  ;;  %v14314_v44 = vld [vmem:[%s19286_s1 + $0x58] sm:$0xff] }
0x24a5   : > { %v12665_v38 = vpop.xlane.xlu0 %12664 }
0x24a6   : > { %v12666_v13 = vmul.f32 0.03125, %v12665_v38  ;;  %v14313_v38 = vld [vmem:[%s19286_s1 + $0x50] sm:$0xff] }
0x24a8   : > { %v12667_v55 = vsub.f32 %v12660_v20, %v12666_v13  ;;  %v14312_v13 = vld [vmem:[%s19286_s1 + $0x48] sm:$0xff] }
0x24aa   : > { %v12668_v18 = vmul.f32 %v12667_v55, %v12667_v55 }
0x24ac   : > { %v12669_v0 = vsel %vm1578_vm1, %v12668_v18, 0.0  ;;  %v14309_v18 = vld [vmem:[%s16507_s27 + $0x1] ss:$0 sm:$0xff] }
0x24ad   : > { %12670 = vadd.xlane.f32.xlu1 %v12669_v0 }
0x2536   : > { %v12671_v15 = vpop.xlane.xlu1 %12670 }
0x2537   : > { %v12672_v26 = vmul.f32 0.03125, %v12671_v15 }
0x2539   : > { %v12673_v1 = vadd.f32 1e-05, %v12672_v26 }
0x253b   : > { %16228 = vrsqrt.f32 %v12673_v1  ;;  %v14316_v1 = vld [vmem:[%s16507_s27 + $0x2] ss:$0 sm:$0xff] }
0x2548   : > { %v16229_v4 = vpop.eup %16228 }
0x2549   : > { %v12675_v39 = vmul.f32 %v16229_v4, %v12667_v55  ;;  %v14311_v55 = vld [vmem:[%s19286_s1 + $0x40] sm:$0xff]  ;;  %s1419_s1 = scalar_lea.vmem %s19288_s0, %s19291_s23  ;;  %s19289_s0 = sshll.u32 %s19291_s23, 3 }
0x254b   : > { %v12684_v7 = vmul.f32 %v14289_v30, %v12675_v39 }
0x254d   : > { %v12693_v10 = vadd.f32 %v14291_v23, %v12684_v7  ;;  %v13172_v23 = vlaneseq  ;;  %v12841_v7 = vld [vmem:[%s1419_s1] sm:$0x1]  ;;  %s1423_s1 = scalar_lea.vmem %s16522_s17, %s19289_s0 }
0x254f   : > { %v12694_v8 = vmax.f32 %v12693_v10, 0.0  ;;  %v14301_v10 = vadd.f32 -1.0, %v12841_v7 }
0x2551   : > { %15754 = vmatmul.mubr.msk.f32.vlgmr.msra.gmra.mxu0 %vm1578_vm1, %v12694_v8  ;;  %v13173_v8 = vshrl.u32 %v13172_v23, 7 }
0x2552   : > { %15775 = vmatprep.mubr.msk.f32.mxu0 %vm16297_vm2, %v16296_v41  ;;  %15768 = vmatpush3.msra.mxu0 %v14307_v53 }
0x2553   : > { %15769 = vmatprep.subr.mxu0 %v16296_v41 }
0x2554   : > { %15770 = vmatpush3.msra.mxu0 %v14306_v56  ;;  %v14330_v56 = vld [vmem:[%s16512_s20 + $0x40] sm:$0xff] }
0x2555   : > { %15771 = vmatprep.subr.mxu0 %v16296_v41 }
0x2556   : > { %15772 = vmatpush3.msra.mxu0 %v14305_v19 }
0x2557   : > { %15773 = vmatprep.subr.mxu0 %v16296_v41 }
0x2558   : > { %15774 = vmatpush3.msra.mxu0 %v14304_v62  ;;  %v14321_v62 = vld [vmem:[%s16517_s12] ss:$0 sm:$0xff] }
0x2559   : > { %15789 = vmatprep.subr.mxu0 %v16296_v41 }
0x2611   : > { %v12775_v47 = vpop.f32.mrf.mxu0 }
0x2612   : > { %v12776_v11 = vadd.f32 %v14292_v46, %v12775_v47  ;;  %v12843_v46 = vmul.f32 1e+09, %v14301_v10  ;;  %v13174_v47 = vsub.s32 0, %v13173_v8 }
0x2613   : > { %v15755_v31 = vpop.f32.mrf.mxu0 }
0x2614   : > { %v12779_v29 = vsel %vm1578_vm1, %v12776_v11, 0.0 }
0x2615   : > { %12780 = vadd.xlane.f32.xlu0 %v12779_v29 }
0x269e   : > { %v12781_v35 = vpop.xlane.xlu0 %12780 }
0x269f   : > { %v12782_v22 = vmul.f32 0.03125, %v12781_v35 }
0x26a1   : > { %v12783_v50 = vsub.f32 %v12776_v11, %v12782_v22  ;;  %v19143_v11 = vrot.slane %v12843_v46, %v13174_v47 }
0x26a3   : > { %v12784_v27 = vmul.f32 %v12783_v50, %v12783_v50 }
0x26a5   : > { %v12785_v57 = vsel %vm1578_vm1, %v12784_v27, 0.0 }
0x26a6   : > { %12786 = vadd.xlane.f32.xlu1 %v12785_v57 }
0x272f   : > { %v12787_v16 = vpop.xlane.xlu1 %12786 }
0x2730   : > { %v12788_v45 = vmul.f32 0.03125, %v12787_v16 }
0x2732   : > { %v12789_v28 = vadd.f32 1e-05, %v12788_v45 }
0x2734   : > { %16230 = vrsqrt.f32 %v12789_v28 }
0x2741   : > { %v16231_v32 = vpop.eup %16230 }
0x2742   : > { %v12791_v49 = vmul.f32 %v16231_v32, %v12783_v50  ;;  %v13265_v32 = vld [vmem:[%s16512_s20 + $0x18] sm:$0xff] }
0x2744   : > { %v12800_v63 = vmul.f32 %v14295_v5, %v12791_v49  ;;  %v13264_v5 = vld [vmem:[%s16512_s20 + $0x10] sm:$0xff]  ;;  %v13263_v49 = vld [vmem:[%s16512_s20 + $0x8] sm:$0xff] }
0x2746   : > { %v12809_v58 = vadd.f32 %v14297_v17, %v12800_v63  ;;  %v13262_v17 = vld [vmem:[%s16512_s20] sm:$0xff] }
0x2748   : > { %v12810_v12 = vmax.f32 %v12809_v58, 0.0 }
0x274a   : > { %v12811_v3 = vsel %vm1578_vm1, %v12810_v12, 0.0 }
0x274b   : > { %12812 = vadd.xlane.f32.xlu0 %v12811_v3  ;;  %v14326_v3 = vld [vmem:[%s16512_s20 + $0x38] sm:$0xff] }
0x27d4   : > { %v12813_v48 = vpop.xlane.xlu0 %12812 }
0x27d5   : > { %v12814_v9 = vmul.f32 0.03125, %v12813_v48  ;;  %v14325_v48 = vld [vmem:[%s16512_s20 + $0x30] sm:$0xff] }
0x27d7   : > { %v12815_v61 = vsub.f32 %v12810_v12, %v12814_v9  ;;  %v14324_v9 = vld [vmem:[%s16512_s20 + $0x28] sm:$0xff] }
0x27d9   : > { %v12816_v59 = vmul.f32 %v12815_v61, %v12815_v61 }
0x27db   : > { %v12817_v52 = vsel %vm1578_vm1, %v12816_v59, 0.0  ;;  %v14333_v59 = vld [vmem:[%s16512_s20 + $0x58] sm:$0xff] }
0x27dc   : > { %12818 = vadd.xlane.f32.xlu1 %v12817_v52 }
0x2865   : > { %v12819_v24 = vpop.xlane.xlu1 %12818 }
0x2866   : > { %v12820_v60 = vmul.f32 0.03125, %v12819_v24 }
0x2868   : > { %v12821_v25 = vadd.f32 1e-05, %v12820_v60 }
0x286a   : > { %16232 = vrsqrt.f32 %v12821_v25 }
0x2877   : > { %v16233_v40 = vpop.eup %16232 }
0x2878   : > { %v12823_v34 = vmul.f32 %v16233_v40, %v12815_v61  ;;  %v14323_v61 = vld [vmem:[%s16512_s20 + $0x20] sm:$0xff] }
0x287a   : > { %v12831_v20 = vmul.f32 %v14298_v54, %v12823_v34  ;;  %v14335_v54 = vld [vmem:[%s16517_s12 + $0x2] ss:$0 sm:$0xff] }
0x287c   : > { %v12840_v36 = vadd.f32 %v14300_v2, %v12831_v20 }
0x287e   : > { %15765 = vmatmul.mubr.msk.f32.vlgmr.msra.gmra.mxu1 %vm1578_vm1, %v12840_v36  ;;  %15776 = vmatmul.mubr.msk.f32.vlgmr.msra.gmra.mxu0 %vm1578_vm1, %v12840_v36 }
0x287f   : > { %15779 = vmatpush3.msra.mxu1 %v14314_v44  ;;  %15786 = vmatprep.mubr.msk.f32.mxu1 %vm16297_vm2, %v16296_v41 }
0x2880   : > { %15780 = vmatprep.subr.mxu1 %v16296_v41  ;;  %15791 = vmatprep.mubr.msk.f32.mxu0 %vm16297_vm2, %v16296_v41 }
0x2881   : > { %15781 = vmatpush3.msra.mxu1 %v14313_v38 }
0x2882   : > { %15782 = vmatprep.subr.mxu1 %v16296_v41 }
0x2883   : > { %15783 = vmatpush3.msra.mxu1 %v14312_v13 }
0x2884   : > { %15784 = vmatprep.subr.mxu1 %v16296_v41 }
0x2885   : > { %15785 = vmatpush3.msra.mxu1 %v14311_v55 }
0x2886   : > { %15787 = vmatmul.mubr.msk.f32.vlgmr.msra.gmra.mxu1 %vm1578_vm1, %v12840_v36  ;;  %15794 = vmatprep.subr.mxu1 %v16296_v41 }
0x2887   : > { %15796 = vmatprep.mubr.msk.f32.mxu1 %vm16297_vm2, %v16296_v41 }
0x293e   : > { %v12924_v0 = vpop.f32.mrf.mxu1  ;;  %v13007_v42 = vpop.f32.mrf.mxu0 }
0x293f   : > { %v13008_v37 = vadd.f32 %v14309_v18, %v13007_v42  ;;  %v12925_v26 = vadd.f32 %v14302_v33, %v12924_v0 }
0x2940   : > { %v15766_v6 = vpop.f32.mrf.mxu1  ;;  %v15777_v15 = vpop.f32.mrf.mxu0 }
0x2941   : > { %15790 = vmatpush3.xpose.msk.msra.mxu0 %vm1578_vm1, %v13008_v37 }
0x2942   : > { %15799 = vmatprep.subr.mxu0 %v16296_v41 }
0x2944   : > { %15792 = vmatmul.mubr.msk.f32.vlgmr.msra.gmra.mxu0 %vm1578_vm1, %v12925_v26 }
0x2945   : > { %15807 = vmatprep.mubr.msk.f32.mxu0 %vm16297_vm2, %v16296_v41  ;;  %15800 = vmatpush3.msra.mxu0 %v13265_v32 }
0x2946   : > { %v13090_v4 = vpop.f32.mrf.mxu1  ;;  %15801 = vmatprep.subr.mxu0 %v16296_v41 }
0x2947   : > { %v13091_v30 = vadd.f32 %v14316_v1, %v13090_v4  ;;  %15802 = vmatpush3.msra.mxu0 %v13264_v5 }
0x2948   : > { %v15788_v39 = vpop.f32.mrf.mxu1  ;;  %15803 = vmatprep.subr.mxu0 %v16296_v41 }
0x2949   : > { %15795 = vmatpush3.msra.mxu1 %v13091_v30  ;;  %15804 = vmatpush3.msra.mxu0 %v13263_v49 }
0x294a   : > { %15810 = vmatprep.subr.mxu1 %v16296_v41  ;;  %15805 = vmatprep.subr.mxu0 %v16296_v41 }
0x294b   : > { %15806 = vmatpush3.msra.mxu0 %v13262_v17 }
0x294c   : > { %15821 = vmatprep.subr.mxu0 %v16296_v41 }
0x2a04   : > { %v13166_v31 = vpop.f32.mrf.mxu0 }
0x2a05   : > { %v13170_v29 = vmul.f32 0.17677669, %v13166_v31 }
0x2a06   : > { %v15793_v35 = vpop.f32.mrf.mxu0 }
0x2a07   : > { %v13177_v22 = vadd.f32 %v19143_v11, %v13170_v29 }
0x2a09   : > { %v13178_v50 = vsel %vm1448_vm0, %v13177_v22, -inf }
0x2a0a   : > { %13179 = vmax.xlane.f32.xlu0 %v13178_v50 }
0x2a93   : > { %v13180_v27 = vpop.xlane.xlu0 %13179 }
0x2a94   : > { %v13181_v57 = vsub.f32 %v13177_v22, %v13180_v27 }
0x2a96   : > { %v13182_v16 = vmul.f32 1.442695, %v13181_v57 }
0x2a98   : > { %16234 = vpow2.f32 %v13182_v16 }
0x2aa5   : > { %v16235_v45 = vpop.eup %16234 }
0x2aa6   : > { %v13184_v28 = vsel %vm1448_vm0, %v16235_v45, 0.0 }
0x2aa7   : > { %13185 = vadd.xlane.f32.xlu1 %v13184_v28 }
0x2b30   : > { %v13186_v63 = vpop.xlane.xlu1 %13185 }
0x2b31   : > { %16236 = vrcp.f32 %v13186_v63 }
0x2b3e   : > { %v16237_v58 = vpop.eup %16236 }
0x2b3f   : > { %v13188_v12 = vmul.f32 %v16237_v58, %v16235_v45 }
0x2b41   : > { %15797 = vmatmul.mubr.msk.f32.vlgmr.msra.gmra.mxu1 %vm1448_vm0, %v13188_v12 }
0x2b42   : > { %15811 = vmatpush3.msra.mxu1 %v14326_v3  ;;  %15818 = vmatprep.mubr.msk.f32.mxu1 %vm16297_vm2, %v16296_v41 }
0x2b43   : > { %15812 = vmatprep.subr.mxu1 %v16296_v41 }
0x2b44   : > { %15813 = vmatpush3.msra.mxu1 %v14325_v48 }
0x2b45   : > { %15814 = vmatprep.subr.mxu1 %v16296_v41 }
0x2b46   : > { %15815 = vmatpush3.msra.mxu1 %v14324_v9 }
0x2b47   : > { %15816 = vmatprep.subr.mxu1 %v16296_v41 }
0x2b48   : > { %15817 = vmatpush3.msra.mxu1 %v14323_v61 }
0x2b49   : > { %15832 = vmatprep.subr.mxu1 %v16296_v41 }
0x2c01   : > { %v13258_v52 = vpop.f32.mrf.mxu1 }
0x2c02   : > { %15808 = vmatmul.mubr.msk.f32.vlgmr.msra.gmra.mxu0 %vm1578_vm1, %v13258_v52  ;;  %15819 = vmatmul.mubr.msk.f32.vlgmr.msra.gmra.mxu1 %vm1578_vm1, %v13258_v52 }
0x2c03   : > { %15822 = vmatpush3.msra.mxu0 %v14333_v59  ;;  %v15798_v53 = vpop.f32.mrf.mxu1  ;;  %15829 = vmatprep.mubr.msk.f32.mxu0 %vm16297_vm2, %v16296_v41 }
0x2c04   : > { %15823 = vmatprep.subr.mxu0 %v16296_v41  ;;  %15834 = vmatprep.mubr.msk.f32.mxu1 %vm16297_vm2, %v16296_v41 }
0x2c05   : > { %15824 = vmatpush3.msra.mxu0 %v14332_v43 }
0x2c06   : > { %15825 = vmatprep.subr.mxu0 %v16296_v41 }
0x2c07   : > { %15826 = vmatpush3.msra.mxu0 %v14331_v21 }
0x2c08   : > { %15827 = vmatprep.subr.mxu0 %v16296_v41 }
0x2c09   : > { %15828 = vmatpush3.msra.mxu0 %v14330_v56 }
0x2c0a   : > { %15830 = vmatmul.mubr.msk.f32.vlgmr.msra.gmra.mxu0 %vm1578_vm1, %v13258_v52 }
0x2cc2   : > { %v13342_v19 = vpop.f32.mrf.mxu0  ;;  %v13425_v51 = vpop.f32.mrf.mxu1 }
0x2cc3   : > { %v13426_v24 = vadd.f32 %v14328_v14, %v13425_v51  ;;  %v13343_v40 = vadd.f32 %v14321_v62, %v13342_v19 }
0x2cc4   : > { %v15809_v60 = vpop.f32.mrf.mxu0  ;;  %v15820_v25 = vpop.f32.mrf.mxu1 }
0x2cc5   : > { %15833 = vmatpush3.xpose.msk.msra.mxu1 %vm1578_vm1, %v13426_v24 }
0x2cc6   : > { %15837 = vmatprep.subr.mxu1 %v16296_v41 }
0x2cc8   : > { %15835 = vmatmul.mubr.msk.f32.vlgmr.msra.gmra.mxu1 %vm1578_vm1, %v13343_v40 }
0x2cc9   : > { %15839 = vmatprep.mubr.msk.f32.mxu1 %vm16297_vm2, %v16296_v41 }
0x2cca   : > { %v13508_v34 = vpop.f32.mrf.mxu0 }
0x2ccb   : > { %v13509_v2 = vadd.f32 %v14335_v54, %v13508_v34 }
0x2ccc   : > { %v15831_v20 = vpop.f32.mrf.mxu0 }
0x2ccd   : > { %15838 = vmatpush3.msra.mxu1 %v13509_v2 }
0x2d88   : > { %v13584_v36 = vpop.f32.mrf.mxu1 }
0x2d89   : > { %v13588_v44 = vmul.f32 0.17677669, %v13584_v36 }
0x2d8a   : > { %v15836_v38 = vpop.f32.mrf.mxu1 }
0x2d8b   : > { %v13589_v13 = vadd.f32 %v13588_v44, %v19143_v11 }
0x2d8d   : > { %v13590_v55 = vsel %vm1448_vm0, %v13589_v13, -inf }
0x2d8e   : > { %13591 = vmax.xlane.f32.xlu0 %v13590_v55 }
0x2e17   : > { %v13592_v18 = vpop.xlane.xlu0 %13591 }
0x2e18   : > { %v13593_v0 = vsub.f32 %v13589_v13, %v13592_v18 }
0x2e1a   : > { %v13594_v42 = vmul.f32 1.442695, %v13593_v0 }
0x2e1c   : > { %16238 = vpow2.f32 %v13594_v42 }
0x2e29   : > { %v16239_v33 = vpop.eup %16238 }
0x2e2a   : > { %v13596_v41 = vsel %vm1448_vm0, %v16239_v33, 0.0 }
0x2e2b   : > { %13597 = vadd.xlane.f32.xlu1 %v13596_v41 }
0x2eb4   : > { %v13598_v37 = vpop.xlane.xlu1 %13597 }
0x2eb5   : > { %16240 = vrcp.f32 %v13598_v37 }
0x2ec2   : > { %v16241_v6 = vpop.eup %16240 }
0x2ec3   : > { %v13600_v15 = vmul.f32 %v16241_v6, %v16239_v33 }
0x2ec5   : > { %15840 = vmatmul.mubr.msk.f32.vlgmr.msra.gmra.mxu1 %vm1448_vm0, %v13600_v15 }
0x2f85   : > { %v13670_v26 = vpop.f32.mrf.mxu1 }
0x2f86   : > { %13674 = vst.msk [vmem:[%s1423_s1] sm:$0xff] %vm1578_vm1, %v13670_v26 }
0x2f87   : > { %v15841_v1 = vpop.f32.mrf.mxu1 }
0x2f88 PF: > { %s97_s22 = sadd.s32 1, %s16251_s22  }
0x2f89   : > { %p94_p4 = scmp.ge.s32.totalorder %s97_s22, 4  }
0x2f8b   :  { %96 = sbr.rel (!%p94_p4) target bundleno = 75 (0x4b), region = 337 }

</bundles_post_ra>
